<compile_context>
chip_gen: v7x
topology: tpu7x:2x2x1
jax: 0.10.0
libtpu: 0.0.40
codegen_flags: <defaults>
</compile_context>

<pallas_src>
import numpy as np
import jax
import jax.numpy as jnp
from jax import lax
from jax.experimental import pallas as pl
from jax.experimental.pallas import tpu as pltpu


_LANES = 128

# Exact-GELU erf constants (Abramowitz & Stegun 7.1.26).  Plain Python floats
# so they stay weakly typed and do not upcast bf16 GELU math to f32.
_SQRT1_2 = 0.7071067811865476
_A1 = 0.254829592
_A2 = -0.284496736
_A3 = 1.421413741
_A4 = -1.453152027
_A5 = 1.061405429
_P = 0.3275911


def _round_up(x, m):
    return (x + m - 1) // m * m


def _default_gelu_dtype():
    # bf16 VPU/EUP exist on v6e / v7x; v5e and older have no bf16 elementwise
    # datapath, so bf16 GELU there only adds convert traffic.  Fall back to the
    # always-correct f32 path whenever detection is ambiguous.
    try:
        kind = jax.devices()[0].device_kind.lower()
    except Exception:
        return jnp.float32
    if ("v6" in kind) or ("v7" in kind) or ("7x" in kind):
        return jnp.bfloat16
    return jnp.float32


def _make_block_kernel(H, W, Cp, residual, gelu_dtype):
    HW = H * W
    C3 = 3 * Cp
    PAD = W            # one image row of halo on each side of the scratch

    def gelu(x):
        # Exact (erf-based) GELU matching torch.nn.functional.gelu's default.
        # erf via A&S 7.1.26 (max abs err ~1.5e-7); polynomial in gelu_dtype
        # (bf16 on v6e/v7x, f32 on v5e); the 1/(1+p*a) term uses the EUP
        # approximate reciprocal in f32 (error ~1e-4, well under tolerance).
        xc = x.astype(gelu_dtype)
        z = xc * _SQRT1_2
        a = jnp.abs(z)
        den = (1.0 + _P * a).astype(jnp.float32)
        t = pl.reciprocal(den, approx=True).astype(gelu_dtype)
        poly = t * (_A1 + t * (_A2 + t * (_A3 + t * (_A4 + t * _A5))))
        erf_abs = 1.0 - poly * jnp.exp(-a * a)
        erf = jnp.where(z >= 0, erf_abs, -erf_abs)
        return 0.5 * xc * (1.0 + erf)

    def kernel(x_ref, w1_ref, b1_ref, w2_ref, b2_ref, w3_ref, b3_ref,
               w4_ref, b4_ref, o_ref, hp_ref):
        # Column-boundary masks — hoisted, shared by both 3x3 convs.
        col = lax.broadcasted_iota(jnp.int32, (HW, 1), 0) % W
        not_first = col != 0          # output column has a left neighbour
        not_last = col != (W - 1)     # output column has a right neighbour

        # Zero the halo slabs of the padded bf16 scratch once per image.
        # NOTE: this must run for EVERY grid step (do NOT move it under
        # pl.when(program_id==0)): with megacore batch sharding a core may
        # never see program_id 0, and the never-rewritten halo lanes must read
        # as zero for each image.
        zeros_halo = jnp.zeros((PAD + 1, C3), jnp.bfloat16)
        hp_ref[pl.ds(0, PAD + 1), :] = zeros_halo
        hp_ref[pl.ds(PAD + HW - 1, PAD + 1), :] = zeros_halo

        def conv1x1(h, w_ref, b_ref):
            hb = gelu(h).astype(jnp.bfloat16)
            return jnp.dot(hb, w_ref[...],
                           preferred_element_type=jnp.float32) + b_ref[...]

        def conv3x3(h, w_ref, b_ref):
            hg = gelu(h).astype(jnp.bfloat16)              # (HW, Cp) bf16
            # Stage the three dj-shifted / column-masked copies of hg as
            # 128-lane-aligned groups [dj=-1 | dj=0 | dj=+1] at row offsets
            # PAD+1 / PAD / PAD-1, so Hp[PAD+q, group dj] == hg[q+dj] *
            # (column q+dj valid); the zero halo supplies the row-boundary
            # zeros of a pad=1 conv.  Staging is bf16: halves vst/vld traffic.
            hp_ref[pl.ds(PAD + 1, HW), 0:Cp] = jnp.where(not_last, hg, 0.0)
            hp_ref[pl.ds(PAD, HW), Cp:2 * Cp] = hg
            hp_ref[pl.ds(PAD - 1, HW), 2 * Cp:C3] = jnp.where(not_first, hg, 0.0)
            # TODO(synk): if the bundle dump shows the PAD±1 stores lowering to
            # masked multi-vst, pre-shift via pltpu.roll and store row-aligned.
            # 3 fused MXU matmuls (one per row offset di), f32 accumulation,
            # accumulator initialized with the broadcast bias.
            acc = b_ref[...] + jnp.dot(hp_ref[pl.ds(PAD - W, HW), :], w_ref[0],
                                       preferred_element_type=jnp.float32)
            acc = acc + jnp.dot(hp_ref[pl.ds(PAD, HW), :], w_ref[1],
                                preferred_element_type=jnp.float32)
            acc = acc + jnp.dot(hp_ref[pl.ds(PAD + W, HW), :], w_ref[2],
                                preferred_element_type=jnp.float32)
            return acc

        h = conv1x1(x_ref[...], w1_ref, b1_ref)   # c1: 1x1
        h = conv3x3(h, w2_ref, b2_ref)            # c2: 3x3, pad=1
        h = conv3x3(h, w3_ref, b3_ref)            # c3: 3x3, pad=1
        h = conv1x1(h, w4_ref, b4_ref)            # c4: 1x1
        if residual:
            h = x_ref[...].astype(jnp.float32) + h   # re-read x_ref: short live range
        o_ref[...] = h.astype(o_ref.dtype)

    return kernel


def block_forward(x_nchw, params, *, down_rate=None, residual=False,
                  gelu_dtype=None):
    """Forward pass of the VDVAE Block.  Input/output NCHW like PyTorch."""
    B, Cin, H, W = x_nchw.shape
    Cp = params["w1"].shape[1]          # padded middle width (multiple of 128)
    Cout = params["w4"].shape[1]
    HW = H * W
    if gelu_dtype is None:
        gelu_dtype = _default_gelu_dtype()
    if residual:
        assert Cin == Cout, "residual Block requires in_width == out_width"

    # bf16 at the kernel boundary halves activation HBM<->VMEM traffic; all
    # matmul operands are bf16 anyway (f32 accumulation on the MXU).
    x_flat = jnp.transpose(x_nchw, (0, 2, 3, 1)).reshape(B, HW, Cin)
    x_flat = x_flat.astype(jnp.bfloat16)

    kernel = _make_block_kernel(H, W, Cp, residual, gelu_dtype)

    def const_spec(shape):
        return pl.BlockSpec(shape, lambda b: (0,) * len(shape))

    # Explicit scoped-VMEM budget: double-buffered I/O + (conservatively
    # double-buffered) weights + staging scratch + slack for the f32
    # intermediates materialized in the body.
    param_bytes = sum(int(p.size) * p.dtype.itemsize for p in params.values())
    scratch_bytes = (HW + 2 * W) * 3 * Cp * 2
    vmem_need = (2 * (HW * Cin * 2 + HW * Cout * 2 + param_bytes)
                 + scratch_bytes + 10 * HW * Cp * 4)
    vmem_limit = int(min(max(vmem_need, 16 << 20), 60 << 20))
    # TODO(synk): for very large images (e.g. 64x64 x 512ch on v7x's 64 MiB
    # VMEM) add a spatial row-block grid axis with a 2-row input halo; the
    # per-image blocks used here are fine at the sizes exercised.

    flops = 2 * B * HW * (Cin * Cp + 18 * Cp * Cp + Cp * Cout)
    transcend = B * HW * (Cin + 3 * Cp)          # one exp per GELU element
    bytes_acc = B * HW * (Cin + Cout) * 2 + param_bytes
    cost = pl.CostEstimate(flops=int(flops), transcendentals=int(transcend),
                           bytes_accessed=int(bytes_acc))

    out = pl.pallas_call(
        kernel,
        grid=(B,),
        in_specs=[
            pl.BlockSpec((None, HW, Cin), lambda b: (b, 0, 0)),
            const_spec(params["w1"].shape), const_spec(params["b1"].shape),
            const_spec(params["w2"].shape), const_spec(params["b2"].shape),
            const_spec(params["w3"].shape), const_spec(params["b3"].shape),
            const_spec(params["w4"].shape), const_spec(params["b4"].shape),
        ],
        out_specs=pl.BlockSpec((None, HW, Cout), lambda b: (b, 0, 0)),
        out_shape=jax.ShapeDtypeStruct((B, HW, Cout), jnp.bfloat16),
        scratch_shapes=[pltpu.VMEM((HW + 2 * W, 3 * Cp), jnp.bfloat16)],
        compiler_params=pltpu.CompilerParams(
            dimension_semantics=("parallel",),
            vmem_limit_bytes=vmem_limit),
        cost_estimate=cost,
    )(x_flat, params["w1"], params["b1"], params["w2"], params["b2"],
      params["w3"], params["b3"], params["w4"], params["b4"])

    out = out.astype(jnp.float32).reshape(B, H, W, Cout)
    if down_rate is not None:
        # avg_pool2d(kernel=stride=down_rate): memory-bound reshape+mean in XLA
        # (fuses with the layout transpose below) — no pooling matmul anywhere.
        assert H % down_rate == 0 and W % down_rate == 0
        out = out.reshape(B, H // down_rate, down_rate,
                          W // down_rate, down_rate, Cout).mean(axis=(2, 4))
    # TODO(synk): keep the surrounding model NHWC to drop this transpose (and
    # the one before the kernel); each is a full HBM pass over the activation.
    return jnp.transpose(out, (0, 3, 1, 2))          # back to NCHW


def init_block_params(key, in_width, middle_width, out_width,
                      *, use_3x3=True, zero_last=False):
    """Deterministic synthetic init (PyTorch Conv2d weight shapes: OIHW) plus
    the padded / fused / transposed kernel-side parameter set."""
    ks = jax.random.split(key, 8)

    def conv_w(k, cout, cin, ksz):
        fan_in = cin * ksz * ksz
        return jax.random.normal(k, (cout, cin, ksz, ksz), jnp.float32) / np.sqrt(fan_in)

    def conv_b(k, cout):
        return 0.1 * jax.random.normal(k, (cout,), jnp.float32)

    k3 = 3 if use_3x3 else 1
    c1_w, c1_b = conv_w(ks[0], middle_width, in_width, 1), conv_b(ks[1], middle_width)
    c2_w, c2_b = conv_w(ks[2], middle_width, middle_width, k3), conv_b(ks[3], middle_width)
    c3_w, c3_b = conv_w(ks[4], middle_width, middle_width, k3), conv_b(ks[5], middle_width)
    c4_w, c4_b = conv_w(ks[6], out_width, middle_width, 1), conv_b(ks[7], out_width)
    if zero_last:
        c4_w = jnp.zeros_like(c4_w)

    torch_params = dict(c1_w=c1_w, c1_b=c1_b, c2_w=c2_w, c2_b=c2_b,
                        c3_w=c3_w, c3_b=c3_b, c4_w=c4_w, c4_b=c4_b)

    # Middle width is zero-padded to a multiple of 128 so the three scratch
    # lane groups are vreg-lane-aligned and the matmul N dim fills MXU columns.
    # Padded channels stay exactly zero through the whole block (zero weights,
    # zero bias, gelu(0)=0), so numerics are unchanged.
    Cp = _round_up(middle_width, _LANES)

    def to_1x1_in(w):      # c1: (Cmid, Cin, 1, 1) -> (Cin, Cp) bf16
        m = jnp.transpose(w[:, :, 0, 0], (1, 0))
        return jnp.pad(m, ((0, 0), (0, Cp - middle_width))).astype(jnp.bfloat16)

    def to_1x1_out(w):     # c4: (Cout, Cmid, 1, 1) -> (Cp, Cout) bf16
        m = jnp.transpose(w[:, :, 0, 0], (1, 0))
        return jnp.pad(m, ((0, Cp - middle_width), (0, 0))).astype(jnp.bfloat16)

    def to_3x3_fused(w):   # (Cmid, Cmid, kh, kw) -> (3, 3*Cp, Cp) bf16
        O, I, kh, _ = w.shape
        full = jnp.zeros((3, 3, Cp, Cp), jnp.float32)
        off = (3 - kh) // 2          # a 1x1 conv embeds at the center tap
        full = full.at[off:off + kh, off:off + kh, :I, :O].set(
            jnp.transpose(w, (2, 3, 1, 0)))
        # Per-di slice rows ordered [dj=-1 | dj=0 | dj=+1] x Cp channels,
        # matching the lane-group layout of the fused operand in VMEM scratch.
        return full.reshape(3, 3 * Cp, Cp).astype(jnp.bfloat16)

    def pad_b(b):
        return jnp.pad(b, (0, Cp - middle_width)).reshape(1, -1)

    kernel_params = dict(
        w1=to_1x1_in(c1_w), b1=pad_b(c1_b),
        w2=to_3x3_fused(c2_w), b2=pad_b(c2_b),
        w3=to_3x3_fused(c3_w), b3=pad_b(c3_b),
        w4=to_1x1_out(c4_w), b4=c4_b.reshape(1, -1),
    )
    return torch_params, kernel_params


def block_reference(x, tp, *, down_rate=None, residual=False):
    """Pure-JAX reference reproducing the PyTorch forward exactly (f32)."""
    g = lambda v: jax.nn.gelu(v, approximate=False)

    def conv(v, w, b):
        pad = (w.shape[-1] - 1) // 2
        y = lax.conv_general_dilated(
            v, w, window_strides=(1, 1), padding=[(pad, pad), (pad, pad)],
            dimension_numbers=("NCHW", "OIHW", "NCHW"),
            precision=lax.Precision.HIGHEST)
        return y + b[None, :, None, None]

    xh = conv(g(x), tp["c1_w"], tp["c1_b"])
    xh = conv(g(xh), tp["c2_w"], tp["c2_b"])
    xh = conv(g(xh), tp["c3_w"], tp["c3_b"])
    xh = conv(g(xh), tp["c4_w"], tp["c4_b"])
    out = x + xh if residual else xh
    if down_rate is not None:
        B, C, H, W = out.shape
        out = out.reshape(B, C, H // down_rate, down_rate,
                          W // down_rate, down_rate).mean(axis=(3, 5))
    return out


if __name__ == "__main__":
    B, H, W = 2, 16, 16
    in_width, middle_width, out_width = 16, 8, 16
    residual, down_rate = True, 2

    key = jax.random.PRNGKey(0)
    kx, kp = jax.random.split(key)
    x = jax.random.normal(kx, (B, in_width, H, W), jnp.float32)   # NCHW input

    torch_params, kernel_params = init_block_params(
        kp, in_width, middle_width, out_width, use_3x3=True, zero_last=False)

    out = block_forward(x, kernel_params, down_rate=down_rate, residual=residual)
    out = jax.block_until_ready(out)

    ref = block_reference(x, torch_params, down_rate=down_rate, residual=residual)
    np.testing.assert_allclose(np.asarray(out), np.asarray(ref), rtol=2e-2, atol=2e-2)
    print("KERNEL_OK")
</pallas_src>

<mosaic_0001>
module attributes {stable_mosaic.version = 11 : i64} {
  func.func @kernel(%arg0: i32, %arg1: memref<1x256x16xbf16, #tpu.memory_space<vmem>>, %arg2: memref<16x128xbf16, #tpu.memory_space<vmem>>, %arg3: memref<1x128xf32, #tpu.memory_space<vmem>>, %arg4: memref<3x384x128xbf16, #tpu.memory_space<vmem>>, %arg5: memref<1x128xf32, #tpu.memory_space<vmem>>, %arg6: memref<3x384x128xbf16, #tpu.memory_space<vmem>>, %arg7: memref<1x128xf32, #tpu.memory_space<vmem>>, %arg8: memref<128x16xbf16, #tpu.memory_space<vmem>>, %arg9: memref<1x16xf32, #tpu.memory_space<vmem>>, %arg10: memref<1x256x16xbf16, #tpu.memory_space<vmem>>, %arg11: memref<288x384xbf16, #tpu.memory_space<vmem>>) attributes {dimension_semantics = [#tpu.dimension_semantics<parallel>], iteration_bounds = array<i64: 2>, scalar_prefetch = 0 : i64, scratch_operands = 1 : i64, tpu.core_type = #tpu.core_type<tc>, window_params = [{transform_indices = @transform_0, window_bounds = array<i64: 1, 256, 16>}, {pipeline_mode = #tpu.pipeline_mode<synchronous>, transform_indices = @transform_1, window_bounds = array<i64: 16, 128>}, {pipeline_mode = #tpu.pipeline_mode<synchronous>, transform_indices = @transform_2, window_bounds = array<i64: 1, 128>}, {pipeline_mode = #tpu.pipeline_mode<synchronous>, transform_indices = @transform_3, window_bounds = array<i64: 3, 384, 128>}, {pipeline_mode = #tpu.pipeline_mode<synchronous>, transform_indices = @transform_4, window_bounds = array<i64: 1, 128>}, {pipeline_mode = #tpu.pipeline_mode<synchronous>, transform_indices = @transform_5, window_bounds = array<i64: 3, 384, 128>}, {pipeline_mode = #tpu.pipeline_mode<synchronous>, transform_indices = @transform_6, window_bounds = array<i64: 1, 128>}, {pipeline_mode = #tpu.pipeline_mode<synchronous>, transform_indices = @transform_7, window_bounds = array<i64: 128, 16>}, {pipeline_mode = #tpu.pipeline_mode<synchronous>, transform_indices = @transform_8, window_bounds = array<i64: 1, 16>}, {transform_indices = @transform_9, window_bounds = array<i64: 1, 256, 16>}]} {
    %0 = tpu.iota {dimensions = array<i32: 0>} : vector<256x1xi32>
    %c16_i32 = arith.constant 16 : i32
    %c0_i32 = arith.constant 0 : i32
    %1 = arith.cmpi eq, %c16_i32, %c0_i32 : i32
    %c1_i32 = arith.constant 1 : i32
    %2 = arith.select %1, %c1_i32, %c16_i32 : i32
    %3 = vector.broadcast %2 : i32 to vector<256x1xi32>
    %4 = arith.remsi %0, %3 : vector<256x1xi32>
    %c0_i32_0 = arith.constant 0 : i32
    %5 = vector.broadcast %c0_i32_0 : i32 to vector<256x1xi32>
    %6 = arith.cmpi ne, %4, %5 : vector<256x1xi32>
    %c0_i32_1 = arith.constant 0 : i32
    %7 = vector.broadcast %c0_i32_1 : i32 to vector<256x1xi32>
    %8 = arith.cmpi slt, %4, %7 : vector<256x1xi32>
    %c0_i32_2 = arith.constant 0 : i32
    %9 = arith.cmpi slt, %2, %c0_i32_2 : i32
    %10 = vector.broadcast %9 : i1 to vector<256x1xi1>
    %11 = vector.broadcast %10 : vector<256x1xi1> to vector<256x1xi1>
    %12 = arith.xori %8, %11 : vector<256x1xi1>
    %13 = arith.andi %12, %6 : vector<256x1xi1>
    %14 = vector.broadcast %2 : i32 to vector<256x1xi32>
    %15 = arith.addi %4, %14 : vector<256x1xi32>
    %16 = arith.select %13, %15, %4 : vector<256x1xi1>, vector<256x1xi32>
    %c0_i32_3 = arith.constant 0 : i32
    %17 = vector.broadcast %c0_i32_3 : i32 to vector<256x1xi32>
    %18 = arith.cmpi ne, %16, %17 : vector<256x1xi32>
    %c15_i32 = arith.constant 15 : i32
    %19 = vector.broadcast %c15_i32 : i32 to vector<256x1xi32>
    %20 = arith.cmpi ne, %16, %19 : vector<256x1xi32>
    %cst = arith.constant 0.000000e+00 : bf16
    %21 = vector.broadcast %cst : bf16 to vector<17x384xbf16>
    %c0 = arith.constant 0 : index
    %c0_4 = arith.constant 0 : index
    %22 = vector.load %arg11[%c0, %c0_4] : memref<288x384xbf16, #tpu.memory_space<vmem>>, vector<17x384xbf16>
    tpu.vector_store %arg11[%c0, %c0_4], %21 {strides = array<i32>} : memref<288x384xbf16, #tpu.memory_space<vmem>>, vector<17x384xbf16>,
    %c271 = arith.constant 271 : index
    %c0_5 = arith.constant 0 : index
    %23 = vector.load %arg11[%c271, %c0_5] : memref<288x384xbf16, #tpu.memory_space<vmem>>, vector<17x384xbf16>
    tpu.vector_store %arg11[%c271, %c0_5], %21 {strides = array<i32>} : memref<288x384xbf16, #tpu.memory_space<vmem>>, vector<17x384xbf16>,
    %c0_6 = arith.constant 0 : index
    %c0_7 = arith.constant 0 : index
    %c0_8 = arith.constant 0 : index
    %24 = vector.load %arg1[%c0_6, %c0_7, %c0_8] : memref<1x256x16xbf16, #tpu.memory_space<vmem>>, vector<1x256x16xbf16>
    %25 = vector.shape_cast %24 : vector<1x256x16xbf16> to vector<256x16xbf16>
    %26 = arith.extf %25 : vector<256x16xbf16> to vector<256x16xf32>
    %cst_9 = arith.constant 0.707106769 : f32
    %27 = vector.broadcast %cst_9 : f32 to vector<256x16xf32>
    %28 = arith.mulf %26, %27 : vector<256x16xf32>
    %29 = math.absf %28 : vector<256x16xf32>
    %cst_10 = arith.constant 0.327591091 : f32
    %30 = vector.broadcast %cst_10 : f32 to vector<256x16xf32>
    %31 = arith.mulf %30, %29 : vector<256x16xf32>
    %cst_11 = arith.constant 1.000000e+00 : f32
    %32 = vector.broadcast %cst_11 : f32 to vector<256x16xf32>
    %33 = arith.addf %32, %31 : vector<256x16xf32>
    %34 = tpu.reciprocal %33 {approx = true} : vector<256x16xf32> -> vector<256x16xf32>
    %cst_12 = arith.constant 1.06140542 : f32
    %35 = vector.broadcast %cst_12 : f32 to vector<256x16xf32>
    %36 = arith.mulf %34, %35 : vector<256x16xf32>
    %cst_13 = arith.constant -1.45315206 : f32
    %37 = vector.broadcast %cst_13 : f32 to vector<256x16xf32>
    %38 = arith.addf %37, %36 : vector<256x16xf32>
    %39 = arith.mulf %34, %38 : vector<256x16xf32>
    %cst_14 = arith.constant 1.42141378 : f32
    %40 = vector.broadcast %cst_14 : f32 to vector<256x16xf32>
    %41 = arith.addf %40, %39 : vector<256x16xf32>
    %42 = arith.mulf %34, %41 : vector<256x16xf32>
    %cst_15 = arith.constant -0.284496725 : f32
    %43 = vector.broadcast %cst_15 : f32 to vector<256x16xf32>
    %44 = arith.addf %43, %42 : vector<256x16xf32>
    %45 = arith.mulf %34, %44 : vector<256x16xf32>
    %cst_16 = arith.constant 0.254829586 : f32
    %46 = vector.broadcast %cst_16 : f32 to vector<256x16xf32>
    %47 = arith.addf %46, %45 : vector<256x16xf32>
    %48 = arith.mulf %34, %47 : vector<256x16xf32>
    %cst_17 = arith.constant 0.000000e+00 : f32
    %49 = vector.broadcast %cst_17 : f32 to vector<256x16xf32>
    %50 = arith.subf %49, %29 : vector<256x16xf32>
    %51 = arith.mulf %50, %29 : vector<256x16xf32>
    %52 = math.exp %51 : vector<256x16xf32>
    %53 = arith.mulf %48, %52 : vector<256x16xf32>
    %cst_18 = arith.constant 1.000000e+00 : f32
    %54 = vector.broadcast %cst_18 : f32 to vector<256x16xf32>
    %55 = arith.subf %54, %53 : vector<256x16xf32>
    %cst_19 = arith.constant 0.000000e+00 : f32
    %56 = vector.broadcast %cst_19 : f32 to vector<256x16xf32>
    %57 = arith.cmpf oge, %28, %56 : vector<256x16xf32>
    %cst_20 = arith.constant 0.000000e+00 : f32
    %58 = vector.broadcast %cst_20 : f32 to vector<256x16xf32>
    %59 = arith.subf %58, %55 : vector<256x16xf32>
    %60 = arith.select %57, %55, %59 : vector<256x16xi1>, vector<256x16xf32>
    %cst_21 = arith.constant 5.000000e-01 : f32
    %61 = vector.broadcast %cst_21 : f32 to vector<256x16xf32>
    %62 = arith.mulf %61, %26 : vector<256x16xf32>
    %cst_22 = arith.constant 1.000000e+00 : f32
    %63 = vector.broadcast %cst_22 : f32 to vector<256x16xf32>
    %64 = arith.addf %63, %60 : vector<256x16xf32>
    %65 = arith.mulf %62, %64 : vector<256x16xf32>
    %66 = arith.truncf %65 : vector<256x16xf32> to vector<256x16xbf16>
    %c0_23 = arith.constant 0 : index
    %c0_24 = arith.constant 0 : index
    %67 = vector.load %arg2[%c0_23, %c0_24] : memref<16x128xbf16, #tpu.memory_space<vmem>>, vector<16x128xbf16>
    %cst_25 = arith.constant dense<0.000000e+00> : vector<256x128xf32>
    %68 = tpu.matmul %66, %67, %cst_25 {dimension_numbers = #tpu.dot_dimension_numbers<[1], [0], [0], [1], [0, 0, 1, 1], [], []>} : vector<256x16xbf16>, vector<16x128xbf16>, vector<256x128xf32> -> vector<256x128xf32>
    %c0_26 = arith.constant 0 : index
    %c0_27 = arith.constant 0 : index
    %69 = vector.load %arg3[%c0_26, %c0_27] : memref<1x128xf32, #tpu.memory_space<vmem>>, vector<1x128xf32>
    %70 = vector.broadcast %69 : vector<1x128xf32> to vector<256x128xf32>
    %71 = arith.addf %68, %70 : vector<256x128xf32>
    %cst_28 = arith.constant 0.707106769 : f32
    %72 = vector.broadcast %cst_28 : f32 to vector<256x128xf32>
    %73 = arith.mulf %71, %72 : vector<256x128xf32>
    %74 = math.absf %73 : vector<256x128xf32>
    %cst_29 = arith.constant 0.327591091 : f32
    %75 = vector.broadcast %cst_29 : f32 to vector<256x128xf32>
    %76 = arith.mulf %75, %74 : vector<256x128xf32>
    %cst_30 = arith.constant 1.000000e+00 : f32
    %77 = vector.broadcast %cst_30 : f32 to vector<256x128xf32>
    %78 = arith.addf %77, %76 : vector<256x128xf32>
    %79 = tpu.reciprocal %78 {approx = true} : vector<256x128xf32> -> vector<256x128xf32>
    %cst_31 = arith.constant 1.06140542 : f32
    %80 = vector.broadcast %cst_31 : f32 to vector<256x128xf32>
    %81 = arith.mulf %79, %80 : vector<256x128xf32>
    %cst_32 = arith.constant -1.45315206 : f32
    %82 = vector.broadcast %cst_32 : f32 to vector<256x128xf32>
    %83 = arith.addf %82, %81 : vector<256x128xf32>
    %84 = arith.mulf %79, %83 : vector<256x128xf32>
    %cst_33 = arith.constant 1.42141378 : f32
    %85 = vector.broadcast %cst_33 : f32 to vector<256x128xf32>
    %86 = arith.addf %85, %84 : vector<256x128xf32>
    %87 = arith.mulf %79, %86 : vector<256x128xf32>
    %cst_34 = arith.constant -0.284496725 : f32
    %88 = vector.broadcast %cst_34 : f32 to vector<256x128xf32>
    %89 = arith.addf %88, %87 : vector<256x128xf32>
    %90 = arith.mulf %79, %89 : vector<256x128xf32>
    %cst_35 = arith.constant 0.254829586 : f32
    %91 = vector.broadcast %cst_35 : f32 to vector<256x128xf32>
    %92 = arith.addf %91, %90 : vector<256x128xf32>
    %93 = arith.mulf %79, %92 : vector<256x128xf32>
    %cst_36 = arith.constant 0.000000e+00 : f32
    %94 = vector.broadcast %cst_36 : f32 to vector<256x128xf32>
    %95 = arith.subf %94, %74 : vector<256x128xf32>
    %96 = arith.mulf %95, %74 : vector<256x128xf32>
    %97 = math.exp %96 : vector<256x128xf32>
    %98 = arith.mulf %93, %97 : vector<256x128xf32>
    %cst_37 = arith.constant 1.000000e+00 : f32
    %99 = vector.broadcast %cst_37 : f32 to vector<256x128xf32>
    %100 = arith.subf %99, %98 : vector<256x128xf32>
    %cst_38 = arith.constant 0.000000e+00 : f32
    %101 = vector.broadcast %cst_38 : f32 to vector<256x128xf32>
    %102 = arith.cmpf oge, %73, %101 : vector<256x128xf32>
    %cst_39 = arith.constant 0.000000e+00 : f32
    %103 = vector.broadcast %cst_39 : f32 to vector<256x128xf32>
    %104 = arith.subf %103, %100 : vector<256x128xf32>
    %105 = arith.select %102, %100, %104 : vector<256x128xi1>, vector<256x128xf32>
    %cst_40 = arith.constant 5.000000e-01 : f32
    %106 = vector.broadcast %cst_40 : f32 to vector<256x128xf32>
    %107 = arith.mulf %106, %71 : vector<256x128xf32>
    %cst_41 = arith.constant 1.000000e+00 : f32
    %108 = vector.broadcast %cst_41 : f32 to vector<256x128xf32>
    %109 = arith.addf %108, %105 : vector<256x128xf32>
    %110 = arith.mulf %107, %109 : vector<256x128xf32>
    %111 = arith.truncf %110 : vector<256x128xf32> to vector<256x128xbf16>
    %cst_42 = arith.constant 0.000000e+00 : f32
    %112 = arith.truncf %cst_42 : f32 to bf16
    %113 = vector.shape_cast %20 : vector<256x1xi1> to vector<256x1xi1>
    %114 = vector.broadcast %113 : vector<256x1xi1> to vector<256x128xi1>
    %115 = vector.broadcast %112 : bf16 to vector<256x128xbf16>
    %116 = arith.select %114, %111, %115 : vector<256x128xi1>, vector<256x128xbf16>
    %c17 = arith.constant 17 : index
    %c0_43 = arith.constant 0 : index
    %117 = vector.load %arg11[%c17, %c0_43] : memref<288x384xbf16, #tpu.memory_space<vmem>>, vector<256x128xbf16>
    tpu.vector_store %arg11[%c17, %c0_43], %116 {strides = array<i32>} : memref<288x384xbf16, #tpu.memory_space<vmem>>, vector<256x128xbf16>,
    %c16 = arith.constant 16 : index
    %c128 = arith.constant 128 : index
    %118 = vector.load %arg11[%c16, %c128] : memref<288x384xbf16, #tpu.memory_space<vmem>>, vector<256x128xbf16>
    tpu.vector_store %arg11[%c16, %c128], %111 {strides = array<i32>} : memref<288x384xbf16, #tpu.memory_space<vmem>>, vector<256x128xbf16>,
    %cst_44 = arith.constant 0.000000e+00 : f32
    %119 = arith.truncf %cst_44 : f32 to bf16
    %120 = vector.shape_cast %18 : vector<256x1xi1> to vector<256x1xi1>
    %121 = vector.broadcast %120 : vector<256x1xi1> to vector<256x128xi1>
    %122 = vector.broadcast %119 : bf16 to vector<256x128xbf16>
    %123 = arith.select %121, %111, %122 : vector<256x128xi1>, vector<256x128xbf16>
    %c15 = arith.constant 15 : index
    %c256 = arith.constant 256 : index
    %124 = vector.load %arg11[%c15, %c256] : memref<288x384xbf16, #tpu.memory_space<vmem>>, vector<256x128xbf16>
    tpu.vector_store %arg11[%c15, %c256], %123 {strides = array<i32>} : memref<288x384xbf16, #tpu.memory_space<vmem>>, vector<256x128xbf16>,
    %c0_45 = arith.constant 0 : index
    %c0_46 = arith.constant 0 : index
    %125 = vector.load %arg5[%c0_45, %c0_46] : memref<1x128xf32, #tpu.memory_space<vmem>>, vector<1x128xf32>
    %c0_47 = arith.constant 0 : index
    %c0_48 = arith.constant 0 : index
    %126 = vector.load %arg11[%c0_47, %c0_48] : memref<288x384xbf16, #tpu.memory_space<vmem>>, vector<256x384xbf16>
    %c0_49 = arith.constant 0 : index
    %c0_50 = arith.constant 0 : index
    %c0_51 = arith.constant 0 : index
    %127 = vector.load %arg4[%c0_49, %c0_50, %c0_51] : memref<3x384x128xbf16, #tpu.memory_space<vmem>>, vector<1x384x128xbf16>
    %128 = vector.shape_cast %127 : vector<1x384x128xbf16> to vector<384x128xbf16>
    %cst_52 = arith.constant dense<0.000000e+00> : vector<256x128xf32>
    %129 = tpu.matmul %126, %128, %cst_52 {dimension_numbers = #tpu.dot_dimension_numbers<[1], [0], [0], [1], [0, 0, 1, 1], [], []>} : vector<256x384xbf16>, vector<384x128xbf16>, vector<256x128xf32> -> vector<256x128xf32>
    %130 = vector.broadcast %125 : vector<1x128xf32> to vector<256x128xf32>
    %131 = arith.addf %130, %129 : vector<256x128xf32>
    %c16_53 = arith.constant 16 : index
    %c0_54 = arith.constant 0 : index
    %132 = vector.load %arg11[%c16_53, %c0_54] : memref<288x384xbf16, #tpu.memory_space<vmem>>, vector<256x384xbf16>
    %c1 = arith.constant 1 : index
    %c0_55 = arith.constant 0 : index
    %c0_56 = arith.constant 0 : index
    %133 = vector.load %arg4[%c1, %c0_55, %c0_56] : memref<3x384x128xbf16, #tpu.memory_space<vmem>>, vector<1x384x128xbf16>
    %134 = vector.shape_cast %133 : vector<1x384x128xbf16> to vector<384x128xbf16>
    %cst_57 = arith.constant dense<0.000000e+00> : vector<256x128xf32>
    %135 = tpu.matmul %132, %134, %cst_57 {dimension_numbers = #tpu.dot_dimension_numbers<[1], [0], [0], [1], [0, 0, 1, 1], [], []>} : vector<256x384xbf16>, vector<384x128xbf16>, vector<256x128xf32> -> vector<256x128xf32>
    %136 = arith.addf %131, %135 : vector<256x128xf32>
    %c32 = arith.constant 32 : index
    %c0_58 = arith.constant 0 : index
    %137 = vector.load %arg11[%c32, %c0_58] : memref<288x384xbf16, #tpu.memory_space<vmem>>, vector<256x384xbf16>
    %c2 = arith.constant 2 : index
    %c0_59 = arith.constant 0 : index
    %c0_60 = arith.constant 0 : index
    %138 = vector.load %arg4[%c2, %c0_59, %c0_60] : memref<3x384x128xbf16, #tpu.memory_space<vmem>>, vector<1x384x128xbf16>
    %139 = vector.shape_cast %138 : vector<1x384x128xbf16> to vector<384x128xbf16>
    %cst_61 = arith.constant dense<0.000000e+00> : vector<256x128xf32>
    %140 = tpu.matmul %137, %139, %cst_61 {dimension_numbers = #tpu.dot_dimension_numbers<[1], [0], [0], [1], [0, 0, 1, 1], [], []>} : vector<256x384xbf16>, vector<384x128xbf16>, vector<256x128xf32> -> vector<256x128xf32>
    %141 = arith.addf %136, %140 : vector<256x128xf32>
    %cst_62 = arith.constant 0.707106769 : f32
    %142 = vector.broadcast %cst_62 : f32 to vector<256x128xf32>
    %143 = arith.mulf %141, %142 : vector<256x128xf32>
    %144 = math.absf %143 : vector<256x128xf32>
    %cst_63 = arith.constant 0.327591091 : f32
    %145 = vector.broadcast %cst_63 : f32 to vector<256x128xf32>
    %146 = arith.mulf %145, %144 : vector<256x128xf32>
    %cst_64 = arith.constant 1.000000e+00 : f32
    %147 = vector.broadcast %cst_64 : f32 to vector<256x128xf32>
    %148 = arith.addf %147, %146 : vector<256x128xf32>
    %149 = tpu.reciprocal %148 {approx = true} : vector<256x128xf32> -> vector<256x128xf32>
    %cst_65 = arith.constant 1.06140542 : f32
    %150 = vector.broadcast %cst_65 : f32 to vector<256x128xf32>
    %151 = arith.mulf %149, %150 : vector<256x128xf32>
    %cst_66 = arith.constant -1.45315206 : f32
    %152 = vector.broadcast %cst_66 : f32 to vector<256x128xf32>
    %153 = arith.addf %152, %151 : vector<256x128xf32>
    %154 = arith.mulf %149, %153 : vector<256x128xf32>
    %cst_67 = arith.constant 1.42141378 : f32
    %155 = vector.broadcast %cst_67 : f32 to vector<256x128xf32>
    %156 = arith.addf %155, %154 : vector<256x128xf32>
    %157 = arith.mulf %149, %156 : vector<256x128xf32>
    %cst_68 = arith.constant -0.284496725 : f32
    %158 = vector.broadcast %cst_68 : f32 to vector<256x128xf32>
    %159 = arith.addf %158, %157 : vector<256x128xf32>
    %160 = arith.mulf %149, %159 : vector<256x128xf32>
    %cst_69 = arith.constant 0.254829586 : f32
    %161 = vector.broadcast %cst_69 : f32 to vector<256x128xf32>
    %162 = arith.addf %161, %160 : vector<256x128xf32>
    %163 = arith.mulf %149, %162 : vector<256x128xf32>
    %cst_70 = arith.constant 0.000000e+00 : f32
    %164 = vector.broadcast %cst_70 : f32 to vector<256x128xf32>
    %165 = arith.subf %164, %144 : vector<256x128xf32>
    %166 = arith.mulf %165, %144 : vector<256x128xf32>
    %167 = math.exp %166 : vector<256x128xf32>
    %168 = arith.mulf %163, %167 : vector<256x128xf32>
    %cst_71 = arith.constant 1.000000e+00 : f32
    %169 = vector.broadcast %cst_71 : f32 to vector<256x128xf32>
    %170 = arith.subf %169, %168 : vector<256x128xf32>
    %cst_72 = arith.constant 0.000000e+00 : f32
    %171 = vector.broadcast %cst_72 : f32 to vector<256x128xf32>
    %172 = arith.cmpf oge, %143, %171 : vector<256x128xf32>
    %cst_73 = arith.constant 0.000000e+00 : f32
    %173 = vector.broadcast %cst_73 : f32 to vector<256x128xf32>
    %174 = arith.subf %173, %170 : vector<256x128xf32>
    %175 = arith.select %172, %170, %174 : vector<256x128xi1>, vector<256x128xf32>
    %cst_74 = arith.constant 5.000000e-01 : f32
    %176 = vector.broadcast %cst_74 : f32 to vector<256x128xf32>
    %177 = arith.mulf %176, %141 : vector<256x128xf32>
    %cst_75 = arith.constant 1.000000e+00 : f32
    %178 = vector.broadcast %cst_75 : f32 to vector<256x128xf32>
    %179 = arith.addf %178, %175 : vector<256x128xf32>
    %180 = arith.mulf %177, %179 : vector<256x128xf32>
    %181 = arith.truncf %180 : vector<256x128xf32> to vector<256x128xbf16>
    %cst_76 = arith.constant 0.000000e+00 : f32
    %182 = arith.truncf %cst_76 : f32 to bf16
    %183 = vector.shape_cast %20 : vector<256x1xi1> to vector<256x1xi1>
    %184 = vector.broadcast %183 : vector<256x1xi1> to vector<256x128xi1>
    %185 = vector.broadcast %182 : bf16 to vector<256x128xbf16>
    %186 = arith.select %184, %181, %185 : vector<256x128xi1>, vector<256x128xbf16>
    %c17_77 = arith.constant 17 : index
    %c0_78 = arith.constant 0 : index
    %187 = vector.load %arg11[%c17_77, %c0_78] : memref<288x384xbf16, #tpu.memory_space<vmem>>, vector<256x128xbf16>
    tpu.vector_store %arg11[%c17_77, %c0_78], %186 {strides = array<i32>} : memref<288x384xbf16, #tpu.memory_space<vmem>>, vector<256x128xbf16>,
    %c16_79 = arith.constant 16 : index
    %c128_80 = arith.constant 128 : index
    %188 = vector.load %arg11[%c16_79, %c128_80] : memref<288x384xbf16, #tpu.memory_space<vmem>>, vector<256x128xbf16>
    tpu.vector_store %arg11[%c16_79, %c128_80], %181 {strides = array<i32>} : memref<288x384xbf16, #tpu.memory_space<vmem>>, vector<256x128xbf16>,
    %cst_81 = arith.constant 0.000000e+00 : f32
    %189 = arith.truncf %cst_81 : f32 to bf16
    %190 = vector.shape_cast %18 : vector<256x1xi1> to vector<256x1xi1>
    %191 = vector.broadcast %190 : vector<256x1xi1> to vector<256x128xi1>
    %192 = vector.broadcast %189 : bf16 to vector<256x128xbf16>
    %193 = arith.select %191, %181, %192 : vector<256x128xi1>, vector<256x128xbf16>
    %c15_82 = arith.constant 15 : index
    %c256_83 = arith.constant 256 : index
    %194 = vector.load %arg11[%c15_82, %c256_83] : memref<288x384xbf16, #tpu.memory_space<vmem>>, vector<256x128xbf16>
    tpu.vector_store %arg11[%c15_82, %c256_83], %193 {strides = array<i32>} : memref<288x384xbf16, #tpu.memory_space<vmem>>, vector<256x128xbf16>,
    %c0_84 = arith.constant 0 : index
    %c0_85 = arith.constant 0 : index
    %195 = vector.load %arg7[%c0_84, %c0_85] : memref<1x128xf32, #tpu.memory_space<vmem>>, vector<1x128xf32>
    %c0_86 = arith.constant 0 : index
    %c0_87 = arith.constant 0 : index
    %196 = vector.load %arg11[%c0_86, %c0_87] : memref<288x384xbf16, #tpu.memory_space<vmem>>, vector<256x384xbf16>
    %c0_88 = arith.constant 0 : index
    %c0_89 = arith.constant 0 : index
    %c0_90 = arith.constant 0 : index
    %197 = vector.load %arg6[%c0_88, %c0_89, %c0_90] : memref<3x384x128xbf16, #tpu.memory_space<vmem>>, vector<1x384x128xbf16>
    %198 = vector.shape_cast %197 : vector<1x384x128xbf16> to vector<384x128xbf16>
    %cst_91 = arith.constant dense<0.000000e+00> : vector<256x128xf32>
    %199 = tpu.matmul %196, %198, %cst_91 {dimension_numbers = #tpu.dot_dimension_numbers<[1], [0], [0], [1], [0, 0, 1, 1], [], []>} : vector<256x384xbf16>, vector<384x128xbf16>, vector<256x128xf32> -> vector<256x128xf32>
    %200 = vector.broadcast %195 : vector<1x128xf32> to vector<256x128xf32>
    %201 = arith.addf %200, %199 : vector<256x128xf32>
    %c16_92 = arith.constant 16 : index
    %c0_93 = arith.constant 0 : index
    %202 = vector.load %arg11[%c16_92, %c0_93] : memref<288x384xbf16, #tpu.memory_space<vmem>>, vector<256x384xbf16>
    %c1_94 = arith.constant 1 : index
    %c0_95 = arith.constant 0 : index
    %c0_96 = arith.constant 0 : index
    %203 = vector.load %arg6[%c1_94, %c0_95, %c0_96] : memref<3x384x128xbf16, #tpu.memory_space<vmem>>, vector<1x384x128xbf16>
    %204 = vector.shape_cast %203 : vector<1x384x128xbf16> to vector<384x128xbf16>
    %cst_97 = arith.constant dense<0.000000e+00> : vector<256x128xf32>
    %205 = tpu.matmul %202, %204, %cst_97 {dimension_numbers = #tpu.dot_dimension_numbers<[1], [0], [0], [1], [0, 0, 1, 1], [], []>} : vector<256x384xbf16>, vector<384x128xbf16>, vector<256x128xf32> -> vector<256x128xf32>
    %206 = arith.addf %201, %205 : vector<256x128xf32>
    %c32_98 = arith.constant 32 : index
    %c0_99 = arith.constant 0 : index
    %207 = vector.load %arg11[%c32_98, %c0_99] : memref<288x384xbf16, #tpu.memory_space<vmem>>, vector<256x384xbf16>
    %c2_100 = arith.constant 2 : index
    %c0_101 = arith.constant 0 : index
    %c0_102 = arith.constant 0 : index
    %208 = vector.load %arg6[%c2_100, %c0_101, %c0_102] : memref<3x384x128xbf16, #tpu.memory_space<vmem>>, vector<1x384x128xbf16>
    %209 = vector.shape_cast %208 : vector<1x384x128xbf16> to vector<384x128xbf16>
    %cst_103 = arith.constant dense<0.000000e+00> : vector<256x128xf32>
    %210 = tpu.matmul %207, %209, %cst_103 {dimension_numbers = #tpu.dot_dimension_numbers<[1], [0], [0], [1], [0, 0, 1, 1], [], []>} : vector<256x384xbf16>, vector<384x128xbf16>, vector<256x128xf32> -> vector<256x128xf32>
    %211 = arith.addf %206, %210 : vector<256x128xf32>
    %cst_104 = arith.constant 0.707106769 : f32
    %212 = vector.broadcast %cst_104 : f32 to vector<256x128xf32>
    %213 = arith.mulf %211, %212 : vector<256x128xf32>
    %214 = math.absf %213 : vector<256x128xf32>
    %cst_105 = arith.constant 0.327591091 : f32
    %215 = vector.broadcast %cst_105 : f32 to vector<256x128xf32>
    %216 = arith.mulf %215, %214 : vector<256x128xf32>
    %cst_106 = arith.constant 1.000000e+00 : f32
    %217 = vector.broadcast %cst_106 : f32 to vector<256x128xf32>
    %218 = arith.addf %217, %216 : vector<256x128xf32>
    %219 = tpu.reciprocal %218 {approx = true} : vector<256x128xf32> -> vector<256x128xf32>
    %cst_107 = arith.constant 1.06140542 : f32
    %220 = vector.broadcast %cst_107 : f32 to vector<256x128xf32>
    %221 = arith.mulf %219, %220 : vector<256x128xf32>
    %cst_108 = arith.constant -1.45315206 : f32
    %222 = vector.broadcast %cst_108 : f32 to vector<256x128xf32>
    %223 = arith.addf %222, %221 : vector<256x128xf32>
    %224 = arith.mulf %219, %223 : vector<256x128xf32>
    %cst_109 = arith.constant 1.42141378 : f32
    %225 = vector.broadcast %cst_109 : f32 to vector<256x128xf32>
    %226 = arith.addf %225, %224 : vector<256x128xf32>
    %227 = arith.mulf %219, %226 : vector<256x128xf32>
    %cst_110 = arith.constant -0.284496725 : f32
    %228 = vector.broadcast %cst_110 : f32 to vector<256x128xf32>
    %229 = arith.addf %228, %227 : vector<256x128xf32>
    %230 = arith.mulf %219, %229 : vector<256x128xf32>
    %cst_111 = arith.constant 0.254829586 : f32
    %231 = vector.broadcast %cst_111 : f32 to vector<256x128xf32>
    %232 = arith.addf %231, %230 : vector<256x128xf32>
    %233 = arith.mulf %219, %232 : vector<256x128xf32>
    %cst_112 = arith.constant 0.000000e+00 : f32
    %234 = vector.broadcast %cst_112 : f32 to vector<256x128xf32>
    %235 = arith.subf %234, %214 : vector<256x128xf32>
    %236 = arith.mulf %235, %214 : vector<256x128xf32>
    %237 = math.exp %236 : vector<256x128xf32>
    %238 = arith.mulf %233, %237 : vector<256x128xf32>
    %cst_113 = arith.constant 1.000000e+00 : f32
    %239 = vector.broadcast %cst_113 : f32 to vector<256x128xf32>
    %240 = arith.subf %239, %238 : vector<256x128xf32>
    %cst_114 = arith.constant 0.000000e+00 : f32
    %241 = vector.broadcast %cst_114 : f32 to vector<256x128xf32>
    %242 = arith.cmpf oge, %213, %241 : vector<256x128xf32>
    %cst_115 = arith.constant 0.000000e+00 : f32
    %243 = vector.broadcast %cst_115 : f32 to vector<256x128xf32>
    %244 = arith.subf %243, %240 : vector<256x128xf32>
    %245 = arith.select %242, %240, %244 : vector<256x128xi1>, vector<256x128xf32>
    %cst_116 = arith.constant 5.000000e-01 : f32
    %246 = vector.broadcast %cst_116 : f32 to vector<256x128xf32>
    %247 = arith.mulf %246, %211 : vector<256x128xf32>
    %cst_117 = arith.constant 1.000000e+00 : f32
    %248 = vector.broadcast %cst_117 : f32 to vector<256x128xf32>
    %249 = arith.addf %248, %245 : vector<256x128xf32>
    %250 = arith.mulf %247, %249 : vector<256x128xf32>
    %251 = arith.truncf %250 : vector<256x128xf32> to vector<256x128xbf16>
    %c0_118 = arith.constant 0 : index
    %c0_119 = arith.constant 0 : index
    %252 = vector.load %arg8[%c0_118, %c0_119] : memref<128x16xbf16, #tpu.memory_space<vmem>>, vector<128x16xbf16>
    %cst_120 = arith.constant dense<0.000000e+00> : vector<256x16xf32>
    %253 = tpu.matmul %251, %252, %cst_120 {dimension_numbers = #tpu.dot_dimension_numbers<[1], [0], [0], [1], [0, 0, 1, 1], [], []>} : vector<256x128xbf16>, vector<128x16xbf16>, vector<256x16xf32> -> vector<256x16xf32>
    %c0_121 = arith.constant 0 : index
    %c0_122 = arith.constant 0 : index
    %254 = vector.load %arg9[%c0_121, %c0_122] : memref<1x16xf32, #tpu.memory_space<vmem>>, vector<1x16xf32>
    %255 = vector.broadcast %254 : vector<1x16xf32> to vector<256x16xf32>
    %256 = arith.addf %253, %255 : vector<256x16xf32>
    %c0_123 = arith.constant 0 : index
    %c0_124 = arith.constant 0 : index
    %c0_125 = arith.constant 0 : index
    %257 = vector.load %arg1[%c0_123, %c0_124, %c0_125] : memref<1x256x16xbf16, #tpu.memory_space<vmem>>, vector<1x256x16xbf16>
    %258 = vector.shape_cast %257 : vector<1x256x16xbf16> to vector<256x16xbf16>
    %259 = arith.extf %258 : vector<256x16xbf16> to vector<256x16xf32>
    %260 = arith.addf %259, %256 : vector<256x16xf32>
    %261 = arith.truncf %260 : vector<256x16xf32> to vector<256x16xbf16>
    %c0_126 = arith.constant 0 : index
    %c0_127 = arith.constant 0 : index
    %c0_128 = arith.constant 0 : index
    %262 = vector.load %arg10[%c0_126, %c0_127, %c0_128] : memref<1x256x16xbf16, #tpu.memory_space<vmem>>, vector<1x256x16xbf16>
    %263 = vector.shape_cast %262 : vector<1x256x16xbf16> to vector<256x16xbf16>
    %264 = vector.shape_cast %261 : vector<256x16xbf16> to vector<1x256x16xbf16>
    tpu.vector_store %arg10[%c0_126, %c0_127, %c0_128], %264 {strides = array<i32>} : memref<1x256x16xbf16, #tpu.memory_space<vmem>>, vector<1x256x16xbf16>,
    return
  }
  func.func @transform_0(%arg0: i32) -> (i32, i32, i32) {
    %c0_i32 = arith.constant 0 : i32
    %c0_i32_0 = arith.constant 0 : i32
    %c0_i32_1 = arith.constant 0 : i32
    return %arg0, %c0_i32, %c0_i32_0 : i32, i32, i32
  }
  func.func @transform_1(%arg0: i32) -> (i32, i32) {
    %c0_i32 = arith.constant 0 : i32
    %c0_i32_0 = arith.constant 0 : i32
    %c0_i32_1 = arith.constant 0 : i32
    return %c0_i32, %c0_i32_0 : i32, i32
  }
  func.func @transform_2(%arg0: i32) -> (i32, i32) {
    %c0_i32 = arith.constant 0 : i32
    %c0_i32_0 = arith.constant 0 : i32
    %c0_i32_1 = arith.constant 0 : i32
    return %c0_i32, %c0_i32_0 : i32, i32
  }
  func.func @transform_3(%arg0: i32) -> (i32, i32, i32) {
    %c0_i32 = arith.constant 0 : i32
    %c0_i32_0 = arith.constant 0 : i32
    %c0_i32_1 = arith.constant 0 : i32
    %c0_i32_2 = arith.constant 0 : i32
    return %c0_i32, %c0_i32_0, %c0_i32_1 : i32, i32, i32
  }
  func.func @transform_4(%arg0: i32) -> (i32, i32) {
    %c0_i32 = arith.constant 0 : i32
    %c0_i32_0 = arith.constant 0 : i32
    %c0_i32_1 = arith.constant 0 : i32
    return %c0_i32, %c0_i32_0 : i32, i32
  }
  func.func @transform_5(%arg0: i32) -> (i32, i32, i32) {
    %c0_i32 = arith.constant 0 : i32
    %c0_i32_0 = arith.constant 0 : i32
    %c0_i32_1 = arith.constant 0 : i32
    %c0_i32_2 = arith.constant 0 : i32
    return %c0_i32, %c0_i32_0, %c0_i32_1 : i32, i32, i32
  }
  func.func @transform_6(%arg0: i32) -> (i32, i32) {
    %c0_i32 = arith.constant 0 : i32
    %c0_i32_0 = arith.constant 0 : i32
    %c0_i32_1 = arith.constant 0 : i32
    return %c0_i32, %c0_i32_0 : i32, i32
  }
  func.func @transform_7(%arg0: i32) -> (i32, i32) {
    %c0_i32 = arith.constant 0 : i32
    %c0_i32_0 = arith.constant 0 : i32
    %c0_i32_1 = arith.constant 0 : i32
    return %c0_i32, %c0_i32_0 : i32, i32
  }
  func.func @transform_8(%arg0: i32) -> (i32, i32) {
    %c0_i32 = arith.constant 0 : i32
    %c0_i32_0 = arith.constant 0 : i32
    %c0_i32_1 = arith.constant 0 : i32
    return %c0_i32, %c0_i32_0 : i32, i32
  }
  func.func @transform_9(%arg0: i32) -> (i32, i32, i32) {
    %c0_i32 = arith.constant 0 : i32
    %c0_i32_0 = arith.constant 0 : i32
    %c0_i32_1 = arith.constant 0 : i32
    return %arg0, %c0_i32, %c0_i32_0 : i32, i32, i32
  }
}

</mosaic_0001>

<bundles_post_ra>
// kernel: tpu_custom_call.1
= control target key start
LH: loop header
LB: loop body
LE: loop exit
PB: predicated region body
PF: predicated region fallthrough
CT: control target
= control target key end

     0   :  { %14 = vsyncpa [#allocation4], 0  ;;  %s18271_s0 = inlined_call_operand.vmem [shape: bf16[2,256,16], index: 0, kind: input, shape index: {}]   ;;  %s18272_s1 = inlined_call_operand.vmem [shape: bf16[16,128], index: 1, kind: input, shape index: {}]   ;;  %s18273_s2 = inlined_call_operand.vmem [shape: f32[1,128], index: 2, kind: input, shape index: {}]   ;;  %s18274_s3 = inlined_call_operand.hbm [shape: bf16[3,384,128], index: 3, kind: input, shape index: {}]   ;;  %s18275_s4 = inlined_call_operand.vmem [shape: f32[1,128], index: 4, kind: input, shape index: {}]   ;;  %s18276_s5 = inlined_call_operand.hbm [shape: bf16[3,384,128], index: 5, kind: input, shape index: {}]   ;;  %s18277_s6 = inlined_call_operand.vmem [shape: f32[1,128], index: 6, kind: input, shape index: {}]   ;;  %s18278_s7 = inlined_call_operand.vmem [shape: bf16[128,16], index: 7, kind: input, shape index: {}]   ;;  %s18279_s8 = inlined_call_operand.vmem [shape: f32[1,16], index: 8, kind: input, shape index: {}]   ;;  %s18280_s9 = inlined_call_operand.vmem [shape: bf16[2,256,16], index: 9, kind: output, shape index: {}]  }
   0x1   :  { %15 = vsyncpa [#allocation6], 0  ;;  %s12812_s30 = smov 0  }
   0x2 LB: > { %s12818_s10 = sadd.s32 4294967295, %s12754_s30   ;;  %p9853_p0 = scmp.ge.s32.totalorder %s12754_s30, 1  ;;  %s12754_s30 = sphi %s12812_s30, %s21_s30  }
   0x3   : > { %p246_p1 = scmp.lt.s32.totalorder %s12754_s30, 3  ;;  %s12756_s11 = smov [#allocation3]  }
   0x4   : > { %s264_s12 = sshll.u32 %s12756_s11, 4  ;;  %p18281_p3 = scmp.eq.s32.totalorder %s12818_s10, 0  ;;  %s265_s12 = int_to_ptr.vmem [resolvable:$true] %s264_s12 }
   0x5   : > { %p12822_p2 = pnand %p9853_p0, %p246_p1  ;;  %s12757_s14 = smov [#allocation5]  }
   0x6   : > { %s280_s15 = sshll.u32 %s12757_s14, 4  ;;  %s12684_s19 = scalar_lea.hbm %s18274_s3, 9216  ;;  %s12835_s15 = int_to_ptr.vmem [resolvable:$true] %s280_s15 }
   0x7   : > { %s18356_s13 = scalar_select %p12822_p2, 1, 0 }
   0x8   : > { %p11930_p4 = pneg %p12822_p2  ;;  %p12685_p6 = scmp.ne.s32.totalorder %s18274_s3, %s12684_s19 }
   0x9   : > { %p12691_p10 = scmp.lt.u32.totalorder %s12684_s19, %s18274_s3 }
   0xa   : > { %p12831_p5 = pnand %p18281_p3, %p11930_p4 }
   0xc   : > { %p12686_p7 = pneg %p12831_p5 }
   0xe   : > { %p12687_p8 = pnand %p12686_p7, %p12685_p6 }
  0x10   : > { %p12688_p9 = pneg %p12687_p8 }
  0x12   : > { %p12693_p11 = pnand %p12691_p10, %p12688_p9 }
  0x14   : > { %12696 = shalt.err (!%p12693_p11)
}
  0x15   : > { %s12697_s24 = scalar_lea.vmem %s265_s12, 9216  ;;  %p12705_p1 = scmp.lt.s32.totalorder %s265_s12, %s265_s12 }
  0x16   : > { %p12698_p12 = scmp.ne.s32.totalorder %s265_s12, %s12697_s24  ;;  %p12706_p4 = scmp.lt.s32.totalorder %s12697_s24, %s12697_s24 }
  0x18   : > { %p12700_p13 = pnand %p12698_p12, %p12686_p7  ;;  %p12707_p3 = por %p12706_p4, %p12705_p1 }
  0x1a   : > { %p12701_p0 = pneg %p12700_p13 }
  0x1c   : > { %p12708_p2 = pnand %p12707_p3, %p12701_p0 }
  0x1e   : > { %12711 = shalt.err (!%p12708_p2)
}
  0x1f   : > { %s12758_s25 = smov 64   ;;  %s12759_s26 = smov 4  }
  0x20   : > { %11933 = dma.hbm_to_vmem [thread:$0]  (!%p12831_p5), %s18274_s3, 9216, %s265_s12, [#allocation4], %s12758_s25, %s12758_s25, %s12759_s26  }
  0x21   : > { %s12712_s14 = scalar_lea.hbm %s18276_s5, 9216 }
  0x22   : > { %p12713_p6 = scmp.ne.s32.totalorder %s18276_s5, %s12712_s14  ;;  %p12719_p8 = scmp.lt.u32.totalorder %s12712_s14, %s18276_s5 }
  0x24   : > { %p12715_p2 = pnand %p12713_p6, %p12686_p7 }
  0x26   : > { %p12716_p3 = pneg %p12715_p2 }
  0x28   : > { %p12721_p9 = pnand %p12719_p8, %p12716_p3 }
  0x2a   : > { %12724 = shalt.err (!%p12721_p9)
}
  0x2b   : > { %s12725_s12 = scalar_lea.vmem %s12835_s15, 9216  ;;  %p12733_p13 = scmp.lt.s32.totalorder %s12835_s15, %s12835_s15 }
  0x2c   : > { %p12726_p10 = scmp.ne.s32.totalorder %s12835_s15, %s12725_s12  ;;  %p12734_p0 = scmp.lt.s32.totalorder %s12725_s12, %s12725_s12 }
  0x2e   : > { %p12728_p11 = pnand %p12726_p10, %p12686_p7  ;;  %p12735_p1 = por %p12734_p0, %p12733_p13 }
  0x30   : > { %p12729_p12 = pneg %p12728_p11 }
  0x32   : > { %p12736_p4 = pnand %p12735_p1, %p12729_p12 }
  0x34   : > { %12739 = shalt.err (!%p12736_p4)
}
  0x35   : > { %11936 = dma.hbm_to_vmem [thread:$0]  (!%p12831_p5), %s18276_s5, 9216, %s12835_s15, [#allocation6], %s12758_s25, %s12758_s25, %s12759_s26  }
  0x36   : > { %p18358_p6 = scmp.ne.s32.totalorder %s18356_s13, 0 }
  0x38   : > { %313 = sbr.rel (%p18358_p6) target bundleno = 2231 (0x8b7), region = 56 }
  0x3f   : > { %p18359_p2 = scmp.eq.s32.totalorder %s12818_s10, 0 }
  0x41   : > { %12745 = dma.done.wait (%p18359_p2), [#allocation4], 9216   ;;  %p18360_p7 = pmov %p18359_p2 }
  0x42   : > { %p18361_p3 = pmov %p18359_p2 }
  0x43   : > { %12747 = vsyncadd (%p18360_p7), [#allocation4], 4294958080 }
  0x44   : > { %12749 = dma.done.wait (%p18361_p3), [#allocation6], 9216   ;;  %p18362_p8 = pmov %p18359_p2 }
  0x45   : > { %p353_p9 = scmp.lt.s32.totalorder %s12818_s10, 1  ;;  %v11955_v0 = vld [vmem:[%s18272_s1] sm:$0xff]   ;;  %vm1804_vm4 = vcmask 130048  }
  0x46   : > { %12751 = vsyncadd (%p18362_p8), [#allocation6], 4294958080  ;;  %11152 = vmatprep.subr.bf16.mxu0 %v11955_v0 }
  0x47   : > { %s18828_s10 = smov (!%p353_p9, %s12818_s10), 1  ;;  %11153 = vmatpush3.bf16.msra.mxu0 %v11955_v0 }
  0x48   : > { %s10103_s13 = sshll.u32 %s18828_s10, 7 }
  0x49   : > { %s12904_s23 = scalar_lea.vmem %s18271_s0, %s10103_s13  ;;  %s18159_s15 = scalar_lea.vmem %s18280_s9, %s10103_s13 }
  0x4a   : > { %v10138_v1 = vld [vmem:[%s12904_s23] sm:$0xff]   ;;  %v12911_v2 = vld [vmem:[%s12904_s23 + $0x8] sm:$0xff]   ;;  %v12916_v7 = vld [vmem:[%s12904_s23 + $0x10] sm:$0xff]  }
  0x4b   : > { %v10139_v3 = vunpack.c.l.bf16 %v10138_v1  ;;  %v10140_v4 = vunpack.c.h.bf16 %v10138_v1  ;;  %v10143_v5 = vunpack.c.l.bf16 %v12911_v2  ;;  %v10144_v6 = vunpack.c.h.bf16 %v12911_v2  ;;  %v12923_v10 = vld [vmem:[%s12904_s23 + $0x18] sm:$0xff]   ;;  %v12966_v0 = vld [vmem:[%s12904_s23 + $0x20] sm:$0xff]  }
  0x4c   : > { %v10147_v15 = vunpack.c.l.bf16 %v12916_v7  ;;  %v10148_v18 = vunpack.c.h.bf16 %v12916_v7  ;;  %v10151_v19 = vunpack.c.l.bf16 %v12923_v10  ;;  %v10152_v35 = vunpack.c.h.bf16 %v12923_v10 }
  0x4d   : > { %v12918_v8 = vmul.f32 0.70710677, %v10139_v3  ;;  %v12920_v9 = vmul.f32 0.70710677, %v10140_v4  ;;  %v12925_v11 = vmul.f32 0.70710677, %v10143_v5 }
  0x4e   : > { %v12929_v12 = vmul.f32 0.70710677, %v10144_v6  ;;  %v12938_v32 = vmul.f32 0.5, %v10139_v3  ;;  %v12943_v38 = vmul.f32 0.70710677, %v10147_v15  ;;  %v12959_v52 = vmul.f32 0.5, %v10140_v4 }
  0x4f   : > { %v973_v13 = vand.u32 2147483647, %v12918_v8  ;;  %v974_v14 = vand.u32 2147483647, %v12920_v9  ;;  %v975_v16 = vand.u32 2147483647, %v12925_v11 }
  0x50   : > { %v976_v17 = vand.u32 2147483647, %v12929_v12  ;;  %v12947_v41 = vmul.f32 0.70710677, %v10148_v18  ;;  %v977_v43 = vand.u32 2147483647, %v12943_v38 }
  0x51   : > { %v1005_v20 = vmul.f32 0.3275911, %v973_v13  ;;  %v1006_v21 = vmul.f32 0.3275911, %v974_v14  ;;  %v1389_v22 = vsub.f32 0.0, %v973_v13  ;;  %v1390_v23 = vsub.f32 0.0, %v974_v14 }
  0x52   : > { %v1007_v24 = vmul.f32 0.3275911, %v975_v16  ;;  %v1008_v25 = vmul.f32 0.3275911, %v976_v17  ;;  %v1391_v26 = vsub.f32 0.0, %v975_v16  ;;  %v1392_v27 = vsub.f32 0.0, %v976_v17 }
  0x53   : > { %v1037_v28 = vadd.f32 1.0, %v1005_v20  ;;  %v1038_v29 = vadd.f32 1.0, %v1006_v21  ;;  %v1421_v30 = vmul.f32 %v1389_v22, %v973_v13  ;;  %v1422_v31 = vmul.f32 %v1390_v23, %v974_v14 }
  0x54   : > { %v1423_v33 = vmul.f32 %v1391_v26, %v975_v16  ;;  %v1424_v34 = vmul.f32 %v1392_v27, %v976_v17  ;;  %v1039_v36 = vadd.f32 1.0, %v1007_v24  ;;  %v1040_v37 = vadd.f32 1.0, %v1008_v25 }
  0x55   : > { %12108 = vrcp.f32 %v1037_v28  ;;  %v1453_v39 = vmul.f32 1.442695, %v1421_v30  ;;  %v1455_v40 = vmul.f32 1.442695, %v1422_v31  ;;  %v978_v45 = vand.u32 2147483647, %v12947_v41 }
  0x56   : > { %12110 = vrcp.f32 %v1038_v29  ;;  %v1457_v42 = vmul.f32 1.442695, %v1423_v33  ;;  %v1459_v44 = vmul.f32 1.442695, %v1424_v34  ;;  %v1009_v46 = vmul.f32 0.3275911, %v977_v43 }
  0x57   : > { %12112 = vrcp.f32 %v1039_v36  ;;  %v1393_v47 = vsub.f32 0.0, %v977_v43  ;;  %v12953_v48 = vmul.f32 0.70710677, %v10151_v19  ;;  %v1010_v49 = vmul.f32 0.3275911, %v978_v45 }
  0x58   : > { %12114 = vrcp.f32 %v1040_v37  ;;  %v1394_v50 = vsub.f32 0.0, %v978_v45  ;;  %v12957_v51 = vmul.f32 0.70710677, %v10152_v35  ;;  %v1041_v53 = vadd.f32 1.0, %v1009_v46 }
  0x59   : > { %v979_v54 = vand.u32 2147483647, %v12953_v48  ;;  %v12962_v55 = vmul.f32 0.5, %v10143_v5  ;;  %v1042_v56 = vadd.f32 1.0, %v1010_v49  ;;  %v1425_v58 = vmul.f32 %v1393_v47, %v977_v43 }
  0x5a   : > { %v980_v57 = vand.u32 2147483647, %v12957_v51  ;;  %12116 = vrcp.f32 %v1041_v53  ;;  %v1426_v61 = vmul.f32 %v1394_v50, %v978_v45  ;;  %v12972_v3 = vmul.f32 0.5, %v10144_v6 }
  0x5b   : > { %v1011_v59 = vmul.f32 0.3275911, %v979_v54  ;;  %v1395_v60 = vsub.f32 0.0, %v979_v54  ;;  %12118 = vrcp.f32 %v1042_v56  ;;  %v12979_v16 = vmul.f32 0.5, %v10147_v15 }
  0x5c   : > { %v1012_v62 = vmul.f32 0.3275911, %v980_v57  ;;  %v1396_v63 = vsub.f32 0.0, %v980_v57  ;;  %12120 = vpow2.f32 %v1453_v39  ;;  %v12984_v21 = vmul.f32 0.5, %v10148_v18 }
  0x5d   : > { %v1043_v4 = vadd.f32 1.0, %v1011_v59  ;;  %v1427_v5 = vmul.f32 %v1395_v60, %v979_v54  ;;  %12122 = vpow2.f32 %v1455_v40  ;;  %v1461_v22 = vmul.f32 1.442695, %v1425_v58  ;;  %v13024_v58 = vld [vmem:[%s12904_s23 + $0x28] sm:$0xff]  }
  0x5e   : > { %v1044_v17 = vadd.f32 1.0, %v1012_v62  ;;  %v1428_v2 = vmul.f32 %v1396_v63, %v980_v57  ;;  %v1463_v23 = vmul.f32 1.442695, %v1426_v61  ;;  %v10155_v15 = vunpack.c.l.bf16 %v12966_v0 }
  0x5f   : > { %v12968_v1 = vpop.eup %12108  ;;  %12124 = vrcp.f32 %v1043_v4  ;;  %v1465_v26 = vmul.f32 1.442695, %v1427_v5  ;;  %v10156_v18 = vunpack.c.h.bf16 %v12966_v0  ;;  %vm1581_vm0 = vcmp.ge.f32.partialorder %v12918_v8, 0.0 }
  0x60   : > { %v12974_v13 = vpop.eup %12110  ;;  %v1101_v14 = vmul.f32 1.0614054, %v12968_v1  ;;  %12126 = vrcp.f32 %v1044_v17  ;;  %v1467_v31 = vmul.f32 1.442695, %v1428_v2  ;;  %v12998_v33 = vmul.f32 0.70710677, %v10155_v15 }
  0x61   : > { %v1102_v20 = vmul.f32 1.0614054, %v12974_v13  ;;  %v12986_v24 = vpop.eup %12112  ;;  %12128 = vpow2.f32 %v1457_v42  ;;  %v13002_v37 = vmul.f32 0.70710677, %v10156_v18  ;;  %vm1582_vm1 = vcmp.ge.f32.partialorder %v12920_v9, 0.0 }
  0x62   : > { %v1133_v6 = vadd.f32 -1.4531521, %v1101_v14  ;;  %v12989_v27 = vpop.eup %12114  ;;  %v1103_v7 = vmul.f32 1.0614054, %v12986_v24  ;;  %12130 = vpow2.f32 %v1459_v44  ;;  %v13007_v43 = vand.u32 2147483647, %v12998_v33 }
  0x63   : > { %v1134_v25 = vadd.f32 -1.4531521, %v1102_v20  ;;  %v1104_v30 = vmul.f32 1.0614054, %v12989_v27  ;;  %12132 = vpow2.f32 %v1461_v22  ;;  %v13015_v49 = vand.u32 2147483647, %v13002_v37 }
  0x64   : > { %v1165_v28 = vmul.f32 %v12968_v1, %v1133_v6  ;;  %v1135_v36 = vadd.f32 -1.4531521, %v1103_v7  ;;  %v13004_v39 = vpop.eup %12116  ;;  %12134 = vpow2.f32 %v1463_v23  ;;  %v13021_v57 = vmul.f32 0.3275911, %v13007_v43 }
  0x65   : > { %v1166_v29 = vmul.f32 %v12974_v13, %v1134_v25  ;;  %v1136_v42 = vadd.f32 -1.4531521, %v1104_v30  ;;  %v13009_v44 = vpop.eup %12118  ;;  %v1105_v47 = vmul.f32 1.0614054, %v13004_v39  ;;  %12136 = vpow2.f32 %v1465_v26 }
  0x66   : > { %v1197_v34 = vadd.f32 1.4214138, %v1165_v28  ;;  %v1167_v46 = vmul.f32 %v12986_v24, %v1135_v36  ;;  %v12121_v50 = vpop.eup %12120  ;;  %v1106_v56 = vmul.f32 1.0614054, %v13009_v44  ;;  %12138 = vpow2.f32 %v1467_v31 }
  0x67   : > { %v1198_v40 = vadd.f32 1.4214138, %v1166_v29  ;;  %v1168_v54 = vmul.f32 %v12989_v27, %v1136_v42  ;;  %v12123_v59 = vpop.eup %12122  ;;  %v1137_v62 = vadd.f32 -1.4531521, %v1105_v47  ;;  %v10159_v36 = vunpack.c.l.bf16 %v13024_v58 }
  0x68   : > { %v1229_v45 = vmul.f32 %v12968_v1, %v1197_v34  ;;  %v1199_v61 = vadd.f32 1.4214138, %v1167_v46  ;;  %v1138_v14 = vadd.f32 -1.4531521, %v1106_v56  ;;  %v10160_v46 = vunpack.c.h.bf16 %v13024_v58 }
  0x69   : > { %v1230_v53 = vmul.f32 %v12974_v13, %v1198_v40  ;;  %v13026_v63 = vpop.eup %12124  ;;  %v1200_v5 = vadd.f32 1.4214138, %v1168_v54  ;;  %v1169_v6 = vmul.f32 %v13004_v39, %v1137_v62  ;;  %vm1583_vm2 = vcmp.ge.f32.partialorder %v12925_v11, 0.0 }
  0x6a   : > { %v1261_v60 = vadd.f32 -0.28449672, %v1229_v45  ;;  %v13028_v17 = vpop.eup %12126  ;;  %v1231_v2 = vmul.f32 %v12986_v24, %v1199_v61  ;;  %v1107_v22 = vmul.f32 1.0614054, %v13026_v63  ;;  %v1170_v28 = vmul.f32 %v13009_v44, %v1138_v14 }
  0x6b   : > { %v1262_v4 = vadd.f32 -0.28449672, %v1230_v53  ;;  %v12129_v23 = vpop.eup %12128  ;;  %v1232_v26 = vmul.f32 %v12989_v27, %v1200_v5  ;;  %v1108_v7 = vmul.f32 1.0614054, %v13028_v17  ;;  %v1201_v34 = vadd.f32 1.4214138, %v1169_v6 }
  0x6c   : > { %v1293_v20 = vmul.f32 %v12968_v1, %v1261_v60  ;;  %v12131_v29 = vpop.eup %12130  ;;  %v1263_v31 = vadd.f32 -0.28449672, %v1231_v2  ;;  %v1202_v45 = vadd.f32 1.4214138, %v1170_v28  ;;  %v1139_v60 = vadd.f32 -1.4531521, %v1107_v22 }
  0x6d   : > { %v1294_v25 = vmul.f32 %v12974_v13, %v1262_v4  ;;  %v1264_v42 = vadd.f32 -0.28449672, %v1232_v26  ;;  %v12133_v47 = vpop.eup %12132  ;;  %v1233_v56 = vmul.f32 %v13004_v39, %v1201_v34  ;;  %v1140_v14 = vadd.f32 -1.4531521, %v1108_v7 }
  0x6e   : > { %v1325_v30 = vadd.f32 0.2548296, %v1293_v20  ;;  %v1295_v54 = vmul.f32 %v12986_v24, %v1263_v31  ;;  %v12135_v61 = vpop.eup %12134  ;;  %v1234_v5 = vmul.f32 %v13009_v44, %v1202_v45  ;;  %vm1584_vm3 = vcmp.ge.f32.partialorder %v12929_v12, 0.0 }
  0x6f   : > { %v1326_v40 = vadd.f32 0.2548296, %v1294_v25  ;;  %v1296_v4 = vmul.f32 %v12989_v27, %v1264_v42  ;;  %v1171_v6 = vmul.f32 %v13026_v63, %v1139_v60  ;;  %v1172_v28 = vmul.f32 %v13028_v17, %v1140_v14 }
  0x70   : > { %v1357_v53 = vmul.f32 %v12968_v1, %v1325_v30  ;;  %v1327_v2 = vadd.f32 0.2548296, %v1295_v54  ;;  %v1265_v1 = vadd.f32 -0.28449672, %v1233_v56  ;;  %v1266_v22 = vadd.f32 -0.28449672, %v1234_v5 }
  0x71   : > { %v1358_v62 = vmul.f32 %v12974_v13, %v1326_v40  ;;  %v1328_v26 = vadd.f32 0.2548296, %v1296_v4  ;;  %v12137_v13 = vpop.eup %12136  ;;  %v1203_v40 = vadd.f32 1.4214138, %v1171_v6  ;;  %vm1585_vm5 = vcmp.ge.f32.partialorder %v12943_v38, 0.0 }
  0x72   : > { %v1517_v20 = vmul.f32 %v12121_v50, %v1357_v53  ;;  %v1359_v31 = vmul.f32 %v12986_v24, %v1327_v2  ;;  %v1297_v34 = vmul.f32 %v13004_v39, %v1265_v1  ;;  %v12139_v7 = vpop.eup %12138  ;;  %v1298_v45 = vmul.f32 %v13009_v44, %v1266_v22 }
  0x73   : > { %v1518_v25 = vmul.f32 %v12123_v59, %v1358_v62  ;;  %v1360_v42 = vmul.f32 %v12989_v27, %v1328_v26  ;;  %v1204_v59 = vadd.f32 1.4214138, %v1172_v28  ;;  %vm1586_vm6 = vcmp.ge.f32.partialorder %v12947_v41, 0.0 }
  0x74   : > { %v1549_v30 = vsub.f32 1.0, %v1517_v20  ;;  %v1519_v54 = vmul.f32 %v12129_v23, %v1359_v31  ;;  %v1329_v56 = vadd.f32 0.2548296, %v1297_v34  ;;  %v1235_v24 = vmul.f32 %v13026_v63, %v1203_v40 }
  0x75   : > { %v1550_v50 = vsub.f32 1.0, %v1518_v25  ;;  %v1520_v62 = vmul.f32 %v12131_v29, %v1360_v42  ;;  %v1330_v4 = vadd.f32 0.2548296, %v1298_v45  ;;  %v1236_v5 = vmul.f32 %v13028_v17, %v1204_v59 }
  0x76   : > { %v1613_v53 = vsub.f32 0.0, %v1549_v30  ;;  %v1551_v14 = vsub.f32 1.0, %v1519_v54  ;;  %v1361_v20 = vmul.f32 %v13004_v39, %v1329_v56  ;;  %v1267_v2 = vadd.f32 -0.28449672, %v1235_v24 }
  0x77   : > { %v1614_v60 = vsub.f32 0.0, %v1550_v50  ;;  %v1552_v6 = vsub.f32 1.0, %v1520_v62  ;;  %v1362_v25 = vmul.f32 %v13009_v44, %v1330_v4  ;;  %v1268_v28 = vadd.f32 -0.28449672, %v1236_v5 }
  0x78   : > { %v1645_v27 = vsel %vm1581_vm0, %v1549_v30, %v1613_v53  ;;  %v1615_v22 = vsub.f32 0.0, %v1551_v14  ;;  %v1521_v29 = vmul.f32 %v12133_v47, %v1361_v20  ;;  %v1299_v30 = vmul.f32 %v13026_v63, %v1267_v2 }
  0x79   : > { %v1646_v23 = vsel %vm1582_vm1, %v1550_v50, %v1614_v60  ;;  %v1709_v1 = vadd.f32 1.0, %v1645_v27  ;;  %v1616_v34 = vsub.f32 0.0, %v1552_v6  ;;  %v1522_v8 = vmul.f32 %v12135_v61, %v1362_v25 }
  0x7a   : > { %v1710_v26 = vadd.f32 1.0, %v1646_v23  ;;  %v1647_v9 = vsel %vm1583_vm2, %v1551_v14, %v1615_v22  ;;  %v1553_v40 = vsub.f32 1.0, %v1521_v29  ;;  %v1300_v50 = vmul.f32 %v13028_v17, %v1268_v28 }
  0x7b   : > { %v1741_v31 = vmul.f32 %v1709_v1, %v12938_v32  ;;  %v1648_v44 = vsel %vm1584_vm3, %v1552_v6, %v1616_v34  ;;  %v1711_v42 = vadd.f32 1.0, %v1647_v9  ;;  %v1554_v47 = vsub.f32 1.0, %v1522_v8 }
  0x7c   : > { %v1742_v39 = vmul.f32 %v1710_v26, %v12959_v52  ;;  %v1331_v45 = vadd.f32 0.2548296, %v1299_v30  ;;  %v1712_v32 = vadd.f32 1.0, %v1648_v44  ;;  %v1617_v53 = vsub.f32 0.0, %v1553_v40 }
  0x7d   : > { %v1332_v61 = vadd.f32 0.2548296, %v1300_v50  ;;  %v1743_v54 = vmul.f32 %v1711_v42, %v12962_v55  ;;  %v1618_v56 = vsub.f32 0.0, %v1554_v47  ;;  %v1014_v11 = vmul.f32 0.3275911, %v13015_v49 }
  0x7e   : > { %v1773_v59 = vpack.c.bf16 %v1742_v39, %v1741_v31  ;;  %v1363_v52 = vmul.f32 %v13026_v63, %v1331_v45  ;;  %v1744_v24 = vmul.f32 %v1712_v32, %v12972_v3  ;;  %v1649_v12 = vsel %vm1585_vm5, %v1553_v40, %v1617_v53 }
  0x7f   : > { %v1364_v60 = vmul.f32 %v13028_v17, %v1332_v61  ;;  %v1045_v62 = vadd.f32 1.0, %v13021_v57  ;;  %v1650_v4 = vsel %vm1586_vm6, %v1554_v47, %v1618_v56  ;;  %v1713_v55 = vadd.f32 1.0, %v1649_v12  ;;  %v13091_v17 = vld [vmem:[%s12904_s23 + $0x30] sm:$0xff]   ;;  %v13124_v61 = vld [vmem:[%s12904_s23 + $0x38] sm:$0xff]  }
  0x80   : > { %11154 = vmatprep.mubr.msk.bf16.mxu0 %vm1804_vm4, %v1773_v59  ;;  %v1523_v5 = vmul.f32 %v12137_v13, %v1363_v52  ;;  %v1046_v63 = vadd.f32 1.0, %v1014_v11  ;;  %v1774_v27 = vpack.c.bf16 %v1744_v24, %v1743_v54  ;;  %v1714_v14 = vadd.f32 1.0, %v1650_v4 }
  0x81   : > { %v1524_v20 = vmul.f32 %v12139_v7, %v1364_v60  ;;  %12140 = vrcp.f32 %v1045_v62  ;;  %v1745_v3 = vmul.f32 %v1713_v55, %v12979_v16  ;;  %v1397_v38 = vsub.f32 0.0, %v13007_v43 }
  0x82   : > { %v1555_v2 = vsub.f32 1.0, %v1523_v5  ;;  %12142 = vrcp.f32 %v1046_v63  ;;  %11155 = vmatmul.mubr.msk.bf16.vlgmr.msra.gmra.mrb[0].mxu0 %vm1804_vm4, %v1774_v27  ;;  %v1746_v57 = vmul.f32 %v1714_v14, %v12984_v21  ;;  %vm1587_vm7 = vcmp.ge.f32.partialorder %v12953_v48, 0.0 }
  0x83   : > { %v1556_v41 = vsub.f32 1.0, %v1524_v20  ;;  %vm1588_vm8 = vcmp.ge.f32.partialorder %v12957_v51, 0.0  ;;  %v1683_v7 = vmul.f32 0.5, %v10151_v19  ;;  %v1429_v16 = vmul.f32 %v1397_v38, %v13007_v43 }
  0x84   : > { %v1619_v13 = vsub.f32 0.0, %v1555_v2  ;;  %v1775_v23 = vpack.c.bf16 %v1746_v57, %v1745_v3  ;;  %v1398_v6 = vsub.f32 0.0, %v13015_v49  ;;  %v13100_v21 = vmul.f32 0.70710677, %v10159_v36 }
  0x85   : > { %v1620_v1 = vsub.f32 0.0, %v1556_v41  ;;  %v1684_v48 = vmul.f32 0.5, %v10152_v35  ;;  %v13106_v51 = vmul.f32 0.70710677, %v10160_v46  ;;  %v10163_v19 = vunpack.c.l.bf16 %v13091_v17 }
  0x86   : > { %v1651_v25 = vsel %vm1587_vm7, %v1555_v2, %v1619_v13  ;;  %11158 = vmatprep.mubr.msk.bf16.mxu0 %vm1804_vm4, %v1775_v23  ;;  %v1469_v22 = vmul.f32 1.442695, %v1429_v16  ;;  %v983_v29 = vand.u32 2147483647, %v13100_v21  ;;  %v10164_v34 = vunpack.c.h.bf16 %v13091_v17 }
  0x87   : > { %v1652_v43 = vsel %vm1588_vm8, %v1556_v41, %v1620_v1  ;;  %v1715_v26 = vadd.f32 1.0, %v1651_v25  ;;  %v984_v31 = vand.u32 2147483647, %v13106_v51  ;;  %v1430_v35 = vmul.f32 %v1398_v6, %v13015_v49 }
  0x88   : > { %v1716_v28 = vadd.f32 1.0, %v1652_v43  ;;  %v1015_v8 = vmul.f32 0.3275911, %v983_v29  ;;  %v1399_v30 = vsub.f32 0.0, %v983_v29  ;;  %v13118_v47 = vmul.f32 0.70710677, %v10163_v19 }
  0x89   : > { %v1747_v10 = vmul.f32 %v1715_v26, %v1683_v7  ;;  %v1016_v9 = vmul.f32 0.3275911, %v984_v31  ;;  %v1400_v40 = vsub.f32 0.0, %v984_v31  ;;  %v1471_v56 = vmul.f32 1.442695, %v1430_v35 }
  0x8a   : > { %v1748_v39 = vmul.f32 %v1716_v28, %v1684_v48  ;;  %v1047_v44 = vadd.f32 1.0, %v1015_v8  ;;  %v1431_v42 = vmul.f32 %v1399_v30, %v983_v29  ;;  %v13129_v52 = vmul.f32 0.70710677, %v10164_v34 }
  0x8b   : > { %v13114_v50 = vpop.eup %12140  ;;  %v1048_v53 = vadd.f32 1.0, %v1016_v9  ;;  %v1432_v49 = vmul.f32 %v1400_v40, %v984_v31  ;;  %v985_v12 = vand.u32 2147483647, %v13118_v47  ;;  %v10167_v55 = vunpack.c.l.bf16 %v13124_v61 }
  0x8c   : > { %v13120_v45 = vpop.eup %12142  ;;  %v1776_v59 = vpack.c.bf16 %v1748_v39, %v1747_v10  ;;  %v1109_v32 = vmul.f32 1.0614054, %v13114_v50  ;;  %12144 = vrcp.f32 %v1047_v44  ;;  %v1473_v24 = vmul.f32 1.442695, %v1431_v42 }
  0x8d   : > { %v1110_v54 = vmul.f32 1.0614054, %v13120_v45  ;;  %12146 = vrcp.f32 %v1048_v53  ;;  %v1475_v62 = vmul.f32 1.442695, %v1432_v49  ;;  %v986_v4 = vand.u32 2147483647, %v13129_v52 }
  0x8e   : > { %11159 = vmatmul.mubr.msk.bf16.gmra.mrb[4].mxu0 %vm1804_vm4, %v1776_v59  ;;  %v1141_v11 = vadd.f32 -1.4531521, %v1109_v32  ;;  %v1017_v63 = vmul.f32 0.3275911, %v985_v12  ;;  %v1401_v27 = vsub.f32 0.0, %v985_v12  ;;  %v10168_v14 = vunpack.c.h.bf16 %v13124_v61 }
  0x8f   : > { %v1142_v60 = vadd.f32 -1.4531521, %v1110_v54  ;;  %12148 = vpow2.f32 %v1469_v22  ;;  %v1018_v3 = vmul.f32 0.3275911, %v986_v4  ;;  %v1402_v2 = vsub.f32 0.0, %v986_v4 }
  0x90   : > { %v1173_v5 = vmul.f32 %v13114_v50, %v1141_v11  ;;  %12150 = vpow2.f32 %v1471_v56  ;;  %v1049_v57 = vadd.f32 1.0, %v1017_v63  ;;  %v1433_v41 = vmul.f32 %v1401_v27, %v985_v12 }
  0x91   : > { %v1174_v20 = vmul.f32 %v13120_v45, %v1142_v60  ;;  %v13140_v7 = vmul.f32 0.5, %v10155_v15  ;;  %v1050_v16 = vadd.f32 1.0, %v1018_v3  ;;  %v1434_v23 = vmul.f32 %v1402_v2, %v986_v4 }
  0x92   : > { %v1205_v38 = vadd.f32 1.4214138, %v1173_v5  ;;  %v13145_v6 = vmul.f32 0.5, %v10156_v18  ;;  %12152 = vrcp.f32 %v1049_v57  ;;  %v13149_v25 = vmul.f32 0.70710677, %v10167_v55 }
  0x93   : > { %v1206_v13 = vadd.f32 1.4214138, %v1174_v20  ;;  %v13154_v43 = vmul.f32 0.5, %v10159_v36  ;;  %12154 = vrcp.f32 %v1050_v16  ;;  %v13158_v15 = vmul.f32 0.70710677, %v10168_v14  ;;  %v13181_v20 = vld [vmem:[%s12904_s23 + $0x40] sm:$0xff]  }
  0x94   : > { %v1237_v1 = vmul.f32 %v13114_v50, %v1205_v38  ;;  %12156 = vpow2.f32 %v1473_v24  ;;  %v1477_v0 = vmul.f32 1.442695, %v1433_v41  ;;  %v987_v18 = vand.u32 2147483647, %v13149_v25 }
  0x95   : > { %v1238_v48 = vmul.f32 %v13120_v45, %v1206_v13  ;;  %12158 = vpow2.f32 %v1475_v62  ;;  %v1479_v28 = vmul.f32 1.442695, %v1434_v23  ;;  %v988_v31 = vand.u32 2147483647, %v13158_v15 }
  0x96   : > { %v1269_v26 = vadd.f32 -0.28449672, %v1237_v1  ;;  %v13161_v22 = vpop.eup %12144  ;;  %v1019_v8 = vmul.f32 0.3275911, %v987_v18  ;;  %v1403_v30 = vsub.f32 0.0, %v987_v18  ;;  %vm1589_vm9 = vcmp.ge.f32.partialorder %v12998_v33, 0.0 }
  0x97   : > { %v1270_v29 = vadd.f32 -0.28449672, %v1238_v48  ;;  %v13164_v10 = vpop.eup %12146  ;;  %v1111_v35 = vmul.f32 1.0614054, %v13161_v22  ;;  %v1020_v40 = vmul.f32 0.3275911, %v988_v31 }
  0x98   : > { %v1301_v36 = vmul.f32 %v13114_v50, %v1269_v26  ;;  %v1112_v9 = vmul.f32 1.0614054, %v13164_v10  ;;  %v1404_v44 = vsub.f32 0.0, %v988_v31  ;;  %vm1590_vm10 = vcmp.ge.f32.partialorder %v13002_v37, 0.0 }
  0x99   : > { %v1302_v39 = vmul.f32 %v13120_v45, %v1270_v29  ;;  %v1143_v59 = vadd.f32 -1.4531521, %v1111_v35  ;;  %v1051_v32 = vadd.f32 1.0, %v1019_v8  ;;  %v1435_v53 = vmul.f32 %v1403_v30, %v987_v18  ;;  %v12149_v49 = vpop.eup %12148 }
  0x9a   : > { %v1333_v42 = vadd.f32 0.2548296, %v1301_v36  ;;  %v1144_v56 = vadd.f32 -1.4531521, %v1112_v9  ;;  %v1052_v11 = vadd.f32 1.0, %v1020_v40  ;;  %v1436_v24 = vmul.f32 %v1404_v44, %v988_v31  ;;  %v12151_v12 = vpop.eup %12150 }
  0x9b   : > { %v1334_v54 = vadd.f32 0.2548296, %v1302_v39  ;;  %v1175_v62 = vmul.f32 %v13161_v22, %v1143_v59  ;;  %12160 = vrcp.f32 %v1051_v32  ;;  %v1481_v4 = vmul.f32 1.442695, %v1435_v53 }
  0x9c   : > { %v1365_v60 = vmul.f32 %v13114_v50, %v1333_v42  ;;  %v1176_v63 = vmul.f32 %v13164_v10, %v1144_v56  ;;  %v13178_v27 = vmul.f32 0.5, %v10160_v46  ;;  %12162 = vrcp.f32 %v1052_v11  ;;  %v13183_v3 = vpop.eup %12152 }
  0x9d   : > { %v1366_v5 = vmul.f32 %v13120_v45, %v1334_v54  ;;  %v1207_v38 = vadd.f32 1.4214138, %v1175_v62  ;;  %12164 = vpow2.f32 %v1477_v0  ;;  %v1483_v50 = vmul.f32 1.442695, %v1436_v24  ;;  %v13185_v57 = vpop.eup %12154 }
  0x9e   : > { %v1525_v2 = vmul.f32 %v12149_v49, %v1365_v60  ;;  %v1208_v13 = vadd.f32 1.4214138, %v1176_v63  ;;  %v1113_v45 = vmul.f32 1.0614054, %v13183_v3  ;;  %12166 = vpow2.f32 %v1479_v28  ;;  %v12157_v16 = vpop.eup %12156 }
  0x9f   : > { %v1526_v41 = vmul.f32 %v12151_v12, %v1366_v5  ;;  %v1239_v46 = vmul.f32 %v13161_v22, %v1207_v38  ;;  %v1114_v23 = vmul.f32 1.0614054, %v13185_v57  ;;  %12168 = vpow2.f32 %v1481_v4  ;;  %v12159_v1 = vpop.eup %12158 }
  0xa0   : > { %v1557_v58 = vsub.f32 1.0, %v1525_v2  ;;  %v1240_v26 = vmul.f32 %v13164_v10, %v1208_v13  ;;  %v1145_v0 = vadd.f32 -1.4531521, %v1113_v45  ;;  %v10171_v18 = vunpack.c.l.bf16 %v13181_v20 }
  0xa1   : > { %v1558_v48 = vsub.f32 1.0, %v1526_v41  ;;  %v1271_v31 = vadd.f32 -0.28449672, %v1239_v46  ;;  %v1146_v36 = vadd.f32 -1.4531521, %v1114_v23  ;;  %v10172_v35 = vunpack.c.h.bf16 %v13181_v20 }
  0xa2   : > { %v1621_v29 = vsub.f32 0.0, %v1557_v58  ;;  %v1272_v8 = vadd.f32 -0.28449672, %v1240_v26  ;;  %v1177_v30 = vmul.f32 %v13183_v3, %v1145_v0  ;;  %v13196_v39 = vmul.f32 0.70710677, %v10171_v18 }
  0xa3   : > { %v1622_v28 = vsub.f32 0.0, %v1558_v48  ;;  %v1303_v40 = vmul.f32 %v13161_v22, %v1271_v31  ;;  %v1178_v44 = vmul.f32 %v13185_v57, %v1146_v36  ;;  %v13204_v42 = vmul.f32 0.70710677, %v10172_v35 }
  0xa4   : > { %v1653_v9 = vsel %vm1589_vm9, %v1557_v58, %v1621_v29  ;;  %v1304_v53 = vmul.f32 %v13164_v10, %v1272_v8  ;;  %vm1591_vm11 = vcmp.ge.f32.partialorder %v13100_v21, 0.0  ;;  %v1209_v49 = vadd.f32 1.4214138, %v1177_v30 }
  0xa5   : > { %v1654_v59 = vsel %vm1590_vm10, %v1558_v48, %v1622_v28  ;;  %v1717_v32 = vadd.f32 1.0, %v1653_v9  ;;  %v13210_v54 = vpop.eup %12160  ;;  %v1335_v56 = vadd.f32 0.2548296, %v1303_v40  ;;  %vm1592_vm12 = vcmp.ge.f32.partialorder %v13106_v51, 0.0 }
  0xa6   : > { %v1718_v33 = vadd.f32 1.0, %v1654_v59  ;;  %v1210_v11 = vadd.f32 1.4214138, %v1178_v44  ;;  %12170 = vpow2.f32 %v1483_v50  ;;  %v13213_v24 = vpop.eup %12162  ;;  %v1336_v37 = vadd.f32 0.2548296, %v1304_v53 }
  0xa7   : > { %v1749_v12 = vmul.f32 %v1717_v32, %v13140_v7  ;;  %v1241_v60 = vmul.f32 %v13183_v3, %v1209_v49  ;;  %v1115_v62 = vmul.f32 1.0614054, %v13210_v54  ;;  %v12165_v4 = vpop.eup %12164  ;;  %v1367_v63 = vmul.f32 %v13161_v22, %v1335_v56 }
  0xa8   : > { %v1750_v5 = vmul.f32 %v1718_v33, %v13145_v6  ;;  %v1242_v2 = vmul.f32 %v13185_v57, %v1210_v11  ;;  %v1116_v38 = vmul.f32 1.0614054, %v13213_v24  ;;  %v12167_v41 = vpop.eup %12166  ;;  %v1368_v50 = vmul.f32 %v13164_v10, %v1336_v37 }
  0xa9   : > { %v1273_v13 = vadd.f32 -0.28449672, %v1241_v60  ;;  %v1147_v45 = vadd.f32 -1.4531521, %v1115_v62  ;;  %v989_v7 = vand.u32 2147483647, %v13196_v39  ;;  %v13224_v58 = vpop.eup %12168  ;;  %v1527_v23 = vmul.f32 %v12157_v16, %v1367_v63 }
  0xaa   : > { %v1777_v46 = vpack.c.bf16 %v1750_v5, %v1749_v12  ;;  %v1274_v48 = vadd.f32 -0.28449672, %v1242_v2  ;;  %v1148_v26 = vadd.f32 -1.4531521, %v1116_v38  ;;  %v1528_v6 = vmul.f32 %v12159_v1, %v1368_v50 }
  0xab   : > { %v1305_v22 = vmul.f32 %v13183_v3, %v1273_v13  ;;  %v1179_v0 = vmul.f32 %v13210_v54, %v1147_v45  ;;  %v13229_v29 = vand.u32 2147483647, %v13204_v42  ;;  %v1559_v10 = vsub.f32 1.0, %v1527_v23 }
  0xac   : > { %11162 = vmatprep.mubr.msk.bf16.mxu0 %vm1804_vm4, %v1777_v46  ;;  %v1306_v31 = vmul.f32 %v13185_v57, %v1274_v48  ;;  %vm1593_vm13 = vcmp.ge.f32.partialorder %v13118_v47, 0.0  ;;  %v1180_v36 = vmul.f32 %v13213_v24, %v1148_v26  ;;  %v1021_v16 = vmul.f32 0.3275911, %v989_v7 }
  0xad   : > { %v1560_v28 = vsub.f32 1.0, %v1528_v6  ;;  %v1337_v8 = vadd.f32 0.2548296, %v1305_v22  ;;  %v1211_v1 = vadd.f32 1.4214138, %v1179_v0  ;;  %v1405_v30 = vsub.f32 0.0, %v989_v7 }
  0xae   : > { %v1623_v9 = vsub.f32 0.0, %v1559_v10  ;;  %v1338_v40 = vadd.f32 0.2548296, %v1306_v31  ;;  %v1212_v44 = vadd.f32 1.4214138, %v1180_v36  ;;  %v1053_v59 = vadd.f32 1.0, %v1021_v16 }
  0xaf   : > { %v1624_v32 = vsub.f32 0.0, %v1560_v28  ;;  %v1369_v53 = vmul.f32 %v13183_v3, %v1337_v8  ;;  %v1243_v49 = vmul.f32 %v13210_v54, %v1211_v1  ;;  %v1022_v33 = vmul.f32 0.3275911, %v13229_v29  ;;  %v13258_v36 = vld [vmem:[%s12904_s23 + $0x48] sm:$0xff]  }
  0xb0   : > { %v12171_v56 = vpop.eup %12170  ;;  %v1655_v11 = vsel %vm1591_vm11, %v1559_v10, %v1623_v9  ;;  %v1370_v12 = vmul.f32 %v13185_v57, %v1338_v40  ;;  %v1244_v37 = vmul.f32 %v13213_v24, %v1212_v44  ;;  %12172 = vrcp.f32 %v1053_v59 }
  0xb1   : > { %v1656_v60 = vsel %vm1592_vm12, %v1560_v28, %v1624_v32  ;;  %v1719_v62 = vadd.f32 1.0, %v1655_v11  ;;  %v1529_v5 = vmul.f32 %v12165_v4, %v1369_v53  ;;  %v1275_v63 = vadd.f32 -0.28449672, %v1243_v49  ;;  %v13282_v49 = vld [vmem:[%s12904_s23 + $0x50] sm:$0xff]  }
  0xb2   : > { %v1720_v3 = vadd.f32 1.0, %v1656_v60  ;;  %v1530_v2 = vmul.f32 %v12167_v41, %v1370_v12  ;;  %v1276_v38 = vadd.f32 -0.28449672, %v1244_v37  ;;  %v1054_v50 = vadd.f32 1.0, %v1022_v33 }
  0xb3   : > { %v1751_v13 = vmul.f32 %v1719_v62, %v13154_v43  ;;  %v1561_v45 = vsub.f32 1.0, %v1529_v5  ;;  %vm1594_vm14 = vcmp.ge.f32.partialorder %v13129_v52, 0.0  ;;  %v1307_v21 = vmul.f32 %v13210_v54, %v1275_v63 }
  0xb4   : > { %v1752_v57 = vmul.f32 %v1720_v3, %v13178_v27  ;;  %v1562_v46 = vsub.f32 1.0, %v1530_v2  ;;  %v1308_v51 = vmul.f32 %v13213_v24, %v1276_v38  ;;  %12174 = vrcp.f32 %v1054_v50 }
  0xb5   : > { %v1625_v4 = vsub.f32 0.0, %v1561_v45  ;;  %v1689_v41 = vmul.f32 0.5, %v10163_v19  ;;  %v1339_v23 = vadd.f32 0.2548296, %v1307_v21  ;;  %v1437_v48 = vmul.f32 %v1405_v30, %v989_v7 }
  0xb6   : > { %v1778_v26 = vpack.c.bf16 %v1752_v57, %v1751_v13  ;;  %v1626_v43 = vsub.f32 0.0, %v1562_v46  ;;  %v1340_v6 = vadd.f32 0.2548296, %v1308_v51  ;;  %v1406_v22 = vsub.f32 0.0, %v13229_v29 }
  0xb7   : > { %v1657_v0 = vsel %vm1593_vm13, %v1561_v45, %v1625_v4  ;;  %v1690_v27 = vmul.f32 0.5, %v10164_v34  ;;  %v1371_v10 = vmul.f32 %v13210_v54, %v1339_v23  ;;  %v1485_v31 = vmul.f32 1.442695, %v1437_v48 }
  0xb8   : > { %11163 = vmatmul.mubr.msk.bf16.gmra.mrb[8].mxu0 %vm1804_vm4, %v1778_v26  ;;  %v1658_v19 = vsel %vm1594_vm14, %v1562_v46, %v1626_v43  ;;  %v1721_v7 = vadd.f32 1.0, %v1657_v0  ;;  %v1372_v16 = vmul.f32 %v13213_v24, %v1340_v6  ;;  %vm1595_vm15 = vcmp.ge.f32.partialorder %v13149_v25, 0.0 }
  0xb9   : > { %v1722_v47 = vadd.f32 1.0, %v1658_v19  ;;  %v1531_v28 = vmul.f32 %v13224_v58, %v1371_v10  ;;  %vm1596_vm0 = vcmp.ge.f32.partialorder %v13158_v15, 0.0  ;;  %v1438_v8 = vmul.f32 %v1406_v22, %v13229_v29 }
  0xba   : > { %v13267_v17 = vpop.eup %12172  ;;  %v1753_v34 = vmul.f32 %v1721_v7, %v1689_v41  ;;  %v1532_v54 = vmul.f32 %v12171_v56, %v1372_v16  ;;  %v10175_v52 = vunpack.c.l.bf16 %v13258_v36  ;;  %v10176_v9 = vunpack.c.h.bf16 %v13258_v36  ;;  %v13305_v41 = vld [vmem:[%s12904_s23 + $0x58] sm:$0xff]  }
  0xbb   : > { %v1754_v1 = vmul.f32 %v1722_v47, %v1690_v27  ;;  %v1563_v30 = vsub.f32 1.0, %v1531_v28  ;;  %v1117_v24 = vmul.f32 1.0614054, %v13267_v17  ;;  %v1691_v58 = vmul.f32 0.5, %v10167_v55 }
  0xbc   : > { %v1564_v40 = vsub.f32 1.0, %v1532_v54  ;;  %v13275_v44 = vmul.f32 0.70710677, %v10175_v52  ;;  %v13279_v29 = vmul.f32 0.70710677, %v10176_v9  ;;  %v1692_v11 = vmul.f32 0.5, %v10168_v14 }
  0xbd   : > { %v1779_v59 = vpack.c.bf16 %v1754_v1, %v1753_v34  ;;  %v1627_v32 = vsub.f32 0.0, %v1563_v30  ;;  %v1149_v53 = vadd.f32 -1.4531521, %v1117_v24  ;;  %v1487_v12 = vmul.f32 1.442695, %v1438_v8 }
  0xbe   : > { %v13284_v33 = vpop.eup %12174  ;;  %v1628_v56 = vsub.f32 0.0, %v1564_v40  ;;  %v991_v55 = vand.u32 2147483647, %v13275_v44  ;;  %v992_v5 = vand.u32 2147483647, %v13279_v29  ;;  %12176 = vpow2.f32 %v1485_v31 }
  0xbf   : > { %11166 = vmatprep.mubr.msk.bf16.mxu0 %vm1804_vm4, %v1779_v59  ;;  %v1659_v37 = vsel %vm1595_vm15, %v1563_v30, %v1627_v32  ;;  %v1118_v60 = vmul.f32 1.0614054, %v13284_v33  ;;  %v1181_v62 = vmul.f32 %v13267_v17, %v1149_v53  ;;  %v10179_v21 = vunpack.c.l.bf16 %v13282_v49 }
  0xc0   : > { %v1660_v63 = vsel %vm1596_vm0, %v1564_v40, %v1628_v56  ;;  %v1723_v3 = vadd.f32 1.0, %v1659_v37  ;;  %v1023_v61 = vmul.f32 0.3275911, %v991_v55  ;;  %v1407_v50 = vsub.f32 0.0, %v991_v55 }
  0xc1   : > { %v1724_v14 = vadd.f32 1.0, %v1660_v63  ;;  %v1150_v2 = vadd.f32 -1.4531521, %v1118_v60  ;;  %v1213_v38 = vadd.f32 1.4214138, %v1181_v62  ;;  %12178 = vpow2.f32 %v1487_v12 }
  0xc2   : > { %v1755_v13 = vmul.f32 %v1723_v3, %v1691_v58  ;;  %v1024_v25 = vmul.f32 0.3275911, %v992_v5  ;;  %v1055_v45 = vadd.f32 1.0, %v1023_v61  ;;  %v13302_v15 = vmul.f32 0.5, %v10171_v18 }
  0xc3   : > { %v1756_v57 = vmul.f32 %v1724_v14, %v1692_v11  ;;  %v1182_v46 = vmul.f32 %v13284_v33, %v1150_v2  ;;  %v1245_v51 = vmul.f32 %v13267_v17, %v1213_v38  ;;  %v1439_v43 = vmul.f32 %v1407_v50, %v991_v55 }
  0xc4   : > { %v1056_v4 = vadd.f32 1.0, %v1024_v25  ;;  %12180 = vrcp.f32 %v1055_v45  ;;  %v1408_v6 = vsub.f32 0.0, %v992_v5  ;;  %v10180_v22 = vunpack.c.h.bf16 %v13282_v49 }
  0xc5   : > { %v1780_v23 = vpack.c.bf16 %v1756_v57, %v1755_v13  ;;  %v1214_v48 = vadd.f32 1.4214138, %v1182_v46  ;;  %v1277_v26 = vadd.f32 -0.28449672, %v1245_v51  ;;  %v13310_v0 = vmul.f32 0.70710677, %v10179_v21 }
  0xc6   : > { %12182 = vrcp.f32 %v1056_v4  ;;  %v10183_v10 = vunpack.c.l.bf16 %v13305_v41  ;;  %vm1597_vm1 = vcmp.ge.f32.partialorder %v13196_v39, 0.0  ;;  %v13319_v31 = vmul.f32 0.5, %v10172_v35 }
  0xc7   : > { %11167 = vmatmul.mubr.msk.bf16.gmra.mrb[12].mxu0 %vm1804_vm4, %v1780_v23  ;;  %v1246_v18 = vmul.f32 %v13284_v33, %v1214_v48  ;;  %v1309_v27 = vmul.f32 %v13267_v17, %v1277_v26  ;;  %v13321_v19 = vmul.f32 0.5, %v10175_v52  ;;  %v13325_v7 = vmul.f32 0.70710677, %v10180_v22 }
  0xc8   : > { %v993_v16 = vand.u32 2147483647, %v13310_v0  ;;  %v1489_v34 = vmul.f32 1.442695, %v1439_v43  ;;  %v10184_v54 = vunpack.c.h.bf16 %v13305_v41  ;;  %v12177_v8 = vpop.eup %12176  ;;  %v1440_v1 = vmul.f32 %v1408_v6, %v992_v5 }
  0xc9   : > { %v1278_v47 = vadd.f32 -0.28449672, %v1246_v18  ;;  %v1341_v28 = vadd.f32 0.2548296, %v1309_v27  ;;  %v994_v30 = vand.u32 2147483647, %v13325_v7 }
  0xca   : > { %v1025_v20 = vmul.f32 0.3275911, %v993_v16  ;;  %v1409_v35 = vsub.f32 0.0, %v993_v16  ;;  %v13334_v40 = vmul.f32 0.70710677, %v10183_v10  ;;  %vm1598_vm2 = vcmp.ge.f32.partialorder %v13204_v42, 0.0 }
  0xcb   : > { %v1310_v52 = vmul.f32 %v13284_v33, %v1278_v47  ;;  %v1373_v24 = vmul.f32 %v13267_v17, %v1341_v28  ;;  %v13338_v58 = vmul.f32 0.70710677, %v10184_v54  ;;  %v1026_v59 = vmul.f32 0.3275911, %v994_v30  ;;  %v12179_v11 = vpop.eup %12178 }
  0xcc   : > { %v1057_v32 = vadd.f32 1.0, %v1025_v20  ;;  %v1410_v53 = vsub.f32 0.0, %v994_v30  ;;  %v1441_v56 = vmul.f32 %v1409_v35, %v993_v16  ;;  %v995_v37 = vand.u32 2147483647, %v13334_v40 }
  0xcd   : > { %v1342_v12 = vadd.f32 0.2548296, %v1310_v52  ;;  %v1533_v55 = vmul.f32 %v12177_v8, %v1373_v24  ;;  %v996_v17 = vand.u32 2147483647, %v13338_v58  ;;  %v1491_v62 = vmul.f32 1.442695, %v1440_v1 }
  0xce   : > { %v13343_v60 = vpop.eup %12180  ;;  %v1058_v5 = vadd.f32 1.0, %v1026_v59  ;;  %12184 = vrcp.f32 %v1057_v32  ;;  %v1442_v63 = vmul.f32 %v1410_v53, %v994_v30  ;;  %v1027_v2 = vmul.f32 0.3275911, %v995_v37  ;;  %v13370_v52 = vld [vmem:[%s12904_s23 + $0x60] sm:$0xff]  }
  0xcf   : > { %v1374_v3 = vmul.f32 %v13284_v33, %v1342_v12  ;;  %v1565_v61 = vsub.f32 1.0, %v1533_v55  ;;  %v1119_v14 = vmul.f32 1.0614054, %v13343_v60  ;;  %v1493_v50 = vmul.f32 1.442695, %v1441_v56 }
  0xd0   : > { %v13347_v38 = vpop.eup %12182  ;;  %12186 = vrcp.f32 %v1058_v5  ;;  %v1495_v13 = vmul.f32 1.442695, %v1442_v63  ;;  %v1028_v25 = vmul.f32 0.3275911, %v996_v17  ;;  %v1059_v4 = vadd.f32 1.0, %v1027_v2 }
  0xd1   : > { %v1534_v45 = vmul.f32 %v12179_v11, %v1374_v3  ;;  %v1629_v57 = vsub.f32 0.0, %v1565_v61  ;;  %v1120_v46 = vmul.f32 1.0614054, %v13347_v38  ;;  %v1151_v51 = vadd.f32 -1.4531521, %v1119_v14 }
  0xd2   : > { %12188 = vpow2.f32 %v1489_v34  ;;  %v1060_v23 = vadd.f32 1.0, %v1028_v25  ;;  %v1411_v48 = vsub.f32 0.0, %v995_v37  ;;  %v1412_v27 = vsub.f32 0.0, %v996_v17 }
  0xd3   : > { %v1566_v33 = vsub.f32 1.0, %v1534_v45  ;;  %v1661_v26 = vsel %vm1597_vm1, %v1565_v61, %v1629_v57  ;;  %v1152_v43 = vadd.f32 -1.4531521, %v1120_v46  ;;  %v1183_v6 = vmul.f32 %v13343_v60, %v1151_v51 }
  0xd4   : > { %v1725_v18 = vadd.f32 1.0, %v1661_v26  ;;  %12190 = vpow2.f32 %v1491_v62  ;;  %v13356_v34 = vmul.f32 0.5, %v10176_v9  ;;  %v13360_v39 = vmul.f32 0.5, %v10179_v21 }
  0xd5   : > { %v1630_v16 = vsub.f32 0.0, %v1566_v33  ;;  %v1184_v47 = vmul.f32 %v13347_v38, %v1152_v43  ;;  %v1215_v28 = vadd.f32 1.4214138, %v1183_v6  ;;  %12192 = vrcp.f32 %v1059_v4 }
  0xd6   : > { %12194 = vrcp.f32 %v1060_v23  ;;  %v1443_v8 = vmul.f32 %v1411_v48, %v995_v37  ;;  %v13367_v35 = vmul.f32 0.5, %v10180_v22  ;;  %v1757_v21 = vmul.f32 %v1725_v18, %v13302_v15 }
  0xd7   : > { %v1662_v1 = vsel %vm1598_vm2, %v1566_v33, %v1630_v16  ;;  %v1216_v30 = vadd.f32 1.4214138, %v1184_v47  ;;  %v1247_v20 = vmul.f32 %v13343_v60, %v1215_v28  ;;  %12196 = vpow2.f32 %v1493_v50 }
  0xd8   : > { %v13372_v36 = vpop.eup %12184  ;;  %v1726_v9 = vadd.f32 1.0, %v1662_v1  ;;  %v1444_v24 = vmul.f32 %v1412_v27, %v996_v17  ;;  %12198 = vpow2.f32 %v1495_v13  ;;  %v1497_v22 = vmul.f32 1.442695, %v1443_v8 }
  0xd9   : > { %v1248_v59 = vmul.f32 %v13347_v38, %v1216_v30  ;;  %v1279_v42 = vadd.f32 -0.28449672, %v1247_v20  ;;  %v1121_v32 = vmul.f32 1.0614054, %v13372_v36  ;;  %v10187_v56 = vunpack.c.l.bf16 %v13370_v52 }
  0xda   : > { %v13377_v53 = vpop.eup %12186  ;;  %v1758_v49 = vmul.f32 %v1726_v9, %v13319_v31  ;;  %v10188_v11 = vunpack.c.h.bf16 %v13370_v52  ;;  %vm1599_vm3 = vcmp.ge.f32.partialorder %v13275_v44, 0.0  ;;  %v1499_v5 = vmul.f32 1.442695, %v1444_v24 }
  0xdb   : > { %v1280_v12 = vadd.f32 -0.28449672, %v1248_v59  ;;  %v1311_v15 = vmul.f32 %v13343_v60, %v1279_v42  ;;  %v1122_v55 = vmul.f32 1.0614054, %v13377_v53  ;;  %v1153_v37 = vadd.f32 -1.4531521, %v1121_v32 }
  0xdc   : > { %v12189_v17 = vpop.eup %12188  ;;  %v1781_v62 = vpack.c.bf16 %v1758_v49, %v1757_v21  ;;  %v13387_v63 = vmul.f32 0.70710677, %v10187_v56  ;;  %v13391_v31 = vmul.f32 0.70710677, %v10188_v11  ;;  %vm1600_vm5 = vcmp.ge.f32.partialorder %v13279_v29, 0.0 }
  0xdd   : > { %v1312_v3 = vmul.f32 %v13347_v38, %v1280_v12  ;;  %v1343_v61 = vadd.f32 0.2548296, %v1311_v15  ;;  %v1154_v14 = vadd.f32 -1.4531521, %v1122_v55  ;;  %v1185_v2 = vmul.f32 %v13372_v36, %v1153_v37 }
  0xde   : > { %v12191_v50 = vpop.eup %12190  ;;  %11170 = vmatprep.mubr.msk.bf16.mxu0 %vm1804_vm4, %v1781_v62  ;;  %12200 = vpow2.f32 %v1497_v22  ;;  %v13399_v13 = vmul.f32 0.5, %v10183_v10  ;;  %v997_v25 = vand.u32 2147483647, %v13387_v63  ;;  %v998_v45 = vand.u32 2147483647, %v13391_v31 }
  0xdf   : > { %v13403_v57 = vpop.eup %12192  ;;  %v1344_v46 = vadd.f32 0.2548296, %v1312_v3  ;;  %v1375_v51 = vmul.f32 %v13343_v60, %v1343_v61  ;;  %v1186_v4 = vmul.f32 %v13377_v53, %v1154_v14  ;;  %v1217_v23 = vadd.f32 1.4214138, %v1185_v2 }
  0xe0   : > { %v13407_v48 = vpop.eup %12194  ;;  %v1123_v33 = vmul.f32 1.0614054, %v13403_v57  ;;  %12202 = vpow2.f32 %v1499_v5  ;;  %v1029_v26 = vmul.f32 0.3275911, %v997_v25  ;;  %v1030_v10 = vmul.f32 0.3275911, %v998_v45 }
  0xe1   : > { %v1376_v43 = vmul.f32 %v13347_v38, %v1344_v46  ;;  %v1535_v6 = vmul.f32 %v12189_v17, %v1375_v51  ;;  %v1218_v18 = vadd.f32 1.4214138, %v1186_v4  ;;  %v1249_v27 = vmul.f32 %v13372_v36, %v1217_v23  ;;  %v12197_v16 = vpop.eup %12196  ;;  %v13424_v46 = vld [vmem:[%s12904_s23 + $0x68] sm:$0xff]  }
  0xe2   : > { %v1124_v47 = vmul.f32 1.0614054, %v13407_v48  ;;  %v1155_v60 = vadd.f32 -1.4531521, %v1123_v33  ;;  %v1061_v28 = vadd.f32 1.0, %v1029_v26  ;;  %v1062_v8 = vadd.f32 1.0, %v1030_v10  ;;  %v12199_v1 = vpop.eup %12198 }
  0xe3   : > { %v1536_v30 = vmul.f32 %v12191_v50, %v1376_v43  ;;  %v1567_v20 = vsub.f32 1.0, %v1535_v6  ;;  %v1250_v9 = vmul.f32 %v13377_v53, %v1218_v18  ;;  %v1281_v21 = vadd.f32 -0.28449672, %v1249_v27 }
  0xe4   : > { %v1156_v24 = vadd.f32 -1.4531521, %v1124_v47  ;;  %v1187_v59 = vmul.f32 %v13403_v57, %v1155_v60  ;;  %12204 = vrcp.f32 %v1061_v28  ;;  %v1413_v38 = vsub.f32 0.0, %v997_v25 }
  0xe5   : > { %v1568_v42 = vsub.f32 1.0, %v1536_v30  ;;  %v1631_v32 = vsub.f32 0.0, %v1567_v20  ;;  %v1282_v49 = vadd.f32 -0.28449672, %v1250_v9  ;;  %v1313_v22 = vmul.f32 %v13372_v36, %v1281_v21 }
  0xe6   : > { %vm1601_vm6 = vcmp.ge.f32.partialorder %v13310_v0, 0.0  ;;  %v1188_v12 = vmul.f32 %v13407_v48, %v1156_v24  ;;  %v1219_v15 = vadd.f32 1.4214138, %v1187_v59  ;;  %12206 = vrcp.f32 %v1062_v8 }
  0xe7   : > { %v1414_v55 = vsub.f32 0.0, %v998_v45  ;;  %v1632_v37 = vsub.f32 0.0, %v1568_v42  ;;  %v1663_v17 = vsel %vm1599_vm3, %v1567_v20, %v1631_v32  ;;  %v1314_v62 = vmul.f32 %v13377_v53, %v1282_v49 }
  0xe8   : > { %v1345_v5 = vadd.f32 0.2548296, %v1313_v22  ;;  %v12201_v3 = vpop.eup %12200  ;;  %v1727_v61 = vadd.f32 1.0, %v1663_v17  ;;  %vm1602_vm7 = vcmp.ge.f32.partialorder %v13325_v7, 0.0  ;;  %v1220_v14 = vadd.f32 1.4214138, %v1188_v12 }
  0xe9   : > { %v1251_v2 = vmul.f32 %v13403_v57, %v1219_v15  ;;  %v1445_v50 = vmul.f32 %v1413_v38, %v997_v25  ;;  %v1664_v51 = vsel %vm1600_vm5, %v1568_v42, %v1632_v37  ;;  %v1346_v4 = vadd.f32 0.2548296, %v1314_v62 }
  0xea   : > { %v1377_v44 = vmul.f32 %v13372_v36, %v1345_v5  ;;  %v1446_v23 = vmul.f32 %v1414_v55, %v998_v45  ;;  %v12203_v33 = vpop.eup %12202  ;;  %v1728_v26 = vadd.f32 1.0, %v1664_v51  ;;  %v1759_v10 = vmul.f32 %v1727_v61, %v13321_v19 }
  0xeb   : > { %v1252_v43 = vmul.f32 %v13407_v48, %v1220_v14  ;;  %v1283_v6 = vadd.f32 -0.28449672, %v1251_v2  ;;  %v1378_v18 = vmul.f32 %v13377_v53, %v1346_v4  ;;  %v1501_v25 = vmul.f32 1.442695, %v1445_v50 }
  0xec   : > { %v1537_v27 = vmul.f32 %v12197_v16, %v1377_v44  ;;  %v10191_v47 = vunpack.c.l.bf16 %v13424_v46  ;;  %v1760_v29 = vmul.f32 %v1728_v26, %v13356_v34  ;;  %v1503_v36 = vmul.f32 1.442695, %v1446_v23 }
  0xed   : > { %v1284_v60 = vadd.f32 -0.28449672, %v1252_v43  ;;  %v1315_v28 = vmul.f32 %v13403_v57, %v1283_v6  ;;  %v1538_v45 = vmul.f32 %v12199_v1, %v1378_v18  ;;  %vm1603_vm8 = vcmp.ge.f32.partialorder %v13334_v40, 0.0 }
  0xee   : > { %v1569_v8 = vsub.f32 1.0, %v1537_v27  ;;  %v13438_v19 = vmul.f32 0.5, %v10184_v54  ;;  %v10192_v53 = vunpack.c.h.bf16 %v13424_v46  ;;  %v13441_v16 = vpop.eup %12204  ;;  %v1782_v30 = vpack.c.bf16 %v1760_v29, %v1759_v10  ;;  %v853_v46 = vld [vmem:[#allocation2 + $0x18] sm:$0x1] }
  0xef   : > { %v1316_v20 = vmul.f32 %v13407_v48, %v1284_v60  ;;  %v1347_v34 = vadd.f32 0.2548296, %v1315_v28  ;;  %12208 = vpow2.f32 %v1501_v25  ;;  %v1570_v9 = vsub.f32 1.0, %v1538_v45  ;;  %v13475_v28 = vld [vmem:[%s12904_s23 + $0x70] sm:$0xff]  }
  0xf0   : > { %v1633_v21 = vsub.f32 0.0, %v1569_v8  ;;  %vm1604_vm9 = vcmp.ge.f32.partialorder %v13338_v58, 0.0  ;;  %v1125_v1 = vmul.f32 1.0614054, %v13441_v16  ;;  %v13448_v41 = vmul.f32 0.70710677, %v10191_v47  ;;  %v13450_v54 = vpop.eup %12206  ;;  %11171 = vmatmul.mubr.msk.bf16.gmra.mrb[16].mxu0 %vm1804_vm4, %v1782_v30 }
  0xf1   : > { %v1348_v24 = vadd.f32 0.2548296, %v1316_v20  ;;  %v1379_v59 = vmul.f32 %v13403_v57, %v1347_v34  ;;  %12210 = vpow2.f32 %v1503_v36  ;;  %v13456_v38 = vmul.f32 0.70710677, %v10192_v53  ;;  %v13483_v34 = vld [vmem:[%s12904_s23 + $0x78] sm:$0xff]  }
  0xf2   : > { %v1634_v42 = vsub.f32 0.0, %v1570_v9  ;;  %v1665_v32 = vsel %vm1601_vm6, %v1569_v8, %v1633_v21  ;;  %v1126_v49 = vmul.f32 1.0614054, %v13450_v54  ;;  %v1157_v22 = vadd.f32 -1.4531521, %v1125_v1 }
  0xf3   : > { %v1729_v12 = vadd.f32 1.0, %v1665_v32  ;;  %v1380_v15 = vmul.f32 %v13407_v48, %v1348_v24  ;;  %v1539_v55 = vmul.f32 %v12201_v3, %v1379_v59  ;;  %v999_v37 = vand.u32 2147483647, %v13448_v41 }
  0xf4   : > { %v1666_v57 = vsel %vm1602_vm7, %v1570_v9, %v1634_v42  ;;  %v1158_v17 = vadd.f32 -1.4531521, %v1126_v49  ;;  %v1189_v62 = vmul.f32 %v13441_v16, %v1157_v22  ;;  %v1000_v5 = vand.u32 2147483647, %v13456_v38 }
  0xf5   : > { %v1730_v61 = vadd.f32 1.0, %v1666_v57  ;;  %v1761_v0 = vmul.f32 %v1729_v12, %v13360_v39  ;;  %v1540_v14 = vmul.f32 %v12203_v33, %v1380_v15  ;;  %v1571_v2 = vsub.f32 1.0, %v1539_v55 }
  0xf6   : > { %v1190_v50 = vmul.f32 %v13450_v54, %v1158_v17  ;;  %v1221_v51 = vadd.f32 1.4214138, %v1189_v62  ;;  %v1031_v48 = vmul.f32 0.3275911, %v999_v37  ;;  %v1032_v3 = vmul.f32 0.3275911, %v1000_v5 }
  0xf7   : > { %v1762_v4 = vmul.f32 %v1730_v61, %v13367_v35  ;;  %v1572_v44 = vsub.f32 1.0, %v1540_v14  ;;  %v1635_v7 = vsub.f32 0.0, %v1571_v2  ;;  %v1415_v23 = vsub.f32 0.0, %v999_v37 }
  0xf8   : > { %v1222_v26 = vadd.f32 1.4214138, %v1190_v50  ;;  %v1253_v10 = vmul.f32 %v13441_v16, %v1221_v51  ;;  %v1063_v43 = vadd.f32 1.0, %v1031_v48  ;;  %v1064_v6 = vadd.f32 1.0, %v1032_v3 }
  0xf9   : > { %v12209_v18 = vpop.eup %12208  ;;  %v1783_v39 = vpack.c.bf16 %v1762_v4, %v1761_v0  ;;  %v1636_v33 = vsub.f32 0.0, %v1572_v44  ;;  %v1667_v27 = vsel %vm1603_vm8, %v1571_v2, %v1635_v7  ;;  %v1416_v25 = vsub.f32 0.0, %v1000_v5 }
  0xfa   : > { %v1731_v29 = vadd.f32 1.0, %v1667_v27  ;;  %v1254_v35 = vmul.f32 %v13450_v54, %v1222_v26  ;;  %v1285_v60 = vadd.f32 -0.28449672, %v1253_v10  ;;  %12212 = vrcp.f32 %v1063_v43 }
  0xfb   : > { %v12211_v36 = vpop.eup %12210  ;;  %11174 = vmatprep.mubr.msk.bf16.mxu0 %vm1804_vm4, %v1783_v39  ;;  %v1668_v45 = vsel %vm1604_vm9, %v1572_v44, %v1636_v33  ;;  %12214 = vrcp.f32 %v1064_v6  ;;  %v1447_v24 = vmul.f32 %v1415_v23, %v999_v37  ;;  %v10195_v59 = vunpack.c.l.bf16 %v13475_v28 }
  0xfc   : > { %v1732_v8 = vadd.f32 1.0, %v1668_v45  ;;  %v1763_v40 = vmul.f32 %v1731_v29, %v13399_v13  ;;  %v1286_v30 = vadd.f32 -0.28449672, %v1254_v35  ;;  %v1317_v20 = vmul.f32 %v13441_v16, %v1285_v60 }
  0xfd   : > { %v10196_v58 = vunpack.c.h.bf16 %v13475_v28  ;;  %v10199_v42 = vunpack.c.l.bf16 %v13483_v34  ;;  %v1448_v22 = vmul.f32 %v1416_v25, %v1000_v5  ;;  %vm1605_vm10 = vcmp.ge.f32.partialorder %v13387_v63, 0.0 }
  0xfe   : > { %v1764_v9 = vmul.f32 %v1732_v8, %v13438_v19  ;;  %v1318_v21 = vmul.f32 %v13450_v54, %v1286_v30  ;;  %v1349_v1 = vadd.f32 0.2548296, %v1317_v20  ;;  %v1701_v19 = vmul.f32 0.5, %v10187_v56 }
  0xff   : > { %v13496_v12 = vmul.f32 0.70710677, %v10195_v59  ;;  %v13500_v15 = vmul.f32 0.70710677, %v10196_v58  ;;  %vm1606_vm11 = vcmp.ge.f32.partialorder %v13391_v31, 0.0  ;;  %v1702_v39 = vmul.f32 0.5, %v10188_v11 }
 0x100   : > { %v1784_v32 = vpack.c.bf16 %v1764_v9, %v1763_v40  ;;  %v1350_v49 = vadd.f32 0.2548296, %v1318_v21  ;;  %v1381_v13 = vmul.f32 %v13441_v16, %v1349_v1  ;;  %v10200_v16 = vunpack.c.h.bf16 %v13483_v34  ;;  %v13621_v34 = vld [vmem:[%s18273_s2] ss:$0 sm:$0xff] }
 0x101   : > { %v1001_v57 = vand.u32 2147483647, %v13496_v12  ;;  %v1002_v56 = vand.u32 2147483647, %v13500_v15  ;;  %v13510_v17 = vmul.f32 0.70710677, %v10199_v42 }
 0x102   : > { %11175 = vmatmul.mubr.msk.bf16.gmra.mrb[20].mxu0 %vm1804_vm4, %v1784_v32  ;;  %v1382_v55 = vmul.f32 %v13450_v54, %v1350_v49  ;;  %v1541_v37 = vmul.f32 %v12209_v18, %v1381_v13  ;;  %v1505_v0 = vmul.f32 1.442695, %v1447_v24  ;;  %v1507_v14 = vmul.f32 1.442695, %v1448_v22 }
 0x103   : > { %v1033_v50 = vmul.f32 0.3275911, %v1001_v57  ;;  %v1034_v51 = vmul.f32 0.3275911, %v1002_v56  ;;  %v13520_v44 = vmul.f32 0.70710677, %v10200_v16 }
 0x104   : > { %v13512_v62 = vpop.eup %12212  ;;  %v1542_v5 = vmul.f32 %v12211_v36, %v1382_v55  ;;  %v1573_v61 = vsub.f32 1.0, %v1541_v37  ;;  %v1003_v10 = vand.u32 2147483647, %v13510_v17  ;;  %12216 = vpow2.f32 %v1505_v0 }
 0x105   : > { %v13514_v54 = vpop.eup %12214  ;;  %v1127_v2 = vmul.f32 1.0614054, %v13512_v62  ;;  %v1065_v23 = vadd.f32 1.0, %v1033_v50  ;;  %v1066_v26 = vadd.f32 1.0, %v1034_v51  ;;  %v1004_v45 = vand.u32 2147483647, %v13520_v44 }
 0x106   : > { %v1574_v48 = vsub.f32 1.0, %v1542_v5  ;;  %v1637_v3 = vsub.f32 0.0, %v1573_v61  ;;  %v1128_v4 = vmul.f32 1.0614054, %v13514_v54  ;;  %v1035_v8 = vmul.f32 0.3275911, %v1003_v10 }
 0x107   : > { %v1159_v7 = vadd.f32 -1.4531521, %v1127_v2  ;;  %12218 = vrcp.f32 %v1065_v23  ;;  %v1417_v40 = vsub.f32 0.0, %v1001_v57  ;;  %v1418_v20 = vsub.f32 0.0, %v1002_v56 }
 0x108   : > { %v1638_v43 = vsub.f32 0.0, %v1574_v48  ;;  %v1669_v6 = vsel %vm1605_vm10, %v1573_v61, %v1637_v3  ;;  %v1160_v18 = vadd.f32 -1.4531521, %v1128_v4  ;;  %12220 = vrcp.f32 %v1066_v26 }
 0x109   : > { %v1733_v33 = vadd.f32 1.0, %v1669_v6  ;;  %v1191_v27 = vmul.f32 %v13512_v62, %v1159_v7  ;;  %12222 = vpow2.f32 %v1507_v14  ;;  %v1036_v31 = vmul.f32 0.3275911, %v1004_v45 }
 0x10a   : > { %v1670_v25 = vsel %vm1606_vm11, %v1574_v48, %v1638_v43  ;;  %v1192_v29 = vmul.f32 %v13514_v54, %v1160_v18  ;;  %v1067_v9 = vadd.f32 1.0, %v1035_v8  ;;  %v1449_v13 = vmul.f32 %v1417_v40, %v1001_v57 }
 0x10b   : > { %v1734_v35 = vadd.f32 1.0, %v1670_v25  ;;  %v1765_v60 = vmul.f32 %v1733_v33, %v1701_v19  ;;  %v1223_v36 = vadd.f32 1.4214138, %v1191_v27  ;;  %v1068_v32 = vadd.f32 1.0, %v1036_v31 }
 0x10c   : > { %v1224_v63 = vadd.f32 1.4214138, %v1192_v29  ;;  %12224 = vrcp.f32 %v1067_v9  ;;  %v1419_v22 = vsub.f32 0.0, %v1003_v10  ;;  %v1450_v37 = vmul.f32 %v1418_v20, %v1002_v56 }
 0x10d   : > { %v1766_v52 = vmul.f32 %v1734_v35, %v1702_v39  ;;  %v1255_v11 = vmul.f32 %v13512_v62, %v1223_v36  ;;  %12226 = vrcp.f32 %v1068_v32  ;;  %v1420_v5 = vsub.f32 0.0, %v1004_v45 }
 0x10e   : > { %v1256_v30 = vmul.f32 %v13514_v54, %v1224_v63  ;;  %v12217_v19 = vpop.eup %12216  ;;  %v12760_v51 = vmov 0   ;;  %v1509_v3 = vmul.f32 1.442695, %v1449_v13  ;;  %v1451_v4 = vmul.f32 %v1419_v22, %v1003_v10  ;;  %v856_v13 = vld [vmem:[#allocation2 + $0x20] sm:$0x1] }
 0x10f   : > { %v1785_v21 = vpack.c.bf16 %v1766_v52, %v1765_v60  ;;  %v1287_v1 = vadd.f32 -0.28449672, %v1255_v11  ;;  %847 = vst [vmem:[#allocation2] sm:$0xff] %v12760_v51  ;;  %849 = vst [vmem:[#allocation2 + $0x10] sm:$0xff] %v12760_v51  ;;  %3902 = vmatprep.mubr.bf16.mxu1 %v12760_v51  ;;  %v1511_v26 = vmul.f32 1.442695, %v1450_v37  ;;  %v1452_v43 = vmul.f32 %v1420_v5, %v1004_v45 }
 0x110   : > { %v1288_v24 = vadd.f32 -0.28449672, %v1256_v30  ;;  %874 = vst [vmem:[#allocation2 + $0x198] sm:$0xff] %v12760_v51  ;;  %v1703_v18 = vmul.f32 0.5, %v10191_v47  ;;  %vm1607_vm12 = vcmp.ge.f32.partialorder %v13448_v41, 0.0  ;;  %vm1608_vm13 = vcmp.ge.f32.partialorder %v13456_v38, 0.0 }
 0x111   : > { %11178 = vmatprep.mubr.msk.bf16.mxu0 %vm1804_vm4, %v1785_v21  ;;  %v1319_v49 = vmul.f32 %v13512_v62, %v1287_v1  ;;  %v13537_v61 = vpop.eup %12218  ;;  %12228 = vpow2.f32 %v1509_v3  ;;  %v1515_v60 = vmul.f32 1.442695, %v1452_v43  ;;  %v1704_v36 = vmul.f32 0.5, %v10192_v53 }
 0x112   : > { %v1320_v55 = vmul.f32 %v13514_v54, %v1288_v24  ;;  %v13539_v14 = vpop.eup %12220  ;;  %v1129_v50 = vmul.f32 1.0614054, %v13537_v61  ;;  %12230 = vpow2.f32 %v1511_v26  ;;  %vm850_vm14 = vcmask 1040384  }
 0x113   : > { %v1351_v0 = vadd.f32 0.2548296, %v1319_v49  ;;  %v12223_v57 = vpop.eup %12222  ;;  %v1130_v48 = vmul.f32 1.0614054, %v13539_v14  ;;  %vm18285_vm15 = vsmask.f32 256 }
 0x114   : > { %v1352_v2 = vadd.f32 0.2548296, %v1320_v55  ;;  %v1161_v23 = vadd.f32 -1.4531521, %v1129_v50  ;;  %vm13571_vm0 = vmand %vm850_vm14, %vm18285_vm15  ;;  %v18363_v41 = vmov 0  ;;  %vm862_vm1 = vcmask 1047559  }
 0x115   : > { %v1383_v56 = vmul.f32 %v13512_v62, %v1351_v0  ;;  %v1162_v39 = vadd.f32 -1.4531521, %v1130_v48  ;;  %v18364_v41 = vsel %vm13571_vm0, 4294967295, %v18363_v41  ;;  %v859_v55 = vld [vmem:[#allocation2 + $0x28] sm:$0x1]  ;;  %v854_v50 = vsel %vm13571_vm0, 0, %v853_v46 }
 0x116   : > { %v1384_v7 = vmul.f32 %v13514_v54, %v1352_v2  ;;  %v1193_v62 = vmul.f32 %v13537_v61, %v1161_v23  ;;  %v1513_v54 = vmul.f32 1.442695, %v1451_v4  ;;  %v13555_v25 = vpop.eup %12224  ;;  %18365 = vst [vmem:[#allocation9_spill] sm:$0xff] %v18364_v41  ;;  %855 = vst [vmem:[#allocation2 + $0x18] sm:$0x1] %v854_v50  ;;  %v857_v26 = vsel %vm13571_vm0, 0, %v856_v13 }
 0x117   : > { %v1543_v6 = vmul.f32 %v12217_v19, %v1383_v56  ;;  %v1194_v10 = vmul.f32 %v13539_v14, %v1162_v39  ;;  %v1131_v45 = vmul.f32 1.0614054, %v13555_v25  ;;  %v13560_v8 = vpop.eup %12226  ;;  %v860_v43 = vsel %vm13571_vm0, 0, %v859_v55  ;;  %858 = vst [vmem:[#allocation2 + $0x20] sm:$0x1] %v857_v26  ;;  %v12027_v41 = vld [vmem:[#allocation3 + $0x238] sm:$0xff]  }
 0x118   : > { %v1544_v33 = vmul.f32 %v12223_v57, %v1384_v7  ;;  %v1225_v35 = vadd.f32 1.4214138, %v1193_v62  ;;  %v1132_v20 = vmul.f32 1.0614054, %v13560_v8  ;;  %12232 = vpow2.f32 %v1513_v54  ;;  %861 = vst [vmem:[#allocation2 + $0x28] sm:$0x1] %v860_v43 }
 0x119   : > { %v1575_v27 = vsub.f32 1.0, %v1543_v6  ;;  %v1226_v63 = vadd.f32 1.4214138, %v1194_v10  ;;  %v1163_v31 = vadd.f32 -1.4531521, %v1131_v45  ;;  %12234 = vpow2.f32 %v1515_v60 }
 0x11a   : > { %v1576_v29 = vsub.f32 1.0, %v1544_v33  ;;  %v1257_v11 = vmul.f32 %v13537_v61, %v1225_v35  ;;  %v1164_v32 = vadd.f32 -1.4531521, %v1132_v20  ;;  %v871_v6 = vld [vmem:[#allocation2 + $0x190] sm:$0x80]  ;;  %vm1609_vm5 = vcmp.ge.f32.partialorder %v13496_v12, 0.0 }
 0x11b   : > { %v1639_v47 = vsub.f32 0.0, %v1575_v27  ;;  %v1258_v30 = vmul.f32 %v13539_v14, %v1226_v63  ;;  %v1195_v49 = vmul.f32 %v13555_v25, %v1163_v31  ;;  %v12229_v57 = vpop.eup %12228  ;;  %vm863_vm2 = vsmask.f32 7966 }
 0x11c   : > { %v1640_v52 = vsub.f32 0.0, %v1576_v29  ;;  %v1289_v21 = vadd.f32 -0.28449672, %v1257_v11  ;;  %v1196_v5 = vmul.f32 %v13560_v8, %v1164_v32  ;;  %v12231_v7 = vpop.eup %12230  ;;  %vm13590_vm3 = vmand %vm862_vm1, %vm863_vm2  ;;  %vm1610_vm6 = vcmp.ge.f32.partialorder %v13500_v15, 0.0 }
 0x11d   : > { %v1671_v40 = vsel %vm1607_vm12, %v1575_v27, %v1639_v47  ;;  %v1290_v24 = vadd.f32 -0.28449672, %v1258_v30  ;;  %v1227_v0 = vadd.f32 1.4214138, %v1195_v49  ;;  %v1706_v12 = vmul.f32 0.5, %v10196_v58 }
 0x11e   : > { %v1672_v53 = vsel %vm1608_vm13, %v1576_v29, %v1640_v52  ;;  %v1735_v9 = vadd.f32 1.0, %v1671_v40  ;;  %v1321_v19 = vmul.f32 %v13537_v61, %v1289_v21  ;;  %v1228_v3 = vadd.f32 1.4214138, %v1196_v5 }
 0x11f   : > { %v1736_v1 = vadd.f32 1.0, %v1672_v53  ;;  %v1322_v37 = vmul.f32 %v13539_v14, %v1290_v24  ;;  %v1259_v4 = vmul.f32 %v13555_v25, %v1227_v0  ;;  %v1705_v52 = vmul.f32 0.5, %v10195_v59 }
 0x120   : > { %v1767_v22 = vmul.f32 %v1735_v9, %v1703_v18  ;;  %v1353_v2 = vadd.f32 0.2548296, %v1321_v19  ;;  %v1260_v39 = vmul.f32 %v13560_v8, %v1228_v3  ;;  %vm1611_vm7 = vcmp.ge.f32.partialorder %v13510_v17, 0.0 }
 0x121   : > { %v1768_v38 = vmul.f32 %v1736_v1, %v1704_v36  ;;  %v1354_v48 = vadd.f32 0.2548296, %v1322_v37  ;;  %v1291_v33 = vadd.f32 -0.28449672, %v1259_v4  ;;  %vm1612_vm8 = vcmp.ge.f32.partialorder %v13520_v44, 0.0 }
 0x122   : > { %v1385_v23 = vmul.f32 %v13537_v61, %v1353_v2  ;;  %v1292_v27 = vadd.f32 -0.28449672, %v1260_v39  ;;  %v12233_v36 = vpop.eup %12232  ;;  %v1707_v28 = vmul.f32 0.5, %v10199_v42  ;;  %v366_v19 = vlaneseq }
 0x123   : > { %v1786_v56 = vpack.c.bf16 %v1768_v38, %v1767_v22  ;;  %v1386_v18 = vmul.f32 %v13539_v14, %v1354_v48  ;;  %v1323_v10 = vmul.f32 %v13555_v25, %v1291_v33  ;;  %v872_v14 = vsel %vm13590_vm3, 0, %v871_v6  ;;  %v12235_v30 = vpop.eup %12234 }
 0x124   : > { %v1545_v62 = vmul.f32 %v12229_v57, %v1385_v23  ;;  %v1324_v60 = vmul.f32 %v13560_v8, %v1292_v27  ;;  %873 = vst [vmem:[#allocation2 + $0x190] sm:$0x80] %v872_v14  ;;  %v13612_v5 = vshrl.u32 %v366_v19, 7 }
 0x125   : > { %11179 = vmatmul.mubr.msk.bf16.gmra.mrb[24].mxu0 %vm1804_vm4, %v1786_v56  ;;  %v1546_v61 = vmul.f32 %v12231_v7, %v1386_v18  ;;  %v1355_v47 = vadd.f32 0.2548296, %v1323_v10 }
 0x126   : > { %v1577_v29 = vsub.f32 1.0, %v1545_v62  ;;  %v1356_v11 = vadd.f32 0.2548296, %v1324_v60  ;;  %v370_v42 = vadd.s32 24, %v13612_v5  ;;  %v369_v44 = vadd.s32 16, %v13612_v5 }
 0x127   : > { %v1578_v35 = vsub.f32 1.0, %v1546_v61  ;;  %v1387_v40 = vmul.f32 %v13555_v25, %v1355_v47  ;;  %v368_v2 = vadd.s32 8, %v13612_v5  ;;  %v403_v56 = vand.u32 15, %v13612_v5 }
 0x128   : > { %v1641_v63 = vsub.f32 0.0, %v1577_v29  ;;  %v1388_v53 = vmul.f32 %v13560_v8, %v1356_v11  ;;  %v1708_v8 = vmul.f32 0.5, %v10200_v16  ;;  %v424_v50 = vand.u32 15, %v370_v42 }
 0x129   : > { %v1642_v45 = vsub.f32 0.0, %v1578_v35  ;;  %v1547_v9 = vmul.f32 %v12233_v36, %v1387_v40  ;;  %v417_v16 = vand.u32 15, %v369_v44  ;;  %v410_v57 = vand.u32 15, %v368_v2 }
 0x12a   : > { %v1673_v20 = vsel %vm1609_vm5, %v1577_v29, %v1641_v63  ;;  %v1548_v1 = vmul.f32 %v12235_v30, %v1388_v53  ;;  %vm13624_vm9 = vcmp.ne.s32.totalorder %v424_v50, 15  ;;  %v373_v3 = vadd.s32 48, %v13612_v5 }
 0x12b   : > { %v1674_v31 = vsel %vm1610_vm6, %v1578_v35, %v1642_v45  ;;  %v1737_v46 = vadd.f32 1.0, %v1673_v20  ;;  %v1579_v24 = vsub.f32 1.0, %v1547_v9  ;;  %vm13629_vm11 = vcmp.ne.s32.totalorder %v417_v16, 0  ;;  %vm2929_vm13 = vmpackc.low %vm13624_vm9, %vm13624_vm9 }
 0x12c   : > { %v1738_v21 = vadd.f32 1.0, %v1674_v31  ;;  %v1580_v59 = vsub.f32 1.0, %v1548_v1  ;;  %vm13633_vm12 = vcmp.ne.s32.totalorder %v410_v57, 15  ;;  %v374_v26 = vadd.s32 56, %v13612_v5  ;;  %vm3320_vm1 = vmpackc.low %vm13629_vm11, %vm13629_vm11 }
 0x12d   : > { %v1769_v15 = vmul.f32 %v1737_v46, %v1705_v52  ;;  %v1643_v49 = vsub.f32 0.0, %v1579_v24  ;;  %v372_v18 = vadd.s32 40, %v13612_v5  ;;  %vm13651_vm14 = vcmp.ne.s32.totalorder %v403_v56, 0  ;;  %vm2927_vm2 = vmpackc.low %vm13633_vm12, %vm13633_vm12 }
 0x12e   : > { %v1770_v32 = vmul.f32 %v1738_v21, %v1706_v12  ;;  %v1644_v58 = vsub.f32 0.0, %v1580_v59  ;;  %v445_v14 = vand.u32 15, %v373_v3  ;;  %v452_v47 = vand.u32 15, %v374_v26 }
 0x12f   : > { %v1675_v13 = vsel %vm1611_vm7, %v1579_v24, %v1643_v49  ;;  %v371_v36 = vadd.s32 32, %v13612_v5  ;;  %v13681_v52 = vsel %vm2929_vm13, 65537, %v12760_v51  ;;  %v438_v11 = vand.u32 15, %v372_v18  ;;  %vm3318_vm7 = vmpackc.low %vm13651_vm14, %vm13651_vm14 }
 0x130   : > { %v1787_v25 = vpack.c.bf16 %v1770_v32, %v1769_v15  ;;  %v1739_v22 = vadd.f32 1.0, %v1675_v13  ;;  %v1676_v55 = vsel %vm1612_vm8, %v1580_v59, %v1644_v58  ;;  %v13687_v30 = vsel %vm3320_vm1, 65537, %v12760_v51 }
 0x131   : > { %v1740_v38 = vadd.f32 1.0, %v1676_v55  ;;  %v378_v12 = vadd.s32 88, %v13612_v5  ;;  %v13698_v53 = vsel %vm2927_vm2, 65537, %v12760_v51  ;;  %vm13700_vm5 = vcmp.ne.s32.totalorder %v445_v14, 0  ;;  %v11957_v55 = vld [vmem:[#allocation3] sm:$0xff]  }
 0x132   : > { %11182 = vmatprep.mubr.msk.bf16.mxu0 %vm1804_vm4, %v1787_v25  ;;  %v1771_v17 = vmul.f32 %v1739_v22, %v1707_v28  ;;  %vm13708_vm6 = vcmp.ne.s32.totalorder %v452_v47, 15  ;;  %v431_v24 = vand.u32 15, %v371_v36  ;;  %vm13716_vm8 = vcmp.ne.s32.totalorder %v438_v11, 15  ;;  %vm3324_vm9 = vmpackc.low %vm13700_vm5, %vm13700_vm5 }
 0x133   : > { %v1772_v37 = vmul.f32 %v1740_v38, %v1708_v8  ;;  %v480_v58 = vand.u32 15, %v378_v12  ;;  %v13734_v38 = vsel %vm3318_vm7, 65537, %v12760_v51  ;;  %v13761_v57 = vsel %vm3324_vm9, 65537, %v12760_v51 }
 0x134   : > { %vm13745_vm11 = vcmp.ne.s32.totalorder %v431_v24, 0  ;;  %v13786_v18 = vadd.s32 80, %v13612_v5 }
 0x135   : > { %v1788_v0 = vpack.c.bf16 %v1772_v37, %v1771_v17  ;;  %vm13763_vm12 = vcmp.ne.s32.totalorder %v480_v58, 15  ;;  %vm3322_vm13 = vmpackc.low %vm13745_vm11, %vm13745_vm11  ;;  %vm18283_vm11 = vcmask 1047552  }
 0x136   : > { %vm2937_vm14 = vmpackc.low %vm13763_vm12, %vm13763_vm12  ;;  %vm3215_vm12 = vsmask.f32 7938 }
 0x137   : > { %11183 = vmatmul.mubr.msk.bf16.gmra.mrb[28].mxu0 %vm1804_vm4, %v1788_v0  ;;  %vm12761_vm4 = vmmov 1  }
 0x138   : > { %vm2926_vm10 = vmpackc.low %vm12761_vm4, %vm12761_vm4 }
 0x139   : > { %v13649_v62 = vsel %vm2926_vm10, 65537, %v12760_v51  ;;  %vm2933_vm4 = vmpackc.low %vm13708_vm6, %vm13708_vm6 }
 0x13a   : > { %v9883_v8 = vcombine.low %v13649_v62, %v13681_v52  ;;  %vm2931_vm10 = vmpackc.low %vm13716_vm8, %vm13716_vm8  ;;  %v13753_v16 = vsel %vm2933_vm4, 65537, %v12760_v51 }
 0x13b   : > { %v13774_v7 = vsel %vm2931_vm10, 65537, %v12760_v51 }
 0x13c   : > { %vm13915_vm8 = vcmp.ne.s16.totalorder %v9883_v8, 0 }
 0x155   : > { %v11156_v4 = vpop.f32.mrb[0].mxu0 }
 0x156   : > { %v13639_v43 = vadd.f32 %v11156_v4, %v13621_v34  ;;  %v1887_v6 = vpop.f32.mrb[1].mxu0 }
 0x157   : > { %v13643_v39 = vadd.f32 %v13621_v34, %v1887_v6  ;;  %v11157_v33 = vpop.f32.mrb[2].mxu0 }
 0x158   : > { %v13656_v27 = vmul.f32 0.70710677, %v13639_v43  ;;  %v13659_v10 = vadd.f32 %v11157_v33, %v13621_v34  ;;  %v1890_v29 = vpop.f32.mrb[3].mxu0  ;;  %v13838_v48 = vmul.f32 0.5, %v13639_v43 }
 0x159   : > { %v13665_v35 = vmul.f32 0.70710677, %v13643_v39  ;;  %v13668_v60 = vadd.f32 %v13621_v34, %v1890_v29 }
 0x15a   : > { %v13675_v63 = vand.u32 2147483647, %v13656_v27  ;;  %v13678_v45 = vmul.f32 0.70710677, %v13659_v10  ;;  %vm2656_vm1 = vcmp.ge.f32.partialorder %v13656_v27, 0.0  ;;  %v18390_v27 = vcombine.low %v13687_v30, %v13649_v62 }
 0x15b   : > { %v13684_v40 = vand.u32 2147483647, %v13665_v35  ;;  %v13690_v20 = vmul.f32 0.70710677, %v13668_v60  ;;  %vm2654_vm2 = vcmp.ge.f32.partialorder %v13665_v35, 0.0  ;;  %v18393_v35 = vcombine.low %v13649_v62, %v13698_v53 }
 0x15c   : > { %v2080_v31 = vmul.f32 0.3275911, %v13675_v63  ;;  %v13695_v46 = vand.u32 2147483647, %v13678_v45  ;;  %v2464_v23 = vsub.f32 0.0, %v13675_v63  ;;  %vm2657_vm5 = vcmp.ge.f32.partialorder %v13678_v45, 0.0 }
 0x15d   : > { %v2078_v21 = vmul.f32 0.3275911, %v13684_v40  ;;  %v13706_v15 = vand.u32 2147483647, %v13690_v20  ;;  %v2462_v33 = vsub.f32 0.0, %v13684_v40  ;;  %vm2655_vm7 = vcmp.ge.f32.partialorder %v13690_v20, 0.0 }
 0x15e   : > { %v2112_v32 = vadd.f32 1.0, %v2080_v31  ;;  %v2081_v59 = vmul.f32 0.3275911, %v13695_v46  ;;  %v2465_v12 = vsub.f32 0.0, %v13695_v46  ;;  %vm13925_vm9 = vcmp.ne.s16.totalorder %v18390_v27, 0 }
 0x15f   : > { %v2110_v25 = vadd.f32 1.0, %v2078_v21  ;;  %v2079_v28 = vmul.f32 0.3275911, %v13706_v15  ;;  %v13811_v21 = vsel %vm3322_vm13, 65537, %v12760_v51  ;;  %vm13935_vm4 = vcmp.ne.s16.totalorder %v18393_v35, 0 }
 0x160   : > { %12236 = vrcp.f32 %v2112_v32  ;;  %v2113_v13 = vadd.f32 1.0, %v2081_v59  ;;  %v473_v32 = vand.u32 15, %v13786_v18  ;;  %v13819_v59 = vsel %vm2937_vm14, 65537, %v12760_v51 }
 0x161   : > { %v11160_v22 = vpop.f32.mrb[4].mxu0  ;;  %12238 = vrcp.f32 %v2110_v25  ;;  %v2111_v37 = vadd.f32 1.0, %v2079_v28  ;;  %v2496_v25 = vmul.f32 %v2464_v23, %v13675_v63  ;;  %v2494_v28 = vmul.f32 %v2462_v33, %v13684_v40 }
 0x162   : > { %v1903_v17 = vpop.f32.mrb[5].mxu0  ;;  %v13740_v0 = vadd.f32 %v11160_v22, %v13621_v34  ;;  %12240 = vrcp.f32 %v2113_v13  ;;  %v13833_v51 = vadd.s32 72, %v13612_v5  ;;  %v2497_v63 = vmul.f32 %v2465_v12, %v13695_v46 }
 0x163   : > { %v13743_v42 = vadd.f32 %v13621_v34, %v1903_v17  ;;  %v11161_v44 = vpop.f32.mrb[6].mxu0  ;;  %12242 = vrcp.f32 %v2111_v37  ;;  %v2463_v37 = vsub.f32 0.0, %v13706_v15  ;;  %v2526_v11 = vmul.f32 1.442695, %v2494_v28  ;;  %v11956_v28 = vld [vmem:[#allocation3 + $0x40] sm:$0xff]  }
 0x164   : > { %v13750_v50 = vadd.f32 %v11161_v44, %v13621_v34  ;;  %v1906_v56 = vpop.f32.mrb[7].mxu0  ;;  %v13768_v3 = vmul.f32 0.70710677, %v13740_v0  ;;  %10312 = vmatprep.subr.bf16.mxu1 %v11956_v28  ;;  %vm13900_vm6 = vcmp.ne.s32.totalorder %v473_v32, 0  ;;  %v18397_v30 = vcombine.low %v13734_v38, %v13649_v62 }
 0x165   : > { %v13771_v4 = vmul.f32 0.70710677, %v13743_v42  ;;  %v13815_v24 = vadd.f32 %v13621_v34, %v1906_v56  ;;  %10313 = vmatpush3.bf16.msra.mxu1 %v11957_v55  ;;  %vm3328_vm13 = vmpackc.low %vm13900_vm6, %vm13900_vm6  ;;  %vm18284_vm14 = vsmask.f32 7424  ;;  %v466_v35 = vand.u32 15, %v13833_v51 }
 0x166   : > { %v13780_v6 = vmul.f32 0.70710677, %v13750_v50  ;;  %v13790_v61 = vand.u32 2147483647, %v13768_v3  ;;  %vm13942_vm10 = vcmp.ne.s16.totalorder %v18397_v30, 0  ;;  %vm14013_vm6 = vmand %vm18283_vm11, %vm3215_vm12 }
 0x167   : > { %v13793_v29 = vand.u32 2147483647, %v13771_v4  ;;  %v13830_v44 = vmul.f32 0.70710677, %v13815_v24 }
 0x168   : > { %v13799_v14 = vand.u32 2147483647, %v13780_v6  ;;  %v2084_v31 = vmul.f32 0.3275911, %v13790_v61 }
 0x169   : > { %v2082_v9 = vmul.f32 0.3275911, %v13793_v29  ;;  %v13841_v23 = vand.u32 2147483647, %v13830_v44 }
 0x16a   : > { %v2085_v1 = vmul.f32 0.3275911, %v13799_v14  ;;  %v13821_v49 = vpop.eup %12236  ;;  %v2116_v58 = vadd.f32 1.0, %v2084_v31  ;;  %v2530_v31 = vmul.f32 1.442695, %v2496_v25  ;;  %v2468_v25 = vsub.f32 0.0, %v13790_v61 }
 0x16b   : > { %v2114_v13 = vadd.f32 1.0, %v2082_v9  ;;  %v13825_v22 = vpop.eup %12238  ;;  %v2176_v17 = vmul.f32 1.0614054, %v13821_v49  ;;  %v2083_v43 = vmul.f32 0.3275911, %v13841_v23 }
 0x16c   : > { %v2174_v2 = vmul.f32 1.0614054, %v13825_v22  ;;  %12244 = vrcp.f32 %v2116_v58  ;;  %v2117_v40 = vadd.f32 1.0, %v2085_v1  ;;  %v13843_v33 = vpop.eup %12240  ;;  %v2495_v1 = vmul.f32 %v2463_v37, %v13706_v15 }
 0x16d   : > { %v2208_v56 = vadd.f32 -1.4531521, %v2176_v17  ;;  %12246 = vrcp.f32 %v2114_v13  ;;  %v2177_v12 = vmul.f32 1.0614054, %v13843_v33  ;;  %v13851_v58 = vpop.eup %12242  ;;  %v2532_v17 = vmul.f32 1.442695, %v2497_v63 }
 0x16e   : > { %v2206_v9 = vadd.f32 -1.4531521, %v2174_v2  ;;  %12248 = vrcp.f32 %v2117_v40  ;;  %v2175_v36 = vmul.f32 1.0614054, %v13851_v58  ;;  %v2466_v37 = vsub.f32 0.0, %v13793_v29 }
 0x16f   : > { %v2240_v46 = vmul.f32 %v13821_v49, %v2208_v56  ;;  %v2209_v47 = vadd.f32 -1.4531521, %v2177_v12  ;;  %12250 = vpow2.f32 %v2530_v31  ;;  %v2115_v26 = vadd.f32 1.0, %v2083_v43  ;;  %v11958_v31 = vld [vmem:[#allocation3 + $0x48] sm:$0xff]  }
 0x170   : > { %v2238_v13 = vmul.f32 %v13825_v22, %v2206_v9  ;;  %12252 = vpow2.f32 %v2526_v11  ;;  %v2207_v9 = vadd.f32 -1.4531521, %v2175_v36  ;;  %v2528_v12 = vmul.f32 1.442695, %v2495_v1  ;;  %10314 = vmatprep.subr.bf16.mxu1 %v11958_v31 }
 0x171   : > { %v2272_v2 = vadd.f32 1.4214138, %v2240_v46  ;;  %v2241_v40 = vmul.f32 %v13843_v33, %v2209_v47  ;;  %v2500_v19 = vmul.f32 %v2468_v25, %v13790_v61  ;;  %12254 = vrcp.f32 %v2115_v26 }
 0x172   : > { %v2270_v15 = vadd.f32 1.4214138, %v2238_v13  ;;  %v13864_v43 = vmul.f32 0.5, %v13659_v10  ;;  %v2239_v28 = vmul.f32 %v13851_v58, %v2207_v9  ;;  %12256 = vpow2.f32 %v2532_v17 }
 0x173   : > { %v2304_v63 = vmul.f32 %v13821_v49, %v2272_v2  ;;  %v2273_v56 = vadd.f32 1.4214138, %v2241_v40  ;;  %v11960_v2 = vld [vmem:[#allocation3 + $0x8] sm:$0xff]   ;;  %v2498_v36 = vmul.f32 %v2466_v37, %v13793_v29  ;;  %v2469_v1 = vsub.f32 0.0, %v13799_v14  ;;  %v11961_v29 = vld [vmem:[#allocation3 + $0x50] sm:$0xff]  }
 0x174   : > { %v2302_v46 = vmul.f32 %v13825_v22, %v2270_v15  ;;  %v2271_v10 = vadd.f32 1.4214138, %v2239_v28  ;;  %12258 = vpow2.f32 %v2528_v12  ;;  %10315 = vmatpush3.bf16.msra.mxu1 %v11960_v2 }
 0x175   : > { %v2336_v13 = vadd.f32 -0.28449672, %v2304_v63  ;;  %v2305_v61 = vmul.f32 %v13843_v33, %v2273_v56  ;;  %v2538_v63 = vmul.f32 1.442695, %v2500_v19  ;;  %v2534_v28 = vmul.f32 1.442695, %v2498_v36  ;;  %10316 = vmatprep.subr.bf16.mxu1 %v11961_v29 }
 0x176   : > { %v13867_v11 = vpop.eup %12244  ;;  %v2334_v47 = vadd.f32 -0.28449672, %v2302_v46  ;;  %v2303_v9 = vmul.f32 %v13851_v58, %v2271_v10  ;;  %v11962_v10 = vld [vmem:[#allocation3 + $0x10] sm:$0xff]  }
 0x177   : > { %v13871_v26 = vpop.eup %12246  ;;  %v2368_v55 = vmul.f32 %v13821_v49, %v2336_v13  ;;  %v2180_v25 = vmul.f32 1.0614054, %v13867_v11  ;;  %v2337_v40 = vadd.f32 -0.28449672, %v2305_v61  ;;  %v11959_v61 = vld [vmem:[#allocation3 + $0x80] sm:$0xff]   ;;  %12260 = vpow2.f32 %v2538_v63 }
 0x178   : > { %v2366_v15 = vmul.f32 %v13825_v22, %v2334_v47  ;;  %v2178_v17 = vmul.f32 1.0614054, %v13871_v26  ;;  %v13879_v31 = vpop.eup %12248  ;;  %v13883_v47 = vmul.f32 %v2469_v1, %v13799_v14  ;;  %v2335_v2 = vadd.f32 -0.28449672, %v2303_v9  ;;  %11186 = vmatprep.subr.bf16.mxu0 %v11959_v61  ;;  %10317 = vmatpush3.bf16.msra.mxu1 %v11962_v10 }
 0x179   : > { %v2400_v37 = vadd.f32 0.2548296, %v2368_v55  ;;  %v2212_v46 = vadd.f32 -1.4531521, %v2180_v25  ;;  %v2369_v12 = vmul.f32 %v13843_v33, %v2337_v40  ;;  %v12251_v25 = vpop.eup %12250  ;;  %v2181_v14 = vmul.f32 1.0614054, %v13879_v31  ;;  %11187 = vmatpush3.bf16.msra.mxu0 %v11959_v61 }
 0x17a   : > { %v2398_v56 = vadd.f32 0.2548296, %v2366_v15  ;;  %v2210_v13 = vadd.f32 -1.4531521, %v2178_v17  ;;  %v12253_v1 = vpop.eup %12252  ;;  %v2367_v29 = vmul.f32 %v13851_v58, %v2335_v2  ;;  %v11963_v40 = vld [vmem:[#allocation3 + $0x58] sm:$0xff]   ;;  %12262 = vpow2.f32 %v2534_v28 }
 0x17b   : > { %v2432_v19 = vmul.f32 %v13821_v49, %v2400_v37  ;;  %v2244_v55 = vmul.f32 %v13867_v11, %v2212_v46  ;;  %v2401_v49 = vadd.f32 0.2548296, %v2369_v12  ;;  %v13893_v9 = vpop.eup %12254  ;;  %v2213_v63 = vadd.f32 -1.4531521, %v2181_v14  ;;  %10318 = vmatprep.subr.bf16.mxu1 %v11963_v40 }
 0x17c   : > { %v2430_v15 = vmul.f32 %v13825_v22, %v2398_v56  ;;  %v2242_v36 = vmul.f32 %v13871_v26, %v2210_v13 }
 0x17d   : > { %v2592_v17 = vmul.f32 %v12251_v25, %v2432_v19  ;;  %v2276_v37 = vadd.f32 1.4214138, %v2244_v55  ;;  %v2433_v13 = vmul.f32 %v13843_v33, %v2401_v49  ;;  %v2399_v19 = vadd.f32 0.2548296, %v2367_v29  ;;  %v12257_v55 = vpop.eup %12256  ;;  %v11964_v25 = vld [vmem:[#allocation3 + $0x88] sm:$0xff]  }
 0x17e   : > { %v2590_v46 = vmul.f32 %v12253_v1, %v2430_v15  ;;  %v2274_v22 = vadd.f32 1.4214138, %v2242_v36  ;;  %v2245_v61 = vmul.f32 %v13879_v31, %v2213_v63  ;;  %v2179_v33 = vmul.f32 1.0614054, %v13893_v9  ;;  %v12259_v14 = vpop.eup %12258  ;;  %11188 = vmatprep.subr.bf16.mxu0 %v11964_v25  ;;  %v11965_v63 = vld [vmem:[#allocation3 + $0x18] sm:$0xff]  }
 0x17f   : > { %v2624_v56 = vsub.f32 1.0, %v2592_v17  ;;  %v2308_v12 = vmul.f32 %v13867_v11, %v2276_v37  ;;  %v2593_v36 = vmul.f32 %v12257_v55, %v2433_v13  ;;  %v2431_v18 = vmul.f32 %v13851_v58, %v2399_v19  ;;  %11189 = vmatpush3.bf16.msra.mxu0 %v11964_v25  ;;  %10319 = vmatpush3.bf16.msra.mxu1 %v11965_v63 }
 0x180   : > { %v2622_v10 = vsub.f32 1.0, %v2590_v46  ;;  %v2306_v28 = vmul.f32 %v13871_v26, %v2274_v22  ;;  %v2277_v49 = vadd.f32 1.4214138, %v2245_v61  ;;  %v2467_v29 = vsub.f32 0.0, %v13841_v23 }
 0x181   : > { %v2688_v15 = vsub.f32 0.0, %v2624_v56  ;;  %v2340_v32 = vadd.f32 -0.28449672, %v2308_v12  ;;  %v2625_v40 = vsub.f32 1.0, %v2593_v36  ;;  %v2591_v58 = vmul.f32 %v12259_v14, %v2431_v18 }
 0x182   : > { %v2686_v1 = vsub.f32 0.0, %v2622_v10  ;;  %v2338_v17 = vadd.f32 -0.28449672, %v2306_v28  ;;  %v2309_v8 = vmul.f32 %v13879_v31, %v2277_v49  ;;  %v2540_v19 = vmul.f32 1.442695, %v13883_v47  ;;  %v12261_v47 = vpop.eup %12260 }
 0x183   : > { %v2720_v37 = vsel %vm2656_vm1, %v2624_v56, %v2688_v15  ;;  %v2372_v22 = vmul.f32 %v13867_v11, %v2340_v32  ;;  %v2689_v55 = vsub.f32 0.0, %v2625_v40  ;;  %v2623_v28 = vsub.f32 1.0, %v2591_v58 }
 0x184   : > { %v2718_v13 = vsel %vm2654_vm2, %v2622_v10, %v2686_v1  ;;  %v2370_v52 = vmul.f32 %v13871_v26, %v2338_v17  ;;  %v2784_v12 = vadd.f32 1.0, %v2720_v37  ;;  %v18394_v10 = vmov 0  ;;  %v12263_v38 = vpop.eup %12262 }
 0x185   : > { %v18395_v10 = vsel %vm13935_vm4, 4294967295, %v18394_v10  ;;  %v18398_v61 = vmov 0  ;;  %v2404_v25 = vadd.f32 0.2548296, %v2372_v22  ;;  %v2341_v36 = vadd.f32 -0.28449672, %v2309_v8 }
 0x186   : > { %18396 = vst [vmem:[#allocation10_spill] sm:$0xff] %v18395_v10  ;;  %v18399_v61 = vsel %vm13942_vm10, 4294967295, %v18398_v61  ;;  %v2402_v15 = vadd.f32 0.2548296, %v2370_v52  ;;  %v2211_v18 = vadd.f32 -1.4531521, %v2179_v33  ;;  %v2499_v32 = vmul.f32 %v2467_v29, %v13841_v23 }
 0x187   : > { %18400 = vst [vmem:[#allocation11_spill] sm:$0xff] %v18399_v61  ;;  %v2782_v53 = vadd.f32 1.0, %v2718_v13  ;;  %v2721_v14 = vsel %vm2657_vm5, %v2625_v40, %v2689_v55  ;;  %v2687_v1 = vsub.f32 0.0, %v2623_v28  ;;  %v2436_v17 = vmul.f32 %v13867_v11, %v2404_v25  ;;  %v13975_v55 = vld [vmem:[#allocation2] sm:$0xff] }
 0x188   : > { %v2785_v49 = vadd.f32 1.0, %v2721_v14  ;;  %v2373_v37 = vmul.f32 %v13879_v31, %v2341_v36  ;;  %12264 = vpow2.f32 %v2540_v19  ;;  %v2243_v58 = vmul.f32 %v13893_v9, %v2211_v18 }
 0x189   : > { %v2750_v22 = vmul.f32 0.5, %v13643_v39  ;;  %v2719_v33 = vsel %vm2655_vm7, %v2623_v28, %v2687_v1  ;;  %v2751_v23 = vmul.f32 0.5, %v13668_v60  ;;  %v2596_v45 = vmul.f32 %v12261_v47, %v2436_v17 }
 0x18a   : > { %v2816_v29 = vmul.f32 %v2784_v12, %v13838_v48  ;;  %v2817_v11 = vmul.f32 %v2785_v49, %v13864_v43  ;;  %v2783_v40 = vadd.f32 1.0, %v2719_v33  ;;  %v2434_v63 = vmul.f32 %v13871_v26, %v2402_v15 }
 0x18b   : > { %v11164_v13 = vpop.f32.mrb[8].mxu0  ;;  %v2814_v39 = vmul.f32 %v2782_v53, %v2750_v22  ;;  %v2405_v20 = vadd.f32 0.2548296, %v2373_v37  ;;  %v2536_v27 = vmul.f32 1.442695, %v2499_v32  ;;  %v13965_v60 = vadd.s32 64, %v13612_v5 }
 0x18c   : > { %v13962_v52 = vpop.f32.mrb[9].mxu0  ;;  %v2847_v8 = vpack.c.bf16 %v2817_v11, %v2816_v29  ;;  %v2815_v48 = vmul.f32 %v2783_v40, %v2751_v23  ;;  %v2628_v19 = vsub.f32 1.0, %v2596_v45  ;;  %v2275_v43 = vadd.f32 1.4214138, %v2243_v58  ;;  %v11966_v23 = vld [vmem:[#allocation3 + $0x60] sm:$0xff]  }
 0x18d   : > { %v13967_v12 = vpop.f32.mrb[10].mxu0  ;;  %v13970_v26 = vmul.f32 0.5, %v13740_v0  ;;  %v13973_v2 = vadd.f32 %v11164_v13, %v13621_v34  ;;  %v13978_v28 = vsel %vm3328_vm13, 65537, %v13975_v55  ;;  %vm2660_vm1 = vcmp.ge.f32.partialorder %v13768_v3, 0.0  ;;  %v3607_v40 = vld [vmem:[#allocation2 + $0x10] sm:$0x80]  ;;  %10320 = vmatprep.subr.bf16.mxu1 %v11966_v23 }
 0x18e   : > { %v13981_v30 = vpop.f32.mrb[11].mxu0  ;;  %v3055_v25 = vsel %vm13915_vm8, %v2847_v8, 0  ;;  %3239 = vst [vmem:[#allocation2 + $0x38] sm:$0xff] %v2847_v8  ;;  %v2846_v47 = vpack.c.bf16 %v2815_v48, %v2814_v39  ;;  %v13986_v0 = vmul.f32 %v12263_v38, %v2434_v63  ;;  %v13990_v36 = vsel %vm13925_vm9, %v2847_v8, 0  ;;  %v11967_v13 = vld [vmem:[#allocation3 + $0x20] sm:$0xff]  }
 0x18f   : > { %v3078_v15 = vshrl.u32 %v3055_v25, 16  ;;  %v2437_v18 = vmul.f32 %v13879_v31, %v2405_v20  ;;  %12266 = vpow2.f32 %v2536_v27  ;;  %v2692_v53 = vsub.f32 0.0, %v2628_v19  ;;  %v3217_v20 = vld [vmem:[#allocation2 + $0x18] sm:$0xff]  ;;  %10321 = vmatpush3.bf16.msra.mxu1 %v11967_v13 }
 0x190   : > { %v3054_v51 = vsel %vm13935_vm4, %v2846_v47, 0  ;;  %3238 = vst [vmem:[#allocation2 + $0x20] sm:$0xff] %v2846_v47  ;;  %v3446_v32 = vsel %vm13942_vm10, %v2846_v47, 0  ;;  %v2307_v14 = vmul.f32 %v13893_v9, %v2275_v43  ;;  %v3081_v17 = vshll.u32 %v3055_v25, 16 }
 0x191   : > { %v13998_v1 = vrot.slane %v3078_v15, 7  ;;  %v3071_v38 = vshrl.u32 %v3054_v51, 16  ;;  %v14001_v49 = vmul.f32 0.70710677, %v13973_v2  ;;  %vm14003_vm2 = vcmp.ne.s32.totalorder %v466_v35, 15 }
 0x192   : > { %v12265_v37 = vpop.eup %12264  ;;  %v3471_v58 = vshll.u32 %v13990_v36, 16  ;;  %v3464_v22 = vshll.u32 %v3446_v32, 16  ;;  %v2626_v33 = vsub.f32 1.0, %v13986_v0  ;;  %vm2661_vm5 = vcmp.ge.f32.partialorder %v13780_v6, 0.0  ;;  %vm2935_vm13 = vmpackc.low %vm14003_vm2, %vm14003_vm2 }
 0x193   : > { %v3083_v45 = vor.u32 %v3081_v17, %v13998_v1  ;;  %v3073_v29 = vrot.slane %v3071_v38, 7  ;;  %v3074_v11 = vshll.u32 %v3054_v51, 16  ;;  %v2597_v63 = vmul.f32 %v12265_v37, %v2437_v18 }
 0x194   : > { %v18403_v39 = vmov 0  ;;  %v3466_v27 = vrot.slane %v3464_v22, 1  ;;  %v3467_v8 = vshrl.u32 %v3446_v32, 16  ;;  %v2724_v48 = vsel %vm2660_vm1, %v2628_v19, %v2692_v53 }
 0x195   : > { %v18404_v39 = vsel %vm14013_vm6, 4294967295, %v18403_v39  ;;  %v2339_v43 = vadd.f32 -0.28449672, %v2307_v14  ;;  %v3076_v35 = vor.u32 %v3074_v11, %v3073_v29  ;;  %v3084_v25 = vsel %vm18285_vm15, %v3073_v29, %v3083_v45 }
 0x196   : > { %18405 = vst [vmem:[#allocation12_spill] sm:$0xff] %v18404_v39  ;;  %v2629_v47 = vsub.f32 1.0, %v2597_v63  ;;  %v18406_v15 = vcombine.low %v13649_v62, %v13753_v16  ;;  %v18407_v18 = vmov 0  ;;  %v2056_v51 = vand.u32 2147483647, %v14001_v49  ;;  %3220 = vst [vmem:[#allocation2 + $0x30] sm:$0xff] %v3084_v25 }
 0x197   : > { %v14028_v32 = vrot.slane %v3471_v58, 1  ;;  %v3469_v3 = vor.u32 %v3467_v8, %v3466_v27  ;;  %v3608_v19 = vsel %vm13590_vm3, %v3466_v27, %v3607_v40  ;;  %v18410_v53 = vcombine.low %v13761_v57, %v13649_v62 }
 0x198   : > { %vm14023_vm7 = vcmp.ne.s16.totalorder %v18406_v15, 0  ;;  %v18411_v14 = vmov 0  ;;  %v2371_v16 = vmul.f32 %v13893_v9, %v2339_v43  ;;  %v3218_v17 = vsel %vm14013_vm6, %v3076_v35, %v3217_v20  ;;  %3609 = vst [vmem:[#allocation2 + $0x10] sm:$0x80] %v3608_v19  ;;  %v11968_v19 = vld [vmem:[#allocation3 + $0x90] sm:$0xff]  }
 0x199   : > { %v18408_v18 = vsel %vm14023_vm7, 4294967295, %v18407_v18  ;;  %vm14035_vm12 = vcmp.ne.s16.totalorder %v18410_v53, 0  ;;  %v2788_v38 = vadd.f32 1.0, %v2724_v48  ;;  %v2693_v37 = vsub.f32 0.0, %v2629_v47  ;;  %3219 = vst [vmem:[#allocation2 + $0x18] sm:$0xff] %v3218_v17  ;;  %v12267_v29 = vpop.eup %12266  ;;  %11190 = vmatprep.subr.bf16.mxu0 %v11968_v19 }
 0x19a   : > { %18409 = vst [vmem:[#allocation13_spill] sm:$0xff] %v18408_v18  ;;  %v18412_v14 = vsel %vm14035_vm12, 4294967295, %v18411_v14  ;;  %v2088_v58 = vmul.f32 0.3275911, %v2056_v51  ;;  %v3474_v22 = vsel %vm18284_vm14, %v3469_v3, %v14028_v32  ;;  %v2403_v23 = vadd.f32 0.2548296, %v2371_v16  ;;  %11191 = vmatpush3.bf16.msra.mxu0 %v11968_v19 }
 0x19b   : > { %18413 = vst [vmem:[#allocation14_spill] sm:$0xff] %v18412_v14  ;;  %v14046_v57 = vadd.f32 %v13621_v34, %v13962_v52  ;;  %v14050_v45 = vadd.f32 %v13967_v12, %v13621_v34  ;;  %3610 = vst [vmem:[#allocation2 + $0x28] sm:$0xff] %v3474_v22  ;;  %v2725_v11 = vsel %vm2661_vm5, %v2629_v47, %v2693_v37  ;;  %v2757_v40 = vmul.f32 0.5, %v13750_v50  ;;  %v14059_v20 = vpop.f32.mrb[12].mxu0 }
 0x19c   : > { %v2120_v63 = vadd.f32 1.0, %v2088_v58  ;;  %v14057_v13 = vadd.f32 %v13621_v34, %v13981_v30  ;;  %v2690_v52 = vsub.f32 0.0, %v2626_v33  ;;  %v2789_v27 = vadd.f32 1.0, %v2725_v11  ;;  %v14067_v6 = vpop.f32.mrb[13].mxu0 }
 0x19d   : > { %v2435_v12 = vmul.f32 %v13893_v9, %v2403_v23  ;;  %v14065_v8 = vmul.f32 0.70710677, %v14046_v57  ;;  %v2472_v50 = vsub.f32 0.0, %v2056_v51  ;;  %v14070_v48 = vmul.f32 0.70710677, %v14050_v45  ;;  %v14073_v43 = vpop.f32.mrb[14].mxu0 }
 0x19e   : > { %12268 = vrcp.f32 %v2120_v63  ;;  %v459_v30 = vand.u32 15, %v13965_v60  ;;  %v2820_v35 = vmul.f32 %v2788_v38, %v13970_v26  ;;  %v2821_v25 = vmul.f32 %v2789_v27, %v2757_v40  ;;  %v14080_v15 = vpop.f32.mrb[15].mxu0 }
 0x19f   : > { %v2595_v47 = vmul.f32 %v12267_v29, %v2435_v12  ;;  %v2054_v9 = vand.u32 2147483647, %v14065_v8  ;;  %vm2658_vm1 = vcmp.ge.f32.partialorder %v13771_v4, 0.0  ;;  %v14084_v3 = vand.u32 2147483647, %v14070_v48 }
 0x1a0   : > { %v14089_v26 = vmul.f32 0.70710677, %v14057_v13  ;;  %v2722_v53 = vsel %vm2658_vm1, %v2626_v33, %v2690_v52  ;;  %v2849_v16 = vpack.c.bf16 %v2821_v25, %v2820_v35  ;;  %v18414_v38 = vcombine.low %v13649_v62, %v13774_v7 }
 0x1a1   : > { %v2627_v17 = vsub.f32 1.0, %v2595_v47  ;;  %v18415_v4 = vmov 0  ;;  %v18418_v37 = vcombine.low %v13811_v21, %v13649_v62  ;;  %v18419_v58 = vmov 0 }
 0x1a2   : > { %vm14096_vm5 = vcmp.ne.s16.totalorder %v18414_v38, 0  ;;  %v2086_v22 = vmul.f32 0.3275911, %v2054_v9  ;;  %v2754_v0 = vmul.f32 0.5, %v13743_v42  ;;  %v2504_v33 = vmul.f32 %v2472_v50, %v2056_v51  ;;  %3241 = vst [vmem:[#allocation2 + $0x68] sm:$0xff] %v2849_v16  ;;  %v11969_v38 = vld [vmem:[#allocation3 + $0x68] sm:$0xff]  }
 0x1a3   : > { %v18416_v4 = vsel %vm14096_vm5, 4294967295, %v18415_v4  ;;  %vm14103_vm11 = vcmp.ne.s16.totalorder %v18418_v37, 0  ;;  %v2089_v23 = vmul.f32 0.3275911, %v14084_v3  ;;  %v14115_v7 = vsel %vm2935_vm13, 65537, %v13975_v55  ;;  %10322 = vmatprep.subr.bf16.mxu1 %v11969_v38 }
 0x1a4   : > { %18417 = vst [vmem:[#allocation15_spill] sm:$0xff] %v18416_v4  ;;  %v18420_v58 = vsel %vm14103_vm11, 4294967295, %v18419_v58  ;;  %v3057_v21 = vsel %vm14023_vm7, %v2849_v16, 0  ;;  %v2691_v29 = vsub.f32 0.0, %v2627_v17  ;;  %v2118_v11 = vadd.f32 1.0, %v2086_v22 }
 0x1a5   : > { %18421 = vst [vmem:[#allocation16_spill] sm:$0xff] %v18420_v58  ;;  %v14120_v42 = vand.u32 2147483647, %v14089_v26  ;;  %v2786_v51 = vadd.f32 1.0, %v2722_v53  ;;  %v14124_v40 = vsel %vm14035_vm12, %v2849_v16, 0  ;;  %vm2659_vm2 = vcmp.ge.f32.partialorder %v13830_v44, 0.0 }
 0x1a6   : > { %v2470_v31 = vsub.f32 0.0, %v2054_v9  ;;  %v3094_v63 = vshrl.u32 %v3057_v21, 16  ;;  %v2723_v52 = vsel %vm2659_vm2, %v2627_v17, %v2691_v29  ;;  %12270 = vrcp.f32 %v2118_v11 }
 0x1a7   : > { %v2121_v27 = vadd.f32 1.0, %v2089_v23  ;;  %v3475_v12 = vshrl.u32 %v13990_v36, 16  ;;  %v2755_v50 = vmul.f32 0.5, %v13815_v24  ;;  %v2787_v35 = vadd.f32 1.0, %v2723_v52 }
 0x1a8   : > { %v2546_v25 = vmul.f32 1.442695, %v2504_v33  ;;  %vm14129_vm13 = vcmp.ne.s32.totalorder %v459_v30, 0  ;;  %v2087_v19 = vmul.f32 0.3275911, %v14120_v42  ;;  %v14136_v53 = vpop.eup %12268  ;;  %v2818_v17 = vmul.f32 %v2786_v51, %v2754_v0 }
 0x1a9   : > { %12272 = vrcp.f32 %v2121_v27  ;;  %v3477_v16 = vor.u32 %v3475_v12, %v14028_v32  ;;  %v3487_v36 = vshll.u32 %v14124_v40, 16  ;;  %v2819_v24 = vmul.f32 %v2787_v35, %v2755_v50  ;;  %vm3326_vm1 = vmpackc.low %vm14129_vm13, %vm14129_vm13 }
 0x1aa   : > { %v14140_v37 = vrot.slane %v3094_v63, 7  ;;  %v2184_v30 = vmul.f32 1.0614054, %v14136_v53  ;;  %v2502_v22 = vmul.f32 %v2470_v31, %v2054_v9  ;;  %v2119_v33 = vadd.f32 1.0, %v2087_v19 }
 0x1ab   : > { %v2848_v23 = vpack.c.bf16 %v2819_v24, %v2818_v17  ;;  %12274 = vpow2.f32 %v2546_v25  ;;  %v2473_v29 = vsub.f32 0.0, %v14084_v3  ;;  %v14146_v11 = vadd.f32 %v14059_v20, %v13621_v34 }
 0x1ac   : > { %v3097_v32 = vshll.u32 %v3057_v21, 16  ;;  %v2216_v0 = vadd.f32 -1.4531521, %v2184_v30  ;;  %12276 = vrcp.f32 %v2119_v33  ;;  %v14150_v51 = vadd.f32 %v13621_v34, %v14067_v6 }
 0x1ad   : > { %v14152_v63 = vrot.slane %v3487_v36, 1  ;;  %v3056_v9 = vsel %vm14096_vm5, %v2848_v23, 0  ;;  %3240 = vst [vmem:[#allocation2 + $0x50] sm:$0xff] %v2848_v23  ;;  %v3448_v31 = vsel %vm14103_vm11, %v2848_v23, 0  ;;  %v14159_v20 = vmul.f32 0.70710677, %v14146_v11 }
 0x1ae   : > { %v3099_v21 = vor.u32 %v3097_v32, %v14140_v37  ;;  %v3086_v52 = vshrl.u32 %v3056_v9, 16  ;;  %v3479_v27 = vshll.u32 %v3448_v31, 16  ;;  %v2542_v12 = vmul.f32 1.442695, %v2502_v22 }
 0x1af   : > { %v3089_v50 = vshll.u32 %v3056_v9, 16  ;;  %v2248_v6 = vmul.f32 %v14136_v53, %v2216_v0  ;;  %v2471_v35 = vsub.f32 0.0, %v14120_v42  ;;  %v14165_v25 = vand.u32 2147483647, %v14159_v20 }
 0x1b0   : > { %v14167_v19 = vpop.eup %12270  ;;  %v3088_v17 = vrot.slane %v3086_v52, 7  ;;  %v3481_v36 = vrot.slane %v3479_v27, 1  ;;  %v3483_v24 = vshrl.u32 %v3448_v31, 16  ;;  %v14170_v38 = vmul.f32 0.70710677, %v14150_v51  ;;  %v11970_v27 = vld [vmem:[#allocation3 + $0x28] sm:$0xff]  }
 0x1b1   : > { %v2280_v30 = vadd.f32 1.4214138, %v2248_v6  ;;  %v2182_v33 = vmul.f32 1.0614054, %v14167_v19  ;;  %v2505_v22 = vmul.f32 %v2473_v29, %v14084_v3  ;;  %v2092_v23 = vmul.f32 0.3275911, %v14165_v25  ;;  %10323 = vmatpush3.bf16.msra.mxu1 %v11970_v27 }
 0x1b2   : > { %v3091_v0 = vor.u32 %v3089_v50, %v3088_v17  ;;  %v3100_v9 = vsel %vm18285_vm15, %v3088_v17, %v3099_v21  ;;  %v3482_v44 = vsel %vm18284_vm14, %v3477_v16, %v3481_v36  ;;  %v3485_v52 = vor.u32 %v3483_v24, %v3481_v36 }
 0x1b3   : > { %v14175_v32 = vpop.eup %12272  ;;  %3222 = vst [vmem:[#allocation2 + $0x60] sm:$0xff] %v3100_v9  ;;  %3611 = vst [vmem:[#allocation2 + $0x40] sm:$0xff] %v3482_v44  ;;  %v2312_v31 = vmul.f32 %v14136_v53, %v2280_v30  ;;  %v2214_v6 = vadd.f32 -1.4531521, %v2182_v33  ;;  %v2124_v3 = vadd.f32 1.0, %v2092_v23  ;;  %v14193_v44 = vadd.f32 %v14073_v43, %v13621_v34 }
 0x1b4   : > { %v2185_v60 = vmul.f32 1.0614054, %v14175_v32  ;;  %v3092_v29 = vsel %vm18285_vm15, %v13998_v1, %v3091_v0  ;;  %v3490_v16 = vsel %vm18284_vm14, %v3485_v52, %v14152_v63  ;;  %v14189_v21 = vand.u32 2147483647, %v14170_v38 }
 0x1b5   : > { %v12275_v50 = vpop.eup %12274  ;;  %3221 = vst [vmem:[#allocation2 + $0x48] sm:$0xff] %v3092_v29  ;;  %3612 = vst [vmem:[#allocation2 + $0x58] sm:$0xff] %v3490_v16  ;;  %v2344_v17 = vadd.f32 -0.28449672, %v2312_v31  ;;  %v2246_v36 = vmul.f32 %v14167_v19, %v2214_v6  ;;  %12278 = vrcp.f32 %v2124_v3  ;;  %v2548_v30 = vmul.f32 1.442695, %v2505_v22 }
 0x1b6   : > { %v2217_v24 = vadd.f32 -1.4531521, %v2185_v60  ;;  %v14196_v1 = vpop.eup %12276  ;;  %v2503_v33 = vmul.f32 %v2471_v35, %v14120_v42  ;;  %v14205_v34 = vsel %vm3326_vm1, 65537, %v13975_v55  ;;  %v2090_v43 = vmul.f32 0.3275911, %v14189_v21 }
 0x1b7   : > { %v2376_v23 = vmul.f32 %v14136_v53, %v2344_v17  ;;  %v2278_v0 = vadd.f32 1.4214138, %v2246_v36  ;;  %v2183_v9 = vmul.f32 1.0614054, %v14196_v1  ;;  %12280 = vpow2.f32 %v2542_v12 }
 0x1b8   : > { %v2249_v60 = vmul.f32 %v14175_v32, %v2217_v24  ;;  %v2122_v22 = vadd.f32 1.0, %v2090_v43  ;;  %v14212_v42 = vadd.s32 112, %v13612_v5  ;;  %v14215_v35 = vmul.f32 0.70710677, %v14193_v44 }
 0x1b9   : > { %v2408_v47 = vadd.f32 0.2548296, %v2376_v23  ;;  %v2310_v52 = vmul.f32 %v14167_v19, %v2278_v0  ;;  %v2215_v31 = vadd.f32 -1.4531521, %v2183_v9  ;;  %12282 = vpow2.f32 %v2548_v30 }
 0x1ba   : > { %v2281_v27 = vadd.f32 1.4214138, %v2249_v60  ;;  %v2544_v6 = vmul.f32 1.442695, %v2503_v33  ;;  %v382_v3 = vadd.s32 120, %v13612_v5  ;;  %v2476_v43 = vsub.f32 0.0, %v14165_v25 }
 0x1bb   : > { %v14220_v29 = vand.u32 2147483647, %v14215_v35  ;;  %v2440_v12 = vmul.f32 %v14136_v53, %v2408_v47  ;;  %v2342_v16 = vadd.f32 -0.28449672, %v2310_v52  ;;  %v2247_v36 = vmul.f32 %v14196_v1, %v2215_v31 }
 0x1bc   : > { %v2313_v17 = vmul.f32 %v14175_v32, %v2281_v27  ;;  %12284 = vrcp.f32 %v2122_v22  ;;  %v508_v9 = vand.u32 15, %v382_v3  ;;  %vm2664_vm2 = vcmp.ge.f32.partialorder %v14001_v49, 0.0 }
 0x1bd   : > { %v2093_v30 = vmul.f32 0.3275911, %v14220_v29  ;;  %v2600_v33 = vmul.f32 %v12275_v50, %v2440_v12  ;;  %v2374_v23 = vmul.f32 %v14167_v19, %v2342_v16  ;;  %v2279_v60 = vadd.f32 1.4214138, %v2247_v36  ;;  %v11971_v36 = vld [vmem:[#allocation3 + $0x98] sm:$0xff]  }
 0x1be   : > { %v2345_v0 = vadd.f32 -0.28449672, %v2313_v17  ;;  %12286 = vpow2.f32 %v2544_v6  ;;  %v14237_v50 = vmul.f32 0.5, %v13973_v2  ;;  %v2508_v17 = vmul.f32 %v2476_v43, %v14165_v25  ;;  %11192 = vmatprep.subr.bf16.mxu0 %v11971_v36  ;;  %v11973_v25 = vld [vmem:[#allocation3 + $0x30] sm:$0xff]  }
 0x1bf   : > { %v2125_v47 = vadd.f32 1.0, %v2093_v30  ;;  %v14231_v52 = vpop.eup %12278  ;;  %v2632_v27 = vsub.f32 1.0, %v2600_v33  ;;  %v2406_v31 = vadd.f32 0.2548296, %v2374_v23  ;;  %v2311_v22 = vmul.f32 %v14196_v1, %v2279_v60  ;;  %v11972_v60 = vld [vmem:[#allocation3 + $0x70] sm:$0xff]   ;;  %11193 = vmatpush3.bf16.msra.mxu0 %v11971_v36 }
 0x1c0   : > { %v2377_v24 = vmul.f32 %v14175_v32, %v2345_v0  ;;  %v2188_v12 = vmul.f32 1.0614054, %v14231_v52  ;;  %v14243_v23 = vmul.f32 0.5, %v14046_v57  ;;  %v14246_v0 = vmul.f32 0.5, %v14050_v45  ;;  %v14257_v45 = vld [vmem:[%s18273_s2] ss:$0 sm:$0xff]  ;;  %10324 = vmatprep.subr.bf16.mxu1 %v11972_v60 }
 0x1c1   : > { %12288 = vrcp.f32 %v2125_v47  ;;  %v2438_v6 = vmul.f32 %v14167_v19, %v2406_v31  ;;  %v2343_v16 = vadd.f32 -0.28449672, %v2311_v22  ;;  %v12281_v30 = vpop.eup %12280  ;;  %v2696_v33 = vsub.f32 0.0, %v2632_v27  ;;  %10325 = vmatpush3.bf16.msra.mxu1 %v11973_v25 }
 0x1c2   : > { %v2409_v3 = vadd.f32 0.2548296, %v2377_v24  ;;  %v2220_v2 = vadd.f32 -1.4531521, %v2188_v12  ;;  %vm2662_vm13 = vcmp.ge.f32.partialorder %v14065_v8, 0.0  ;;  %v2474_v47 = vsub.f32 0.0, %v14189_v21 }
 0x1c3   : > { %v2598_v53 = vmul.f32 %v12281_v30, %v2438_v6  ;;  %v2375_v24 = vmul.f32 %v14196_v1, %v2343_v16  ;;  %v12283_v43 = vpop.eup %12282  ;;  %v14261_v31 = vadd.f32 %v14257_v45, %v14080_v15  ;;  %v2554_v6 = vmul.f32 1.442695, %v2508_v17 }
 0x1c4   : > { %v2441_v19 = vmul.f32 %v14175_v32, %v2409_v3  ;;  %v2252_v57 = vmul.f32 %v14231_v52, %v2220_v2  ;;  %vm14263_vm14 = vcmp.ne.s32.totalorder %v508_v9, 15  ;;  %v2728_v30 = vsel %vm2664_vm2, %v2632_v27, %v2696_v33 }
 0x1c5   : > { %v2630_v32 = vsub.f32 1.0, %v2598_v53  ;;  %v2407_v12 = vadd.f32 0.2548296, %v2375_v24  ;;  %v14273_v2 = vmul.f32 0.70710677, %v14261_v31  ;;  %v14275_v53 = vpop.f32.mrb[16].mxu0  ;;  %v18426_v9 = vcombine.low %v13649_v62, %v13819_v59  ;;  %vm2941_vm5 = vmpackc.low %vm14263_vm14, %vm14263_vm14 }
 0x1c6   : > { %v2601_v22 = vmul.f32 %v12283_v43, %v2441_v19  ;;  %v14267_v16 = vpop.eup %12284  ;;  %v2284_v15 = vadd.f32 1.4214138, %v2252_v57  ;;  %v18427_v60 = vmov 0  ;;  %v14286_v33 = vpop.f32.mrb[17].mxu0  ;;  %v2506_v25 = vmul.f32 %v2474_v47, %v14189_v21 }
 0x1c7   : > { %v2694_v36 = vsub.f32 0.0, %v2630_v32  ;;  %vm14280_vm1 = vcmp.ne.s16.totalorder %v18426_v9, 0  ;;  %v2439_v49 = vmul.f32 %v14196_v1, %v2407_v12  ;;  %v2186_v27 = vmul.f32 1.0614054, %v14267_v16  ;;  %v14294_v59 = vpop.f32.mrb[18].mxu0 }
 0x1c8   : > { %v2633_v17 = vsub.f32 1.0, %v2601_v22  ;;  %v18428_v60 = vsel %vm14280_vm1, 4294967295, %v18427_v60  ;;  %v12287_v19 = vpop.eup %12286  ;;  %v2316_v24 = vmul.f32 %v14231_v52, %v2284_v15  ;;  %v2477_v43 = vsub.f32 0.0, %v14220_v29  ;;  %v14296_v12 = vpop.f32.mrb[19].mxu0 }
 0x1c9   : > { %18429 = vst [vmem:[#allocation17_spill] sm:$0xff] %v18428_v60  ;;  %v14292_v57 = vand.u32 2147483647, %v14273_v2  ;;  %v2599_v9 = vmul.f32 %v12287_v19, %v2439_v49  ;;  %12290 = vpow2.f32 %v2554_v6  ;;  %v2218_v1 = vadd.f32 -1.4531521, %v2186_v27  ;;  %v11994_v60 = vld [vmem:[#allocation3 + $0x138] sm:$0xff]  }
 0x1ca   : > { %v2697_v22 = vsub.f32 0.0, %v2633_v17  ;;  %v2792_v4 = vadd.f32 1.0, %v2728_v30  ;;  %v2726_v15 = vsel %vm2662_vm13, %v2630_v32, %v2694_v36  ;;  %v18430_v21 = vcombine.low %v13978_v28, %v13649_v62 }
 0x1cb   : > { %v14298_v58 = vpop.eup %12288  ;;  %v18431_v47 = vmov 0  ;;  %v2348_v14 = vadd.f32 -0.28449672, %v2316_v24  ;;  %v2091_v49 = vmul.f32 0.3275911, %v14292_v57  ;;  %vm18434_vm15 = vcmp.ge.f32.partialorder %v14070_v48, 0.0 }
 0x1cc   : > { %vm14305_vm2 = vcmp.ne.s16.totalorder %v18430_v21, 0  ;;  %v2729_v6 = vsel %vm18434_vm15, %v2633_v17, %v2697_v22  ;;  %v2631_v27 = vsub.f32 1.0, %v2599_v9  ;;  %v18435_v30 = vcombine.low %v13649_v62, %v14115_v7  ;;  %v11974_v17 = vld [vmem:[#allocation3 + $0xa0] sm:$0xff]  }
 0x1cd   : > { %v18432_v47 = vsel %vm14305_vm2, 4294967295, %v18431_v47  ;;  %v18436_v8 = vmov 0  ;;  %v18439_v28 = vcombine.low %v14205_v34, %v13649_v62  ;;  %v18440_v32 = vmov 0  ;;  %11194 = vmatprep.subr.bf16.mxu0 %v11974_v17 }
 0x1ce   : > { %18433 = vst [vmem:[#allocation18_spill] sm:$0xff] %v18432_v47  ;;  %vm14315_vm11 = vcmp.ne.s16.totalorder %v18435_v30, 0  ;;  %v2250_v36 = vmul.f32 %v14267_v16, %v2218_v1  ;;  %v2189_v48 = vmul.f32 1.0614054, %v14298_v58  ;;  %v2793_v19 = vadd.f32 1.0, %v2729_v6  ;;  %11195 = vmatpush3.bf16.msra.mxu0 %v11974_v17 }
 0x1cf   : > { %v18437_v8 = vsel %vm14315_vm11, 4294967295, %v18436_v8  ;;  %vm14322_vm13 = vcmp.ne.s16.totalorder %v18439_v28, 0  ;;  %v2380_v24 = vmul.f32 %v14231_v52, %v2348_v14  ;;  %v2509_v7 = vmul.f32 %v2477_v43, %v14220_v29 }
 0x1d0   : > { %18438 = vst [vmem:[#allocation19_spill] sm:$0xff] %v18437_v8  ;;  %v18441_v32 = vsel %vm14322_vm13, 4294967295, %v18440_v32  ;;  %v2123_v22 = vadd.f32 1.0, %v2091_v49  ;;  %v2790_v9 = vadd.f32 1.0, %v2726_v15  ;;  %v2695_v21 = vsub.f32 0.0, %v2631_v27 }
 0x1d1   : > { %18442 = vst [vmem:[#allocation20_spill] sm:$0xff] %v18441_v32  ;;  %v2282_v30 = vadd.f32 1.4214138, %v2250_v36  ;;  %v2221_v18 = vadd.f32 -1.4531521, %v2189_v48  ;;  %v2824_v34 = vmul.f32 %v2792_v4, %v14237_v50  ;;  %v2825_v28 = vmul.f32 %v2793_v19, %v14246_v0 }
 0x1d2   : > { %v2412_v39 = vadd.f32 0.2548296, %v2380_v24  ;;  %12292 = vrcp.f32 %v2123_v22  ;;  %vm18443_vm15 = vcmp.ge.f32.partialorder %v14089_v26, 0.0  ;;  %v2550_v6 = vmul.f32 1.442695, %v2506_v25 }
 0x1d3   : > { %v2727_v1 = vsel %vm18443_vm15, %v2631_v27, %v2695_v21  ;;  %v2314_v14 = vmul.f32 %v14267_v16, %v2282_v30  ;;  %v2253_v29 = vmul.f32 %v14298_v58, %v2221_v18  ;;  %v2851_v43 = vpack.c.bf16 %v2825_v28, %v2824_v34  ;;  %v12291_v48 = vpop.eup %12290 }
 0x1d4   : > { %v2759_v15 = vmul.f32 0.5, %v14057_v13  ;;  %v2791_v49 = vadd.f32 1.0, %v2727_v1  ;;  %v2556_v36 = vmul.f32 1.442695, %v2509_v7  ;;  %v2822_v4 = vmul.f32 %v2790_v9, %v14243_v23  ;;  %v11975_v7 = vld [vmem:[#allocation3 + $0x78] sm:$0xff]  }
 0x1d5   : > { %v2346_v50 = vadd.f32 -0.28449672, %v2314_v14  ;;  %v2285_v0 = vadd.f32 1.4214138, %v2253_v29  ;;  %v14342_v26 = vadd.s32 96, %v13612_v5  ;;  %v3059_v25 = vsel %vm14280_vm1, %v2851_v43, 0  ;;  %10326 = vmatprep.subr.bf16.mxu1 %v11975_v7 }
 0x1d6   : > { %3243 = vst [vmem:[#allocation2 + $0x98] sm:$0xff] %v2851_v43  ;;  %v2823_v18 = vmul.f32 %v2791_v49, %v2759_v15  ;;  %v2444_v13 = vmul.f32 %v14231_v52, %v2412_v39  ;;  %v18444_v27 = vand.u32 15, %v14212_v42  ;;  %v14355_v23 = vadd.f32 %v14257_v45, %v14275_v53  ;;  %v11976_v15 = vld [vmem:[#allocation3 + $0x38] sm:$0xff]  }
 0x1d7   : > { %v3110_v17 = vshrl.u32 %v3059_v25, 16  ;;  %12294 = vpow2.f32 %v2550_v6  ;;  %v14358_v19 = vsel %vm2941_vm5, 65537, %v13975_v55  ;;  %v2475_v24 = vsub.f32 0.0, %v14292_v57  ;;  %10327 = vmatpush3.bf16.msra.mxu1 %v11976_v15 }
 0x1d8   : > { %vm14349_vm15 = vcmp.ne.s32.totalorder %v18444_v27, 0  ;;  %v3491_v39 = vshrl.u32 %v14124_v40, 16  ;;  %v2850_v42 = vpack.c.bf16 %v2823_v18, %v2822_v4  ;;  %v2378_v52 = vmul.f32 %v14267_v16, %v2346_v50 }
 0x1d9   : > { %12296 = vpow2.f32 %v2556_v36  ;;  %v14363_v22 = vrot.slane %v3110_v17, 7  ;;  %v3113_v9 = vshll.u32 %v3059_v25, 16  ;;  %v14367_v53 = vsel %vm14305_vm2, %v2851_v43, 0  ;;  %v14382_v43 = vpop.f32.mrb[20].mxu0 }
 0x1da   : > { %v2317_v21 = vmul.f32 %v14298_v58, %v2285_v0  ;;  %v3058_v30 = vsel %vm14315_vm11, %v2850_v42, 0  ;;  %3242 = vst [vmem:[#allocation2 + $0x80] sm:$0xff] %v2850_v42  ;;  %v3450_v40 = vsel %vm14322_vm13, %v2850_v42, 0  ;;  %v14374_v34 = vmul.f32 %v12291_v48, %v2444_v13  ;;  %v14388_v25 = vpop.f32.mrb[21].mxu0  ;;  %3903 = vmatmul.mubr.bf16.vlgmr.msra.gmra.mrb[0].mxu1 %v13975_v55 }
 0x1db   : > { %v14377_v28 = vmul.f32 0.70710677, %v14355_v23  ;;  %v3115_v1 = vor.u32 %v3113_v9, %v14363_v22  ;;  %v3102_v14 = vshrl.u32 %v3058_v30, 16  ;;  %v380_v6 = vadd.s32 104, %v13612_v5 }
 0x1dc   : > { %v2507_v29 = vmul.f32 %v2475_v24, %v14292_v57  ;;  %v14384_v49 = vpop.eup %12292  ;;  %v3493_v36 = vor.u32 %v3491_v39, %v14152_v63  ;;  %v3503_v4 = vshll.u32 %v14367_v53, 16  ;;  %v3495_v50 = vshll.u32 %v3450_v40, 16  ;;  %v14395_v63 = vpop.f32.mrb[22].mxu0 }
 0x1dd   : > { %v2410_v0 = vadd.f32 0.2548296, %v2378_v52  ;;  %v3104_v18 = vrot.slane %v3102_v14, 7  ;;  %v3105_v13 = vshll.u32 %v3058_v30, 16  ;;  %v2349_v27 = vadd.f32 -0.28449672, %v2317_v21 }
 0x1de   : > { %v2187_v48 = vmul.f32 1.0614054, %v14384_v49  ;;  %v3497_v57 = vrot.slane %v3495_v50, 1  ;;  %v3499_v17 = vshrl.u32 %v3450_v40, 16  ;;  %v2636_v24 = vsub.f32 1.0, %v14374_v34  ;;  %v14399_v30 = vpop.f32.mrb[23].mxu0 }
 0x1df   : > { %v14393_v7 = vand.u32 2147483647, %v14377_v28  ;;  %v3107_v39 = vor.u32 %v3105_v13, %v3104_v18  ;;  %vm18447_vm14 = vsmask.f32 256  ;;  %v2381_v52 = vmul.f32 %v14298_v58, %v2349_v27 }
 0x1e0   : > { %v3116_v42 = vsel %vm18447_vm14, %v3104_v18, %v3115_v1  ;;  %v2552_v9 = vmul.f32 1.442695, %v2507_v29  ;;  %v14401_v21 = vrot.slane %v3503_v4, 1  ;;  %vm18448_vm5 = vsmask.f32 7424  ;;  %vm18449_vm13 = vmmov %vm18447_vm14 }
 0x1e1   : > { %3224 = vst [vmem:[#allocation2 + $0x90] sm:$0xff] %v3116_v42  ;;  %v3498_v40 = vsel %vm18448_vm5, %v3493_v36, %v3497_v57  ;;  %v3501_v14 = vor.u32 %v3499_v17, %v3497_v57  ;;  %v2219_v34 = vadd.f32 -1.4531521, %v2187_v48  ;;  %v12295_v15 = vpop.eup %12294  ;;  %v3108_v50 = vsel %vm18449_vm13, %v14140_v37, %v3107_v39  ;;  %vm3332_vm14 = vmpackc.low %vm14349_vm15, %vm14349_vm15 }
 0x1e2   : > { %3613 = vst [vmem:[#allocation2 + $0x70] sm:$0xff] %v3498_v40  ;;  %v2413_v1 = vadd.f32 0.2548296, %v2381_v52  ;;  %v494_v29 = vand.u32 15, %v380_v6  ;;  %v2096_v4 = vmul.f32 0.3275911, %v14393_v7  ;;  %v2442_v27 = vmul.f32 %v14267_v16, %v2410_v0 }
 0x1e3   : > { %v12297_v18 = vpop.eup %12296  ;;  %3223 = vst [vmem:[#allocation2 + $0x78] sm:$0xff] %v3108_v50  ;;  %v3506_v36 = vsel %vm18448_vm5, %v3501_v14, %v14401_v21  ;;  %v2700_v13 = vsub.f32 0.0, %v2636_v24  ;;  %v2251_v48 = vmul.f32 %v14384_v49, %v2219_v34  ;;  %v487_v3 = vand.u32 15, %v14342_v26  ;;  %v11979_v40 = vld [vmem:[#allocation3 + $0xb0] sm:$0xff]  }
 0x1e4   : > { %3614 = vst [vmem:[#allocation2 + $0x88] sm:$0xff] %v3506_v36  ;;  %v2445_v37 = vmul.f32 %v14298_v58, %v2413_v1  ;;  %v2128_v57 = vadd.f32 1.0, %v2096_v4  ;;  %v14419_v6 = vadd.f32 %v14257_v45, %v14286_v33  ;;  %v9889_v17 = vcombine.low %v13649_v62, %v14358_v19 }
 0x1e5   : > { %v3364_v39 = vsel %vm3332_vm14, 65537, %v13975_v55  ;;  %v2283_v42 = vadd.f32 1.4214138, %v2251_v48  ;;  %12298 = vpow2.f32 %v2552_v9  ;;  %vm2668_vm13 = vcmp.ge.f32.partialorder %v14159_v20, 0.0 }
 0x1e6   : > { %v2605_v16 = vmul.f32 %v12297_v18, %v2445_v37  ;;  %vm14425_vm15 = vcmp.ne.s32.totalorder %v494_v29, 15  ;;  %12300 = vrcp.f32 %v2128_v57  ;;  %v2732_v58 = vsel %vm2668_vm13, %v2636_v24, %v2700_v13 }
 0x1e7   : > { %v2602_v26 = vmul.f32 %v12295_v15, %v2442_v27  ;;  %v2315_v33 = vmul.f32 %v14384_v49, %v2283_v42  ;;  %v14431_v52 = vmul.f32 0.70710677, %v14419_v6  ;;  %vm14433_vm5 = vcmp.ne.s32.totalorder %v487_v3, 0  ;;  %vm2939_vm13 = vmpackc.low %vm14425_vm15, %vm14425_vm15 }
 0x1e8   : > { %v2637_v19 = vsub.f32 1.0, %v2605_v16  ;;  %vm14437_vm14 = vcmp.ne.s16.totalorder %v9889_v17, 0  ;;  %v18454_v20 = vmov 0  ;;  %v2796_v24 = vadd.f32 1.0, %v2732_v58  ;;  %vm3330_vm2 = vmpackc.low %vm14433_vm5, %vm14433_vm5 }
 0x1e9   : > { %v18455_v20 = vsel %vm14437_vm14, 4294967295, %v18454_v20  ;;  %v2347_v9 = vadd.f32 -0.28449672, %v2315_v33  ;;  %v14442_v14 = vand.u32 2147483647, %v14431_v52  ;;  %v9905_v15 = vcombine.low %v3364_v39, %v13649_v62 }
 0x1ea   : > { %18456 = vst [vmem:[#allocation21_spill] sm:$0xff] %v18455_v20  ;;  %v2701_v34 = vsub.f32 0.0, %v2637_v19  ;;  %v14450_v50 = vadd.f32 %v14257_v45, %v14294_v59  ;;  %v2634_v1 = vsub.f32 1.0, %v2602_v26  ;;  %vm2669_vm11 = vcmp.ge.f32.partialorder %v14215_v35, 0.0  ;;  %v11977_v59 = vld [vmem:[#allocation3 + $0xa8] sm:$0xff]  }
 0x1eb   : > { %v2379_v29 = vmul.f32 %v14384_v49, %v2347_v9  ;;  %v2094_v4 = vmul.f32 0.3275911, %v14442_v14  ;;  %v2764_v18 = vmul.f32 0.5, %v14146_v11  ;;  %v2765_v13 = vmul.f32 0.5, %v14193_v44  ;;  %11196 = vmatprep.subr.bf16.mxu0 %v11977_v59 }
 0x1ec   : > { %v2733_v36 = vsel %vm2669_vm11, %v2637_v19, %v2701_v34  ;;  %v14461_v27 = vmul.f32 0.70710677, %v14450_v50  ;;  %v2971_v35 = vsel %vm2939_vm13, 65537, %v13975_v55  ;;  %v3362_v17 = vsel %vm3330_vm2, 65537, %v13975_v55  ;;  %11197 = vmatpush3.bf16.msra.mxu0 %v11977_v59  ;;  %v3634_v34 = vld [vmem:[#allocation2 + $0x20] sm:$0xff] }
 0x1ed   : > { %v2797_v48 = vadd.f32 1.0, %v2733_v36  ;;  %v2411_v37 = vadd.f32 0.2548296, %v2379_v29  ;;  %v2126_v3 = vadd.f32 1.0, %v2094_v4  ;;  %v2828_v57 = vmul.f32 %v2796_v24, %v2764_v18  ;;  %3910 = vmatprep.mubr.bf16.mxu1 %v3634_v34  ;;  %11198 = vmatprep.subr.bf16.mxu0 %v11979_v40 }
 0x1ee   : > { %v2480_v39 = vsub.f32 0.0, %v14393_v7  ;;  %v2065_v42 = vand.u32 2147483647, %v14461_v27  ;;  %v2698_v16 = vsub.f32 0.0, %v2634_v1  ;;  %v2762_v26 = vmul.f32 0.5, %v14150_v51 }
 0x1ef   : > { %v12299_v11 = vpop.eup %12298  ;;  %v2829_v44 = vmul.f32 %v2797_v48, %v2765_v13  ;;  %v2443_v0 = vmul.f32 %v14384_v49, %v2411_v37  ;;  %12302 = vrcp.f32 %v2126_v3  ;;  %vm14471_vm11 = vcmp.ne.s16.totalorder %v9905_v15, 0  ;;  %v11981_v37 = vld [vmem:[#allocation3 + $0xb8] sm:$0xff]  }
 0x1f0   : > { %v14468_v58 = vpop.eup %12300  ;;  %v18457_v33 = vmov 0  ;;  %v9888_v55 = vcombine.low %v13649_v62, %v2971_v35  ;;  %v2097_v19 = vmul.f32 0.3275911, %v2065_v42  ;;  %vm2666_vm2 = vcmp.ge.f32.partialorder %v14170_v38, 0.0  ;;  %11199 = vmatpush3.bf16.msra.mxu0 %v11979_v40 }
 0x1f1   : > { %v18458_v33 = vsel %vm14471_vm11, 4294967295, %v18457_v33  ;;  %v2853_v9 = vpack.c.bf16 %v2829_v44, %v2828_v57  ;;  %v2603_v24 = vmul.f32 %v12299_v11, %v2443_v0  ;;  %v2192_v49 = vmul.f32 1.0614054, %v14468_v58  ;;  %11200 = vmatprep.subr.bf16.mxu0 %v11981_v37  ;;  %v3632_v0 = vld [vmem:[#allocation2 + $0x10] sm:$0xff] }
 0x1f2   : > { %18459 = vst [vmem:[#allocation22_spill] sm:$0xff] %v18458_v33  ;;  %v9904_v29 = vcombine.low %v3362_v17, %v13649_v62  ;;  %v2512_v4 = vmul.f32 %v2480_v39, %v14393_v7  ;;  %v2478_v51 = vsub.f32 0.0, %v14442_v14  ;;  %v2129_v15 = vadd.f32 1.0, %v2097_v19  ;;  %11202 = vmatprep.mubr.bf16.mxu0 %v3632_v0 }
 0x1f3   : > { %v2730_v18 = vsel %vm2666_vm2, %v2634_v1, %v2698_v16  ;;  %v3061_v36 = vsel %vm14437_vm14, %v2853_v9, 0  ;;  %3245 = vst [vmem:[#allocation2 + $0xc8] sm:$0xff] %v2853_v9  ;;  %v2635_v38 = vsub.f32 1.0, %v2603_v24  ;;  %v2224_v13 = vadd.f32 -1.4531521, %v2192_v49 }
 0x1f4   : > { %vm2667_vm15 = vcmp.ge.f32.partialorder %v14273_v2, 0.0  ;;  %v2763_v59 = vmul.f32 0.5, %v14261_v31  ;;  %vm14485_vm5 = vcmp.ne.s16.totalorder %v9888_v55, 0  ;;  %v18460_v48 = vmov 0  ;;  %11201 = vmatpush3.bf16.msra.mxu0 %v11981_v37 }
 0x1f5   : > { %v18461_v48 = vsel %vm14485_vm5, 4294967295, %v18460_v48  ;;  %v2481_v7 = vsub.f32 0.0, %v2065_v42  ;;  %v3126_v35 = vshrl.u32 %v3061_v36, 16  ;;  %v2699_v3 = vsub.f32 0.0, %v2635_v38 }
 0x1f6   : > { %18462 = vst [vmem:[#allocation23_spill] sm:$0xff] %v18461_v48  ;;  %v2256_v1 = vmul.f32 %v14468_v58, %v2224_v13  ;;  %12304 = vrcp.f32 %v2129_v15  ;;  %v3507_v57 = vshrl.u32 %v14367_v53, 16  ;;  %v2794_v17 = vadd.f32 1.0, %v2730_v18 }
 0x1f7   : > { %vm14491_vm13 = vcmp.ne.s16.totalorder %v9904_v29, 0  ;;  %v18463_v39 = vmov 0  ;;  %v2510_v31 = vmul.f32 %v2478_v51, %v14442_v14  ;;  %v2731_v2 = vsel %vm2667_vm15, %v2635_v38, %v2699_v3  ;;  %v3633_v29 = vld [vmem:[#allocation2 + $0x18] sm:$0xff] }
 0x1f8   : > { %v18464_v39 = vsel %vm14491_vm13, 4294967295, %v18463_v39  ;;  %v2288_v11 = vadd.f32 1.4214138, %v2256_v1  ;;  %v2562_v16 = vmul.f32 1.442695, %v2512_v4  ;;  %v14498_v44 = vadd.f32 %v14257_v45, %v14296_v12  ;;  %v3635_v4 = vld [vmem:[#allocation2 + $0x28] sm:$0xff]  ;;  %3911 = vmatmul.mubr.bf16.gmra.mrb[4].mxu1 %v3633_v29 }
 0x1f9   : > { %18465 = vst [vmem:[#allocation24_spill] sm:$0xff] %v18464_v39  ;;  %v2795_v55 = vadd.f32 1.0, %v2731_v2  ;;  %v14501_v53 = vadd.s32 144, %v13612_v5  ;;  %v14504_v19 = vadd.s32 152, %v13612_v5  ;;  %v2513_v40 = vmul.f32 %v2481_v7, %v2065_v42  ;;  %v14506_v14 = vpop.eup %12302  ;;  %11203 = vmatmul.mubr.bf16.vlgmr.msra.gmra.mrb[32].mxu0 %v3635_v4  ;;  %v3637_v38 = vld [vmem:[#allocation2 + $0x38] sm:$0xff]  ;;  %v14542_v29 = vpop.f32.mrb[24].mxu0 }
 0x1fa   : > { %v14508_v24 = vrot.slane %v3126_v35, 7  ;;  %v14512_v49 = vsel %vm14471_vm11, %v2853_v9, 0  ;;  %v2320_v12 = vmul.f32 %v14468_v58, %v2288_v11  ;;  %v14516_v34 = vmul.f32 0.70710677, %v14498_v44  ;;  %3918 = vmatprep.mubr.bf16.mxu1 %v3637_v38  ;;  %v3638_v4 = vld [vmem:[#allocation2 + $0x40] sm:$0xff] }
 0x1fb   : > { %v2826_v51 = vmul.f32 %v2794_v17, %v2762_v26  ;;  %v2827_v15 = vmul.f32 %v2795_v55, %v2763_v59  ;;  %v2190_v42 = vmul.f32 1.0614054, %v14506_v14  ;;  %v14519_v18 = vmul.f32 1.442695, %v2510_v31  ;;  %11206 = vmatprep.mubr.bf16.mxu0 %v3638_v4 }
 0x1fc   : > { %v3129_v13 = vshll.u32 %v3061_v36, 16  ;;  %v2352_v7 = vadd.f32 -0.28449672, %v2320_v12  ;;  %12306 = vpow2.f32 %v2562_v16  ;;  %v14522_v9 = vand.u32 2147483647, %v14516_v34 }
 0x1fd   : > { %v3519_v37 = vshll.u32 %v14512_v49, 16  ;;  %v2852_v35 = vpack.c.bf16 %v2827_v15, %v2826_v51  ;;  %v2222_v3 = vadd.f32 -1.4531521, %v2190_v42  ;;  %v14527_v26 = vadd.f32 %v14257_v45, %v14382_v43  ;;  %v3636_v51 = vld [vmem:[#allocation2 + $0x30] sm:$0xff] }
 0x1fe   : > { %v3131_v59 = vor.u32 %v3129_v13, %v14508_v24  ;;  %v2384_v1 = vmul.f32 %v14468_v58, %v2352_v7  ;;  %v2564_v17 = vmul.f32 1.442695, %v2513_v40  ;;  %v2095_v36 = vmul.f32 0.3275911, %v14522_v9 }
 0x1ff   : > { %v3060_v31 = vsel %vm14485_vm5, %v2852_v35, 0  ;;  %3244 = vst [vmem:[#allocation2 + $0xb0] sm:$0xff] %v2852_v35  ;;  %v3452_v2 = vsel %vm14491_vm13, %v2852_v35, 0  ;;  %v2254_v11 = vmul.f32 %v14506_v14, %v2222_v3  ;;  %v14538_v16 = vmul.f32 0.70710677, %v14527_v26 }
 0x200   : > { %v14540_v43 = vpop.eup %12304  ;;  %v3118_v0 = vshrl.u32 %v3060_v31, 16  ;;  %v3121_v55 = vshll.u32 %v3060_v31, 16  ;;  %v3511_v12 = vshll.u32 %v3452_v2, 16  ;;  %v3515_v40 = vshrl.u32 %v3452_v2, 16  ;;  %v14549_v31 = vpop.f32.mrb[25].mxu0  ;;  %3919 = vmatmul.mubr.bf16.gmra.mrb[8].mxu1 %v3636_v51 }
 0x201   : > { %v3509_v15 = vor.u32 %v3507_v57, %v14401_v21  ;;  %v2416_v42 = vadd.f32 0.2548296, %v2384_v1  ;;  %v2286_v38 = vadd.f32 1.4214138, %v2254_v11  ;;  %v2193_v13 = vmul.f32 1.0614054, %v14540_v43 }
 0x202   : > { %v3120_v7 = vrot.slane %v3118_v0, 7  ;;  %v3513_v35 = vrot.slane %v3511_v12, 1  ;;  %v2127_v3 = vadd.f32 1.0, %v2095_v36  ;;  %v14547_v39 = vand.u32 2147483647, %v14538_v16  ;;  %v14555_v57 = vpop.f32.mrb[26].mxu0 }
 0x203   : > { %v14551_v2 = vrot.slane %v3519_v37, 1  ;;  %v2318_v48 = vmul.f32 %v14506_v14, %v2286_v38  ;;  %v536_v33 = vand.u32 15, %v14504_v19  ;;  %v2225_v21 = vadd.f32 -1.4531521, %v2193_v13  ;;  %v3641_v1 = vld [vmem:[#allocation2 + $0x58] sm:$0xff]  ;;  %v14559_v4 = vpop.f32.mrb[27].mxu0 }
 0x204   : > { %v3123_v11 = vor.u32 %v3121_v55, %v3120_v7  ;;  %vm18466_vm2 = vsmask.f32 256  ;;  %vm18467_vm15 = vsmask.f32 7424  ;;  %v3517_v12 = vor.u32 %v3515_v40, %v3513_v35  ;;  %11207 = vmatmul.mubr.bf16.gmra.mrb[36].mxu0 %v3641_v1  ;;  %v3640_v37 = vld [vmem:[#allocation2 + $0x50] sm:$0xff] }
 0x205   : > { %v3132_v0 = vsel %vm18466_vm2, %v3120_v7, %v3131_v59  ;;  %v3514_v36 = vsel %vm18467_vm15, %v3509_v15, %v3513_v35  ;;  %v2448_v38 = vmul.f32 %v14468_v58, %v2416_v42  ;;  %v2350_v19 = vadd.f32 -0.28449672, %v2318_v48  ;;  %3926 = vmatprep.mubr.bf16.mxu1 %v3640_v37  ;;  %vm18468_vm13 = vmmov %vm18466_vm2  ;;  %v3644_v35 = vld [vmem:[#allocation2 + $0x70] sm:$0xff] }
 0x206   : > { %3226 = vst [vmem:[#allocation2 + $0xc0] sm:$0xff] %v3132_v0  ;;  %3615 = vst [vmem:[#allocation2 + $0xa0] sm:$0xff] %v3514_v36  ;;  %v2257_v13 = vmul.f32 %v14540_v43, %v2225_v21  ;;  %12308 = vrcp.f32 %v2127_v3  ;;  %v12307_v51 = vpop.eup %12306  ;;  %v3124_v59 = vsel %vm18468_vm13, %v14363_v22, %v3123_v11  ;;  %v2100_v40 = vmul.f32 0.3275911, %v14547_v39  ;;  %11210 = vmatprep.mubr.bf16.mxu0 %v3644_v35  ;;  %v3647_v21 = vld [vmem:[#allocation2 + $0x88] sm:$0xff] }
 0x207   : > { %vm18469_vm2 = vmmov %vm18467_vm15  ;;  %3225 = vst [vmem:[#allocation2 + $0xa8] sm:$0xff] %v3124_v59  ;;  %12310 = vpow2.f32 %v14519_v18  ;;  %v529_v58 = vand.u32 15, %v14501_v53  ;;  %vm14570_vm15 = vcmp.ne.s32.totalorder %v536_v33, 15  ;;  %v2382_v42 = vmul.f32 %v14506_v14, %v2350_v19  ;;  %v3639_v53 = vld [vmem:[#allocation2 + $0x48] sm:$0xff] }
 0x208   : > { %v3522_v55 = vsel %vm18469_vm2, %v3517_v12, %v14551_v2  ;;  %v2289_v15 = vadd.f32 1.4214138, %v2257_v13  ;;  %12312 = vpow2.f32 %v2564_v17  ;;  %v2132_v22 = vadd.f32 1.0, %v2100_v40  ;;  %vm2945_vm13 = vmpackc.low %vm14570_vm15, %vm14570_vm15  ;;  %3927 = vmatmul.mubr.bf16.gmra.mrb[12].mxu1 %v3639_v53  ;;  %v3643_v17 = vld [vmem:[#allocation2 + $0x68] sm:$0xff]  ;;  %v14603_v13 = vld [vmem:[#allocation2] sm:$0xff] }
 0x209   : > { %3616 = vst [vmem:[#allocation2 + $0xb8] sm:$0xff] %v3522_v55  ;;  %v14577_v7 = vadd.f32 %v14257_v45, %v14388_v25  ;;  %v14579_v3 = vmul.f32 %v12307_v51, %v2448_v38  ;;  %v2479_v25 = vsub.f32 0.0, %v14522_v9  ;;  %v2414_v11 = vadd.f32 0.2548296, %v2382_v42  ;;  %3934 = vmatprep.mubr.bf16.mxu1 %v3643_v17 }
 0x20a   : > { %v2321_v18 = vmul.f32 %v14540_v43, %v2289_v15  ;;  %12314 = vrcp.f32 %v2132_v22  ;;  %vm14589_vm2 = vcmp.ne.s32.totalorder %v529_v58, 0  ;;  %v383_v36 = vadd.s32 128, %v13612_v5 }
 0x20b   : > { %v14583_v33 = vmul.f32 0.70710677, %v14577_v7  ;;  %v2640_v37 = vsub.f32 1.0, %v14579_v3  ;;  %vm2672_vm15 = vcmp.ge.f32.partialorder %v14377_v28, 0.0  ;;  %v14601_v19 = vmul.f32 0.5, %v14355_v23  ;;  %vm3336_vm5 = vmpackc.low %vm14589_vm2, %vm14589_vm2 }
 0x20c   : > { %v2353_v1 = vadd.f32 -0.28449672, %v2321_v18  ;;  %11211 = vmatmul.mubr.bf16.gmra.mrb[40].mxu0 %v3647_v21  ;;  %v2977_v51 = vsel %vm2945_vm13, 65537, %v14603_v13  ;;  %v384_v58 = vadd.s32 136, %v13612_v5  ;;  %v2511_v48 = vmul.f32 %v2479_v25, %v14522_v9 }
 0x20d   : > { %v14595_v12 = vand.u32 2147483647, %v14583_v33  ;;  %v14616_v23 = vadd.f32 %v14257_v45, %v14395_v63  ;;  %v2446_v15 = vmul.f32 %v14506_v14, %v2414_v11  ;;  %v515_v42 = vand.u32 15, %v383_v36  ;;  %v3650_v3 = vld [vmem:[#allocation2 + $0xa0] sm:$0xff] }
 0x20e   : > { %v2385_v38 = vmul.f32 %v14540_v43, %v2353_v1  ;;  %v2704_v53 = vsub.f32 0.0, %v2640_v37  ;;  %v14621_v21 = vmul.f32 0.5, %v14419_v6  ;;  %11214 = vmatprep.mubr.bf16.mxu0 %v3650_v3  ;;  %v14633_v14 = vsel %vm3336_vm5, 65537, %v14603_v13  ;;  %v3642_v6 = vld [vmem:[#allocation2 + $0x60] sm:$0xff] }
 0x20f   : > { %v2098_v59 = vmul.f32 0.3275911, %v14595_v12  ;;  %v14625_v9 = vmul.f32 0.70710677, %v14616_v23  ;;  %v2484_v17 = vsub.f32 0.0, %v14547_v39  ;;  %v9891_v36 = vcombine.low %v13649_v62, %v2977_v51 }
 0x210   : > { %v14607_v55 = vpop.eup %12308  ;;  %v2417_v40 = vadd.f32 0.2548296, %v2385_v38  ;;  %v3653_v11 = vld [vmem:[#allocation2 + $0xb8] sm:$0xff]  ;;  %v2560_v38 = vmul.f32 1.442695, %v2511_v48  ;;  %3935 = vmatmul.mubr.bf16.gmra.mrb[16].mxu1 %v3642_v6  ;;  %v522_v20 = vand.u32 15, %v384_v58  ;;  %v2736_v51 = vsel %vm2672_vm15, %v2640_v37, %v2704_v53 }
 0x211   : > { %v2191_v22 = vmul.f32 1.0614054, %v14607_v55  ;;  %v2130_v35 = vadd.f32 1.0, %v2098_v59  ;;  %v12311_v18 = vpop.eup %12310  ;;  %v14638_v59 = vand.u32 2147483647, %v14625_v9  ;;  %vm14644_vm5 = vcmp.ne.s32.totalorder %v515_v42, 0 }
 0x212   : > { %v2449_v1 = vmul.f32 %v14540_v43, %v2417_v40  ;;  %v12313_v63 = vpop.eup %12312  ;;  %v3646_v40 = vld [vmem:[#allocation2 + $0x80] sm:$0xff]  ;;  %v14642_v0 = vmul.f32 %v12311_v18, %v2446_v15  ;;  %v2769_v58 = vmul.f32 0.5, %v14450_v50  ;;  %v2516_v42 = vmul.f32 %v2484_v17, %v14547_v39  ;;  %v14659_v53 = vpop.f32.mrb[28].mxu0  ;;  %vm18482_vm15 = vmpackc.low %vm14644_vm5, %vm14644_vm5 }
 0x213   : > { %v2223_v25 = vadd.f32 -1.4531521, %v2191_v22  ;;  %12316 = vrcp.f32 %v2130_v35  ;;  %3942 = vmatprep.mubr.bf16.mxu1 %v3646_v40  ;;  %vm14663_vm13 = vcmp.ne.s16.totalorder %v9891_v36, 0  ;;  %v18476_v50 = vmov 0  ;;  %v11980_v22 = vld [vmem:[#allocation3 + $0xc0] sm:$0xff]  }
 0x214   : > { %v2609_v43 = vmul.f32 %v12313_v63, %v2449_v1  ;;  %v14640_v3 = vpop.eup %12314  ;;  %11215 = vmatmul.mubr.bf16.gmra.mrb[44].mxu0 %v3653_v11  ;;  %v2101_v63 = vmul.f32 0.3275911, %v14638_v59  ;;  %12318 = vpow2.f32 %v2560_v38  ;;  %v2638_v6 = vsub.f32 1.0, %v14642_v0  ;;  %v14672_v11 = vpop.f32.mrb[29].mxu0  ;;  %v11978_v0 = vld [vmem:[#allocation3 + $0x100] sm:$0xff]  }
 0x215   : > { %v2255_v35 = vmul.f32 %v14607_v55, %v2223_v25  ;;  %v2196_v1 = vmul.f32 1.0614054, %v14640_v3  ;;  %v2800_v25 = vadd.f32 1.0, %v2736_v51  ;;  %v18477_v50 = vsel %vm14663_vm13, 4294967295, %v18476_v50  ;;  %v14678_v36 = vpop.f32.mrb[30].mxu0  ;;  %11522 = vmatprep.subr.bf16.mxu1 %v11978_v0  ;;  %10448 = vmatprep.subr.bf16.mxu0 %v11978_v0  ;;  %v11982_v0 = vld [vmem:[#allocation3 + $0x108] sm:$0xff]  }
 0x216   : > { %v2641_v48 = vsub.f32 1.0, %v2609_v43  ;;  %v2133_v37 = vadd.f32 1.0, %v2101_v63  ;;  %18478 = vst [vmem:[#allocation25_spill] sm:$0xff] %v18477_v50  ;;  %vm14667_vm11 = vcmp.ne.s32.totalorder %v522_v20, 15  ;;  %vm18481_vm2 = vcmp.ge.f32.partialorder %v14461_v27, 0.0  ;;  %11530 = vmatpush3.bf16.msra.mxu1 %v11980_v22  ;;  %10449 = vmatpush3.bf16.msra.mxu0 %v11980_v22 }
 0x217   : > { %v2287_v15 = vadd.f32 1.4214138, %v2255_v35  ;;  %v2228_v28 = vadd.f32 -1.4531521, %v2196_v1  ;;  %v14686_v51 = vsel %vm18482_vm15, 65537, %v14603_v13  ;;  %v9907_v27 = vcombine.low %v14633_v14, %v13649_v62  ;;  %11523 = vmatprep.subr.bf16.mxu1 %v11982_v0  ;;  %10450 = vmatprep.subr.bf16.mxu0 %v11982_v0  ;;  %v3648_v0 = vld [vmem:[#allocation2 + $0x90] sm:$0xff] }
 0x218   : > { %v2705_v18 = vsub.f32 0.0, %v2641_v48  ;;  %12320 = vrcp.f32 %v2133_v37  ;;  %v2570_v1 = vmul.f32 1.442695, %v2516_v42  ;;  %v2482_v63 = vsub.f32 0.0, %v14595_v12  ;;  %v3645_v42 = vld [vmem:[#allocation2 + $0x78] sm:$0xff] }
 0x219   : > { %v2319_v17 = vmul.f32 %v14607_v55, %v2287_v15  ;;  %v2260_v40 = vmul.f32 %v14640_v3, %v2228_v28  ;;  %v14696_v15 = vadd.f32 %v14257_v45, %v14399_v30  ;;  %v2832_v14 = vmul.f32 %v2800_v25, %v14601_v19  ;;  %3943 = vmatmul.mubr.bf16.gmra.mrb[20].mxu1 %v3645_v42  ;;  %v11983_v25 = vld [vmem:[#allocation3 + $0xc8] sm:$0xff]  }
 0x21a   : > { %v2737_v38 = vsel %vm18481_vm2, %v2641_v48, %v2705_v18  ;;  %vm2943_vm2 = vmpackc.low %vm14667_vm11, %vm14667_vm11  ;;  %v14698_v18 = vpop.f32.mrb[31].mxu0  ;;  %v2702_v37 = vsub.f32 0.0, %v2638_v6  ;;  %v2485_v32 = vsub.f32 0.0, %v14638_v59  ;;  %12322 = vpow2.f32 %v2570_v1  ;;  %11531 = vmatpush3.bf16.msra.mxu1 %v11983_v25  ;;  %10451 = vmatpush3.bf16.msra.mxu0 %v11983_v25 }
 0x21b   : > { %v2801_v35 = vadd.f32 1.0, %v2737_v38  ;;  %v2351_v20 = vadd.f32 -0.28449672, %v2319_v17  ;;  %v2292_v48 = vadd.f32 1.4214138, %v2260_v40  ;;  %v3649_v40 = vld [vmem:[#allocation2 + $0x98] sm:$0xff] }
 0x21c   : > { %v14708_v8 = vmul.f32 0.70710677, %v14696_v15  ;;  %3950 = vmatprep.mubr.bf16.mxu1 %v3649_v40  ;;  %vm14723_vm5 = vcmp.ne.s16.totalorder %v9907_v27, 0  ;;  %v18483_v22 = vmov 0  ;;  %vm2671_vm11 = vcmp.ge.f32.partialorder %v14516_v34, 0.0 }
 0x21d   : > { %v14700_v28 = vpop.eup %12316  ;;  %v2833_v17 = vmul.f32 %v2801_v35, %v2769_v58  ;;  %v2383_v38 = vmul.f32 %v14607_v55, %v2351_v20  ;;  %v2324_v43 = vmul.f32 %v14640_v3, %v2292_v48  ;;  %v2975_v58 = vsel %vm2943_vm2, 65537, %v14603_v13 }
 0x21e   : > { %v2194_v30 = vmul.f32 1.0614054, %v14700_v28  ;;  %v2514_v48 = vmul.f32 %v2482_v63, %v14595_v12  ;;  %v14720_v42 = vand.u32 2147483647, %v14708_v8  ;;  %v18484_v22 = vsel %vm14723_vm5, 4294967295, %v18483_v22  ;;  %v12319_v1 = vpop.eup %12318 }
 0x21f   : > { %v14710_v47 = vpack.c.bf16 %v2833_v17, %v2832_v14  ;;  %v2415_v19 = vadd.f32 0.2548296, %v2383_v38  ;;  %v2356_v35 = vadd.f32 -0.28449672, %v2324_v43  ;;  %18485 = vst [vmem:[#allocation26_spill] sm:$0xff] %v18484_v22  ;;  %v14730_v43 = vmul.f32 0.5, %v14498_v44 }
 0x220   : > { %v2226_v20 = vadd.f32 -1.4531521, %v2194_v30  ;;  %v9906_v12 = vcombine.low %v14686_v51, %v13649_v62  ;;  %vm18486_vm15 = vcmp.ge.f32.partialorder %v14431_v52, 0.0  ;;  %v9890_v14 = vcombine.low %v13649_v62, %v2975_v58  ;;  %v11985_v30 = vld [vmem:[#allocation3 + $0xd0] sm:$0xff]  }
 0x221   : > { %3247 = vst [vmem:[#allocation2 + $0xf8] sm:$0xff] %v14710_v47  ;;  %v2447_v39 = vmul.f32 %v14607_v55, %v2415_v19  ;;  %v2734_v63 = vsel %vm18486_vm15, %v2638_v6, %v2702_v37  ;;  %v14738_v27 = vadd.s32 176, %v13612_v5  ;;  %v2517_v17 = vmul.f32 %v2485_v32, %v14638_v59  ;;  %v11984_v55 = vld [vmem:[#allocation3 + $0x110] sm:$0xff]   ;;  %v3652_v19 = vld [vmem:[#allocation2 + $0xb0] sm:$0xff]  ;;  %3951 = vmatmul.mubr.bf16.gmra.mrb[24].mxu1 %v3648_v0 }
 0x222   : > { %v2388_v44 = vmul.f32 %v14640_v3, %v2356_v35  ;;  %v2258_v40 = vmul.f32 %v14700_v28, %v2226_v20  ;;  %v2099_v51 = vmul.f32 0.3275911, %v14720_v42  ;;  %v14744_v52 = vpop.eup %12320  ;;  %v14749_v6 = vsel %vm14663_vm13, %v14710_v47, 0  ;;  %11524 = vmatprep.subr.bf16.mxu1 %v11984_v55  ;;  %10452 = vmatprep.subr.bf16.mxu0 %v11984_v55  ;;  %v11986_v55 = vld [vmem:[#allocation3 + $0x118] sm:$0xff]  }
 0x223   : > { %v2607_v38 = vmul.f32 %v12319_v1, %v2447_v39  ;;  %v2566_v37 = vmul.f32 1.442695, %v2514_v48  ;;  %v14752_v32 = vadd.s32 184, %v13612_v5  ;;  %v14756_v59 = vadd.f32 %v14257_v45, %v14542_v29  ;;  %11532 = vmatpush3.bf16.msra.mxu1 %v11985_v30  ;;  %3958 = vmatprep.mubr.bf16.mxu1 %v3652_v19 }
 0x224   : > { %vm14758_vm2 = vcmp.ne.s16.totalorder %v9906_v12, 0  ;;  %v18487_v25 = vmov 0  ;;  %v2420_v35 = vadd.f32 0.2548296, %v2388_v44  ;;  %v2290_v20 = vadd.f32 1.4214138, %v2258_v40  ;;  %10453 = vmatpush3.bf16.msra.mxu0 %v11985_v30  ;;  %11525 = vmatprep.subr.bf16.mxu1 %v11986_v55 }
 0x225   : > { %v2639_v58 = vsub.f32 1.0, %v2607_v38  ;;  %v18488_v25 = vsel %vm14758_vm2, 4294967295, %v18487_v25  ;;  %v2131_v39 = vadd.f32 1.0, %v2099_v51  ;;  %v18490_v48 = vshrl.u32 %v14512_v49, 16  ;;  %v11987_v40 = vld [vmem:[#allocation3 + $0xd8] sm:$0xff]   ;;  %10454 = vmatprep.subr.bf16.mxu0 %v11986_v55 }
 0x226   : > { %18489 = vst [vmem:[#allocation27_spill] sm:$0xff] %v18488_v25  ;;  %v2798_v45 = vadd.f32 1.0, %v2734_v63  ;;  %v2197_v29 = vmul.f32 1.0614054, %v14744_v52  ;;  %v2572_v50 = vmul.f32 1.442695, %v2517_v17  ;;  %v2322_v44 = vmul.f32 %v14700_v28, %v2290_v20  ;;  %v12323_v17 = vpop.eup %12322 }
 0x227   : > { %v14765_v1 = vor.u32 %v18490_v48, %v14551_v2  ;;  %v3142_v12 = vshrl.u32 %v14749_v6, 16  ;;  %v2703_v38 = vsub.f32 0.0, %v2639_v58  ;;  %12324 = vrcp.f32 %v2131_v39  ;;  %11533 = vmatpush3.bf16.msra.mxu1 %v11987_v40  ;;  %v11988_v48 = vld [vmem:[#allocation3 + $0x120] sm:$0xff]   ;;  %v11993_v25 = vld [vmem:[#allocation3 + $0xf0] sm:$0xff]  }
 0x228   : > { %vm14770_vm15 = vcmp.ne.s16.totalorder %v9890_v14, 0  ;;  %v18491_v51 = vmov 0  ;;  %v557_v49 = vand.u32 15, %v14738_v27  ;;  %v2229_v2 = vadd.f32 -1.4531521, %v2197_v29  ;;  %10455 = vmatpush3.bf16.msra.mxu0 %v11987_v40  ;;  %11526 = vmatprep.subr.bf16.mxu1 %v11988_v48 }
 0x229   : > { %v18492_v51 = vsel %vm14770_vm15, 4294967295, %v18491_v51  ;;  %v2483_v63 = vsub.f32 0.0, %v14720_v42  ;;  %v2735_v0 = vsel %vm2671_vm11, %v2639_v58, %v2703_v38  ;;  %v2452_v19 = vmul.f32 %v14640_v3, %v2420_v35  ;;  %v11989_v3 = vld [vmem:[#allocation3 + $0xe0] sm:$0xff]   ;;  %10456 = vmatprep.subr.bf16.mxu0 %v11988_v48 }
 0x22a   : > { %18493 = vst [vmem:[#allocation28_spill] sm:$0xff] %v18492_v51  ;;  %v2354_v20 = vadd.f32 -0.28449672, %v2322_v44  ;;  %v14780_v30 = vmul.f32 0.70710677, %v14756_v59  ;;  %v2799_v14 = vadd.f32 1.0, %v2735_v0  ;;  %12326 = vpow2.f32 %v2566_v37 }
 0x22b   : > { %v564_v39 = vand.u32 15, %v14752_v32  ;;  %v2261_v27 = vmul.f32 %v14744_v52, %v2229_v2  ;;  %v2830_v29 = vmul.f32 %v2798_v45, %v14621_v21  ;;  %v14785_v55 = vrot.slane %v3142_v12, 7  ;;  %v11990_v45 = vld [vmem:[#allocation3 + $0x128] sm:$0xff]   ;;  %v14814_v0 = vld [vmem:[%s18273_s2] ss:$0 sm:$0xff]  ;;  %11534 = vmatpush3.bf16.msra.mxu1 %v11989_v3 }
 0x22c   : > { %12328 = vpow2.f32 %v2572_v50  ;;  %v14788_v34 = vand.u32 2147483647, %v14780_v30  ;;  %v14793_v37 = vsel %vm14723_vm5, %v14710_v47, 0  ;;  %v2831_v32 = vmul.f32 %v2799_v14, %v14730_v43  ;;  %v3651_v50 = vld [vmem:[#allocation2 + $0xa8] sm:$0xff]  ;;  %10457 = vmatpush3.bf16.msra.mxu0 %v11989_v3  ;;  %v11992_v14 = vld [vmem:[#allocation3 + $0x130] sm:$0xff]   ;;  %11527 = vmatprep.subr.bf16.mxu1 %v11990_v45 }
 0x22d   : > { %v2386_v58 = vmul.f32 %v14700_v28, %v2354_v20  ;;  %vm14797_vm11 = vcmp.ne.s32.totalorder %v557_v49, 0  ;;  %v2293_v21 = vadd.f32 1.4214138, %v2261_v27  ;;  %v3145_v12 = vshll.u32 %v14749_v6, 16  ;;  %3959 = vmatmul.mubr.bf16.gmra.mrb[28].mxu1 %v3651_v50  ;;  %v3655_v43 = vld [vmem:[#allocation2 + $0xc8] sm:$0xff]  ;;  %v11991_v20 = vld [vmem:[#allocation3 + $0xe8] sm:$0xff]   ;;  %10458 = vmatprep.subr.bf16.mxu0 %v11990_v45 }
 0x22e   : > { %v14802_v38 = vmul.f32 %v12323_v17, %v2452_v19  ;;  %v2515_v47 = vmul.f32 %v2483_v63, %v14720_v42  ;;  %v2104_v44 = vmul.f32 0.3275911, %v14788_v34  ;;  %v2854_v40 = vpack.c.bf16 %v2831_v32, %v2830_v29  ;;  %3966 = vmatprep.mubr.bf16.mxu1 %v3655_v43  ;;  %v3654_v45 = vld [vmem:[#allocation2 + $0xc0] sm:$0xff] }
 0x22f   : > { %vm14806_vm5 = vcmp.ne.s32.totalorder %v564_v39, 15  ;;  %v2325_v2 = vmul.f32 %v14744_v52, %v2293_v21  ;;  %v14818_v6 = vadd.f32 %v14814_v0, %v14549_v31  ;;  %v3147_v42 = vor.u32 %v3145_v12, %v14785_v55  ;;  %11535 = vmatpush3.bf16.msra.mxu1 %v11991_v20 }
 0x230   : > { %v3535_v63 = vshll.u32 %v14793_v37, 16  ;;  %v14823_v17 = vadd.s32 160, %v13612_v5  ;;  %v2136_v19 = vadd.f32 1.0, %v2104_v44  ;;  %v3062_v39 = vsel %vm14770_vm15, %v2854_v40, 0  ;;  %3246 = vst [vmem:[#allocation2 + $0xe0] sm:$0xff] %v2854_v40  ;;  %10459 = vmatpush3.bf16.msra.mxu0 %v11991_v20  ;;  %11528 = vmatprep.subr.bf16.mxu1 %v11992_v14 }
 0x231   : > { %v3454_v31 = vsel %vm14758_vm2, %v2854_v40, 0  ;;  %v2418_v27 = vadd.f32 0.2548296, %v2386_v58  ;;  %v2357_v48 = vadd.f32 -0.28449672, %v2325_v2  ;;  %v14829_v29 = vpop.eup %12324  ;;  %v3134_v32 = vshrl.u32 %v3062_v39, 16  ;;  %10460 = vmatprep.subr.bf16.mxu0 %v11992_v14 }
 0x232   : > { %v3527_v21 = vshll.u32 %v3454_v31, 16  ;;  %v2644_v50 = vsub.f32 1.0, %v14802_v38  ;;  %v2568_v3 = vmul.f32 1.442695, %v2515_v47  ;;  %v3137_v12 = vshll.u32 %v3062_v39, 16 }
 0x233   : > { %v2389_v44 = vmul.f32 %v14744_v52, %v2357_v48  ;;  %v2195_v43 = vmul.f32 1.0614054, %v14829_v29  ;;  %v14835_v51 = vmul.f32 0.70710677, %v14818_v6  ;;  %v3136_v40 = vrot.slane %v3134_v32, 7  ;;  %11536 = vmatpush3.bf16.msra.mxu1 %v11993_v25 }
 0x234   : > { %v3529_v58 = vrot.slane %v3527_v21, 1  ;;  %v3531_v2 = vshrl.u32 %v3454_v31, 16  ;;  %12330 = vrcp.f32 %v2136_v19  ;;  %v12327_v22 = vpop.eup %12326  ;;  %v14837_v38 = vrot.slane %v3535_v63, 1  ;;  %10461 = vmatpush3.bf16.msra.mxu0 %v11993_v25  ;;  %11529 = vmatprep.subr.bf16.mxu1 %v11994_v60 }
 0x235   : > { %v2450_v47 = vmul.f32 %v14700_v28, %v2418_v27  ;;  %v2421_v39 = vadd.f32 0.2548296, %v2389_v44  ;;  %v2227_v48 = vadd.f32 -1.4531521, %v2195_v43  ;;  %v3139_v10 = vor.u32 %v3137_v12, %v3136_v40  ;;  %3967 = vmatmul.mubr.bf16.gmra.mrb[32].mxu1 %v3654_v45  ;;  %10462 = vmatprep.subr.bf16.mxu0 %v11994_v60 }
 0x236   : > { %v12329_v61 = vpop.eup %12328  ;;  %vm18498_vm2 = vsmask.f32 256  ;;  %vm18499_vm15 = vsmask.f32 7424  ;;  %v3533_v20 = vor.u32 %v3531_v2, %v3529_v58  ;;  %v2708_v31 = vsub.f32 0.0, %v2644_v50 }
 0x237   : > { %v3148_v32 = vsel %vm18498_vm2, %v3136_v40, %v3147_v42  ;;  %v3530_v19 = vsel %vm18499_vm15, %v14765_v1, %v3529_v58  ;;  %v2453_v63 = vmul.f32 %v14744_v52, %v2421_v39  ;;  %v2259_v28 = vmul.f32 %v14829_v29, %v2227_v48  ;;  %vm18500_vm13 = vmmov %vm18498_vm2  ;;  %v3658_v42 = vld [vmem:[#allocation2 + $0xe0] sm:$0xff]  ;;  %v11995_v52 = vld [vmem:[#allocation3 + $0xf8] sm:$0xff]  }
 0x238   : > { %3228 = vst [vmem:[#allocation2 + $0xf0] sm:$0xff] %v3148_v32  ;;  %3617 = vst [vmem:[#allocation2 + $0xd0] sm:$0xff] %v3530_v19  ;;  %v3140_v14 = vsel %vm18500_vm13, %v14508_v24, %v3139_v10  ;;  %12332 = vpow2.f32 %v2568_v3  ;;  %v14853_v1 = vand.u32 2147483647, %v14835_v51  ;;  %v388_v24 = vadd.s32 168, %v13612_v5  ;;  %3974 = vmatprep.mubr.bf16.mxu1 %v3658_v42  ;;  %11537 = vmatpush3.bf16.msra.mxu1 %v11995_v52 }
 0x239   : > { %vm18501_vm14 = vmmov %vm18499_vm15  ;;  %3227 = vst [vmem:[#allocation2 + $0xd8] sm:$0xff] %v3140_v14  ;;  %vm2676_vm15 = vcmp.ge.f32.partialorder %v14538_v16, 0.0  ;;  %v2613_v10 = vmul.f32 %v12329_v61, %v2453_v63  ;;  %v2291_v21 = vadd.f32 1.4214138, %v2259_v28  ;;  %v2772_v3 = vmul.f32 0.5, %v14527_v26  ;;  %10463 = vmatpush3.bf16.msra.mxu0 %v11995_v52  ;;  %v3661_v14 = vld [vmem:[#allocation2 + $0xf8] sm:$0xff] }
 0x23a   : > { %v3538_v27 = vsel %vm18501_vm14, %v3533_v20, %v14837_v38  ;;  %vm3340_vm2 = vmpackc.low %vm14797_vm11, %vm14797_vm11  ;;  %v14861_v12 = vmul.f32 %v12327_v22, %v2450_v47  ;;  %v543_v25 = vand.u32 15, %v14823_v17  ;;  %v2102_v44 = vmul.f32 0.3275911, %v14853_v1 }
 0x23b   : > { %3618 = vst [vmem:[#allocation2 + $0xe8] sm:$0xff] %v3538_v27  ;;  %vm2949_vm14 = vmpackc.low %vm14806_vm5, %vm14806_vm5  ;;  %v2740_v43 = vsel %vm2676_vm15, %v2644_v50, %v2708_v31  ;;  %v2645_v16 = vsub.f32 1.0, %v2613_v10  ;;  %v2323_v61 = vmul.f32 %v14829_v29, %v2291_v21  ;;  %v14868_v49 = vadd.f32 %v14814_v0, %v14555_v57 }
 0x23c   : > { %vm2677_vm13 = vcmp.ge.f32.partialorder %v14625_v9, 0.0  ;;  %v2981_v60 = vsel %vm2949_vm14, 65537, %v14603_v13  ;;  %v3372_v26 = vsel %vm3340_vm2, 65537, %v14603_v13  ;;  %v2134_v22 = vadd.f32 1.0, %v2102_v44 }
 0x23d   : > { %v2709_v17 = vsub.f32 0.0, %v2645_v16  ;;  %v550_v50 = vand.u32 15, %v388_v24  ;;  %v2355_v40 = vadd.f32 -0.28449672, %v2323_v61  ;;  %v14879_v57 = vmul.f32 0.70710677, %v14868_v49 }
 0x23e   : > { %v14881_v58 = vpop.eup %12330  ;;  %v2804_v9 = vadd.f32 1.0, %v2740_v43  ;;  %v2642_v2 = vsub.f32 1.0, %v14861_v12  ;;  %vm14884_vm5 = vcmp.ne.s32.totalorder %v543_v25, 0  ;;  %12334 = vrcp.f32 %v2134_v22 }
 0x23f   : > { %v3656_v35 = vld [vmem:[#allocation2 + $0xd0] sm:$0xff]  ;;  %v2741_v47 = vsel %vm2677_vm13, %v2645_v16, %v2709_v17  ;;  %v2387_v39 = vmul.f32 %v14829_v29, %v2355_v40  ;;  %v2200_v48 = vmul.f32 1.0614054, %v14881_v58  ;;  %v2073_v32 = vand.u32 2147483647, %v14879_v57  ;;  %vm3338_vm11 = vmpackc.low %vm14884_vm5, %vm14884_vm5 }
 0x240   : > { %11218 = vmatprep.mubr.bf16.mxu0 %v3656_v35  ;;  %v2773_v19 = vmul.f32 0.5, %v14616_v23  ;;  %v2805_v20 = vadd.f32 1.0, %v2741_v47  ;;  %v2488_v31 = vsub.f32 0.0, %v14788_v34  ;;  %v3657_v28 = vld [vmem:[#allocation2 + $0xd8] sm:$0xff]  ;;  %v9893_v27 = vcombine.low %v13649_v62, %v2981_v60 }
 0x241   : > { %v2419_v42 = vadd.f32 0.2548296, %v2387_v39  ;;  %v2232_v52 = vadd.f32 -1.4531521, %v2200_v48  ;;  %v2105_v10 = vmul.f32 0.3275911, %v2073_v32  ;;  %3975 = vmatmul.mubr.bf16.gmra.mrb[36].mxu1 %v3657_v28  ;;  %v2836_v21 = vmul.f32 %v2804_v9, %v2772_v3 }
 0x242   : > { %v3659_v63 = vld [vmem:[#allocation2 + $0xe8] sm:$0xff]  ;;  %v12333_v24 = vpop.eup %12332  ;;  %v2837_v23 = vmul.f32 %v2805_v20, %v2773_v19  ;;  %v9909_v12 = vcombine.low %v3372_v26, %v13649_v62  ;;  %vm14898_vm2 = vcmp.ne.s32.totalorder %v550_v50, 15  ;;  %3982 = vmatprep.mubr.bf16.mxu1 %v3661_v14  ;;  %v2706_v44 = vsub.f32 0.0, %v2642_v2  ;;  %v3660_v19 = vld [vmem:[#allocation2 + $0xf0] sm:$0xff] }
 0x243   : > { %11219 = vmatmul.mubr.bf16.gmra.mrb[48].mxu0 %v3659_v63  ;;  %v2451_v43 = vmul.f32 %v14829_v29, %v2419_v42  ;;  %v2264_v16 = vmul.f32 %v14881_v58, %v2232_v52  ;;  %v2137_v61 = vadd.f32 1.0, %v2105_v10  ;;  %v3370_v3 = vsel %vm3338_vm11, 65537, %v14603_v13  ;;  %vm2947_vm15 = vmpackc.low %vm14898_vm2, %vm14898_vm2 }
 0x244   : > { %v2857_v60 = vpack.c.bf16 %v2837_v23, %v2836_v21  ;;  %v2520_v26 = vmul.f32 %v2488_v31, %v14788_v34  ;;  %v2770_v22 = vmul.f32 0.5, %v14577_v7  ;;  %vm2674_vm14 = vcmp.ge.f32.partialorder %v14583_v33, 0.0 }
 0x245   : > { %v2611_v17 = vmul.f32 %v12333_v24, %v2451_v43  ;;  %v2296_v29 = vadd.f32 1.4214138, %v2264_v16  ;;  %12336 = vrcp.f32 %v2137_v61  ;;  %vm14916_vm13 = vcmp.ne.s16.totalorder %v9893_v27, 0  ;;  %v14961_v16 = vld [vmem:[#allocation3 + $0x140] sm:$0xff]  }
 0x246   : > { %v18506_v50 = vmov 0  ;;  %3249 = vst [vmem:[#allocation2 + $0x128] sm:$0xff] %v2857_v60  ;;  %vm14920_vm5 = vcmp.ne.s16.totalorder %v9909_v12, 0  ;;  %v18509_v40 = vmov 0  ;;  %v2771_v7 = vmul.f32 0.5, %v14696_v15  ;;  %11234 = vmatprep.subr.bf16.mxu0 %v14961_v16 }
 0x247   : > { %v18507_v50 = vsel %vm14916_vm13, 4294967295, %v18506_v50  ;;  %v18510_v40 = vsel %vm14920_vm5, 4294967295, %v18509_v40  ;;  %v2738_v34 = vsel %vm2674_vm14, %v2642_v2, %v2706_v44  ;;  %vm2675_vm11 = vcmp.ge.f32.partialorder %v14708_v8, 0.0 }
 0x248   : > { %18508 = vst [vmem:[#allocation29_spill] sm:$0xff] %v18507_v50  ;;  %18511 = vst [vmem:[#allocation30_spill] sm:$0xff] %v18510_v40  ;;  %v9908_v9 = vcombine.low %v3370_v3, %v13649_v62  ;;  %v2489_v45 = vsub.f32 0.0, %v2073_v32  ;;  %v14927_v35 = vpop.eup %12334  ;;  %v2643_v33 = vsub.f32 1.0, %v2611_v17  ;;  %v2979_v47 = vsel %vm2947_vm15, 65537, %v14603_v13 }
 0x249   : > { %v2328_v39 = vmul.f32 %v14881_v58, %v2296_v29  ;;  %v2578_v48 = vmul.f32 1.442695, %v2520_v26  ;;  %v3539_v20 = vshrl.u32 %v14793_v37, 16  ;;  %v3065_v15 = vsel %vm14916_vm13, %v2857_v60, 0  ;;  %3983 = vmatmul.mubr.bf16.gmra.mrb[40].mxu1 %v3660_v19 }
 0x24a   : > { %v2198_v2 = vmul.f32 1.0614054, %v14927_v35  ;;  %v2486_v31 = vsub.f32 0.0, %v14853_v1  ;;  %v2802_v63 = vadd.f32 1.0, %v2738_v34  ;;  %v2707_v28 = vsub.f32 0.0, %v2643_v33 }
 0x24b   : > { %v2360_v14 = vadd.f32 -0.28449672, %v2328_v39  ;;  %v14938_v27 = vadd.f32 %v14814_v0, %v14559_v4  ;;  %v3541_v42 = vor.u32 %v3539_v20, %v14837_v38  ;;  %v9892_v52 = vcombine.low %v13649_v62, %v2979_v47 }
 0x24c   : > { %v2230_v37 = vadd.f32 -1.4531521, %v2198_v2  ;;  %v2521_v10 = vmul.f32 %v2489_v45, %v2073_v32  ;;  %v3158_v24 = vshrl.u32 %v3065_v15, 16  ;;  %v2739_v21 = vsel %vm2675_vm11, %v2643_v33, %v2707_v28 }
 0x24d   : > { %12338 = vpow2.f32 %v2578_v48  ;;  %v14945_v23 = vmul.f32 0.70710677, %v14938_v27  ;;  %v2803_v12 = vadd.f32 1.0, %v2739_v21  ;;  %v2392_v25 = vmul.f32 %v14881_v58, %v2360_v14 }
 0x24e   : > { %v2262_v4 = vmul.f32 %v14927_v35, %v2230_v37  ;;  %v2518_v44 = vmul.f32 %v2486_v31, %v14853_v1  ;;  %v2834_v38 = vmul.f32 %v2802_v63, %v2770_v22  ;;  %vm14950_vm2 = vcmp.ne.s16.totalorder %v9908_v9, 0 }
 0x24f   : > { %v18512_v43 = vmov 0  ;;  %v14955_v32 = vand.u32 2147483647, %v14945_v23  ;;  %v14959_v8 = vadd.f32 %v14814_v0, %v14659_v53  ;;  %v14963_v61 = vpop.eup %12336  ;;  %v14967_v3 = vsel %vm14920_vm5, %v2857_v60, 0 }
 0x250   : > { %v18513_v43 = vsel %vm14950_vm2, 4294967295, %v18512_v43  ;;  %v2835_v1 = vmul.f32 %v2803_v12, %v2771_v7  ;;  %v2294_v26 = vadd.f32 1.4214138, %v2262_v4  ;;  %v2580_v22 = vmul.f32 1.442695, %v2521_v10 }
 0x251   : > { %18514 = vst [vmem:[#allocation31_spill] sm:$0xff] %v18513_v43  ;;  %v14969_v17 = vrot.slane %v3158_v24, 7  ;;  %vm14971_vm15 = vcmp.ne.s16.totalorder %v9892_v52, 0  ;;  %v18515_v29 = vmov 0  ;;  %v2201_v53 = vmul.f32 1.0614054, %v14963_v61 }
 0x252   : > { %v18516_v29 = vsel %vm14971_vm15, 4294967295, %v18515_v29  ;;  %v2103_v34 = vmul.f32 0.3275911, %v14955_v32  ;;  %v2856_v9 = vpack.c.bf16 %v2835_v1, %v2834_v38  ;;  %v2424_v45 = vadd.f32 0.2548296, %v2392_v25 }
 0x253   : > { %18517 = vst [vmem:[#allocation32_spill] sm:$0xff] %v18516_v29  ;;  %v2574_v33 = vmul.f32 1.442695, %v2518_v44  ;;  %v14979_v60 = vmul.f32 0.70710677, %v14959_v8  ;;  %v3161_v7 = vshll.u32 %v3065_v15, 16  ;;  %v2326_v2 = vmul.f32 %v14927_v35, %v2294_v26 }
 0x254   : > { %v3551_v47 = vshll.u32 %v14967_v3, 16  ;;  %v2233_v39 = vadd.f32 -1.4531521, %v2201_v53  ;;  %v2135_v48 = vadd.f32 1.0, %v2103_v34  ;;  %v3064_v19 = vsel %vm14971_vm15, %v2856_v9, 0  ;;  %3248 = vst [vmem:[#allocation2 + $0x110] sm:$0xff] %v2856_v9 }
 0x255   : > { %v3456_v20 = vsel %vm14950_vm2, %v2856_v9, 0  ;;  %v14988_v31 = vand.u32 2147483647, %v14979_v60  ;;  %v3163_v63 = vor.u32 %v3161_v7, %v14969_v17  ;;  %v3150_v28 = vshrl.u32 %v3064_v19, 16 }
 0x256   : > { %v3543_v15 = vshll.u32 %v3456_v20, 16  ;;  %12340 = vpow2.f32 %v2580_v22  ;;  %v3153_v14 = vshll.u32 %v3064_v19, 16  ;;  %v2456_v52 = vmul.f32 %v14881_v58, %v2424_v45 }
 0x257   : > { %v2265_v37 = vmul.f32 %v14963_v61, %v2233_v39  ;;  %12342 = vrcp.f32 %v2135_v48  ;;  %v12339_v10 = vpop.eup %12338  ;;  %v3152_v24 = vrot.slane %v3150_v28, 7  ;;  %v3547_v12 = vshrl.u32 %v3456_v20, 16 }
 0x258   : > { %v3545_v21 = vrot.slane %v3543_v15, 1  ;;  %v2108_v25 = vmul.f32 0.3275911, %v14988_v31  ;;  %v14994_v4 = vrot.slane %v3551_v47, 1  ;;  %v2358_v44 = vadd.f32 -0.28449672, %v2326_v2 }
 0x259   : > { %v393_v38 = vadd.s32 208, %v13612_v5  ;;  %v2297_v1 = vadd.f32 1.4214138, %v2265_v37  ;;  %v3155_v26 = vor.u32 %v3153_v14, %v3152_v24  ;;  %vm18518_vm14 = vsmask.f32 256 }
 0x25a   : > { %v3164_v22 = vsel %vm18518_vm14, %v3152_v24, %v3163_v63  ;;  %vm18519_vm11 = vsmask.f32 7424  ;;  %v3549_v53 = vor.u32 %v3547_v12, %v3545_v21  ;;  %v2616_v34 = vmul.f32 %v12339_v10, %v2456_v52  ;;  %vm18520_vm5 = vmmov %vm18518_vm14  ;;  %v868_v2 = vld [vmem:[#allocation2 + $0x188] sm:$0x80] }
 0x25b   : > { %v3546_v58 = vsel %vm18519_vm11, %v3541_v42, %v3545_v21  ;;  %3230 = vst [vmem:[#allocation2 + $0x120] sm:$0xff] %v3164_v22  ;;  %v2329_v9 = vmul.f32 %v14963_v61, %v2297_v1  ;;  %v2487_v45 = vsub.f32 0.0, %v14955_v32  ;;  %v3156_v7 = vsel %vm18520_vm5, %v14785_v55, %v3155_v26  ;;  %vm18521_vm13 = vmmov %vm18519_vm11  ;;  %v15005_v48 = vld [vmem:[#allocation2 + $0x110] sm:$0xff] }
 0x25c   : > { %3619 = vst [vmem:[#allocation2 + $0x100] sm:$0xff] %v3546_v58  ;;  %11222 = vmatprep.mubr.bf16.mxu0 %v3546_v58  ;;  %v3554_v47 = vsel %vm18521_vm13, %v3549_v53, %v14994_v4  ;;  %12344 = vpow2.f32 %v2574_v33  ;;  %v2140_v39 = vadd.f32 1.0, %v2108_v25  ;;  %3229 = vst [vmem:[#allocation2 + $0x108] sm:$0xff] %v3156_v7  ;;  %v2390_v42 = vmul.f32 %v14927_v35, %v2358_v44 }
 0x25d   : > { %3620 = vst [vmem:[#allocation2 + $0x118] sm:$0xff] %v3554_v47  ;;  %v394_v19 = vadd.s32 216, %v13612_v5  ;;  %v2361_v20 = vadd.f32 -0.28449672, %v2329_v9  ;;  %11223 = vmatmul.mubr.bf16.gmra.mrb[52].mxu0 %v3554_v47  ;;  %3990 = vmatprep.mubr.bf16.mxu1 %v15005_v48  ;;  %v585_v63 = vand.u32 15, %v393_v38  ;;  %v15012_v55 = vadd.f32 %v14814_v0, %v14672_v11 }
 0x25e   : > { %12346 = vrcp.f32 %v2140_v39  ;;  %v2648_v33 = vsub.f32 1.0, %v2616_v34  ;;  %v2519_v15 = vmul.f32 %v2487_v45, %v14955_v32  ;;  %v869_v37 = vsel %vm13590_vm3, 0, %v868_v2 }
 0x25f   : > { %v2393_v28 = vmul.f32 %v14963_v61, %v2361_v20  ;;  %v15017_v52 = vmul.f32 0.70710677, %v15012_v55  ;;  %vm2680_vm13 = vcmp.ge.f32.partialorder %v14780_v30, 0.0  ;;  %v2422_v24 = vadd.f32 0.2548296, %v2390_v42 }
 0x260   : > { %v12341_v14 = vpop.eup %12340  ;;  %v592_v21 = vand.u32 15, %v394_v19  ;;  %870 = vst [vmem:[#allocation2 + $0x188] sm:$0x80] %v869_v37  ;;  %v2776_v12 = vmul.f32 0.5, %v14756_v59  ;;  %vm15025_vm5 = vcmp.ne.s32.totalorder %v585_v63, 0  ;;  %v2712_v38 = vsub.f32 0.0, %v2648_v33 }
 0x261   : > { %v15021_v10 = vpop.eup %12342  ;;  %v2425_v11 = vadd.f32 0.2548296, %v2393_v28  ;;  %v15031_v44 = vand.u32 2147483647, %v15017_v52  ;;  %v2576_v26 = vmul.f32 1.442695, %v2519_v15  ;;  %v15036_v22 = vadd.f32 %v14814_v0, %v14678_v36  ;;  %vm18526_vm2 = vmpackc.low %vm15025_vm5, %vm15025_vm5 }
 0x262   : > { %v2199_v32 = vmul.f32 1.0614054, %v15021_v10  ;;  %v391_v58 = vadd.s32 192, %v13612_v5  ;;  %v392_v59 = vadd.s32 200, %v13612_v5  ;;  %v2454_v9 = vmul.f32 %v14927_v35, %v2422_v24  ;;  %v15055_v35 = vld [vmem:[#allocation2 + $0x128] sm:$0xff] }
 0x263   : > { %v2457_v1 = vmul.f32 %v14963_v61, %v2425_v11  ;;  %v2106_v34 = vmul.f32 0.3275911, %v15031_v44  ;;  %vm15042_vm14 = vcmp.ne.s32.totalorder %v592_v21, 15  ;;  %v15047_v61 = vmul.f32 0.70710677, %v15036_v22  ;;  %v15049_v47 = vld [vmem:[#allocation2 + $0x108] sm:$0xff] }
 0x264   : > { %v2231_v53 = vadd.f32 -1.4531521, %v2199_v32  ;;  %v2777_v39 = vmul.f32 0.5, %v14868_v49  ;;  %v2492_v19 = vsub.f32 0.0, %v14988_v31  ;;  %3991 = vmatmul.mubr.bf16.gmra.mrb[44].mxu1 %v15049_v47  ;;  %v2744_v2 = vsel %vm2680_vm13, %v2648_v33, %v2712_v38  ;;  %vm2953_vm13 = vmpackc.low %vm15042_vm14, %vm15042_vm14 }
 0x265   : > { %v2617_v7 = vmul.f32 %v12341_v14, %v2457_v1  ;;  %v2138_v20 = vadd.f32 1.0, %v2106_v34  ;;  %12348 = vpow2.f32 %v2576_v26  ;;  %v15063_v49 = vand.u32 2147483647, %v15047_v61  ;;  %3998 = vmatprep.mubr.bf16.mxu1 %v15055_v35  ;;  %v12000_v1 = vld [vmem:[#allocation3 + $0x1c0] sm:$0xff]   ;;  %v865_v34 = vld [vmem:[#allocation2 + $0x180] sm:$0x80] }
 0x266   : > { %v12345_v36 = vpop.eup %12344  ;;  %v2263_v42 = vmul.f32 %v15021_v10, %v2231_v53  ;;  %v571_v15 = vand.u32 15, %v391_v58  ;;  %v578_v14 = vand.u32 15, %v392_v59  ;;  %v2808_v11 = vadd.f32 1.0, %v2744_v2  ;;  %10584 = vmatprep.subr.bf16.mxu1 %v12000_v1 }
 0x267   : > { %v2649_v63 = vsub.f32 1.0, %v2617_v7  ;;  %12350 = vrcp.f32 %v2138_v20  ;;  %v2614_v24 = vmul.f32 %v12345_v36, %v2454_v9  ;;  %v2109_v21 = vmul.f32 0.3275911, %v15063_v49 }
 0x268   : > { %v15066_v28 = vpop.eup %12346  ;;  %v2295_v37 = vadd.f32 1.4214138, %v2263_v42  ;;  %vm2681_vm11 = vcmp.ge.f32.partialorder %v14879_v57, 0.0  ;;  %v3376_v32 = vsel %vm18526_vm2, 65537, %v14603_v13  ;;  %v2524_v59 = vmul.f32 %v2492_v19, %v14988_v31  ;;  %v15092_v31 = vld [vmem:[#allocation2 + $0x120] sm:$0xff] }
 0x269   : > { %v2713_v30 = vsub.f32 0.0, %v2649_v63  ;;  %v2204_v33 = vmul.f32 1.0614054, %v15066_v28  ;;  %v2141_v53 = vadd.f32 1.0, %v2109_v21  ;;  %v2985_v45 = vsel %vm2953_vm13, 65537, %v14603_v13 }
 0x26a   : > { %v2327_v38 = vmul.f32 %v15021_v10, %v2295_v37  ;;  %vm15083_vm14 = vcmp.ne.s32.totalorder %v571_v15, 0  ;;  %v2646_v25 = vsub.f32 1.0, %v2614_v24  ;;  %vm15087_vm2 = vcmp.ne.s32.totalorder %v578_v14, 15 }
 0x26b   : > { %v2745_v26 = vsel %vm2681_vm11, %v2649_v63, %v2713_v30  ;;  %v2236_v58 = vadd.f32 -1.4531521, %v2204_v33  ;;  %12352 = vrcp.f32 %v2141_v53  ;;  %v2840_v19 = vmul.f32 %v2808_v11, %v2776_v12  ;;  %vm3342_vm5 = vmpackc.low %vm15083_vm14, %vm15083_vm14 }
 0x26c   : > { %v2809_v9 = vadd.f32 1.0, %v2745_v26  ;;  %v2359_v7 = vadd.f32 -0.28449672, %v2327_v38  ;;  %v866_v2 = vsel %vm13590_vm3, 0, %v865_v34  ;;  %3999 = vmatmul.mubr.bf16.gmra.mrb[48].mxu1 %v15092_v31  ;;  %v9895_v63 = vcombine.low %v13649_v62, %v2985_v45  ;;  %vm2951_vm11 = vmpackc.low %vm15087_vm2, %vm15087_vm2  ;;  %v15127_v26 = vld [vmem:[#allocation2] sm:$0xff] }
 0x26d   : > { %v2268_v42 = vmul.f32 %v15066_v28, %v2236_v58  ;;  %v2586_v14 = vmul.f32 1.442695, %v2524_v59  ;;  %867 = vst [vmem:[#allocation2 + $0x180] sm:$0x80] %v866_v2  ;;  %v15104_v12 = vadd.f32 %v14814_v0, %v14698_v18  ;;  %v9911_v37 = vcombine.low %v3376_v32, %v13649_v62 }
 0x26e   : > { %v2841_v20 = vmul.f32 %v2809_v9, %v2777_v39  ;;  %v2391_v13 = vmul.f32 %v15021_v10, %v2359_v7  ;;  %v2710_v33 = vsub.f32 0.0, %v2646_v25  ;;  %v2493_v11 = vsub.f32 0.0, %v15063_v49 }
 0x26f   : > { %v2300_v15 = vadd.f32 1.4214138, %v2268_v42  ;;  %v12349_v30 = vpop.eup %12348  ;;  %v15115_v38 = vmul.f32 0.70710677, %v15104_v12  ;;  %vm2678_vm13 = vcmp.ge.f32.partialorder %v14835_v51, 0.0  ;;  %v2774_v0 = vmul.f32 0.5, %v14818_v6 }
 0x270   : > { %v15106_v39 = vpack.c.bf16 %v2841_v20, %v2840_v19  ;;  %v2423_v24 = vadd.f32 0.2548296, %v2391_v13  ;;  %vm15123_vm2 = vcmp.ne.s16.totalorder %v9895_v63, 0  ;;  %v18531_v1 = vmov 0 }
 0x271   : > { %v2332_v21 = vmul.f32 %v15066_v28, %v2300_v15  ;;  %v15117_v18 = vpop.eup %12350  ;;  %v18532_v1 = vsel %vm15123_vm2, 4294967295, %v18531_v1  ;;  %v2983_v58 = vsel %vm2951_vm11, 65537, %v15127_v26  ;;  %v3374_v51 = vsel %vm3342_vm5, 65537, %v15127_v26 }
 0x272   : > { %3251 = vst [vmem:[#allocation2 + $0x158] sm:$0xff] %v15106_v39  ;;  %v2455_v32 = vmul.f32 %v15021_v10, %v2423_v24  ;;  %18533 = vst [vmem:[#allocation33_spill] sm:$0xff] %v18532_v1  ;;  %12354 = vpow2.f32 %v2586_v14  ;;  %v2202_v10 = vmul.f32 1.0614054, %v15117_v18  ;;  %v15138_v53 = vand.u32 2147483647, %v15115_v38 }
 0x273   : > { %v2364_v59 = vadd.f32 -0.28449672, %v2332_v21  ;;  %v3555_v34 = vshrl.u32 %v14967_v3, 16  ;;  %v2742_v9 = vsel %vm2678_vm13, %v2646_v25, %v2710_v33  ;;  %vm15141_vm15 = vcmp.ne.s16.totalorder %v9911_v37, 0 }
 0x274   : > { %v2615_v6 = vmul.f32 %v12349_v30, %v2455_v32  ;;  %v18534_v45 = vmov 0  ;;  %v2525_v7 = vmul.f32 %v2493_v11, %v15063_v49  ;;  %v2234_v42 = vadd.f32 -1.4531521, %v2202_v10 }
 0x275   : > { %v18535_v45 = vsel %vm15141_vm15, 4294967295, %v18534_v45  ;;  %v2396_v36 = vmul.f32 %v15066_v28, %v2364_v59  ;;  %v2107_v19 = vmul.f32 0.3275911, %v15138_v53  ;;  %v15148_v20 = vpop.eup %12352  ;;  %v3067_v13 = vsel %vm15123_vm2, %v15106_v39, 0 }
 0x276   : > { %18536 = vst [vmem:[#allocation34_spill] sm:$0xff] %v18535_v45  ;;  %v2647_v57 = vsub.f32 1.0, %v2615_v6  ;;  %v9894_v3 = vcombine.low %v13649_v62, %v2983_v58  ;;  %v9910_v25 = vcombine.low %v3374_v51, %v13649_v62  ;;  %v2490_v2 = vsub.f32 0.0, %v15031_v44 }
 0x277   : > { %vm2679_vm14 = vcmp.ge.f32.partialorder %v14945_v23, 0.0  ;;  %v2266_v63 = vmul.f32 %v15117_v18, %v2234_v42  ;;  %v2205_v15 = vmul.f32 1.0614054, %v15148_v20  ;;  %v2806_v14 = vadd.f32 1.0, %v2742_v9 }
 0x278   : > { %v2711_v49 = vsub.f32 0.0, %v2647_v57  ;;  %v2428_v37 = vadd.f32 0.2548296, %v2396_v36  ;;  %v2588_v24 = vmul.f32 1.442695, %v2525_v7  ;;  %v2139_v30 = vadd.f32 1.0, %v2107_v19 }
 0x279   : > { %v3174_v33 = vshrl.u32 %v3067_v13, 16  ;;  %v2298_v11 = vadd.f32 1.4214138, %v2266_v63  ;;  %v2237_v32 = vadd.f32 -1.4531521, %v2205_v15  ;;  %v2775_v58 = vmul.f32 0.5, %v14938_v27 }
 0x27a   : > { %v2743_v21 = vsel %vm2679_vm14, %v2647_v57, %v2711_v49  ;;  %v2522_v6 = vmul.f32 %v2490_v2, %v15031_v44  ;;  %12356 = vrcp.f32 %v2139_v30  ;;  %vm15161_vm5 = vcmp.ne.s16.totalorder %v9894_v3, 0 }
 0x27b   : > { %v2807_v51 = vadd.f32 1.0, %v2743_v21  ;;  %v18537_v23 = vmov 0  ;;  %vm15165_vm11 = vcmp.ne.s16.totalorder %v9910_v25, 0  ;;  %v18540_v59 = vmov 0 }
 0x27c   : > { %v18538_v23 = vsel %vm15161_vm5, 4294967295, %v18537_v23  ;;  %v18541_v59 = vsel %vm15165_vm11, 4294967295, %v18540_v59  ;;  %v2330_v10 = vmul.f32 %v15117_v18, %v2298_v11  ;;  %v2269_v9 = vmul.f32 %v15148_v20, %v2237_v32  ;;  %v12355_v7 = vpop.eup %12354 }
 0x27d   : > { %18539 = vst [vmem:[#allocation35_spill] sm:$0xff] %v18538_v23  ;;  %18542 = vst [vmem:[#allocation36_spill] sm:$0xff] %v18541_v59  ;;  %v2838_v57 = vmul.f32 %v2806_v14, %v2774_v0  ;;  %v15174_v27 = vsel %vm15141_vm15, %v15106_v39, 0  ;;  %v2839_v44 = vmul.f32 %v2807_v51, %v2775_v58  ;;  %v2460_v36 = vmul.f32 %v15066_v28, %v2428_v37  ;;  %v12033_v59 = vld [vmem:[#allocation5 + $0x50] sm:$0xff]  }
 0x27e   : > { %v15177_v42 = vrot.slane %v3174_v33, 7  ;;  %v397_v19 = vadd.s32 240, %v13612_v5  ;;  %v2301_v3 = vadd.f32 1.4214138, %v2269_v9  ;;  %12358 = vpow2.f32 %v2588_v24 }
 0x27f   : > { %v15180_v25 = vpack.c.bf16 %v2839_v44, %v2838_v57  ;;  %v2362_v2 = vadd.f32 -0.28449672, %v2330_v10  ;;  %v2582_v49 = vmul.f32 1.442695, %v2522_v6  ;;  %v398_v0 = vadd.s32 248, %v13612_v5 }
 0x280   : > { %v3557_v63 = vor.u32 %v3555_v34, %v14994_v4  ;;  %v3177_v15 = vshll.u32 %v3067_v13, 16  ;;  %v3567_v14 = vshll.u32 %v15174_v27, 16  ;;  %v2333_v30 = vmul.f32 %v15148_v20, %v2301_v3 }
 0x281   : > { %v3066_v28 = vsel %vm15161_vm5, %v15180_v25, 0  ;;  %3250 = vst [vmem:[#allocation2 + $0x140] sm:$0xff] %v15180_v25  ;;  %v3458_v37 = vsel %vm15165_vm11, %v15180_v25, 0  ;;  %v2620_v24 = vmul.f32 %v12355_v7, %v2460_v36  ;;  %v2491_v33 = vsub.f32 0.0, %v15138_v53  ;;  %4006 = vmatprep.mubr.bf16.mxu1 %v15180_v25 }
 0x282   : > { %v3179_v4 = vor.u32 %v3177_v15, %v15177_v42  ;;  %v3166_v34 = vshrl.u32 %v3066_v28, 16  ;;  %v3559_v13 = vshll.u32 %v3458_v37, 16  ;;  %v613_v21 = vand.u32 15, %v397_v19 }
 0x283   : > { %v2394_v11 = vmul.f32 %v15117_v18, %v2362_v2  ;;  %12360 = vpow2.f32 %v2582_v49  ;;  %v620_v32 = vand.u32 15, %v398_v0  ;;  %v2365_v58 = vadd.f32 -0.28449672, %v2333_v30 }
 0x284   : > { %v3168_v51 = vrot.slane %v3166_v34, 7  ;;  %v3169_v6 = vshll.u32 %v3066_v28, 16  ;;  %v3561_v10 = vrot.slane %v3559_v13, 1  ;;  %v3563_v9 = vshrl.u32 %v3458_v37, 16  ;;  %v15197_v57 = vpop.eup %12356 }
 0x285   : > { %v15199_v7 = vrot.slane %v3567_v14, 1  ;;  %v2652_v44 = vsub.f32 1.0, %v2620_v24  ;;  %v2397_v36 = vmul.f32 %v15148_v20, %v2365_v58  ;;  %v2523_v3 = vmul.f32 %v2491_v33, %v15138_v53 }
 0x286   : > { %v3171_v15 = vor.u32 %v3169_v6, %v3168_v51  ;;  %vm18543_vm13 = vsmask.f32 256  ;;  %vm18544_vm14 = vsmask.f32 7424  ;;  %v3565_v49 = vor.u32 %v3563_v9, %v3561_v10 }
 0x287   : > { %v3180_v19 = vsel %vm18543_vm13, %v3168_v51, %v3179_v4  ;;  %v3562_v2 = vsel %vm18544_vm14, %v3557_v63, %v3561_v10  ;;  %vm15205_vm15 = vcmp.ne.s32.totalorder %v613_v21, 0  ;;  %v2429_v30 = vadd.f32 0.2548296, %v2397_v36  ;;  %vm18547_vm2 = vmmov %vm18543_vm13 }
 0x288   : > { %3232 = vst [vmem:[#allocation2 + $0x150] sm:$0xff] %v3180_v19  ;;  %3621 = vst [vmem:[#allocation2 + $0x130] sm:$0xff] %v3562_v2  ;;  %v2203_v14 = vmul.f32 1.0614054, %v15197_v57  ;;  %11226 = vmatprep.mubr.bf16.mxu0 %v3562_v2  ;;  %v12359_v28 = vpop.eup %12358  ;;  %v3172_v53 = vsel %vm18547_vm2, %v14969_v17, %v3171_v15  ;;  %v2426_v24 = vadd.f32 0.2548296, %v2394_v11 }
 0x289   : > { %vm18548_vm11 = vmmov %vm18544_vm14  ;;  %vm15214_vm13 = vcmp.ne.s32.totalorder %v620_v32, 15  ;;  %3231 = vst [vmem:[#allocation2 + $0x138] sm:$0xff] %v3172_v53  ;;  %v2716_v33 = vsub.f32 0.0, %v2652_v44  ;;  %v2461_v4 = vmul.f32 %v15148_v20, %v2429_v30  ;;  %v2584_v13 = vmul.f32 1.442695, %v2523_v3  ;;  %4007 = vmatmul.mubr.bf16.gmra.mrb[52].mxu1 %v3172_v53 }
 0x28a   : > { %v3570_v37 = vsel %vm18548_vm11, %v3565_v49, %v15199_v7  ;;  %v2235_v34 = vadd.f32 -1.4531521, %v2203_v14  ;;  %vm3348_vm2 = vmpackc.low %vm15205_vm15, %vm15205_vm15  ;;  %4014 = vmatprep.mubr.bf16.mxu1 %v15106_v39  ;;  %vm2684_vm14 = vcmp.ge.f32.partialorder %v14979_v60, 0.0  ;;  %v2458_v20 = vmul.f32 %v15117_v18, %v2426_v24 }
 0x28b   : > { %3622 = vst [vmem:[#allocation2 + $0x148] sm:$0xff] %v3570_v37  ;;  %11227 = vmatmul.mubr.bf16.gmra.mrb[56].mxu0 %v3570_v37  ;;  %v2621_v17 = vmul.f32 %v12359_v28, %v2461_v4  ;;  %vm2957_vm11 = vmpackc.low %vm15214_vm13, %vm15214_vm13  ;;  %v2748_v32 = vsel %vm2684_vm14, %v2652_v44, %v2716_v33  ;;  %12362 = vpow2.f32 %v2584_v13  ;;  %v3380_v39 = vsel %vm3348_vm2, 65537, %v15127_v26 }
 0x28c   : > { %v2267_v21 = vmul.f32 %v15197_v57, %v2235_v34  ;;  %v2989_v6 = vsel %vm2957_vm11, 65537, %v15127_v26  ;;  %v395_v10 = vadd.s32 224, %v13612_v5  ;;  %v396_v36 = vadd.s32 232, %v13612_v5 }
 0x28d   : > { %v12361_v11 = vpop.eup %12360  ;;  %v2653_v58 = vsub.f32 1.0, %v2621_v17  ;;  %v2812_v15 = vadd.f32 1.0, %v2748_v32  ;;  %vm2685_vm15 = vcmp.ge.f32.partialorder %v15047_v61, 0.0  ;;  %v9897_v44 = vcombine.low %v13649_v62, %v2989_v6 }
 0x28e   : > { %v2299_v51 = vadd.f32 1.4214138, %v2267_v21  ;;  %v2618_v60 = vmul.f32 %v12361_v11, %v2458_v20  ;;  %v9913_v2 = vcombine.low %v3380_v39, %v13649_v62  ;;  %v2780_v0 = vmul.f32 0.5, %v14959_v8 }
 0x28f   : > { %v2717_v9 = vsub.f32 0.0, %v2653_v58  ;;  %v2781_v30 = vmul.f32 0.5, %v15036_v22  ;;  %v599_v28 = vand.u32 15, %v395_v10  ;;  %v606_v5 = vand.u32 15, %v396_v36  ;;  %v3626_v36 = vld [vmem:[#allocation2 + $0x190] sm:$0xff] }
 0x290   : > { %v2331_v3 = vmul.f32 %v15197_v57, %v2299_v51  ;;  %v2844_v37 = vmul.f32 %v2812_v15, %v2780_v0  ;;  %v2650_v24 = vsub.f32 1.0, %v2618_v60  ;;  %vm15240_vm13 = vcmp.ne.s16.totalorder %v9897_v44, 0 }
 0x291   : > { %v2749_v18 = vsel %vm2685_vm15, %v2653_v58, %v2717_v9  ;;  %4015 = vmatmul.mubr.bf16.gmra.mrb[56].mxu1 %v3180_v19  ;;  %v18551_v61 = vmov 0  ;;  %vm15244_vm2 = vcmp.ne.s16.totalorder %v9913_v2, 0  ;;  %v18554_v33 = vmov 0  ;;  %v3235_v58 = vld [vmem:[#allocation2 + $0x198] sm:$0x1] }
 0x292   : > { %v2363_v49 = vadd.f32 -0.28449672, %v2331_v3  ;;  %v2813_v14 = vadd.f32 1.0, %v2749_v18  ;;  %v18552_v61 = vsel %vm15240_vm13, 4294967295, %v18551_v61  ;;  %v18555_v33 = vsel %vm15244_vm2, 4294967295, %v18554_v33 }
 0x293   : > { %18553 = vst [vmem:[#allocation37_spill] sm:$0xff] %v18552_v61  ;;  %18556 = vst [vmem:[#allocation38_spill] sm:$0xff] %v18555_v33  ;;  %vm15250_vm11 = vcmp.ne.s32.totalorder %v599_v28, 0  ;;  %vm15254_vm14 = vcmp.ne.s32.totalorder %v606_v5, 15  ;;  %v2714_v17 = vsub.f32 0.0, %v2650_v24  ;;  %v18563_v9 = vmov 0 }
 0x294   : > { %v2395_v53 = vmul.f32 %v15197_v57, %v2363_v49  ;;  %v2845_v63 = vmul.f32 %v2813_v14, %v2781_v30  ;;  %vm3346_vm15 = vmpackc.low %vm15250_vm11, %vm15250_vm11  ;;  %vm18561_vm1 = vsmask.f32 7424  ;;  %v2778_v28 = vmul.f32 0.5, %v15012_v55  ;;  %v12652_v33 = vld [vmem:[#allocation2 + $0xd0] sm:$0xff] }
 0x295   : > { %v12363_v4 = vpop.eup %12362  ;;  %vm2955_vm5 = vmpackc.low %vm15254_vm14, %vm15254_vm14  ;;  %v2779_v5 = vmul.f32 0.5, %v15104_v12  ;;  %vm18573_vm11 = vsmask.f32 7424 }
 0x296   : > { %v2427_v19 = vadd.f32 0.2548296, %v2395_v53  ;;  %v15248_v8 = vpack.c.bf16 %v2845_v63, %v2844_v37  ;;  %v2987_v18 = vsel %vm2955_vm5, 65537, %v15127_v26  ;;  %v18566_v63 = vmov 0 }
 0x297   : > { %v9896_v30 = vcombine.low %v13649_v62, %v2987_v18  ;;  %v12003_v18 = vld [vmem:[#allocation3 + $0x188] sm:$0xff]  }
 0x298   : > { %v2459_v13 = vmul.f32 %v15197_v57, %v2427_v19  ;;  %v3069_v21 = vsel %vm15240_vm13, %v15248_v8, 0  ;;  %3253 = vst [vmem:[#allocation2 + $0x188] sm:$0xff] %v15248_v8  ;;  %v3461_v20 = vsel %vm15244_vm2, %v15248_v8, 0  ;;  %vm2682_vm13 = vcmp.ge.f32.partialorder %v15017_v52, 0.0 }
 0x299   : > { %v3190_v11 = vshrl.u32 %v3069_v21, 16  ;;  %v3583_v32 = vshll.u32 %v3461_v20, 16  ;;  %v3587_v39 = vshrl.u32 %v3461_v20, 16  ;;  %v2746_v10 = vsel %vm2682_vm13, %v2650_v24, %v2714_v17 }
 0x29a   : > { %v2619_v51 = vmul.f32 %v12363_v4, %v2459_v13  ;;  %vm18562_vm2 = vcmask 1047552   ;;  %v3378_v52 = vsel %vm3346_vm15, 65537, %v15127_v26  ;;  %v2810_v2 = vadd.f32 1.0, %v2746_v10  ;;  %vm18575_vm15 = vmmov %vm18573_vm11  ;;  %v12625_v10 = vld [vmem:[#allocation2 + $0x20] sm:$0xff] }
 0x29b   : > { %v3192_v57 = vrot.slane %v3190_v11, 7  ;;  %v3585_v6 = vrot.slane %v3583_v32, 1  ;;  %vm15275_vm12 = vmand %vm18562_vm2, %vm18561_vm1  ;;  %vm2683_vm1 = vcmp.ge.f32.partialorder %v15115_v38, 0.0  ;;  %v9912_v14 = vcombine.low %v3378_v52, %v13649_v62 }
 0x29c   : > { %v18564_v9 = vsel %vm15275_vm12, 4294967295, %v18563_v9  ;;  %v2651_v3 = vsub.f32 1.0, %v2619_v51  ;;  %v2842_v37 = vmul.f32 %v2810_v2, %v2778_v28  ;;  %vm15293_vm5 = vcmp.ne.s16.totalorder %v9896_v30, 0  ;;  %v12007_v2 = vld [vmem:[#allocation3 + $0x190] sm:$0xff]  }
 0x29d   : > { %18565 = vst [vmem:[#allocation39_spill] sm:$0xff] %v18564_v9  ;;  %v3236_v15 = vsel %vm13571_vm0, %v3192_v57, %v3235_v58  ;;  %v3589_v60 = vor.u32 %v3587_v39, %v3585_v6  ;;  %v18567_v63 = vsel %vm15293_vm5, 4294967295, %v18566_v63  ;;  %vm15297_vm13 = vcmp.ne.s16.totalorder %v9912_v14, 0  ;;  %v15344_v14 = vld [vmem:[#allocation2 + $0x50] sm:$0xff] }
 0x29e   : > { %3237 = vst [vmem:[#allocation2 + $0x198] sm:$0x1] %v3236_v15  ;;  %v2715_v44 = vsub.f32 0.0, %v2651_v3  ;;  %18568 = vst [vmem:[#allocation40_spill] sm:$0xff] %v18567_v63  ;;  %v18569_v38 = vmov 0  ;;  %v3193_v22 = vshll.u32 %v3069_v21, 16 }
 0x29f   : > { %v15285_v49 = vsel %vm15275_vm12, %v3589_v60, %v3626_v36  ;;  %v18570_v38 = vsel %vm15297_vm13, 4294967295, %v18569_v38  ;;  %v3571_v62 = vshrl.u32 %v15174_v27, 16  ;;  %vm18572_vm2 = vsmask.f32 256  ;;  %v11997_v36 = vld [vmem:[#allocation3 + $0x148] sm:$0xff]   ;;  %v11998_v60 = vld [vmem:[#allocation3 + $0x150] sm:$0xff]  }
 0x2a0   : > { %3628 = vst [vmem:[#allocation2 + $0x190] sm:$0xff] %v15285_v49  ;;  %v2747_v0 = vsel %vm2683_vm1, %v2651_v3, %v2715_v44  ;;  %18571 = vst [vmem:[#allocation41_spill] sm:$0xff] %v18570_v38  ;;  %v3195_v4 = vor.u32 %v3193_v22, %v3192_v57  ;;  %v12001_v3 = vld [vmem:[#allocation3 + $0x180] sm:$0xff]   ;;  %v12002_v15 = vld [vmem:[#allocation3 + $0x1c8] sm:$0xff]  }
 0x2a1   : > { %v2811_v53 = vadd.f32 1.0, %v2747_v0  ;;  %v3573_v17 = vor.u32 %v3571_v62, %v15199_v7  ;;  %vm18574_vm14 = vmmov %vm18572_vm2  ;;  %v11999_v44 = vld [vmem:[#allocation3 + $0x158] sm:$0xff]   ;;  %v15340_v0 = vld [vmem:[#allocation2 + $0x30] sm:$0xff] }
 0x2a2   : > { %v12006_v62 = vld [vmem:[#allocation3 + $0x168] sm:$0xff]   ;;  %v4265_v38 = vld [vmem:[#allocation2 + $0x130] sm:$0xff] }
 0x2a3   : > { %v2843_v24 = vmul.f32 %v2811_v53, %v2779_v5  ;;  %v12004_v53 = vld [vmem:[#allocation3 + $0x160] sm:$0xff]  }
 0x2a5   : > { %v15301_v19 = vpack.c.bf16 %v2843_v24, %v2842_v37  ;;  %v12010_v24 = vld [vmem:[#allocation3 + $0x198] sm:$0xff]  }
 0x2a7   : > { %v3068_v55 = vsel %vm15293_vm5, %v15301_v19, 0  ;;  %3252 = vst [vmem:[#allocation2 + $0x170] sm:$0xff] %v15301_v19  ;;  %v3460_v12 = vsel %vm15297_vm13, %v15301_v19, 0  ;;  %4022 = vmatprep.mubr.bf16.mxu1 %v15301_v19 }
 0x2a8   : > { %v3182_v34 = vshrl.u32 %v3068_v55, 16  ;;  %v3575_v13 = vshll.u32 %v3460_v12, 16  ;;  %v3185_v20 = vshll.u32 %v3068_v55, 16  ;;  %v3579_v11 = vshrl.u32 %v3460_v12, 16  ;;  %v15352_v55 = vld [vmem:[#allocation2 + $0x138] sm:$0xff]  ;;  %v12012_v12 = vld [vmem:[#allocation3 + $0x1e0] sm:$0xff]  }
 0x2aa   : > { %v3184_v21 = vrot.slane %v3182_v34, 7  ;;  %v3577_v27 = vrot.slane %v3575_v13, 1  ;;  %v15358_v34 = vld [vmem:[#allocation2 + $0x68] sm:$0xff]  ;;  %v15361_v13 = vld [vmem:[#allocation2 + $0x158] sm:$0xff] }
 0x2ac   : > { %v3187_v32 = vor.u32 %v3185_v20, %v3184_v21  ;;  %v15314_v58 = vsel %vm18572_vm2, %v3184_v21, %v3195_v4  ;;  %v15317_v51 = vsel %vm18573_vm11, %v3573_v17, %v3577_v27  ;;  %v3581_v39 = vor.u32 %v3579_v11, %v3577_v27  ;;  %v15354_v4 = vld [vmem:[#allocation2 + $0x48] sm:$0xff]  ;;  %v12014_v17 = vld [vmem:[#allocation3 + $0x1e8] sm:$0xff]   ;;  %v12008_v21 = vld [vmem:[#allocation3 + $0x170] sm:$0xff]  }
 0x2ad   : > { %3234 = vst [vmem:[#allocation2 + $0x180] sm:$0xff] %v15314_v58  ;;  %3623 = vst [vmem:[#allocation2 + $0x160] sm:$0xff] %v15317_v51  ;;  %11230 = vmatprep.mubr.bf16.mxu0 %v15317_v51  ;;  %v10328_v52 = vpop.f32.mrb[0].mxu1  ;;  %v12011_v20 = vld [vmem:[#allocation3 + $0x178] sm:$0xff]   ;;  %v15364_v27 = vld [vmem:[#allocation2 + $0x150] sm:$0xff] }
 0x2ae   : > { %v15324_v7 = vsel %vm18574_vm14, %v15177_v42, %v3187_v32  ;;  %v15327_v57 = vsel %vm18575_vm15, %v3581_v39, %v3585_v6  ;;  %v12626_v42 = vld [vmem:[#allocation2 + $0x18] sm:$0xff]  ;;  %v10329_v30 = vpop.f32.mrb[1].mxu1  ;;  %v15366_v32 = vld [vmem:[#allocation2 + $0x60] sm:$0xff] }
 0x2af   : > { %3233 = vst [vmem:[#allocation2 + $0x168] sm:$0xff] %v15324_v7  ;;  %3624 = vst [vmem:[#allocation2 + $0x178] sm:$0xff] %v15327_v57  ;;  %11231 = vmatmul.mubr.bf16.gmra.mrb[60].mxu0 %v15327_v57  ;;  %4023 = vmatmul.mubr.bf16.gmra.mrb[60].mxu1 %v15324_v7  ;;  %v15335_v6 = vld [vmem:[#allocation2 + $0x38] sm:$0xff]  ;;  %v15347_v28 = vadd.f32 %v10329_v30, %v10328_v52  ;;  %v10331_v5 = vpop.f32.mrb[2].mxu1  ;;  %v12016_v39 = vld [vmem:[#allocation3 + $0x1f0] sm:$0xff]  }
 0x2b0   : > { %4503 = vmatprep.mubr.bf16.mxu0 %v12625_v10  ;;  %4583 = vmatprep.mubr.bf16.mxu1 %v15005_v48  ;;  %v12005_v48 = vld [vmem:[#allocation3 + $0x1d0] sm:$0xff]   ;;  %v10332_v37 = vpop.f32.mrb[3].mxu1  ;;  %v12015_v11 = vld [vmem:[#allocation3 + $0x1a8] sm:$0xff]   ;;  %v12018_v52 = vld [vmem:[#allocation3 + $0x1f8] sm:$0xff]  }
 0x2b1   : > { %v15350_v22 = vadd.f32 %v10332_v37, %v10331_v5  ;;  %v15370_v10 = vld [vmem:[#allocation2 + $0x80] sm:$0xff] }
 0x2b7   : > { %4504 = vmatmul.mubr.bf16.vlgmr.msra.gmra.mrb[64].mxu0 %v12626_v42  ;;  %4584 = vmatmul.mubr.bf16.vlgmr.msra.gmra.mrb[64].mxu1 %v15049_v47 }
 0x2b8   : > { %4511 = vmatprep.mubr.bf16.mxu0 %v15335_v6  ;;  %11235 = vmatpush3.bf16.msra.mxu0 %v14961_v16  ;;  %v12009_v16 = vld [vmem:[#allocation3 + $0x1d8] sm:$0xff]  }
 0x2b9   : > { %11236 = vmatprep.subr.bf16.mxu0 %v11997_v36  ;;  %10585 = vmatpush3.bf16.msra.mxu1 %v12001_v3  ;;  %v12017_v3 = vld [vmem:[#allocation3 + $0x1b0] sm:$0xff]  }
 0x2ba   : > { %4591 = vmatprep.mubr.bf16.mxu1 %v15055_v35  ;;  %10586 = vmatprep.subr.bf16.mxu1 %v12002_v15 }
 0x2bc   : > { %11237 = vmatpush3.bf16.msra.mxu0 %v11997_v36  ;;  %v15374_v36 = vld [vmem:[#allocation3 + $0x200] sm:$0xff]  }
 0x2bd   : > { %11238 = vmatprep.subr.bf16.mxu0 %v11998_v60  ;;  %10587 = vmatpush3.bf16.msra.mxu1 %v12003_v18 }
 0x2be   : > { %10588 = vmatprep.subr.bf16.mxu1 %v12005_v48 }
 0x2bf   : > { %4512 = vmatmul.mubr.bf16.gmra.mrb[68].mxu0 %v15340_v0  ;;  %4592 = vmatmul.mubr.bf16.gmra.mrb[68].mxu1 %v15092_v31 }
 0x2c0   : > { %4519 = vmatprep.mubr.bf16.mxu0 %v15344_v14  ;;  %11239 = vmatpush3.bf16.msra.mxu0 %v11998_v60 }
 0x2c1   : > { %11240 = vmatprep.subr.bf16.mxu0 %v11999_v44  ;;  %4599 = vmatprep.mubr.bf16.mxu1 %v15180_v25  ;;  %v12013_v25 = vld [vmem:[#allocation3 + $0x1a0] sm:$0xff]  }
 0x2c2   : > { %10589 = vmatpush3.bf16.msra.mxu1 %v12007_v2 }
 0x2c3   : > { %10590 = vmatprep.subr.bf16.mxu1 %v12009_v16  ;;  %v15382_v16 = vld [vmem:[#allocation2 + $0x98] sm:$0xff] }
 0x2c4   : > { %11241 = vmatpush3.bf16.msra.mxu0 %v11999_v44  ;;  %v12019_v44 = vld [vmem:[#allocation3 + $0x1b8] sm:$0xff]  }
 0x2c5   : > { %11242 = vmatprep.subr.bf16.mxu0 %v12004_v53 }
 0x2c6   : > { %10591 = vmatpush3.bf16.msra.mxu1 %v12010_v24 }
 0x2c7   : > { %4520 = vmatmul.mubr.bf16.gmra.mrb[72].mxu0 %v15354_v4  ;;  %4600 = vmatmul.mubr.bf16.gmra.mrb[72].mxu1 %v15352_v55 }
 0x2c8   : > { %4527 = vmatprep.mubr.bf16.mxu0 %v15358_v34  ;;  %11243 = vmatpush3.bf16.msra.mxu0 %v12004_v53 }
 0x2c9   : > { %11244 = vmatprep.subr.bf16.mxu0 %v12006_v62  ;;  %4607 = vmatprep.mubr.bf16.mxu1 %v15361_v13 }
 0x2ca   : > { %10592 = vmatprep.subr.bf16.mxu1 %v12012_v12  ;;  %v12636_v12 = vld [vmem:[#allocation2 + $0x90] sm:$0xff] }
 0x2cb   : > { %10593 = vmatpush3.bf16.msra.mxu1 %v12013_v25  ;;  %v10334_v15 = vpop.f32.mrb[4].mxu1 }
 0x2cc   : > { %11245 = vmatpush3.bf16.msra.mxu0 %v12006_v62  ;;  %10594 = vmatprep.subr.bf16.mxu1 %v12014_v17  ;;  %v10335_v42 = vpop.f32.mrb[5].mxu1 }
 0x2cd   : > { %11246 = vmatprep.subr.bf16.mxu0 %v12008_v21  ;;  %v15376_v60 = vadd.f32 %v10335_v42, %v10334_v15  ;;  %v10337_v18 = vpop.f32.mrb[6].mxu1 }
 0x2ce   : > { %v10338_v48 = vpop.f32.mrb[7].mxu1 }
 0x2cf   : > { %4528 = vmatmul.mubr.bf16.gmra.mrb[76].mxu0 %v15366_v32  ;;  %4608 = vmatmul.mubr.bf16.gmra.mrb[76].mxu1 %v15364_v27  ;;  %v15379_v2 = vadd.f32 %v10338_v48, %v10337_v18  ;;  %v15411_v48 = vld [vmem:[#allocation2 + $0xc0] sm:$0xff] }
 0x2d0   : > { %4535 = vmatprep.mubr.bf16.mxu0 %v15370_v10  ;;  %11247 = vmatpush3.bf16.msra.mxu0 %v12008_v21 }
 0x2d1   : > { %11248 = vmatprep.subr.bf16.mxu0 %v12011_v20  ;;  %4615 = vmatprep.mubr.bf16.mxu1 %v15301_v19  ;;  %v12634_v19 = vld [vmem:[#allocation2 + $0x78] sm:$0xff] }
 0x2d2   : > { %10595 = vmatpush3.bf16.msra.mxu1 %v12015_v11 }
 0x2d3   : > { %10596 = vmatprep.subr.bf16.mxu1 %v12016_v39  ;;  %v10340_v30 = vpop.f32.mrb[8].mxu1  ;;  %v15399_v39 = vld [vmem:[#allocation2 + $0xa8] sm:$0xff] }
 0x2d4   : > { %11249 = vmatpush3.bf16.msra.mxu0 %v12011_v20  ;;  %v10341_v5 = vpop.f32.mrb[9].mxu1 }
 0x2d5   : > { %11282 = vmatprep.subr.bf16.mxu0 %v15374_v36  ;;  %v15386_v53 = vadd.f32 %v10341_v5, %v10340_v30  ;;  %v10343_v37 = vpop.f32.mrb[10].mxu1 }
 0x2d6   : > { %10597 = vmatpush3.bf16.msra.mxu1 %v12017_v3  ;;  %v10344_v24 = vpop.f32.mrb[11].mxu1 }
 0x2d7   : > { %4536 = vmatmul.mubr.bf16.gmra.mrb[80].mxu0 %v12634_v19  ;;  %4616 = vmatmul.mubr.bf16.gmra.mrb[80].mxu1 %v15324_v7  ;;  %v15388_v62 = vadd.f32 %v10344_v24, %v10343_v37  ;;  %v15391_v7 = vld [vmem:[#allocation2 + $0xb0] sm:$0xff]  ;;  %v15421_v24 = vld [vmem:[#allocation2 + $0xd8] sm:$0xff] }
 0x2d8   : > { %4543 = vmatprep.mubr.bf16.mxu0 %v15382_v16  ;;  %4623 = vmatprep.mubr.bf16.mxu1 %v15248_v8 }
 0x2d9   : > { %10598 = vmatprep.subr.bf16.mxu1 %v12018_v52 }
 0x2da   : > { %10599 = vmatpush3.bf16.msra.mxu1 %v12019_v44 }
 0x2db   : > { %v10346_v8 = vpop.f32.mrb[12].mxu1 }
 0x2dc   : > { %v10347_v25 = vpop.f32.mrb[13].mxu1 }
 0x2dd   : > { %v15395_v17 = vadd.f32 %v10347_v25, %v10346_v8  ;;  %v10349_v21 = vpop.f32.mrb[14].mxu1 }
 0x2de   : > { %v10350_v20 = vpop.f32.mrb[15].mxu1 }
 0x2df   : > { %4544 = vmatmul.mubr.bf16.gmra.mrb[84].mxu0 %v12636_v12  ;;  %4624 = vmatmul.mubr.bf16.gmra.mrb[84].mxu1 %v15314_v58  ;;  %v15397_v11 = vadd.f32 %v10350_v20, %v10349_v21  ;;  %v15403_v58 = vld [vmem:[#allocation2 + $0xc8] sm:$0xff] }
 0x2e0   : > { %4551 = vmatprep.mubr.bf16.mxu0 %v15391_v7  ;;  %5098 = vmatprep.mubr.bf16.mxu1 %v15335_v6 }
 0x2e3   : > { %v10352_v6 = vpop.f32.mrb[16].mxu1 }
 0x2e4   : > { %v10353_v3 = vpop.f32.mrb[17].mxu1 }
 0x2e5   : > { %v15407_v15 = vadd.f32 %v10353_v3, %v10352_v6  ;;  %v10355_v42 = vpop.f32.mrb[18].mxu1  ;;  %v15433_v3 = vld [vmem:[#allocation2 + $0xf0] sm:$0xff] }
 0x2e6   : > { %v10356_v18 = vpop.f32.mrb[19].mxu1 }
 0x2e7   : > { %4552 = vmatmul.mubr.bf16.gmra.mrb[88].mxu0 %v15399_v39  ;;  %5099 = vmatmul.mubr.bf16.vlgmr.msra.gmra.mrb[88].mxu1 %v15340_v0  ;;  %v15409_v52 = vadd.f32 %v10356_v18, %v10355_v42  ;;  %v15415_v0 = vld [vmem:[#allocation2 + $0xe0] sm:$0xff]  ;;  %v12645_v42 = vld [vmem:[#allocation2 + $0x28] sm:$0xff] }
 0x2e8   : > { %4559 = vmatprep.mubr.bf16.mxu0 %v15403_v58  ;;  %5106 = vmatprep.mubr.bf16.mxu1 %v15344_v14 }
 0x2ec   : > { %v10358_v14 = vpop.f32.mrb[20].mxu1 }
 0x2ed   : > { %v10359_v44 = vpop.f32.mrb[21].mxu1 }
 0x2ee   : > { %v15419_v30 = vadd.f32 %v10359_v44, %v10358_v14  ;;  %v10361_v5 = vpop.f32.mrb[22].mxu1 }
 0x2ef   : > { %4560 = vmatmul.mubr.bf16.gmra.mrb[92].mxu0 %v15411_v48  ;;  %5107 = vmatmul.mubr.bf16.gmra.mrb[92].mxu1 %v15354_v4  ;;  %v10362_v37 = vpop.f32.mrb[23].mxu1  ;;  %v15427_v4 = vld [vmem:[#allocation2 + $0xf8] sm:$0xff] }
 0x2f0   : > { %4567 = vmatprep.mubr.bf16.mxu0 %v15415_v0  ;;  %5114 = vmatprep.mubr.bf16.mxu1 %v15358_v34  ;;  %v15425_v8 = vadd.f32 %v10362_v37, %v10361_v5 }
 0x2f4   : > { %v10364_v34 = vpop.f32.mrb[24].mxu1 }
 0x2f5   : > { %v10365_v25 = vpop.f32.mrb[25].mxu1 }
 0x2f6   : > { %v15431_v21 = vadd.f32 %v10365_v25, %v10364_v34  ;;  %v10367_v20 = vpop.f32.mrb[26].mxu1  ;;  %v15441_v34 = vld [vmem:[#allocation2 + $0x40] sm:$0xff] }
 0x2f7   : > { %4568 = vmatmul.mubr.bf16.gmra.mrb[96].mxu0 %v15421_v24  ;;  %5115 = vmatmul.mubr.bf16.gmra.mrb[96].mxu1 %v15366_v32  ;;  %v10368_v6 = vpop.f32.mrb[27].mxu1 }
 0x2f8   : > { %4575 = vmatprep.mubr.bf16.mxu0 %v15427_v4  ;;  %5122 = vmatprep.mubr.bf16.mxu1 %v15370_v10  ;;  %v15436_v32 = vadd.f32 %v10368_v6, %v10367_v20  ;;  %v12021_v10 = vld [vmem:[#allocation3 + $0x208] sm:$0xff]  }
 0x2ff   : > { %4576 = vmatmul.mubr.bf16.gmra.mrb[100].mxu0 %v15433_v3  ;;  %5123 = vmatmul.mubr.bf16.gmra.mrb[100].mxu1 %v12634_v19  ;;  %v15446_v19 = vld [vmem:[#allocation2 + $0x58] sm:$0xff] }
 0x300   : > { %11250 = vmatprep.mubr.bf16.mxu0 %v12645_v42  ;;  %5130 = vmatprep.mubr.bf16.mxu1 %v15382_v16  ;;  %v10370_v18 = vpop.f32.mrb[28].mxu1  ;;  %v12022_v16 = vld [vmem:[#allocation3 + $0x210] sm:$0xff]   ;;  %v12023_v42 = vld [vmem:[#allocation3 + $0x218] sm:$0xff]  }
 0x301   : > { %v10371_v14 = vpop.f32.mrb[29].mxu1 }
 0x302   : > { %v15439_v44 = vadd.f32 %v10371_v14, %v10370_v18  ;;  %v10373_v5 = vpop.f32.mrb[30].mxu1 }
 0x303   : > { %v10374_v37 = vpop.f32.mrb[31].mxu1 }
 0x304   : > { %v15444_v25 = vadd.f32 %v10374_v37, %v10373_v5  ;;  %v15453_v5 = vld [vmem:[#allocation2 + $0x70] sm:$0xff]  ;;  %v15459_v37 = vld [vmem:[#allocation2 + $0x88] sm:$0xff] }
 0x307   : > { %11251 = vmatmul.mubr.bf16.vlgmr.msra.gmra.mrb[32].mxu0 %v15441_v34  ;;  %5131 = vmatmul.mubr.bf16.gmra.mrb[104].mxu1 %v12636_v12 }
 0x308   : > { %11254 = vmatprep.mubr.bf16.mxu0 %v15446_v19  ;;  %11283 = vmatpush3.bf16.msra.mxu0 %v15374_v36  ;;  %v10376_v20 = vpop.f32.mrb[32].mxu1 }
 0x309   : > { %11284 = vmatprep.subr.bf16.mxu0 %v12021_v10  ;;  %5138 = vmatprep.mubr.bf16.mxu1 %v15391_v7  ;;  %v10377_v6 = vpop.f32.mrb[33].mxu1  ;;  %v12024_v7 = vld [vmem:[#allocation3 + $0x220] sm:$0xff]  }
 0x30a   : > { %v15451_v18 = vadd.f32 %v10377_v6, %v10376_v20  ;;  %v10379_v12 = vpop.f32.mrb[34].mxu1  ;;  %v15463_v6 = vld [vmem:[#allocation2 + $0xa0] sm:$0xff] }
 0x30b   : > { %v10380_v14 = vpop.f32.mrb[35].mxu1 }
 0x30c   : > { %11285 = vmatpush3.bf16.msra.mxu0 %v12021_v10  ;;  %v15457_v36 = vadd.f32 %v10380_v14, %v10379_v12  ;;  %v12025_v10 = vld [vmem:[#allocation3 + $0x228] sm:$0xff]  }
 0x30d   : > { %11286 = vmatprep.subr.bf16.mxu0 %v12022_v16  ;;  %v15467_v12 = vld [vmem:[#allocation2 + $0xb8] sm:$0xff] }
 0x30f   : > { %11255 = vmatmul.mubr.bf16.gmra.mrb[36].mxu0 %v15453_v5  ;;  %5139 = vmatmul.mubr.bf16.gmra.mrb[108].mxu1 %v15399_v39 }
 0x310   : > { %11258 = vmatprep.mubr.bf16.mxu0 %v15459_v37  ;;  %11287 = vmatpush3.bf16.msra.mxu0 %v12022_v16 }
 0x311   : > { %11288 = vmatprep.subr.bf16.mxu0 %v12023_v42  ;;  %5146 = vmatprep.mubr.bf16.mxu1 %v15403_v58  ;;  %v12026_v58 = vld [vmem:[#allocation3 + $0x230] sm:$0xff]  }
 0x314   : > { %11289 = vmatpush3.bf16.msra.mxu0 %v12023_v42  ;;  %v10382_v20 = vpop.f32.mrb[36].mxu1 }
 0x315   : > { %11290 = vmatprep.subr.bf16.mxu0 %v12024_v7  ;;  %v10383_v39 = vpop.f32.mrb[37].mxu1 }
 0x316   : > { %v15470_v16 = vadd.f32 %v10383_v39, %v10382_v20  ;;  %v10385_v14 = vpop.f32.mrb[38].mxu1 }
 0x317   : > { %11259 = vmatmul.mubr.bf16.gmra.mrb[40].mxu0 %v15463_v6  ;;  %5147 = vmatmul.mubr.bf16.gmra.mrb[112].mxu1 %v15411_v48  ;;  %v10386_v42 = vpop.f32.mrb[39].mxu1 }
 0x318   : > { %11262 = vmatprep.mubr.bf16.mxu0 %v15467_v12  ;;  %11291 = vmatpush3.bf16.msra.mxu0 %v12024_v7  ;;  %v15473_v9 = vadd.f32 %v10386_v42, %v10385_v14  ;;  %v15476_v7 = vld [vmem:[#allocation2 + $0xe8] sm:$0xff]  ;;  %v4259_v14 = vld [vmem:[#allocation2 + $0x100] sm:$0xff]  ;;  %v4262_v42 = vld [vmem:[#allocation2 + $0x118] sm:$0xff] }
 0x319   : > { %11292 = vmatprep.subr.bf16.mxu0 %v12025_v10  ;;  %5154 = vmatprep.mubr.bf16.mxu1 %v15415_v0 }
 0x31c   : > { %11293 = vmatpush3.bf16.msra.mxu0 %v12025_v10  ;;  %v10388_v48 = vpop.f32.mrb[40].mxu1 }
 0x31d   : > { %11294 = vmatprep.subr.bf16.mxu0 %v12026_v58  ;;  %v10389_v61 = vpop.f32.mrb[41].mxu1 }
 0x31e   : > { %v15479_v20 = vadd.f32 %v10389_v61, %v10388_v48  ;;  %v10391_v0 = vpop.f32.mrb[42].mxu1  ;;  %v4268_v61 = vld [vmem:[#allocation2 + $0x148] sm:$0xff] }
 0x31f   : > { %11263 = vmatmul.mubr.bf16.gmra.mrb[44].mxu0 %v12652_v33  ;;  %5155 = vmatmul.mubr.bf16.gmra.mrb[116].mxu1 %v15421_v24  ;;  %v10392_v10 = vpop.f32.mrb[43].mxu1  ;;  %v12654_v24 = vld [vmem:[#allocation2 + $0x110] sm:$0xff] }
 0x320   : > { %11266 = vmatprep.mubr.bf16.mxu0 %v15476_v7  ;;  %11295 = vmatpush3.bf16.msra.mxu0 %v12026_v58  ;;  %v15482_v39 = vadd.f32 %v10392_v10, %v10391_v0 }
 0x321   : > { %11296 = vmatprep.subr.bf16.mxu0 %v12027_v41  ;;  %5162 = vmatprep.mubr.bf16.mxu1 %v15427_v4 }
 0x324   : > { %11297 = vmatpush3.bf16.msra.mxu0 %v12027_v41  ;;  %v4859_v41 = vld [vmem:[#allocation2 + $0x140] sm:$0xff] }
 0x327   : > { %11267 = vmatmul.mubr.bf16.gmra.mrb[48].mxu0 %v4259_v14  ;;  %5163 = vmatmul.mubr.bf16.gmra.mrb[120].mxu1 %v15433_v3 }
 0x328   : > { %11270 = vmatprep.mubr.bf16.mxu0 %v4262_v42  ;;  %5170 = vmatprep.mubr.bf16.mxu1 %v12654_v24 }
 0x32f   : > { %11271 = vmatmul.mubr.bf16.gmra.mrb[52].mxu0 %v4265_v38  ;;  %5171 = vmatmul.mubr.bf16.gmra.mrb[124].mxu1 %v15049_v47 }
 0x330   : > { %11274 = vmatprep.mubr.bf16.mxu0 %v4268_v61  ;;  %5178 = vmatprep.mubr.bf16.mxu1 %v15055_v35 }
 0x337   : > { %11275 = vmatmul.mubr.bf16.gmra.mrb[56].mxu0 %v15317_v51  ;;  %5179 = vmatmul.mubr.bf16.gmra.mrb[128].mxu1 %v15092_v31  ;;  %v10394_v4 = vpop.f32.mrb[44].mxu1 }
 0x338   : > { %11278 = vmatprep.mubr.bf16.mxu0 %v15327_v57  ;;  %5186 = vmatprep.mubr.bf16.mxu1 %v4859_v41  ;;  %v10395_v3 = vpop.f32.mrb[45].mxu1  ;;  %v4865_v41 = vld [vmem:[#allocation2 + $0x170] sm:$0xff] }
 0x339   : > { %v15490_v58 = vadd.f32 %v10395_v3, %v10394_v4  ;;  %v10397_v48 = vpop.f32.mrb[46].mxu1 }
 0x33a   : > { %v10398_v0 = vpop.f32.mrb[47].mxu1 }
 0x33b   : > { %v15492_v10 = vadd.f32 %v10398_v0, %v10397_v48 }
 0x33f   : > { %11279 = vmatmul.mubr.bf16.gmra.mrb[60].mxu0 %v15285_v49  ;;  %5187 = vmatmul.mubr.bf16.gmra.mrb[132].mxu1 %v15352_v55  ;;  %v10400_v47 = vpop.f32.mrb[48].mxu1  ;;  %v4864_v49 = vld [vmem:[#allocation2 + $0x168] sm:$0xff] }
 0x340   : > { %11298 = vmatprep.mubr.bf16.mxu0 %v15441_v34  ;;  %5194 = vmatprep.mubr.bf16.mxu1 %v15361_v13  ;;  %v10401_v35 = vpop.f32.mrb[49].mxu1  ;;  %v4868_v55 = vld [vmem:[#allocation2 + $0x188] sm:$0xff]  ;;  %v4867_v13 = vld [vmem:[#allocation2 + $0x180] sm:$0xff] }
 0x341   : > { %v15498_v31 = vadd.f32 %v10401_v35, %v10400_v47  ;;  %v10403_v51 = vpop.f32.mrb[50].mxu1  ;;  %v4863_v35 = vld [vmem:[#allocation2 + $0x160] sm:$0xff] }
 0x342   : > { %v10404_v57 = vpop.f32.mrb[51].mxu1 }
 0x343   : > { %v15500_v24 = vadd.f32 %v10404_v57, %v10403_v51 }
 0x347   : > { %11299 = vmatmul.mubr.bf16.vlgmr.msra.gmra.mrb[32].mxu0 %v15446_v19  ;;  %5195 = vmatmul.mubr.bf16.gmra.mrb[136].mxu1 %v15364_v27  ;;  %v4870_v19 = vld [vmem:[#allocation2 + $0x198] sm:$0xff] }
 0x348   : > { %11302 = vmatprep.mubr.bf16.mxu0 %v15453_v5  ;;  %5202 = vmatprep.mubr.bf16.mxu1 %v4865_v41 }
 0x34f   : > { %11303 = vmatmul.mubr.bf16.gmra.mrb[36].mxu0 %v15459_v37  ;;  %5203 = vmatmul.mubr.bf16.gmra.mrb[140].mxu1 %v4864_v49 }
 0x350   : > { %11306 = vmatprep.mubr.bf16.mxu0 %v15463_v6  ;;  %5210 = vmatprep.mubr.bf16.mxu1 %v4868_v55 }
 0x357   : > { %11307 = vmatmul.mubr.bf16.gmra.mrb[40].mxu0 %v15467_v12  ;;  %5211 = vmatmul.mubr.bf16.gmra.mrb[144].mxu1 %v4867_v13 }
 0x358   : > { %11310 = vmatprep.mubr.bf16.mxu0 %v12652_v33  ;;  %5218 = vmatprep.mubr.bf16.mxu1 %v15127_v26 }
 0x35c   : > { %v10406_v27 = vpop.f32.mrb[52].mxu1 }
 0x35d   : > { %v10407_v34 = vpop.f32.mrb[53].mxu1 }
 0x35e   : > { %v15509_v5 = vadd.f32 %v10407_v34, %v10406_v27  ;;  %v10409_v4 = vpop.f32.mrb[54].mxu1 }
 0x35f   : > { %11311 = vmatmul.mubr.bf16.gmra.mrb[44].mxu0 %v15476_v7  ;;  %5219 = vmatmul.mubr.bf16.gmra.mrb[148].mxu1 %v4870_v19  ;;  %v10410_v37 = vpop.f32.mrb[55].mxu1  ;;  %v4866_v7 = vld [vmem:[#allocation2 + $0x178] sm:$0xff] }
 0x360   : > { %11314 = vmatprep.mubr.bf16.mxu0 %v4259_v14  ;;  %v15512_v6 = vadd.f32 %v10410_v37, %v10409_v4  ;;  %6919 = vmatprep.mubr.bf16.mxu1 %v15127_v26  ;;  %v4869_v14 = vld [vmem:[#allocation2 + $0x190] sm:$0xff] }
 0x364   : > { %v10412_v12 = vpop.f32.mrb[56].mxu1 }
 0x365   : > { %v10413_v3 = vpop.f32.mrb[57].mxu1 }
 0x366   : > { %v15515_v33 = vadd.f32 %v10413_v3, %v10412_v12  ;;  %v10415_v48 = vpop.f32.mrb[58].mxu1 }
 0x367   : > { %11315 = vmatmul.mubr.bf16.gmra.mrb[48].mxu0 %v4262_v42  ;;  %v10416_v0 = vpop.f32.mrb[59].mxu1 }
 0x368   : > { %11318 = vmatprep.mubr.bf16.mxu0 %v4265_v38  ;;  %v15517_v47 = vadd.f32 %v10416_v0, %v10415_v48  ;;  %v15527_v38 = vld [vmem:[%s18275_s4] ss:$0 sm:$0xff] }
 0x369   : > { %v11622_v12 = vadd.f32 %v15479_v20, %v15527_v38  ;;  %v11550_v0 = vadd.f32 %v15350_v22, %v15527_v38  ;;  %v11538_v22 = vadd.f32 %v15376_v60, %v15527_v38 }
 0x36f   : > { %11319 = vmatmul.mubr.bf16.gmra.mrb[52].mxu0 %v4268_v61 }
 0x370   : > { %11322 = vmatprep.mubr.bf16.mxu0 %v4863_v35 }
 0x377   : > { %11323 = vmatmul.mubr.bf16.gmra.mrb[56].mxu0 %v4866_v7  ;;  %v11630_v7 = vadd.f32 %v15482_v39, %v15527_v38 }
 0x378   : > { %11326 = vmatprep.mubr.bf16.mxu0 %v4869_v14 }
 0x37f   : > { %11327 = vmatmul.mubr.bf16.gmra.mrb[60].mxu0 %v15127_v26  ;;  %v11542_v26 = vadd.f32 %v15347_v28, %v15527_v38 }
 0x382   : > { %v10418_v51 = vpop.f32.mrb[60].mxu1 }
 0x383   : > { %v10419_v57 = vpop.f32.mrb[61].mxu1 }
 0x384   : > { %v15520_v41 = vadd.f32 %v10419_v57, %v10418_v51  ;;  %v10421_v49 = vpop.f32.mrb[62].mxu1 }
 0x385   : > { %v10422_v55 = vpop.f32.mrb[63].mxu1 }
 0x386   : > { %v15522_v42 = vadd.f32 %v10422_v55, %v10421_v49 }
 0x38a   : > { %v10464_v61 = vpop.f32.mrb[64].mxu0  ;;  %v10524_v13 = vpop.f32.mrb[64].mxu1 }
 0x38b   : > { %v10465_v27 = vpop.f32.mrb[65].mxu0  ;;  %v10525_v34 = vpop.f32.mrb[65].mxu1 }
 0x38c   : > { %v10466_v19 = vadd.f32 %v10465_v27, %v10464_v61  ;;  %v10467_v4 = vpop.f32.mrb[66].mxu0  ;;  %v10526_v37 = vadd.f32 %v10525_v34, %v10524_v13  ;;  %v10527_v3 = vpop.f32.mrb[66].mxu1 }
 0x38d   : > { %v10468_v48 = vpop.f32.mrb[67].mxu0  ;;  %v10528_v35 = vpop.f32.mrb[67].mxu1 }
 0x38e   : > { %v15537_v14 = vadd.f32 %v11542_v26, %v10466_v19  ;;  %v10469_v51 = vadd.f32 %v10468_v48, %v10467_v4  ;;  %v15539_v57 = vadd.f32 %v11622_v12, %v10526_v37  ;;  %v10529_v28 = vadd.f32 %v10528_v35, %v10527_v3 }
 0x38f   : > { %v11618_v19 = vadd.f32 %v15490_v58, %v15527_v38  ;;  %v11546_v37 = vadd.f32 %v15379_v2, %v15527_v38  ;;  %v11626_v3 = vadd.f32 %v15492_v10, %v15527_v38  ;;  %v11558_v2 = vadd.f32 %v15386_v53, %v15527_v38 }
 0x390   : > { %18576 = vst [vmem:[#allocation42_spill] sm:$0xff] %v15539_v57  ;;  %v15541_v49 = vadd.f32 %v11550_v0, %v10469_v51  ;;  %v15543_v55 = vadd.f32 %v11630_v7, %v10529_v28 }
 0x392   : > { %18577 = vst [vmem:[#allocation43_spill] sm:$0xff] %v15543_v55  ;;  %v10470_v20 = vpop.f32.mrb[68].mxu0  ;;  %v10530_v61 = vpop.f32.mrb[68].mxu1 }
 0x393   : > { %v10471_v13 = vpop.f32.mrb[69].mxu0  ;;  %v10531_v27 = vpop.f32.mrb[69].mxu1 }
 0x394   : > { %v10472_v34 = vadd.f32 %v10471_v13, %v10470_v20  ;;  %v10473_v63 = vpop.f32.mrb[70].mxu0  ;;  %v10532_v39 = vadd.f32 %v10531_v27, %v10530_v61  ;;  %v10533_v26 = vpop.f32.mrb[70].mxu1 }
 0x395   : > { %v10474_v4 = vpop.f32.mrb[71].mxu0  ;;  %v10534_v12 = vpop.f32.mrb[71].mxu1 }
 0x396   : > { %v15553_v48 = vadd.f32 %v11538_v22, %v10472_v34  ;;  %v10475_v0 = vadd.f32 %v10474_v4, %v10473_v63  ;;  %v15555_v35 = vadd.f32 %v11618_v19, %v10532_v39  ;;  %v10535_v60 = vadd.f32 %v10534_v12, %v10533_v26 }
 0x397   : > { %v11638_v63 = vadd.f32 %v15498_v31, %v15527_v38  ;;  %v11566_v39 = vadd.f32 %v15388_v62, %v15527_v38  ;;  %v11646_v26 = vadd.f32 %v15500_v24, %v15527_v38  ;;  %v11554_v62 = vadd.f32 %v15395_v17, %v15527_v38 }
 0x398   : > { %18578 = vst [vmem:[#allocation44_spill] sm:$0xff] %v15555_v35  ;;  %v15557_v7 = vadd.f32 %v11546_v37, %v10475_v0  ;;  %v15559_v51 = vadd.f32 %v11626_v3, %v10535_v60 }
 0x39a   : > { %18579 = vst [vmem:[#allocation45_spill] sm:$0xff] %v15559_v51  ;;  %v10476_v58 = vpop.f32.mrb[72].mxu0  ;;  %v10536_v28 = vpop.f32.mrb[72].mxu1 }
 0x39b   : > { %v10477_v20 = vpop.f32.mrb[73].mxu0  ;;  %v10537_v61 = vpop.f32.mrb[73].mxu1 }
 0x39c   : > { %v10478_v13 = vadd.f32 %v10477_v20, %v10476_v58  ;;  %v10479_v27 = vpop.f32.mrb[74].mxu0  ;;  %v10538_v10 = vadd.f32 %v10537_v61, %v10536_v28  ;;  %v10539_v34 = vpop.f32.mrb[74].mxu1 }
 0x39d   : > { %v10480_v22 = vpop.f32.mrb[75].mxu0  ;;  %v10540_v19 = vpop.f32.mrb[75].mxu1 }
 0x39e   : > { %v15569_v4 = vadd.f32 %v11558_v2, %v10478_v13  ;;  %v10481_v37 = vadd.f32 %v10480_v22, %v10479_v27  ;;  %v15571_v12 = vadd.f32 %v11638_v63, %v10538_v10  ;;  %v10541_v53 = vadd.f32 %v10540_v19, %v10539_v34 }
 0x39f   : > { %v11634_v13 = vadd.f32 %v15509_v5, %v15527_v38  ;;  %v11562_v10 = vadd.f32 %v15397_v11, %v15527_v38  ;;  %v11642_v34 = vadd.f32 %v15512_v6, %v15527_v38  ;;  %v11574_v11 = vadd.f32 %v15407_v15, %v15527_v38 }
 0x3a0   : > { %18580 = vst [vmem:[#allocation46_spill] sm:$0xff] %v15571_v12  ;;  %v15573_v3 = vadd.f32 %v11566_v39, %v10481_v37  ;;  %v15575_v0 = vadd.f32 %v11646_v26, %v10541_v53  ;;  %v11654_v6 = vadd.f32 %v15515_v33, %v15527_v38 }
 0x3a2   : > { %18581 = vst [vmem:[#allocation47_spill] sm:$0xff] %v15575_v0  ;;  %v10482_v31 = vpop.f32.mrb[76].mxu0  ;;  %v10542_v60 = vpop.f32.mrb[76].mxu1 }
 0x3a3   : > { %v10483_v58 = vpop.f32.mrb[77].mxu0  ;;  %v10543_v28 = vpop.f32.mrb[77].mxu1 }
 0x3a4   : > { %v10484_v20 = vadd.f32 %v10483_v58, %v10482_v31  ;;  %v10485_v61 = vpop.f32.mrb[78].mxu0  ;;  %v10544_v24 = vadd.f32 %v10543_v28, %v10542_v60  ;;  %v10545_v2 = vpop.f32.mrb[78].mxu1 }
 0x3a5   : > { %v10486_v27 = vpop.f32.mrb[79].mxu0  ;;  %v10546_v63 = vpop.f32.mrb[79].mxu1 }
 0x3a6   : > { %v15585_v22 = vadd.f32 %v11554_v62, %v10484_v20  ;;  %v10487_v39 = vadd.f32 %v10486_v27, %v10485_v61  ;;  %v15587_v19 = vadd.f32 %v11634_v13, %v10544_v24  ;;  %v10547_v17 = vadd.f32 %v10546_v63, %v10545_v2 }
 0x3a7   : > { %v11582_v24 = vadd.f32 %v15409_v52, %v15527_v38  ;;  %v11662_v13 = vadd.f32 %v15517_v47, %v15527_v38  ;;  %v11570_v52 = vadd.f32 %v15419_v30, %v15527_v38 }
 0x3a8   : > { %18582 = vst [vmem:[#allocation48_spill] sm:$0xff] %v15587_v19  ;;  %v15589_v26 = vadd.f32 %v11562_v10, %v10487_v39  ;;  %v15591_v37 = vadd.f32 %v11642_v34, %v10547_v17  ;;  %v12035_v19 = vld [vmem:[#allocation5 + $0x88] sm:$0xff]  }
 0x3aa   : > { %18583 = vst [vmem:[#allocation49_spill] sm:$0xff] %v15591_v37  ;;  %v10488_v5 = vpop.f32.mrb[80].mxu0  ;;  %v10548_v53 = vpop.f32.mrb[80].mxu1 }
 0x3ab   : > { %v10489_v31 = vpop.f32.mrb[81].mxu0  ;;  %v10549_v60 = vpop.f32.mrb[81].mxu1 }
 0x3ac   : > { %v10490_v58 = vadd.f32 %v10489_v31, %v10488_v5  ;;  %v10491_v28 = vpop.f32.mrb[82].mxu0  ;;  %v10550_v20 = vadd.f32 %v10549_v60, %v10548_v53  ;;  %v10551_v62 = vpop.f32.mrb[82].mxu1  ;;  %v11650_v60 = vadd.f32 %v15520_v41, %v15527_v38 }
 0x3ad   : > { %v10492_v61 = vpop.f32.mrb[83].mxu0  ;;  %v10552_v2 = vpop.f32.mrb[83].mxu1 }
 0x3ae   : > { %v15601_v27 = vadd.f32 %v11574_v11, %v10490_v58  ;;  %v10493_v10 = vadd.f32 %v10492_v61, %v10491_v28  ;;  %v15603_v63 = vadd.f32 %v11654_v6, %v10550_v20  ;;  %v10553_v15 = vadd.f32 %v10552_v2, %v10551_v62 }
 0x3af   : > { %v11578_v6 = vadd.f32 %v15425_v8, %v15527_v38  ;;  %v11658_v20 = vadd.f32 %v15522_v42, %v15527_v38  ;;  %v11590_v8 = vadd.f32 %v15431_v21, %v15527_v38 }
 0x3b0   : > { %18584 = vst [vmem:[#allocation50_spill] sm:$0xff] %v15603_v63  ;;  %v15605_v34 = vadd.f32 %v11582_v24, %v10493_v10  ;;  %v15607_v39 = vadd.f32 %v11662_v13, %v10553_v15 }
 0x3b2   : > { %18585 = vst [vmem:[#allocation51_spill] sm:$0xff] %v15607_v39  ;;  %v10494_v33 = vpop.f32.mrb[84].mxu0  ;;  %v10554_v17 = vpop.f32.mrb[84].mxu1 }
 0x3b3   : > { %v10495_v5 = vpop.f32.mrb[85].mxu0  ;;  %v10555_v53 = vpop.f32.mrb[85].mxu1 }
 0x3b4   : > { %v10496_v31 = vadd.f32 %v10495_v5, %v10494_v33  ;;  %v10497_v47 = vpop.f32.mrb[86].mxu0  ;;  %v10556_v58 = vadd.f32 %v10555_v53, %v10554_v17  ;;  %v10557_v11 = vpop.f32.mrb[86].mxu1 }
 0x3b5   : > { %v10498_v28 = vpop.f32.mrb[87].mxu0  ;;  %v10558_v62 = vpop.f32.mrb[87].mxu1 }
 0x3b6   : > { %v15617_v61 = vadd.f32 %v11570_v52, %v10496_v31  ;;  %v10499_v24 = vadd.f32 %v10498_v28, %v10497_v47  ;;  %v15619_v13 = vadd.f32 %v11650_v60, %v10556_v58  ;;  %v10559_v30 = vadd.f32 %v10558_v62, %v10557_v11 }
 0x3b7   : > { %v11598_v47 = vadd.f32 %v15436_v32, %v15527_v38  ;;  %v11586_v32 = vadd.f32 %v15439_v44, %v15527_v38 }
 0x3b8   : > { %18586 = vst [vmem:[#allocation52_spill] sm:$0xff] %v15619_v13  ;;  %v15621_v2 = vadd.f32 %v11578_v6, %v10499_v24  ;;  %v15623_v10 = vadd.f32 %v11658_v20, %v10559_v30 }
 0x3ba   : > { %18587 = vst [vmem:[#allocation53_spill] sm:$0xff] %v15623_v10  ;;  %v10500_v41 = vpop.f32.mrb[88].mxu0  ;;  %v10600_v15 = vpop.f32.mrb[88].mxu1 }
 0x3bb   : > { %v10501_v33 = vpop.f32.mrb[89].mxu0  ;;  %v10601_v17 = vpop.f32.mrb[89].mxu1 }
 0x3bc   : > { %v10502_v5 = vadd.f32 %v10501_v33, %v10500_v41  ;;  %v10503_v42 = vpop.f32.mrb[90].mxu0  ;;  %v10602_v53 = vadd.f32 %v10601_v17, %v10600_v15  ;;  %v10603_v31 = vpop.f32.mrb[90].mxu1 }
 0x3bd   : > { %v10504_v52 = vpop.f32.mrb[91].mxu0  ;;  %v10604_v60 = vpop.f32.mrb[91].mxu1 }
 0x3be   : > { %v15629_v58 = vadd.f32 %v11590_v8, %v10502_v5  ;;  %v10505_v11 = vadd.f32 %v10504_v52, %v10503_v42  ;;  %v10605_v28 = vadd.f32 %v10604_v60, %v10603_v31  ;;  %v15632_v6 = vadd.f32 %v15537_v14, %v10602_v53 }
 0x3bf   : > { %v11594_v14 = vadd.f32 %v15444_v25, %v15527_v38  ;;  %v11606_v25 = vadd.f32 %v15451_v18, %v15527_v38 }
 0x3c0   : > { %v15634_v20 = vadd.f32 %v11598_v47, %v10505_v11  ;;  %v15637_v62 = vadd.f32 %v15541_v49, %v10605_v28 }
 0x3c2   : > { %v10506_v21 = vpop.f32.mrb[92].mxu0  ;;  %v10606_v24 = vpop.f32.mrb[92].mxu1 }
 0x3c3   : > { %v10507_v30 = vpop.f32.mrb[93].mxu0  ;;  %v10607_v41 = vpop.f32.mrb[93].mxu1 }
 0x3c4   : > { %v10508_v15 = vadd.f32 %v10507_v30, %v10506_v21  ;;  %v10509_v33 = vpop.f32.mrb[94].mxu0  ;;  %v10608_v17 = vadd.f32 %v10607_v41, %v10606_v24  ;;  %v10609_v5 = vpop.f32.mrb[94].mxu1 }
 0x3c5   : > { %v10510_v8 = vpop.f32.mrb[95].mxu0  ;;  %v10610_v42 = vpop.f32.mrb[95].mxu1 }
 0x3c6   : > { %v15643_v53 = vadd.f32 %v11586_v32, %v10508_v15  ;;  %v10511_v49 = vadd.f32 %v10510_v8, %v10509_v33  ;;  %v10611_v31 = vadd.f32 %v10610_v42, %v10609_v5  ;;  %v15646_v52 = vadd.f32 %v15553_v48, %v10608_v17 }
 0x3c7   : > { %v11614_v48 = vadd.f32 %v15457_v36, %v15527_v38  ;;  %v11602_v36 = vadd.f32 %v15470_v16, %v15527_v38 }
 0x3c8   : > { %v15648_v47 = vadd.f32 %v11594_v14, %v10511_v49  ;;  %v15651_v60 = vadd.f32 %v15557_v7, %v10611_v31 }
 0x3ca   : > { %v10512_v44 = vpop.f32.mrb[96].mxu0  ;;  %v10612_v11 = vpop.f32.mrb[96].mxu1 }
 0x3cb   : > { %v10513_v28 = vpop.f32.mrb[97].mxu0  ;;  %v10613_v21 = vpop.f32.mrb[97].mxu1 }
 0x3cc   : > { %v10514_v24 = vadd.f32 %v10513_v28, %v10512_v44  ;;  %v10515_v30 = vpop.f32.mrb[98].mxu0  ;;  %v10614_v41 = vadd.f32 %v10613_v21, %v10612_v11  ;;  %v10615_v15 = vpop.f32.mrb[98].mxu1 }
 0x3cd   : > { %v10516_v32 = vpop.f32.mrb[99].mxu0  ;;  %v10616_v33 = vpop.f32.mrb[99].mxu1 }
 0x3ce   : > { %v11607_v17 = vadd.f32 %v11606_v25, %v10514_v24  ;;  %v10517_v5 = vadd.f32 %v10516_v32, %v10515_v30  ;;  %v10617_v7 = vadd.f32 %v10616_v33, %v10615_v15  ;;  %v15658_v8 = vadd.f32 %v15569_v4, %v10614_v41 }
 0x3cf   : > { %v11610_v4 = vadd.f32 %v15473_v9, %v15527_v38 }
 0x3d0   : > { %v15660_v14 = vadd.f32 %v11614_v48, %v10517_v5  ;;  %v15663_v42 = vadd.f32 %v15573_v3, %v10617_v7 }
 0x3d2   : > { %v10518_v18 = vpop.f32.mrb[100].mxu0  ;;  %v10618_v49 = vpop.f32.mrb[100].mxu1 }
 0x3d3   : > { %v10519_v31 = vpop.f32.mrb[101].mxu0  ;;  %v10619_v44 = vpop.f32.mrb[101].mxu1 }
 0x3d4   : > { %v10520_v11 = vadd.f32 %v10519_v31, %v10518_v18  ;;  %v10521_v28 = vpop.f32.mrb[102].mxu0  ;;  %v10620_v21 = vadd.f32 %v10619_v44, %v10618_v49  ;;  %v10621_v24 = vpop.f32.mrb[102].mxu1 }
 0x3d5   : > { %v10522_v25 = vpop.f32.mrb[103].mxu0  ;;  %v10622_v30 = vpop.f32.mrb[103].mxu1 }
 0x3d6   : > { %v11603_v41 = vadd.f32 %v11602_v36, %v10520_v11  ;;  %v10523_v15 = vadd.f32 %v10522_v25, %v10521_v28  ;;  %v10623_v3 = vadd.f32 %v10622_v30, %v10621_v24  ;;  %v15670_v32 = vadd.f32 %v15585_v22, %v10620_v21 }
 0x3d8   : > { %v11611_v48 = vadd.f32 %v11610_v4, %v10523_v15  ;;  %v15673_v33 = vadd.f32 %v15589_v26, %v10623_v3 }
 0x3da   : > { %v10624_v5 = vpop.f32.mrb[104].mxu1 }
 0x3db   : > { %v10625_v16 = vpop.f32.mrb[105].mxu1 }
 0x3dc   : > { %v10626_v7 = vadd.f32 %v10625_v16, %v10624_v5  ;;  %v10627_v18 = vpop.f32.mrb[106].mxu1 }
 0x3dd   : > { %v10628_v49 = vpop.f32.mrb[107].mxu1 }
 0x3de   : > { %v10629_v31 = vadd.f32 %v10628_v49, %v10627_v18  ;;  %v15676_v44 = vadd.f32 %v15601_v27, %v10626_v7 }
 0x3e0   : > { %v15679_v9 = vadd.f32 %v15605_v34, %v10629_v31 }
 0x3e2   : > { %v10630_v38 = vpop.f32.mrb[108].mxu1 }
 0x3e3   : > { %v10631_v11 = vpop.f32.mrb[109].mxu1 }
 0x3e4   : > { %v10632_v22 = vadd.f32 %v10631_v11, %v10630_v38  ;;  %v10633_v36 = vpop.f32.mrb[110].mxu1 }
 0x3e5   : > { %v10634_v28 = vpop.f32.mrb[111].mxu1 }
 0x3e6   : > { %v10635_v21 = vadd.f32 %v10634_v28, %v10633_v36  ;;  %v15682_v26 = vadd.f32 %v15617_v61, %v10632_v22 }
 0x3e8   : > { %v15685_v24 = vadd.f32 %v15621_v2, %v10635_v21 }
 0x3ea   : > { %v10636_v25 = vpop.f32.mrb[112].mxu1 }
 0x3eb   : > { %v10637_v4 = vpop.f32.mrb[113].mxu1 }
 0x3ec   : > { %v10638_v30 = vadd.f32 %v10637_v4, %v10636_v25  ;;  %v10639_v27 = vpop.f32.mrb[114].mxu1  ;;  %v12028_v25 = vld [vmem:[#allocation5 + $0x40] sm:$0xff]  }
 0x3ed   : > { %v10640_v15 = vpop.f32.mrb[115].mxu1  ;;  %v12029_v4 = vld [vmem:[#allocation5] sm:$0xff]   ;;  %10720 = vmatprep.subr.bf16.mxu1 %v12028_v25 }
 0x3ee   : > { %v10641_v3 = vadd.f32 %v10640_v15, %v10639_v27  ;;  %v15688_v34 = vadd.f32 %v15629_v58, %v10638_v30  ;;  %10721 = vmatpush3.bf16.msra.mxu1 %v12029_v4 }
 0x3f0   : > { %v15691_v5 = vadd.f32 %v15634_v20, %v10641_v3 }
 0x3f2   : > { %18588 = vst [vmem:[#allocation54_spill] sm:$0xff] %v15691_v5  ;;  %v10642_v16 = vpop.f32.mrb[116].mxu1 }
 0x3f3   : > { %v10643_v7 = vpop.f32.mrb[117].mxu1 }
 0x3f4   : > { %v10644_v18 = vadd.f32 %v10643_v7, %v10642_v16  ;;  %v10645_v61 = vpop.f32.mrb[118].mxu1 }
 0x3f5   : > { %v10646_v49 = vpop.f32.mrb[119].mxu1 }
 0x3f6   : > { %v10647_v31 = vadd.f32 %v10646_v49, %v10645_v61  ;;  %v15694_v2 = vadd.f32 %v15643_v53, %v10644_v18  ;;  %v12030_v18 = vld [vmem:[#allocation5 + $0x80] sm:$0xff]  }
 0x3f7   : > { %11330 = vmatprep.subr.bf16.mxu0 %v12030_v18 }
 0x3f8   : > { %v15697_v38 = vadd.f32 %v15648_v47, %v10647_v31  ;;  %11331 = vmatpush3.bf16.msra.mxu0 %v12030_v18 }
 0x3f9   : > { %11332 = vmatprep.subr.bf16.mxu0 %v12035_v19 }
 0x3fa   : > { %v10648_v11 = vpop.f32.mrb[120].mxu1 }
 0x3fb   : > { %v10649_v22 = vpop.f32.mrb[121].mxu1 }
 0x3fc   : > { %v10650_v36 = vadd.f32 %v10649_v22, %v10648_v11  ;;  %v10651_v58 = vpop.f32.mrb[122].mxu1  ;;  %11333 = vmatpush3.bf16.msra.mxu0 %v12035_v19 }
 0x3fd   : > { %v10652_v28 = vpop.f32.mrb[123].mxu1 }
 0x3fe   : > { %v10653_v21 = vadd.f32 %v10652_v28, %v10651_v58  ;;  %v15699_v20 = vadd.f32 %v11607_v17, %v10650_v36 }
 0x400   : > { %18589 = vst [vmem:[#allocation55_spill] sm:$0xff] %v15699_v20  ;;  %v15704_v7 = vadd.f32 %v15660_v14, %v10653_v21 }
 0x402   : > { %v10654_v30 = vpop.f32.mrb[124].mxu1  ;;  %18591 = vst [vmem:[#allocation57_spill] sm:$0xff] %v15704_v7 }
 0x403   : > { %v10655_v27 = vpop.f32.mrb[125].mxu1 }
 0x404   : > { %v10656_v15 = vadd.f32 %v10655_v27, %v10654_v30  ;;  %v10657_v3 = vpop.f32.mrb[126].mxu1 }
 0x405   : > { %v10658_v47 = vpop.f32.mrb[127].mxu1 }
 0x406   : > { %v15701_v53 = vadd.f32 %v11603_v41, %v10656_v15  ;;  %v10659_v16 = vadd.f32 %v10658_v47, %v10657_v3  ;;  %v12031_v47 = vld [vmem:[#allocation5 + $0x48] sm:$0xff]  }
 0x407   : > { %10722 = vmatprep.subr.bf16.mxu1 %v12031_v47 }
 0x408   : > { %18590 = vst [vmem:[#allocation56_spill] sm:$0xff] %v15701_v53  ;;  %v15706_v61 = vadd.f32 %v11611_v48, %v10659_v16 }
 0x40a   : > { %18592 = vst [vmem:[#allocation58_spill] sm:$0xff] %v15706_v61 }
 0x41a   : > { %v11300_v17 = vpop.f32.mrb[32].mxu0 }
 0x41b   : > { %v11541_v49 = vadd.f32 %v15646_v52, %v11300_v17  ;;  %v5261_v31 = vpop.f32.mrb[33].mxu0  ;;  %v12032_v17 = vld [vmem:[#allocation5 + $0x8] sm:$0xff]  }
 0x41c   : > { %v11545_v11 = vadd.f32 %v15632_v6, %v5261_v31  ;;  %v11301_v22 = vpop.f32.mrb[34].mxu0  ;;  %10723 = vmatpush3.bf16.msra.mxu1 %v12032_v17 }
 0x41d   : > { %v15710_v41 = vmul.f32 0.70710677, %v11541_v49  ;;  %v11549_v36 = vadd.f32 %v15651_v60, %v11301_v22  ;;  %v5264_v58 = vpop.f32.mrb[35].mxu0  ;;  %10724 = vmatprep.subr.bf16.mxu1 %v12033_v59 }
 0x41e   : > { %v15713_v28 = vmul.f32 0.70710677, %v11545_v11  ;;  %v11553_v14 = vadd.f32 %v15637_v62, %v5264_v58 }
 0x41f   : > { %v5454_v48 = vand.u32 2147483647, %v15710_v41  ;;  %v15717_v21 = vmul.f32 0.70710677, %v11549_v36  ;;  %vm6062_vm1 = vcmp.ge.f32.partialorder %v15710_v41, 0.0 }
 0x420   : > { %v5452_v52 = vand.u32 2147483647, %v15713_v28  ;;  %v15720_v25 = vmul.f32 0.70710677, %v11553_v14  ;;  %vm6060_vm2 = vcmp.ge.f32.partialorder %v15713_v28, 0.0 }
 0x421   : > { %v5486_v4 = vmul.f32 0.3275911, %v5454_v48  ;;  %v5455_v6 = vand.u32 2147483647, %v15717_v21  ;;  %v5870_v31 = vsub.f32 0.0, %v5454_v48  ;;  %vm6063_vm11 = vcmp.ge.f32.partialorder %v15717_v21, 0.0 }
 0x422   : > { %v5484_v30 = vmul.f32 0.3275911, %v5452_v52  ;;  %v5453_v27 = vand.u32 2147483647, %v15720_v25  ;;  %v11304_v3 = vpop.f32.mrb[36].mxu0  ;;  %v5868_v45 = vsub.f32 0.0, %v5452_v52 }
 0x423   : > { %v5518_v60 = vadd.f32 1.0, %v5486_v4  ;;  %v5487_v15 = vmul.f32 0.3275911, %v5455_v6  ;;  %v5277_v18 = vpop.f32.mrb[37].mxu0  ;;  %v15725_v4 = vadd.f32 %v15670_v32, %v11304_v3  ;;  %v15742_v32 = vpop.f32.mrb[128].mxu1  ;;  %vm6061_vm14 = vcmp.ge.f32.partialorder %v15720_v25, 0.0 }
 0x424   : > { %v5516_v16 = vadd.f32 1.0, %v5484_v30  ;;  %v5485_v62 = vmul.f32 0.3275911, %v5453_v27  ;;  %v11305_v58 = vpop.f32.mrb[38].mxu0  ;;  %v15728_v10 = vadd.f32 %v15658_v8, %v5277_v18  ;;  %v12034_v30 = vld [vmem:[#allocation5 + $0x10] sm:$0xff]   ;;  %18593 = vst [vmem:[#allocation59_spill] sm:$0xff] %v15742_v32  ;;  %v5900_v3 = vmul.f32 %v5868_v45, %v5452_v52 }
 0x425   : > { %12364 = vrcp.f32 %v5518_v60  ;;  %v5519_v22 = vadd.f32 1.0, %v5487_v15  ;;  %v5280_v1 = vpop.f32.mrb[39].mxu0  ;;  %v15731_v13 = vadd.f32 %v15673_v33, %v11305_v58  ;;  %v5902_v15 = vmul.f32 %v5870_v31, %v5454_v48  ;;  %10725 = vmatpush3.bf16.msra.mxu1 %v12034_v30  ;;  %v15749_v59 = vpop.f32.mrb[129].mxu1 }
 0x426   : > { %12366 = vrcp.f32 %v5516_v16  ;;  %v5517_v23 = vadd.f32 1.0, %v5485_v62  ;;  %v15734_v60 = vadd.f32 %v15663_v42, %v5280_v1  ;;  %v15737_v47 = vmul.f32 0.70710677, %v15725_v4  ;;  %18594 = vst [vmem:[#allocation60_spill] sm:$0xff] %v15749_v59  ;;  %v15771_v0 = vpop.f32.mrb[130].mxu1 }
 0x427   : > { %12368 = vrcp.f32 %v5519_v22  ;;  %v15740_v16 = vmul.f32 0.70710677, %v15728_v10  ;;  %v15744_v8 = vmul.f32 0.5, %v11541_v49  ;;  %v5871_v62 = vsub.f32 0.0, %v5455_v6  ;;  %18595 = vst [vmem:[#allocation61_spill] sm:$0xff] %v15771_v0  ;;  %v15779_v12 = vpop.f32.mrb[131].mxu1 }
 0x428   : > { %v15747_v33 = vmul.f32 0.70710677, %v15731_v13  ;;  %12370 = vrcp.f32 %v5517_v23  ;;  %v5869_v42 = vsub.f32 0.0, %v5453_v27  ;;  %v5458_v48 = vand.u32 2147483647, %v15737_v47  ;;  %18596 = vst [vmem:[#allocation62_spill] sm:$0xff] %v15779_v12 }
 0x429   : > { %v5456_v18 = vand.u32 2147483647, %v15740_v16  ;;  %v15755_v31 = vmul.f32 0.5, %v11545_v11  ;;  %v15757_v49 = vmul.f32 0.5, %v11549_v36  ;;  %v15759_v45 = vmul.f32 0.5, %v11553_v14 }
 0x42a   : > { %v11308_v1 = vpop.f32.mrb[40].mxu0  ;;  %v5459_v52 = vand.u32 2147483647, %v15747_v33  ;;  %v5936_v58 = vmul.f32 1.442695, %v5902_v15  ;;  %v5903_v50 = vmul.f32 %v5871_v62, %v5455_v6  ;;  %v5901_v11 = vmul.f32 %v5869_v42, %v5453_v27 }
 0x42b   : > { %v15753_v17 = vpop.f32.mrb[41].mxu0  ;;  %v5490_v30 = vmul.f32 0.3275911, %v5458_v48  ;;  %v5488_v23 = vmul.f32 0.3275911, %v5456_v18  ;;  %v5874_v63 = vsub.f32 0.0, %v5458_v48 }
 0x42c   : > { %v15762_v22 = vpop.f32.mrb[42].mxu0  ;;  %v5932_v40 = vmul.f32 1.442695, %v5900_v3  ;;  %v5491_v39 = vmul.f32 0.3275911, %v5459_v52  ;;  %v5872_v6 = vsub.f32 0.0, %v5456_v18 }
 0x42d   : > { %v15765_v43 = vmul.f32 0.70710677, %v15734_v60  ;;  %v5522_v36 = vadd.f32 1.0, %v5490_v30  ;;  %v5520_v14 = vadd.f32 1.0, %v5488_v23  ;;  %v15769_v37 = vpop.f32.mrb[43].mxu0  ;;  %v5875_v30 = vsub.f32 0.0, %v5459_v52 }
 0x42e   : > { %v5523_v42 = vadd.f32 1.0, %v5491_v39  ;;  %v5938_v51 = vmul.f32 1.442695, %v5903_v50  ;;  %v5934_v57 = vmul.f32 1.442695, %v5901_v11  ;;  %v5906_v59 = vmul.f32 %v5874_v63, %v5458_v48  ;;  %v12036_v50 = vld [vmem:[#allocation5 + $0x58] sm:$0xff]  }
 0x42f   : > { %v15767_v29 = vpop.eup %12364  ;;  %v15777_v62 = vand.u32 2147483647, %v15765_v43  ;;  %12372 = vrcp.f32 %v5522_v36  ;;  %v5904_v36 = vmul.f32 %v5872_v6, %v5456_v18  ;;  %v15795_v11 = vadd.f32 %v15682_v26, %v11308_v1  ;;  %v12037_v48 = vld [vmem:[#allocation5 + $0x18] sm:$0xff]   ;;  %10726 = vmatprep.subr.bf16.mxu1 %v12036_v50 }
 0x430   : > { %v15773_v15 = vpop.eup %12366  ;;  %v5582_v3 = vmul.f32 1.0614054, %v15767_v29  ;;  %12374 = vrcp.f32 %v5520_v14  ;;  %v5944_v6 = vmul.f32 1.442695, %v5906_v59  ;;  %10727 = vmatpush3.bf16.msra.mxu1 %v12037_v48  ;;  %v12039_v59 = vld [vmem:[#allocation5 + $0x20] sm:$0xff]   ;;  %vm6066_vm15 = vcmp.ge.f32.partialorder %v15737_v47, 0.0 }
 0x431   : > { %v5580_v27 = vmul.f32 1.0614054, %v15773_v15  ;;  %v5489_v35 = vmul.f32 0.3275911, %v15777_v62  ;;  %v15783_v55 = vpop.eup %12368  ;;  %12376 = vpow2.f32 %v5936_v58  ;;  %v5907_v58 = vmul.f32 %v5875_v30, %v5459_v52 }
 0x432   : > { %v5614_v23 = vadd.f32 -1.4531521, %v5582_v3  ;;  %v15785_v32 = vpop.f32.mrb[44].mxu0  ;;  %v5583_v39 = vmul.f32 1.0614054, %v15783_v55  ;;  %v15791_v14 = vpop.eup %12370  ;;  %12378 = vrcp.f32 %v5523_v42 }
 0x433   : > { %v5612_v0 = vadd.f32 -1.4531521, %v5580_v27  ;;  %v5521_v7 = vadd.f32 1.0, %v5489_v35  ;;  %v15789_v3 = vpop.f32.mrb[45].mxu0  ;;  %12380 = vpow2.f32 %v5932_v40  ;;  %v5581_v35 = vmul.f32 1.0614054, %v15791_v14 }
 0x434   : > { %v5646_v12 = vmul.f32 %v15767_v29, %v5614_v23  ;;  %v15797_v63 = vpop.f32.mrb[46].mxu0  ;;  %v5615_v23 = vadd.f32 -1.4531521, %v5583_v39  ;;  %v15801_v61 = vmul.f32 0.70710677, %v15795_v11  ;;  %v12038_v40 = vld [vmem:[#allocation5 + $0x60] sm:$0xff]  }
 0x435   : > { %v5644_v19 = vmul.f32 %v15773_v15, %v5612_v0  ;;  %12382 = vrcp.f32 %v5521_v7  ;;  %v5613_v1 = vadd.f32 -1.4531521, %v5581_v35  ;;  %v5940_v52 = vmul.f32 1.442695, %v5904_v36  ;;  %v15805_v42 = vpop.f32.mrb[47].mxu0  ;;  %v12040_v39 = vld [vmem:[#allocation5 + $0x90] sm:$0xff]   ;;  %10728 = vmatprep.subr.bf16.mxu1 %v12038_v40 }
 0x436   : > { %v5678_v27 = vadd.f32 1.4214138, %v5646_v12  ;;  %18597 = vst [vmem:[#allocation63_spill] sm:$0xff] %v15801_v61  ;;  %v5647_v26 = vmul.f32 %v15783_v55, %v5615_v23  ;;  %12384 = vpow2.f32 %v5938_v51  ;;  %v15808_v30 = vmul.f32 1.442695, %v5907_v58  ;;  %10729 = vmatpush3.bf16.msra.mxu1 %v12039_v59  ;;  %11334 = vmatprep.subr.bf16.mxu0 %v12040_v39  ;;  %v15836_v40 = vpop.f32.mrb[132].mxu1 }
 0x437   : > { %v5676_v18 = vadd.f32 1.4214138, %v5644_v19  ;;  %v15811_v7 = vand.u32 2147483647, %v15801_v61  ;;  %v5645_v48 = vmul.f32 %v15791_v14, %v5613_v1  ;;  %v15816_v36 = vadd.f32 %v15676_v44, %v15753_v17  ;;  %18601 = vst [vmem:[#allocation67_spill] sm:$0xff] %v15836_v40  ;;  %11335 = vmatpush3.bf16.msra.mxu0 %v12040_v39  ;;  %v12045_v61 = vld [vmem:[#allocation5 + $0x30] sm:$0xff]  }
 0x438   : > { %v5710_v0 = vmul.f32 %v15767_v29, %v5678_v27  ;;  %v5679_v19 = vadd.f32 1.4214138, %v5647_v26  ;;  %12386 = vpow2.f32 %v5934_v57  ;;  %v15825_v35 = vadd.f32 %v15685_v24, %v15762_v22 }
 0x439   : > { %v5708_v12 = vmul.f32 %v15773_v15, %v5676_v18  ;;  %v15820_v23 = vpop.eup %12372  ;;  %v5494_v58 = vmul.f32 0.3275911, %v15811_v7  ;;  %v5677_v26 = vadd.f32 1.4214138, %v5645_v48  ;;  %12388 = vpow2.f32 %v5944_v6 }
 0x43a   : > { %v5742_v50 = vadd.f32 -0.28449672, %v5710_v0  ;;  %v15818_v27 = vpop.f32.mrb[48].mxu0  ;;  %v15829_v0 = vpop.eup %12374  ;;  %v5711_v17 = vmul.f32 %v15783_v55, %v5679_v19  ;;  %v5586_v1 = vmul.f32 1.0614054, %v15820_v23  ;;  %v12041_v19 = vld [vmem:[#allocation5 + $0x68] sm:$0xff]   ;;  %12390 = vpow2.f32 %v5940_v52 }
 0x43b   : > { %18598 = vst [vmem:[#allocation64_spill] sm:$0xff] %v15818_v27  ;;  %v5740_v51 = vadd.f32 -0.28449672, %v5708_v12  ;;  %v15827_v18 = vpop.f32.mrb[49].mxu0  ;;  %v12377_v24 = vpop.eup %12376  ;;  %v5584_v12 = vmul.f32 1.0614054, %v15829_v0  ;;  %v5709_v53 = vmul.f32 %v15791_v14, %v5677_v26  ;;  %10730 = vmatprep.subr.bf16.mxu1 %v12041_v19 }
 0x43c   : > { %18599 = vst [vmem:[#allocation65_spill] sm:$0xff] %v15827_v18  ;;  %v5774_v44 = vmul.f32 %v15767_v29, %v5742_v50  ;;  %v15834_v57 = vpop.f32.mrb[50].mxu0  ;;  %v5526_v59 = vadd.f32 1.0, %v5494_v58  ;;  %v15842_v50 = vpop.f32.mrb[133].mxu1  ;;  %v5743_v18 = vadd.f32 -0.28449672, %v5711_v17 }
 0x43d   : > { %18600 = vst [vmem:[#allocation66_spill] sm:$0xff] %v15834_v57  ;;  %v5772_v22 = vmul.f32 %v15773_v15, %v5740_v51  ;;  %v15840_v20 = vpop.f32.mrb[51].mxu0  ;;  %18603 = vst [vmem:[#allocation69_spill] sm:$0xff] %v15842_v50  ;;  %v5618_v57 = vadd.f32 -1.4531521, %v5586_v1  ;;  %v15845_v27 = vpop.eup %12378  ;;  %v12042_v50 = vld [vmem:[#allocation5 + $0x28] sm:$0xff]  }
 0x43e   : > { %18602 = vst [vmem:[#allocation68_spill] sm:$0xff] %v15840_v20  ;;  %v5806_v48 = vadd.f32 0.2548296, %v5774_v44  ;;  %v5616_v51 = vadd.f32 -1.4531521, %v5584_v12  ;;  %v12381_v58 = vpop.eup %12380  ;;  %v5775_v44 = vmul.f32 %v15783_v55, %v5743_v18  ;;  %v15853_v1 = vpop.f32.mrb[134].mxu1  ;;  %12392 = vrcp.f32 %v5526_v59  ;;  %10731 = vmatpush3.bf16.msra.mxu1 %v12042_v50 }
 0x43f   : > { %v5804_v39 = vadd.f32 0.2548296, %v5772_v22  ;;  %v5741_v17 = vadd.f32 -0.28449672, %v5709_v53  ;;  %v5650_v26 = vmul.f32 %v15820_v23, %v5618_v57  ;;  %18604 = vst [vmem:[#allocation70_spill] sm:$0xff] %v15853_v1  ;;  %v12043_v20 = vld [vmem:[#allocation5 + $0x98] sm:$0xff]   ;;  %v15855_v22 = vpop.eup %12382  ;;  %12394 = vpow2.f32 %v15808_v30 }
 0x440   : > { %v5838_v40 = vmul.f32 %v15767_v29, %v5806_v48  ;;  %v5648_v12 = vmul.f32 %v15829_v0, %v5616_v51  ;;  %v5587_v19 = vmul.f32 1.0614054, %v15845_v27  ;;  %v15860_v29 = vpop.f32.mrb[135].mxu1  ;;  %v12044_v48 = vld [vmem:[#allocation5 + $0x70] sm:$0xff]   ;;  %v5807_v53 = vadd.f32 0.2548296, %v5775_v44  ;;  %11336 = vmatprep.subr.bf16.mxu0 %v12043_v20  ;;  %v12385_v5 = vpop.eup %12384 }
 0x441   : > { %v5836_v52 = vmul.f32 %v15773_v15, %v5804_v39  ;;  %18605 = vst [vmem:[#allocation71_spill] sm:$0xff] %v15860_v29  ;;  %v5773_v57 = vmul.f32 %v15791_v14, %v5741_v17  ;;  %v5682_v6 = vadd.f32 1.4214138, %v5650_v26  ;;  %v5585_v59 = vmul.f32 1.0614054, %v15855_v22  ;;  %11337 = vmatpush3.bf16.msra.mxu0 %v12043_v20  ;;  %10732 = vmatprep.subr.bf16.mxu1 %v12044_v48  ;;  %v15871_v50 = vpop.f32.mrb[136].mxu1 }
 0x442   : > { %v5998_v18 = vmul.f32 %v12377_v24, %v5838_v40  ;;  %v15863_v1 = vpop.f32.mrb[52].mxu0  ;;  %v5680_v39 = vadd.f32 1.4214138, %v5648_v12  ;;  %v5619_v51 = vadd.f32 -1.4531521, %v5587_v19  ;;  %v5839_v24 = vmul.f32 %v15783_v55, %v5807_v53  ;;  %18608 = vst [vmem:[#allocation74_spill] sm:$0xff] %v15871_v50  ;;  %10733 = vmatpush3.bf16.msra.mxu1 %v12045_v61 }
 0x443   : > { %18606 = vst [vmem:[#allocation72_spill] sm:$0xff] %v15863_v1  ;;  %v5996_v15 = vmul.f32 %v12381_v58, %v5836_v52  ;;  %v5805_v44 = vadd.f32 0.2548296, %v5773_v57  ;;  %v5714_v17 = vmul.f32 %v15820_v23, %v5682_v6  ;;  %v15869_v26 = vpop.f32.mrb[53].mxu0  ;;  %v12046_v1 = vld [vmem:[#allocation5 + $0xa0] sm:$0xff]   ;;  %v12387_v58 = vpop.eup %12386 }
 0x444   : > { %v6030_v40 = vsub.f32 1.0, %v5998_v18  ;;  %18607 = vst [vmem:[#allocation73_spill] sm:$0xff] %v15869_v26  ;;  %v5712_v12 = vmul.f32 %v15829_v0, %v5680_v39  ;;  %v5651_v20 = vmul.f32 %v15845_v27, %v5619_v51  ;;  %v5617_v19 = vadd.f32 -1.4531521, %v5585_v59  ;;  %v15876_v48 = vpop.f32.mrb[54].mxu0  ;;  %v15878_v55 = vpop.f32.mrb[137].mxu1  ;;  %11338 = vmatprep.subr.bf16.mxu0 %v12046_v1 }
 0x445   : > { %v6028_v52 = vsub.f32 1.0, %v5996_v15  ;;  %18609 = vst [vmem:[#allocation75_spill] sm:$0xff] %v15876_v48  ;;  %18610 = vst [vmem:[#allocation76_spill] sm:$0xff] %v15878_v55  ;;  %v5999_v6 = vmul.f32 %v12385_v5, %v5839_v24  ;;  %v5837_v53 = vmul.f32 %v15791_v14, %v5805_v44  ;;  %v5746_v57 = vadd.f32 -0.28449672, %v5714_v17  ;;  %v15881_v50 = vpop.f32.mrb[55].mxu0  ;;  %v12389_v15 = vpop.eup %12388  ;;  %11339 = vmatpush3.bf16.msra.mxu0 %v12046_v1 }
 0x446   : > { %v6094_v18 = vsub.f32 0.0, %v6030_v40  ;;  %v5744_v26 = vadd.f32 -0.28449672, %v5712_v12  ;;  %v5683_v39 = vadd.f32 1.4214138, %v5651_v20  ;;  %v5649_v51 = vmul.f32 %v15855_v22, %v5617_v19  ;;  %v12391_v14 = vpop.eup %12390  ;;  %v15894_v1 = vpop.f32.mrb[138].mxu1 }
 0x447   : > { %v6092_v29 = vsub.f32 0.0, %v6028_v52  ;;  %v6031_v55 = vsub.f32 1.0, %v5999_v6  ;;  %v5997_v48 = vmul.f32 %v12387_v58, %v5837_v53  ;;  %v5778_v5 = vmul.f32 %v15820_v23, %v5746_v57 }
 0x448   : > { %v6126_v59 = vsel %vm6062_vm1, %v6030_v40, %v6094_v18  ;;  %v5776_v61 = vmul.f32 %v15829_v0, %v5744_v26  ;;  %v5715_v44 = vmul.f32 %v15845_v27, %v5683_v39  ;;  %v18611_v17 = vsub.f32 0.0, %v15777_v62  ;;  %v15898_v18 = vpop.eup %12392 }
 0x449   : > { %v6124_v24 = vsel %vm6060_vm2, %v6028_v52, %v6092_v29  ;;  %v6190_v41 = vadd.f32 1.0, %v6126_v59  ;;  %v6095_v40 = vsub.f32 0.0, %v6031_v55  ;;  %v6029_v20 = vsub.f32 1.0, %v5997_v48  ;;  %v15906_v48 = vpop.f32.mrb[139].mxu1  ;;  %v12395_v46 = vpop.eup %12394 }
 0x44a   : > { %v5905_v12 = vmul.f32 %v18611_v17, %v15777_v62  ;;  %v5810_v58 = vadd.f32 0.2548296, %v5778_v5  ;;  %v15896_v19 = vpop.f32.mrb[56].mxu0  ;;  %v5808_v28 = vadd.f32 0.2548296, %v5776_v61  ;;  %v6188_v52 = vadd.f32 1.0, %v6124_v24 }
 0x44b   : > { %v5747_v29 = vadd.f32 -0.28449672, %v5715_v44  ;;  %v5681_v26 = vadd.f32 1.4214138, %v5649_v51  ;;  %v6127_v6 = vsel %vm6063_vm11, %v6031_v55, %v6095_v40  ;;  %v6093_v62 = vsub.f32 0.0, %v6029_v20  ;;  %v15904_v57 = vpop.f32.mrb[57].mxu0 }
 0x44c   : > { %v5842_v53 = vmul.f32 %v15820_v23, %v5810_v58  ;;  %v6191_v39 = vadd.f32 1.0, %v6127_v6  ;;  %v5840_v59 = vmul.f32 %v15829_v0, %v5808_v28  ;;  %v15911_v30 = vpop.f32.mrb[58].mxu0  ;;  %v5942_v51 = vmul.f32 1.442695, %v5905_v12 }
 0x44d   : > { %v5779_v5 = vmul.f32 %v15845_v27, %v5747_v29  ;;  %v5713_v61 = vmul.f32 %v15855_v22, %v5681_v26  ;;  %18612 = vst [vmem:[#allocation77_spill] sm:$0xff] %v15911_v30  ;;  %v6125_v21 = vsel %vm6061_vm14, %v6029_v20, %v6093_v62  ;;  %v5590_v23 = vmul.f32 1.0614054, %v15898_v18  ;;  %v15916_v24 = vpop.f32.mrb[59].mxu0 }
 0x44e   : > { %v6002_v55 = vmul.f32 %v12389_v15, %v5842_v53  ;;  %v6222_v44 = vmul.f32 %v6190_v41, %v15744_v8  ;;  %v6223_v17 = vmul.f32 %v6191_v39, %v15757_v49  ;;  %v6189_v0 = vadd.f32 1.0, %v6125_v21 }
 0x44f   : > { %v15920_v40 = vmul.f32 %v12391_v14, %v5840_v59  ;;  %v15923_v28 = vmul.f32 0.5, %v15725_v4  ;;  %v5811_v29 = vadd.f32 0.2548296, %v5779_v5  ;;  %v6220_v25 = vmul.f32 %v6188_v52, %v15755_v31 }
 0x450   : > { %v6034_v58 = vsub.f32 1.0, %v6002_v55  ;;  %v6253_v15 = vpack.c.bf16 %v6223_v17, %v6222_v44  ;;  %v6221_v12 = vmul.f32 %v6189_v0, %v15759_v45  ;;  %v5745_v20 = vadd.f32 -0.28449672, %v5713_v61 }
 0x451   : > { %v18346_v26 = vsub.f32 1.0, %v15920_v40  ;;  %12396 = vpow2.f32 %v5942_v51  ;;  %v5622_v8 = vadd.f32 -1.4531521, %v5590_v23  ;;  %v15929_v49 = vmul.f32 0.70710677, %v15816_v36 }
 0x452   : > { %v15931_v14 = vpop.f32.mrb[60].mxu0  ;;  %v6269_v4 = vsel %vm13915_vm8, %v6253_v15, 0  ;;  %6450 = vst [vmem:[#allocation2 + $0x38] sm:$0xff] %v6253_v15  ;;  %v15937_v31 = vsel %vm13925_vm9, %v6253_v15, 0  ;;  %v6252_v41 = vpack.c.bf16 %v6221_v12, %v6220_v25  ;;  %v6098_v45 = vsub.f32 0.0, %v6034_v58 }
 0x453   : > { %18613 = vst [vmem:[#allocation78_spill] sm:$0xff] %v15931_v14  ;;  %v15939_v52 = vpop.f32.mrb[61].mxu0  ;;  %v6292_v6 = vshrl.u32 %v6269_v4, 16  ;;  %v5843_v62 = vmul.f32 %v15845_v27, %v5811_v29  ;;  %v5878_v53 = vsub.f32 0.0, %v15811_v7  ;;  %v6489_v59 = vshll.u32 %v15937_v31, 16  ;;  %v6428_v14 = vld [vmem:[#allocation2 + $0x18] sm:$0xff] }
 0x454   : > { %18614 = vst [vmem:[#allocation79_spill] sm:$0xff] %v15939_v52  ;;  %v15944_v39 = vpop.f32.mrb[62].mxu0  ;;  %v6268_v56 = vsel %vm13935_vm4, %v6252_v41, 0  ;;  %6449 = vst [vmem:[#allocation2 + $0x20] sm:$0xff] %v6252_v41  ;;  %v6465_v21 = vsel %vm13942_vm10, %v6252_v41, 0  ;;  %v5777_v55 = vmul.f32 %v15855_v22, %v5745_v20  ;;  %v6295_v47 = vshll.u32 %v6269_v4, 16 }
 0x455   : > { %18615 = vst [vmem:[#allocation80_spill] sm:$0xff] %v15944_v39  ;;  %v15952_v51 = vrot.slane %v6292_v6, 7  ;;  %v6285_v27 = vshrl.u32 %v6268_v56, 16  ;;  %v5654_v23 = vmul.f32 %v15898_v18, %v5622_v8  ;;  %v6482_v44 = vshll.u32 %v6465_v21, 16 }
 0x456   : > { %v6130_v17 = vsel %vm6066_vm15, %v6034_v58, %v6098_v45  ;;  %v6096_v0 = vsub.f32 0.0, %v18346_v26  ;;  %v15958_v29 = vand.u32 2147483647, %v15929_v49  ;;  %v6288_v12 = vshll.u32 %v6268_v56, 16  ;;  %v6625_v58 = vld [vmem:[#allocation2 + $0x10] sm:$0x80] }
 0x457   : > { %v6297_v25 = vor.u32 %v6295_v47, %v15952_v51  ;;  %v6287_v15 = vrot.slane %v6285_v27, 7  ;;  %v6003_v41 = vmul.f32 %v12395_v46, %v5843_v62  ;;  %v15961_v20 = vrot.slane %v6489_v59, 1  ;;  %v12047_v26 = vld [vmem:[#allocation5 + $0x78] sm:$0xff]   ;;  %v12049_v56 = vld [vmem:[#allocation5 + $0xa8] sm:$0xff]  }
 0x458   : > { %v6484_v6 = vrot.slane %v6482_v44, 1  ;;  %v6485_v4 = vshrl.u32 %v6465_v21, 16  ;;  %v5809_v5 = vadd.f32 0.2548296, %v5777_v55  ;;  %vm18618_vm8 = vsmask.f32 256  ;;  %10734 = vmatprep.subr.bf16.mxu1 %v12047_v26  ;;  %11340 = vmatprep.subr.bf16.mxu0 %v12049_v56 }
 0x459   : > { %v6290_v61 = vor.u32 %v6288_v12, %v6287_v15  ;;  %v6298_v8 = vsel %vm18618_vm8, %v6287_v15, %v6297_v25  ;;  %v6035_v45 = vsub.f32 1.0, %v6003_v41  ;;  %v5686_v39 = vadd.f32 1.4214138, %v5654_v23  ;;  %v12048_v59 = vld [vmem:[#allocation5 + $0x38] sm:$0xff]   ;;  %v15971_v15 = vpop.f32.mrb[63].mxu0  ;;  %11341 = vmatpush3.bf16.msra.mxu0 %v12049_v56  ;;  %vm18630_vm2 = vmmov %vm18618_vm8 }
 0x45a   : > { %6431 = vst [vmem:[#allocation2 + $0x30] sm:$0xff] %v6298_v8  ;;  %v6487_v52 = vor.u32 %v6485_v4, %v6484_v6  ;;  %v6626_v47 = vsel %vm13590_vm3, %v6484_v6, %v6625_v58  ;;  %v5841_v62 = vmul.f32 %v15855_v22, %v5809_v5  ;;  %v5492_v46 = vmul.f32 0.3275911, %v15958_v29  ;;  %18620 = vst [vmem:[#allocation10_spill] sm:$0xff] %v15971_v15  ;;  %v12655_v8 = vld [vmem:[#allocation2] sm:$0xff] }
 0x45b   : > { %v12397_v21 = vpop.eup %12396  ;;  %v6429_v27 = vsel %vm14013_vm6, %v6290_v61, %v6428_v14  ;;  %6627 = vst [vmem:[#allocation2 + $0x10] sm:$0x80] %v6626_v47  ;;  %v6194_v44 = vadd.f32 1.0, %v6130_v17  ;;  %v6099_v23 = vsub.f32 0.0, %v6035_v45  ;;  %v5718_v25 = vmul.f32 %v15898_v18, %v5686_v39  ;;  %10735 = vmatpush3.bf16.msra.mxu1 %v12048_v59  ;;  %vm18632_vm14 = vmmov %vm18630_vm2 }
 0x45c   : > { %6430 = vst [vmem:[#allocation2 + $0x18] sm:$0xff] %v6429_v27  ;;  %vm18621_vm3 = vsmask.f32 7424  ;;  %vm6067_vm9 = vcmp.ge.f32.partialorder %v15747_v33, 0.0  ;;  %v6001_v22 = vmul.f32 %v12397_v21, %v5841_v62  ;;  %v5524_v12 = vadd.f32 1.0, %v5492_v46  ;;  %v12050_v33 = vld [vmem:[#allocation5 + $0xb0] sm:$0xff]  }
 0x45d   : > { %v6492_v54 = vsel %vm18621_vm3, %v6487_v52, %v15961_v20  ;;  %v6131_v14 = vsel %vm6067_vm9, %v6035_v45, %v6099_v23  ;;  %v6163_v17 = vmul.f32 0.5, %v15731_v13  ;;  %v5910_v41 = vmul.f32 %v5878_v53, %v15811_v7  ;;  %v6651_v7 = vld [vmem:[#allocation2 + $0x20] sm:$0xff]  ;;  %11342 = vmatprep.subr.bf16.mxu0 %v12050_v33  ;;  %vm18631_vm11 = vmmov %vm18621_vm3 }
 0x45e   : > { %6628 = vst [vmem:[#allocation2 + $0x28] sm:$0xff] %v6492_v54  ;;  %v15979_v39 = vmul.f32 0.70710677, %v15825_v35  ;;  %vm6064_vm4 = vcmp.ge.f32.partialorder %v15740_v16, 0.0  ;;  %v6195_v26 = vadd.f32 1.0, %v6131_v14  ;;  %v6033_v52 = vsub.f32 1.0, %v6001_v22  ;;  %6920 = vmatmul.mubr.bf16.vlgmr.msra.gmra.mrb[152].mxu1 %v12655_v8  ;;  %11343 = vmatpush3.bf16.msra.mxu0 %v12050_v33  ;;  %vm18633_vm15 = vmmov %vm18621_vm3 }
 0x45f   : > { %12398 = vrcp.f32 %v5524_v12  ;;  %v6226_v6 = vmul.f32 %v6194_v44, %v15923_v28  ;;  %v18622_v4 = vsub.f32 1.0, %v15920_v40  ;;  %v5750_v61 = vadd.f32 -0.28449672, %v5718_v25  ;;  %v15994_v28 = vpop.f32.mrb[140].mxu1  ;;  %6927 = vmatprep.mubr.bf16.mxu1 %v6651_v7 }
 0x460   : > { %v5463_v13 = vand.u32 2147483647, %v15979_v39  ;;  %v6227_v53 = vmul.f32 %v6195_v26, %v6163_v17  ;;  %v6097_v58 = vsub.f32 0.0, %v6033_v52  ;;  %v15988_v16 = vadd.f32 %v15679_v9, %v15769_v37  ;;  %v15997_v47 = vpop.f32.mrb[141].mxu1 }
 0x461   : > { %v6128_v5 = vsel %vm6064_vm4, %v18622_v4, %v6096_v0  ;;  %v15992_v45 = vadd.f32 %v15694_v2, %v15785_v32  ;;  %vm6065_vm10 = vcmp.ge.f32.partialorder %v15765_v43, 0.0  ;;  %v5952_v40 = vmul.f32 1.442695, %v5910_v41 }
 0x462   : > { %v5495_v0 = vmul.f32 0.3275911, %v5463_v13  ;;  %v6192_v62 = vadd.f32 1.0, %v6128_v5  ;;  %v6255_v46 = vpack.c.bf16 %v6227_v53, %v6226_v6  ;;  %v6129_v59 = vsel %vm6065_vm10, %v6033_v52, %v6097_v58  ;;  %v18626_v58 = vld [vmem:[#allocation15_spill] sm:$0xff] }
 0x463   : > { %v16000_v37 = vmul.f32 0.70710677, %v15988_v16  ;;  %v6160_v9 = vmul.f32 0.5, %v15728_v10  ;;  %v6193_v2 = vadd.f32 1.0, %v6129_v59  ;;  %v5876_v32 = vsub.f32 0.0, %v15958_v29  ;;  %v16012_v10 = vpop.f32.mrb[142].mxu1 }
 0x464   : > { %v5527_v56 = vadd.f32 1.0, %v5495_v0  ;;  %v6271_v43 = vsel %vm14023_vm7, %v6255_v46, 0  ;;  %6452 = vst [vmem:[#allocation2 + $0x68] sm:$0xff] %v6255_v46  ;;  %v6161_v55 = vmul.f32 0.5, %v15734_v60  ;;  %v5782_v27 = vmul.f32 %v15898_v18, %v5750_v61  ;;  %v16014_v14 = vpop.f32.mrb[143].mxu1  ;;  %v18624_v60 = vld [vmem:[#allocation14_spill] sm:$0xff] }
 0x465   : > { %v16009_v44 = vand.u32 2147483647, %v16000_v37  ;;  %v6493_v23 = vshrl.u32 %v15937_v31, 16  ;;  %v6308_v25 = vshrl.u32 %v6271_v43, 16  ;;  %12400 = vpow2.f32 %v5952_v40  ;;  %v18628_v40 = vld [vmem:[#allocation16_spill] sm:$0xff] }
 0x466   : > { %v6224_v54 = vmul.f32 %v6192_v62, %v6160_v9  ;;  %v6225_v22 = vmul.f32 %v6193_v2, %v6161_v55  ;;  %12402 = vrcp.f32 %v5527_v56  ;;  %v5879_v12 = vsub.f32 0.0, %v5463_v13  ;;  %v12051_v2 = vld [vmem:[#allocation5 + $0xb8] sm:$0xff]  }
 0x467   : > { %v16016_v17 = vrot.slane %v6308_v25, 7  ;;  %vm18625_vm6 = vnez %v18624_v60  ;;  %v5908_v26 = vmul.f32 %v5876_v32, %v15958_v29  ;;  %v5493_v31 = vmul.f32 0.3275911, %v16009_v44  ;;  %11344 = vmatprep.subr.bf16.mxu0 %v12051_v2 }
 0x468   : > { %v16020_v41 = vsel %vm18625_vm6, %v6255_v46, 0  ;;  %v6495_v33 = vor.u32 %v6493_v23, %v15961_v20  ;;  %v6254_v6 = vpack.c.bf16 %v6225_v22, %v6224_v54  ;;  %v5814_v4 = vadd.f32 0.2548296, %v5782_v27  ;;  %11345 = vmatpush3.bf16.msra.mxu0 %v12051_v2  ;;  %v6649_v22 = vld [vmem:[#allocation2 + $0x10] sm:$0xff] }
 0x469   : > { %v16024_v52 = vpop.eup %12398  ;;  %v6311_v5 = vshll.u32 %v6271_v43, 16  ;;  %v5525_v8 = vadd.f32 1.0, %v5493_v31  ;;  %v16029_v7 = vmul.f32 0.70710677, %v15992_v45  ;;  %v6505_v53 = vshll.u32 %v16020_v41, 16  ;;  %11346 = vmatprep.mubr.bf16.mxu0 %v6649_v22 }
 0x46a   : > { %v5588_v61 = vmul.f32 1.0614054, %v16024_v52  ;;  %vm18627_vm7 = vnez %v18626_v58  ;;  %6451 = vst [vmem:[#allocation2 + $0x50] sm:$0xff] %v6254_v6  ;;  %vm18629_vm1 = vnez %v18628_v40  ;;  %v5911_v62 = vmul.f32 %v5879_v12, %v5463_v13  ;;  %v16060_v40 = vpop.f32.mrb[144].mxu1 }
 0x46b   : > { %v6270_v29 = vsel %vm18627_vm7, %v6254_v6, 0  ;;  %v6467_v0 = vsel %vm18629_vm1, %v6254_v6, 0  ;;  %v6313_v20 = vor.u32 %v6311_v5, %v16016_v17  ;;  %v5948_v9 = vmul.f32 1.442695, %v5908_v26 }
 0x46c   : > { %v6300_v46 = vshrl.u32 %v6270_v29, 16  ;;  %v6497_v59 = vshll.u32 %v6467_v0, 16  ;;  %v6303_v32 = vshll.u32 %v6270_v29, 16  ;;  %v5846_v56 = vmul.f32 %v15898_v18, %v5814_v4 }
 0x46d   : > { %v5620_v21 = vadd.f32 -1.4531521, %v5588_v61  ;;  %12404 = vrcp.f32 %v5525_v8  ;;  %v6501_v27 = vshrl.u32 %v6467_v0, 16  ;;  %v16039_v23 = vand.u32 2147483647, %v16029_v7  ;;  %v6650_v8 = vld [vmem:[#allocation2 + $0x18] sm:$0xff] }
 0x46e   : > { %v6302_v43 = vrot.slane %v6300_v46, 7  ;;  %v6499_v55 = vrot.slane %v6497_v59, 1  ;;  %v16041_v25 = vrot.slane %v6505_v53, 1  ;;  %v5954_v54 = vmul.f32 1.442695, %v5911_v62  ;;  %6928 = vmatmul.mubr.bf16.gmra.mrb[156].mxu1 %v6650_v8  ;;  %v6652_v0 = vld [vmem:[#allocation2 + $0x28] sm:$0xff] }
 0x46f   : > { %v5652_v13 = vmul.f32 %v16024_v52, %v5620_v21  ;;  %v12401_v12 = vpop.eup %12400  ;;  %12406 = vpow2.f32 %v5948_v9  ;;  %v5498_v61 = vmul.f32 0.3275911, %v16039_v23  ;;  %v16058_v29 = vadd.f32 %v15688_v34, %v15789_v3  ;;  %v6654_v62 = vld [vmem:[#allocation2 + $0x38] sm:$0xff]  ;;  %11347 = vmatmul.mubr.bf16.vlgmr.msra.gmra.mrb[104].mxu0 %v6652_v0  ;;  %v16068_v9 = vpop.f32.mrb[145].mxu1  ;;  %v6653_v0 = vld [vmem:[#allocation2 + $0x30] sm:$0xff] }
 0x470   : > { %v6305_v60 = vor.u32 %v6303_v32, %v6302_v43  ;;  %v6314_v18 = vsel %vm18630_vm2, %v6302_v43, %v6313_v20  ;;  %v6500_v26 = vsel %vm18631_vm11, %v6495_v33, %v6499_v55  ;;  %v6503_v31 = vor.u32 %v6501_v27, %v6499_v55  ;;  %v16046_v6 = vpop.eup %12402  ;;  %6935 = vmatprep.mubr.bf16.mxu1 %v6654_v62  ;;  %v18634_v32 = vld [vmem:[#allocation54_spill] sm:$0xff]  ;;  %v16080_v21 = vpop.f32.mrb[146].mxu1  ;;  %v18635_v55 = vld [vmem:[#allocation63_spill] sm:$0xff]  ;;  %vm18652_vm11 = vmmov %vm18632_vm14 }
 0x471   : > { %6433 = vst [vmem:[#allocation2 + $0x60] sm:$0xff] %v6314_v18  ;;  %6629 = vst [vmem:[#allocation2 + $0x40] sm:$0xff] %v6500_v26  ;;  %v16048_v4 = vmul.f32 %v12401_v12, %v5846_v56  ;;  %v5684_v5 = vadd.f32 1.4214138, %v5652_v13  ;;  %v5591_v33 = vmul.f32 1.0614054, %v16046_v6  ;;  %v16066_v59 = vadd.f32 %v15697_v38, %v15797_v63 }
 0x472   : > { %v6306_v53 = vsel %vm18632_vm14, %v15952_v51, %v6305_v60  ;;  %v6508_v58 = vsel %vm18633_vm15, %v6503_v31, %v16041_v25  ;;  %v5877_v51 = vsub.f32 0.0, %v16009_v44  ;;  %v5530_v46 = vadd.f32 1.0, %v5498_v61  ;;  %v18637_v61 = vld [vmem:[#allocation56_spill] sm:$0xff]  ;;  %vm18653_vm14 = vmmov %vm18633_vm15 }
 0x473   : > { %6432 = vst [vmem:[#allocation2 + $0x48] sm:$0xff] %v6306_v53  ;;  %6630 = vst [vmem:[#allocation2 + $0x58] sm:$0xff] %v6508_v58  ;;  %v5716_v20 = vmul.f32 %v16024_v52, %v5684_v5  ;;  %v16071_v34 = vmul.f32 0.5, %v15795_v11  ;;  %v5623_v3 = vadd.f32 -1.4531521, %v5591_v33  ;;  %v16078_v56 = vadd.f32 %v18634_v32, %v15805_v42  ;;  %v16092_v42 = vpop.f32.mrb[147].mxu1 }
 0x474   : > { %v16074_v2 = vmul.f32 0.70710677, %v16058_v29  ;;  %v6038_v38 = vsub.f32 1.0, %v16048_v4  ;;  %12408 = vrcp.f32 %v5530_v46  ;;  %v16084_v43 = vmul.f32 0.70710677, %v16066_v59  ;;  %v18636_v5 = vld [vmem:[#allocation64_spill] sm:$0xff]  ;;  %vm18654_vm15 = vmmov %vm18652_vm11 }
 0x475   : > { %v5748_v63 = vadd.f32 -0.28449672, %v5716_v20  ;;  %vm6070_vm8 = vcmp.ge.f32.partialorder %v18635_v55, 0.0  ;;  %v16088_v11 = vmul.f32 0.5, %v15816_v36  ;;  %v5655_v27 = vmul.f32 %v16046_v6, %v5623_v3  ;;  %v6657_v46 = vld [vmem:[#allocation2 + $0x50] sm:$0xff]  ;;  %v16130_v55 = vpop.f32.mrb[148].mxu1 }
 0x476   : > { %v5464_v13 = vand.u32 2147483647, %v16074_v2  ;;  %v5909_v60 = vmul.f32 %v5877_v51, %v16009_v44  ;;  %v5882_v18 = vsub.f32 0.0, %v16039_v23  ;;  %v16100_v26 = vand.u32 2147483647, %v16084_v43  ;;  %6936 = vmatmul.mubr.bf16.gmra.mrb[160].mxu1 %v6653_v0  ;;  %18638 = vst [vmem:[#allocation11_spill] sm:$0xff] %v16130_v55 }
 0x477   : > { %v16094_v22 = vpop.eup %12404  ;;  %v5780_v12 = vmul.f32 %v16024_v52, %v5748_v63  ;;  %v5687_v31 = vadd.f32 1.4214138, %v5655_v27  ;;  %v16105_v8 = vadd.f32 %v18637_v61, %v18636_v5  ;;  %v6102_v53 = vsub.f32 0.0, %v6038_v38  ;;  %6943 = vmatprep.mubr.bf16.mxu1 %v6657_v46 }
 0x478   : > { %v5589_v36 = vmul.f32 1.0614054, %v16094_v22  ;;  %v5496_v4 = vmul.f32 0.3275911, %v5464_v13  ;;  %12410 = vpow2.f32 %v5954_v54  ;;  %v5499_v33 = vmul.f32 0.3275911, %v16100_v26 }
 0x479   : > { %v5812_v58 = vadd.f32 0.2548296, %v5780_v12  ;;  %v5719_v44 = vmul.f32 %v16046_v6, %v5687_v31  ;;  %v16110_v51 = vmul.f32 0.70710677, %v16078_v56  ;;  %v12407_v3 = vpop.eup %12406  ;;  %v5950_v63 = vmul.f32 1.442695, %v5909_v60 }
 0x47a   : > { %v5621_v62 = vadd.f32 -1.4531521, %v5589_v36  ;;  %v5528_v20 = vadd.f32 1.0, %v5496_v4  ;;  %v5914_v27 = vmul.f32 %v5882_v18, %v16039_v23  ;;  %v5531_v12 = vadd.f32 1.0, %v5499_v33  ;;  %v6655_v36 = vld [vmem:[#allocation2 + $0x40] sm:$0xff] }
 0x47b   : > { %v5844_v32 = vmul.f32 %v16024_v52, %v5812_v58  ;;  %v5751_v54 = vadd.f32 -0.28449672, %v5719_v44  ;;  %v5465_v31 = vand.u32 2147483647, %v16110_v51  ;;  %v6134_v4 = vsel %vm6070_vm8, %v6038_v38, %v6102_v53  ;;  %11350 = vmatprep.mubr.bf16.mxu0 %v6655_v36  ;;  %v6658_v58 = vld [vmem:[#allocation2 + $0x58] sm:$0xff]  ;;  %v6659_v15 = vld [vmem:[#allocation2 + $0x60] sm:$0xff]  ;;  %vm18655_vm8 = vmmov %vm18653_vm14 }
 0x47c   : > { %v5653_v5 = vmul.f32 %v16094_v22, %v5621_v62  ;;  %12412 = vrcp.f32 %v5528_v20  ;;  %v16119_v61 = vmul.f32 0.5, %v15825_v35  ;;  %v5880_v0 = vsub.f32 0.0, %v5464_v13  ;;  %11351 = vmatmul.mubr.bf16.gmra.mrb[108].mxu0 %v6658_v58 }
 0x47d   : > { %12414 = vrcp.f32 %v5531_v12  ;;  %v16121_v52 = vmul.f32 %v12407_v3, %v5844_v32  ;;  %v5783_v23 = vmul.f32 %v16046_v6, %v5751_v54  ;;  %v5497_v18 = vmul.f32 0.3275911, %v5465_v31  ;;  %v16134_v3 = vpop.f32.mrb[149].mxu1 }
 0x47e   : > { %v5685_v60 = vadd.f32 1.4214138, %v5653_v5  ;;  %v16124_v33 = vpop.eup %12408  ;;  %v6509_v44 = vshrl.u32 %v16020_v41, 16  ;;  %12416 = vpow2.f32 %v5950_v63  ;;  %v16128_v38 = vmul.f32 0.5, %v15988_v16  ;;  %18639 = vst [vmem:[#allocation12_spill] sm:$0xff] %v16134_v3 }
 0x47f   : > { %v5960_v35 = vmul.f32 1.442695, %v5914_v27  ;;  %v6198_v53 = vadd.f32 1.0, %v6134_v4  ;;  %v5815_v62 = vadd.f32 0.2548296, %v5783_v23  ;;  %vm6071_vm3 = vcmp.ge.f32.partialorder %v15979_v39, 0.0 }
 0x480   : > { %v5717_v20 = vmul.f32 %v16094_v22, %v5685_v60  ;;  %v5594_v46 = vmul.f32 1.0614054, %v16124_v33  ;;  %v5912_v32 = vmul.f32 %v5880_v0, %v5464_v13  ;;  %v5883_v41 = vsub.f32 0.0, %v16100_v26  ;;  %v6656_v23 = vld [vmem:[#allocation2 + $0x48] sm:$0xff] }
 0x481   : > { %v5529_v63 = vadd.f32 1.0, %v5497_v18  ;;  %v16139_v16 = vmul.f32 0.70710677, %v16105_v8  ;;  %v6036_v27 = vsub.f32 1.0, %v16121_v52  ;;  %vm6068_vm9 = vcmp.ge.f32.partialorder %v15929_v49, 0.0  ;;  %6944 = vmatmul.mubr.bf16.gmra.mrb[164].mxu1 %v6656_v23 }
 0x482   : > { %v5847_v12 = vmul.f32 %v16046_v6, %v5815_v62  ;;  %v5749_v54 = vadd.f32 -0.28449672, %v5717_v20  ;;  %v5626_v5 = vadd.f32 -1.4531521, %v5594_v46  ;;  %v12411_v36 = vpop.eup %12410  ;;  %v16145_v4 = vor.u32 %v6509_v44, %v16041_v25  ;;  %v16153_v6 = vpop.f32.mrb[150].mxu1  ;;  %v6660_v62 = vld [vmem:[#allocation2 + $0x68] sm:$0xff] }
 0x483   : > { %12418 = vrcp.f32 %v5529_v63  ;;  %v5881_v13 = vsub.f32 0.0, %v5465_v31  ;;  %v16148_v0 = vand.u32 2147483647, %v16139_v16  ;;  %v6230_v60 = vmul.f32 %v6198_v53, %v16071_v34  ;;  %18640 = vst [vmem:[#allocation13_spill] sm:$0xff] %v16153_v6  ;;  %v16157_v46 = vpop.f32.mrb[151].mxu1  ;;  %6951 = vmatprep.mubr.bf16.mxu1 %v6660_v62 }
 0x484   : > { %v6007_v18 = vmul.f32 %v12411_v36, %v5847_v12  ;;  %v5781_v52 = vmul.f32 %v16094_v22, %v5749_v54  ;;  %v5658_v58 = vmul.f32 %v16124_v33, %v5626_v5  ;;  %12420 = vpow2.f32 %v5960_v35  ;;  %18641 = vst [vmem:[#allocation14_spill] sm:$0xff] %v16157_v46 }
 0x485   : > { %v5956_v25 = vmul.f32 1.442695, %v5912_v32  ;;  %v5915_v44 = vmul.f32 %v5883_v41, %v16100_v26  ;;  %v5502_v20 = vmul.f32 0.3275911, %v16148_v0  ;;  %v6100_v34 = vsub.f32 0.0, %v6036_v27  ;;  %v18642_v26 = vld [vmem:[#allocation65_spill] sm:$0xff] }
 0x486   : > { %v16159_v63 = vpop.eup %12412  ;;  %v6039_v53 = vsub.f32 1.0, %v6007_v18  ;;  %v5813_v12 = vadd.f32 0.2548296, %v5781_v52  ;;  %v5690_v54 = vadd.f32 1.4214138, %v5658_v58  ;;  %vm6069_vm4 = vcmp.ge.f32.partialorder %v16000_v37, 0.0 }
 0x487   : > { %v16161_v5 = vpop.eup %12414  ;;  %v5592_v35 = vmul.f32 1.0614054, %v16159_v63  ;;  %v5913_v32 = vmul.f32 %v5881_v13, %v5465_v31  ;;  %v5534_v36 = vadd.f32 1.0, %v5502_v20  ;;  %v18643_v41 = vld [vmem:[#allocation55_spill] sm:$0xff]  ;;  %v5962_v3 = vmul.f32 1.442695, %v5915_v44 }
 0x488   : > { %v16167_v23 = vadd.f32 %v18643_v41, %v18642_v26  ;;  %v6103_v46 = vsub.f32 0.0, %v6039_v53  ;;  %v5845_v62 = vmul.f32 %v16094_v22, %v5813_v12  ;;  %v5722_v6 = vmul.f32 %v16124_v33, %v5690_v54  ;;  %v12417_v52 = vpop.eup %12416 }
 0x489   : > { %v5595_v18 = vmul.f32 1.0614054, %v16161_v5  ;;  %v5624_v58 = vadd.f32 -1.4531521, %v5592_v35  ;;  %12422 = vrcp.f32 %v5534_v36  ;;  %v6132_v22 = vsel %vm6068_vm9, %v6036_v27, %v6100_v34  ;;  %6952 = vmatmul.mubr.bf16.gmra.mrb[168].mxu1 %v6659_v15 }
 0x48a   : > { %v16173_v55 = vmul.f32 0.70710677, %v16167_v23  ;;  %v6135_v31 = vsel %vm6071_vm3, %v6039_v53, %v6103_v46  ;;  %v6005_v13 = vmul.f32 %v12417_v52, %v5845_v62  ;;  %v5754_v20 = vadd.f32 -0.28449672, %v5722_v6 }
 0x48b   : > { %v5627_v26 = vadd.f32 -1.4531521, %v5595_v18  ;;  %v6199_v12 = vadd.f32 1.0, %v6135_v31  ;;  %v5656_v54 = vmul.f32 %v16159_v63, %v5624_v58  ;;  %v5958_v41 = vmul.f32 1.442695, %v5913_v32  ;;  %v18644_v31 = vld [vmem:[#allocation17_spill] sm:$0xff] }
 0x48c   : > { %v6037_v35 = vsub.f32 1.0, %v6005_v13  ;;  %v5786_v44 = vmul.f32 %v16124_v33, %v5754_v20  ;;  %12424 = vpow2.f32 %v5956_v25  ;;  %v16186_v49 = vand.u32 2147483647, %v16173_v55 }
 0x48d   : > { %v5659_v36 = vmul.f32 %v16161_v5, %v5627_v26  ;;  %v16182_v39 = vpop.eup %12418  ;;  %v6231_v6 = vmul.f32 %v6199_v12, %v16119_v61  ;;  %v5688_v46 = vadd.f32 1.4214138, %v5656_v54  ;;  %12426 = vpow2.f32 %v5962_v3 }
 0x48e   : > { %v6196_v27 = vadd.f32 1.0, %v6132_v22  ;;  %v6101_v34 = vsub.f32 0.0, %v6037_v35  ;;  %v5818_v53 = vadd.f32 0.2548296, %v5786_v44  ;;  %v12421_v62 = vpop.eup %12420  ;;  %v16189_v25 = vmul.f32 0.5, %v15992_v45 }
 0x48f   : > { %v5691_v32 = vadd.f32 1.4214138, %v5659_v36  ;;  %v6257_v18 = vpack.c.bf16 %v6231_v6, %v6230_v60  ;;  %v5720_v15 = vmul.f32 %v16159_v63, %v5688_v46  ;;  %12428 = vpow2.f32 %v5958_v41  ;;  %v18646_v60 = vld [vmem:[#allocation18_spill] sm:$0xff] }
 0x490   : > { %v6133_v61 = vsel %vm6069_vm4, %v6037_v35, %v6101_v34  ;;  %v5850_v3 = vmul.f32 %v16124_v33, %v5818_v53  ;;  %v5593_v58 = vmul.f32 1.0614054, %v16182_v39  ;;  %vm18645_vm10 = vnez %v18644_v31  ;;  %v18648_v31 = vld [vmem:[#allocation19_spill] sm:$0xff] }
 0x491   : > { %v5723_v52 = vmul.f32 %v16161_v5, %v5691_v32  ;;  %v6273_v13 = vsel %vm18645_vm10, %v6257_v18, 0  ;;  %6454 = vst [vmem:[#allocation2 + $0x98] sm:$0xff] %v6257_v18  ;;  %vm18647_vm6 = vnez %v18646_v60  ;;  %v6197_v20 = vadd.f32 1.0, %v6133_v61 }
 0x492   : > { %v16201_v45 = vsel %vm18647_vm6, %v6257_v18, 0  ;;  %v5752_v26 = vadd.f32 -0.28449672, %v5720_v15  ;;  %v6228_v22 = vmul.f32 %v6196_v27, %v16088_v11  ;;  %v6324_v37 = vshrl.u32 %v6273_v13, 16 }
 0x493   : > { %v5886_v12 = vsub.f32 0.0, %v16148_v0  ;;  %v5500_v33 = vmul.f32 0.3275911, %v16186_v49  ;;  %v16206_v54 = vpop.eup %12422  ;;  %v6229_v41 = vmul.f32 %v6197_v20, %v16128_v38  ;;  %v6010_v35 = vmul.f32 %v12421_v62, %v5850_v3 }
 0x494   : > { %v5784_v44 = vmul.f32 %v16159_v63, %v5752_v26  ;;  %v5755_v36 = vadd.f32 -0.28449672, %v5723_v52  ;;  %v16210_v6 = vrot.slane %v6324_v37, 7  ;;  %v6521_v46 = vshll.u32 %v16201_v45, 16 }
 0x495   : > { %vm6074_vm7 = vcmp.ge.f32.partialorder %v16029_v7, 0.0  ;;  %v5625_v11 = vadd.f32 -1.4531521, %v5593_v58  ;;  %v5598_v27 = vmul.f32 1.0614054, %v16206_v54  ;;  %v6256_v34 = vpack.c.bf16 %v6229_v41, %v6228_v22  ;;  %v18650_v58 = vld [vmem:[#allocation20_spill] sm:$0xff] }
 0x496   : > { %v6042_v53 = vsub.f32 1.0, %v6010_v35  ;;  %v5816_v32 = vadd.f32 0.2548296, %v5784_v44  ;;  %v5787_v18 = vmul.f32 %v16161_v5, %v5755_v36  ;;  %v12425_v15 = vpop.eup %12424  ;;  %v6327_v38 = vshll.u32 %v6273_v13, 16 }
 0x497   : > { %v5657_v62 = vmul.f32 %v16182_v39, %v5625_v11  ;;  %v5630_v61 = vadd.f32 -1.4531521, %v5598_v27  ;;  %v5918_v3 = vmul.f32 %v5886_v12, %v16148_v0  ;;  %v12427_v52 = vpop.eup %12426  ;;  %vm18649_vm1 = vnez %v18648_v31  ;;  %6453 = vst [vmem:[#allocation2 + $0x80] sm:$0xff] %v6256_v34 }
 0x498   : > { %v6272_v60 = vsel %vm18649_vm1, %v6256_v34, 0  ;;  %vm18651_vm2 = vnez %v18650_v58  ;;  %v5848_v26 = vmul.f32 %v16159_v63, %v5816_v32  ;;  %v5532_v22 = vadd.f32 1.0, %v5500_v33 }
 0x499   : > { %v6469_v20 = vsel %vm18651_vm2, %v6256_v34, 0  ;;  %v6329_v37 = vor.u32 %v6327_v38, %v16210_v6  ;;  %v16224_v41 = vrot.slane %v6521_v46, 1  ;;  %v6316_v13 = vshrl.u32 %v6272_v60, 16  ;;  %v12429_v44 = vpop.eup %12428 }
 0x49a   : > { %v6513_v35 = vshll.u32 %v6469_v20, 16  ;;  %v6319_v36 = vshll.u32 %v6272_v60, 16  ;;  %v6106_v0 = vsub.f32 0.0, %v6042_v53  ;;  %v5819_v12 = vadd.f32 0.2548296, %v5787_v18 }
 0x49b   : > { %v5689_v11 = vadd.f32 1.4214138, %v5657_v62  ;;  %v6318_v27 = vrot.slane %v6316_v13, 7  ;;  %v6517_v30 = vshrl.u32 %v6469_v20, 16  ;;  %v5662_v58 = vmul.f32 %v16206_v54, %v5630_v61 }
 0x49c   : > { %v6515_v31 = vrot.slane %v6513_v35, 1  ;;  %v6008_v34 = vmul.f32 %v12425_v15, %v5848_v26  ;;  %v5851_v63 = vmul.f32 %v16161_v5, %v5819_v12  ;;  %12430 = vrcp.f32 %v5532_v22  ;;  %v18659_v12 = vld [vmem:[#allocation57_spill] sm:$0xff] }
 0x49d   : > { %v5721_v33 = vmul.f32 %v16182_v39, %v5689_v11  ;;  %v6321_v46 = vor.u32 %v6319_v36, %v6318_v27  ;;  %v6330_v32 = vsel %vm18652_vm11, %v6318_v27, %v6329_v37  ;;  %v6138_v18 = vsel %vm6074_vm7, %v6042_v53, %v6106_v0  ;;  %v18657_v37 = vld [vmem:[#allocation58_spill] sm:$0xff]  ;;  %v18658_v0 = vld [vmem:[#allocation68_spill] sm:$0xff] }
 0x49e   : > { %v6516_v38 = vsel %vm18653_vm14, %v16145_v4, %v6515_v31  ;;  %v6519_v60 = vor.u32 %v6517_v30, %v6515_v31  ;;  %6435 = vst [vmem:[#allocation2 + $0x90] sm:$0xff] %v6330_v32  ;;  %v6011_v62 = vmul.f32 %v12427_v52, %v5851_v63  ;;  %v5884_v15 = vsub.f32 0.0, %v16186_v49  ;;  %v6663_v30 = vld [vmem:[#allocation2 + $0x80] sm:$0xff]  ;;  %v18656_v52 = vld [vmem:[#allocation66_spill] sm:$0xff]  ;;  %vm18680_vm14 = vmmov %vm18655_vm8 }
 0x49f   : > { %6631 = vst [vmem:[#allocation2 + $0x70] sm:$0xff] %v6516_v38  ;;  %v5753_v61 = vadd.f32 -0.28449672, %v5721_v33  ;;  %v6322_v5 = vsel %vm18654_vm15, %v16016_v17, %v6321_v46  ;;  %vm6072_vm3 = vcmp.ge.f32.partialorder %v16074_v2, 0.0  ;;  %v5694_v26 = vadd.f32 1.4214138, %v5662_v58  ;;  %6959 = vmatprep.mubr.bf16.mxu1 %v6663_v30  ;;  %vm18681_vm15 = vmmov %vm18652_vm11 }
 0x4a0   : > { %v6524_v20 = vsel %vm18655_vm8, %v6519_v60, %v16224_v41  ;;  %v5968_v4 = vmul.f32 1.442695, %v5918_v3  ;;  %6434 = vst [vmem:[#allocation2 + $0x78] sm:$0xff] %v6322_v5  ;;  %v6040_v22 = vsub.f32 1.0, %v6008_v34  ;;  %v6043_v7 = vsub.f32 1.0, %v6011_v62 }
 0x4a1   : > { %6632 = vst [vmem:[#allocation2 + $0x88] sm:$0xff] %v6524_v20  ;;  %v5785_v53 = vmul.f32 %v16182_v39, %v5753_v61  ;;  %v16243_v13 = vadd.f32 %v18657_v37, %v18656_v52  ;;  %v6202_v17 = vadd.f32 1.0, %v6138_v18  ;;  %v6171_v35 = vmul.f32 0.5, %v16066_v59  ;;  %v18660_v20 = vld [vmem:[#allocation59_spill] sm:$0xff] }
 0x4a2   : > { %v5726_v36 = vmul.f32 %v16206_v54, %v5694_v26  ;;  %v16249_v3 = vadd.f32 %v18659_v12, %v18658_v0  ;;  %v6107_v11 = vsub.f32 0.0, %v6043_v7  ;;  %v5916_v31 = vmul.f32 %v5884_v15, %v16186_v49  ;;  %v18661_v26 = vld [vmem:[#allocation60_spill] sm:$0xff] }
 0x4a3   : > { %v5817_v27 = vadd.f32 0.2548296, %v5785_v53  ;;  %v16253_v58 = vmul.f32 0.70710677, %v16243_v13  ;;  %vm6075_vm9 = vcmp.ge.f32.partialorder %v16084_v43, 0.0  ;;  %12432 = vpow2.f32 %v5968_v4 }
 0x4a4   : > { %v5758_v34 = vadd.f32 -0.28449672, %v5726_v36  ;;  %v16257_v63 = vmul.f32 0.70710677, %v16249_v3  ;;  %v6104_v59 = vsub.f32 0.0, %v6040_v22  ;;  %v6139_v33 = vsel %vm6075_vm9, %v6043_v7, %v6107_v11 }
 0x4a5   : > { %v5849_v46 = vmul.f32 %v16182_v39, %v5817_v27  ;;  %v5471_v32 = vand.u32 2147483647, %v16253_v58  ;;  %v6234_v38 = vmul.f32 %v6202_v17, %v16189_v25  ;;  %v6203_v60 = vadd.f32 1.0, %v6139_v33 }
 0x4a6   : > { %v5790_v49 = vmul.f32 %v16206_v54, %v5758_v34  ;;  %v5469_v18 = vand.u32 2147483647, %v16257_v63  ;;  %v6661_v62 = vld [vmem:[#allocation2 + $0x70] sm:$0xff]  ;;  %v16264_v43 = vpop.eup %12430  ;;  %v5964_v15 = vmul.f32 1.442695, %v5916_v31  ;;  %v10662_v4 = vadd.f32 %v18661_v26, %v18660_v20 }
 0x4a7   : > { %v6009_v61 = vmul.f32 %v12429_v44, %v5849_v46  ;;  %v5503_v5 = vmul.f32 0.3275911, %v5471_v32  ;;  %11354 = vmatprep.mubr.bf16.mxu0 %v6661_v62  ;;  %v6235_v39 = vmul.f32 %v6203_v60, %v6171_v35  ;;  %v5596_v7 = vmul.f32 1.0614054, %v16264_v43  ;;  %v6662_v0 = vld [vmem:[#allocation2 + $0x78] sm:$0xff]  ;;  %v18662_v34 = vld [vmem:[#allocation21_spill] sm:$0xff] }
 0x4a8   : > { %v5822_v30 = vadd.f32 0.2548296, %v5790_v49  ;;  %v5501_v25 = vmul.f32 0.3275911, %v5469_v18  ;;  %v6136_v53 = vsel %vm6072_vm3, %v6040_v22, %v6104_v59  ;;  %v5887_v17 = vsub.f32 0.0, %v5471_v32  ;;  %v6664_v36 = vld [vmem:[#allocation2 + $0x88] sm:$0xff]  ;;  %6960 = vmatmul.mubr.bf16.gmra.mrb[172].mxu1 %v6662_v0 }
 0x4a9   : > { %v6041_v52 = vsub.f32 1.0, %v6009_v61  ;;  %v5535_v37 = vadd.f32 1.0, %v5503_v5  ;;  %v6168_v44 = vmul.f32 0.5, %v16058_v29  ;;  %v6259_v12 = vpack.c.bf16 %v6235_v39, %v6234_v38  ;;  %11355 = vmatmul.mubr.bf16.gmra.mrb[112].mxu0 %v6664_v36  ;;  %v6666_v35 = vld [vmem:[#allocation2 + $0x98] sm:$0xff]  ;;  %v12052_v26 = vld [vmem:[#allocation5 + $0x140] sm:$0xff]  }
 0x4aa   : > { %vm6073_vm4 = vcmp.ge.f32.partialorder %v16110_v51, 0.0  ;;  %v5628_v11 = vadd.f32 -1.4531521, %v5596_v7  ;;  %v6169_v31 = vmul.f32 0.5, %v16078_v56  ;;  %v5533_v2 = vadd.f32 1.0, %v5501_v25  ;;  %6967 = vmatprep.mubr.bf16.mxu1 %v6666_v35  ;;  %v18664_v56 = vld [vmem:[#allocation22_spill] sm:$0xff]  ;;  %11378 = vmatprep.subr.bf16.mxu0 %v12052_v26 }
 0x4ab   : > { %v6105_v27 = vsub.f32 0.0, %v6041_v52  ;;  %12434 = vrcp.f32 %v5535_v37  ;;  %v6200_v22 = vadd.f32 1.0, %v6136_v53  ;;  %vm18663_vm10 = vnez %v18662_v34  ;;  %6456 = vst [vmem:[#allocation2 + $0xc8] sm:$0xff] %v6259_v12  ;;  %v18666_v7 = vld [vmem:[#allocation42_spill] sm:$0xff]  ;;  %v18667_v37 = vld [vmem:[#allocation61_spill] sm:$0xff]  ;;  %11379 = vmatpush3.bf16.msra.mxu0 %v12052_v26 }
 0x4ac   : > { %v6275_v59 = vsel %vm18663_vm10, %v6259_v12, 0  ;;  %v5854_v29 = vmul.f32 %v16206_v54, %v5822_v30  ;;  %v5660_v33 = vmul.f32 %v16264_v43, %v5628_v11  ;;  %v6525_v46 = vshrl.u32 %v16201_v45, 16  ;;  %v12053_v35 = vld [vmem:[#allocation5 + $0x148] sm:$0xff]   ;;  %v18672_v34 = vld [vmem:[#allocation69_spill] sm:$0xff] }
 0x4ad   : > { %12436 = vpow2.f32 %v5964_v15  ;;  %v5919_v38 = vmul.f32 %v5887_v17, %v5471_v32  ;;  %v5885_v60 = vsub.f32 0.0, %v5469_v18  ;;  %v12433_v49 = vpop.eup %12432  ;;  %v6340_v62 = vshrl.u32 %v6275_v59, 16  ;;  %11380 = vmatprep.subr.bf16.mxu0 %v12053_v35 }
 0x4ae   : > { %vm18665_vm6 = vnez %v18664_v56  ;;  %v6137_v5 = vsel %vm6073_vm4, %v6041_v52, %v6105_v27  ;;  %v5692_v20 = vadd.f32 1.4214138, %v5660_v33  ;;  %v6527_v54 = vor.u32 %v6525_v46, %v16224_v41  ;;  %v18668_v41 = vld [vmem:[#allocation62_spill] sm:$0xff]  ;;  %v18675_v56 = vld [vmem:[#allocation23_spill] sm:$0xff] }
 0x4af   : > { %v16281_v61 = vsel %vm18665_vm6, %v6259_v12, 0  ;;  %v6201_v39 = vadd.f32 1.0, %v6137_v5  ;;  %v16287_v30 = vmul.f32 0.5, %v16105_v8  ;;  %12438 = vrcp.f32 %v5533_v2  ;;  %v6665_v8 = vld [vmem:[#allocation2 + $0x90] sm:$0xff]  ;;  %v18670_v2 = vld [vmem:[#allocation43_spill] sm:$0xff]  ;;  %11381 = vmatpush3.bf16.msra.mxu0 %v12053_v35 }
 0x4b0   : > { %v6232_v45 = vmul.f32 %v6200_v22, %v6168_v44  ;;  %v16289_v32 = vmul.f32 %v12433_v49, %v5854_v29  ;;  %v5724_v15 = vmul.f32 %v16264_v43, %v5692_v20  ;;  %v11624_v25 = vadd.f32 %v18666_v7, %v10662_v4  ;;  %v18669_v12 = vld [vmem:[#allocation73_spill] sm:$0xff]  ;;  %6968 = vmatmul.mubr.bf16.gmra.mrb[176].mxu1 %v6665_v8  ;;  %v18671_v22 = vld [vmem:[#allocation67_spill] sm:$0xff]  ;;  %v18677_v20 = vld [vmem:[#allocation24_spill] sm:$0xff] }
 0x4b1   : > { %v6537_v51 = vshll.u32 %v16281_v61, 16  ;;  %v6233_v53 = vmul.f32 %v6201_v39, %v6169_v31  ;;  %v16294_v52 = vmul.f32 1.442695, %v5919_v38  ;;  %v10665_v17 = vadd.f32 %v18668_v41, %v18667_v37  ;;  %v18679_v8 = vld [vmem:[#allocation44_spill] sm:$0xff] }
 0x4b2   : > { %v16298_v36 = vrot.slane %v6340_v62, 7  ;;  %v5756_v0 = vadd.f32 -0.28449672, %v5724_v15  ;;  %v5917_v44 = vmul.f32 %v5885_v60, %v5469_v18  ;;  %v16301_v11 = vadd.f32 %v11624_v25, %v18669_v12  ;;  %v18673_v18 = vld [vmem:[#allocation70_spill] sm:$0xff]  ;;  %v18674_v60 = vld [vmem:[#allocation71_spill] sm:$0xff] }
 0x4b3   : > { %v6343_v4 = vshll.u32 %v6275_v59, 16  ;;  %v6258_v27 = vpack.c.bf16 %v6233_v53, %v6232_v45  ;;  %v11632_v31 = vadd.f32 %v18670_v2, %v10665_v17  ;;  %v10668_v29 = vadd.f32 %v18672_v34, %v18671_v22 }
 0x4b4   : > { %v6046_v33 = vsub.f32 1.0, %v16289_v32  ;;  %v5788_v46 = vmul.f32 %v16264_v43, %v5756_v0  ;;  %v16309_v38 = vmul.f32 0.70710677, %v16301_v11  ;;  %v16313_v49 = vadd.f32 %v18674_v60, %v18673_v18 }
 0x4b5   : > { %v16315_v62 = vpop.eup %12434  ;;  %v16317_v59 = vrot.slane %v6537_v51, 1  ;;  %vm18676_vm7 = vnez %v18675_v56  ;;  %6455 = vst [vmem:[#allocation2 + $0xb0] sm:$0xff] %v6258_v27  ;;  %vm18678_vm1 = vnez %v18677_v20  ;;  %v16324_v39 = vadd.f32 %v11632_v31, %v15881_v50  ;;  %v12054_v51 = vld [vmem:[#allocation5 + $0x150] sm:$0xff]   ;;  %v12055_v56 = vld [vmem:[#allocation5 + $0x158] sm:$0xff]  }
 0x4b6   : > { %v6274_v5 = vsel %vm18676_vm7, %v6258_v27, 0  ;;  %v6471_v26 = vsel %vm18678_vm1, %v6258_v27, 0  ;;  %v6345_v45 = vor.u32 %v6343_v4, %v16298_v36  ;;  %vm6078_vm2 = vcmp.ge.f32.partialorder %v16139_v16, 0.0  ;;  %11382 = vmatprep.subr.bf16.mxu0 %v12054_v51 }
 0x4b7   : > { %v6332_v15 = vshrl.u32 %v6274_v5, 16  ;;  %v6335_v7 = vshll.u32 %v6274_v5, 16  ;;  %v6529_v25 = vshll.u32 %v6471_v26, 16  ;;  %v12437_v53 = vpop.eup %12436  ;;  %v5820_v37 = vadd.f32 0.2548296, %v5788_v46  ;;  %11383 = vmatpush3.bf16.msra.mxu0 %v12054_v51 }
 0x4b8   : > { %v5599_v41 = vmul.f32 1.0614054, %v16315_v62  ;;  %v5472_v17 = vand.u32 2147483647, %v16309_v38  ;;  %v11620_v0 = vadd.f32 %v18679_v8, %v10668_v29  ;;  %v6533_v27 = vshrl.u32 %v6471_v26, 16  ;;  %11384 = vmatprep.subr.bf16.mxu0 %v12055_v56 }
 0x4b9   : > { %v6334_v12 = vrot.slane %v6332_v15, 7  ;;  %v6531_v50 = vrot.slane %v6529_v25, 1  ;;  %v16332_v35 = vmul.f32 0.70710677, %v16324_v39  ;;  %v16334_v4 = vpop.eup %12438  ;;  %v6110_v2 = vsub.f32 0.0, %v6046_v33 }
 0x4ba   : > { %v5852_v31 = vmul.f32 %v16264_v43, %v5820_v37  ;;  %v5631_v22 = vadd.f32 -1.4531521, %v5599_v41  ;;  %v5504_v34 = vmul.f32 0.3275911, %v5472_v17  ;;  %v5597_v20 = vmul.f32 1.0614054, %v16334_v4 }
 0x4bb   : > { %v6337_v46 = vor.u32 %v6335_v7, %v6334_v12  ;;  %v6346_v29 = vsel %vm18652_vm11, %v6334_v12, %v6345_v45  ;;  %v6532_v18 = vsel %vm18680_vm14, %v6527_v54, %v6531_v50  ;;  %v6535_v60 = vor.u32 %v6533_v27, %v6531_v50  ;;  %11385 = vmatpush3.bf16.msra.mxu0 %v12055_v56  ;;  %v18684_v56 = vld [vmem:[#allocation75_spill] sm:$0xff]  ;;  %vm18697_vm14 = vmmov %vm18655_vm8 }
 0x4bc   : > { %6437 = vst [vmem:[#allocation2 + $0xc0] sm:$0xff] %v6346_v29  ;;  %6633 = vst [vmem:[#allocation2 + $0xa0] sm:$0xff] %v6532_v18  ;;  %v5663_v5 = vmul.f32 %v16315_v62, %v5631_v22  ;;  %v5536_v26 = vadd.f32 1.0, %v5504_v34  ;;  %v5888_v15 = vsub.f32 0.0, %v5472_v17  ;;  %v16347_v25 = vmul.f32 %v12437_v53, %v5852_v31  ;;  %v6669_v45 = vld [vmem:[#allocation2 + $0xb0] sm:$0xff]  ;;  %v18682_v22 = vld [vmem:[#allocation72_spill] sm:$0xff] }
 0x4bd   : > { %v6338_v43 = vsel %vm18681_vm15, %v16210_v6, %v6337_v46  ;;  %v6540_v7 = vsel %vm18655_vm8, %v6535_v60, %v16317_v59  ;;  %v16350_v54 = vand.u32 2147483647, %v16332_v35  ;;  %v5629_v37 = vadd.f32 -1.4531521, %v5597_v20  ;;  %6975 = vmatprep.mubr.bf16.mxu1 %v6669_v45  ;;  %v12056_v31 = vld [vmem:[#allocation5 + $0x160] sm:$0xff]   ;;  %vm18698_vm15 = vmmov %vm18652_vm11 }
 0x4be   : > { %6436 = vst [vmem:[#allocation2 + $0xa8] sm:$0xff] %v6338_v43  ;;  %6634 = vst [vmem:[#allocation2 + $0xb8] sm:$0xff] %v6540_v7  ;;  %v5695_v51 = vadd.f32 1.4214138, %v5663_v5  ;;  %v5966_v41 = vmul.f32 1.442695, %v5917_v44  ;;  %12440 = vrcp.f32 %v5536_v26  ;;  %v6142_v12 = vsel %vm6078_vm2, %v6046_v33, %v6110_v2  ;;  %11386 = vmatprep.subr.bf16.mxu0 %v12056_v31 }
 0x4bf   : > { %v16353_v6 = vmul.f32 0.5, %v16167_v23  ;;  %12442 = vpow2.f32 %v16294_v52  ;;  %v16357_v53 = vmul.f32 0.5, %v16243_v13  ;;  %v5505_v8 = vmul.f32 0.3275911, %v16350_v54  ;;  %v18683_v33 = vld [vmem:[#allocation45_spill] sm:$0xff]  ;;  %11387 = vmatpush3.bf16.msra.mxu0 %v12056_v31  ;;  %v6672_v7 = vld [vmem:[#allocation2 + $0xc8] sm:$0xff] }
 0x4c0   : > { %v5727_v44 = vmul.f32 %v16315_v62, %v5695_v51  ;;  %v5661_v50 = vmul.f32 %v16334_v4, %v5629_v37  ;;  %v5920_v27 = vmul.f32 %v5888_v15, %v5472_v17  ;;  %v6044_v23 = vsub.f32 1.0, %v16347_v25  ;;  %v18685_v37 = vld [vmem:[#allocation74_spill] sm:$0xff] }
 0x4c1   : > { %vm6076_vm3 = vcmp.ge.f32.partialorder %v16173_v55, 0.0  ;;  %v16369_v13 = vmul.f32 0.5, %v16249_v3  ;;  %v5537_v52 = vadd.f32 1.0, %v5505_v8  ;;  %v16372_v34 = vadd.f32 %v11620_v0, %v18682_v22 }
 0x4c2   : > { %v5759_v32 = vadd.f32 -0.28449672, %v5727_v44  ;;  %v5693_v16 = vadd.f32 1.4214138, %v5661_v50  ;;  %12444 = vpow2.f32 %v5966_v41  ;;  %v11628_v2 = vadd.f32 %v18683_v33, %v16313_v49  ;;  %v12057_v49 = vld [vmem:[#allocation5 + $0x168] sm:$0xff]   ;;  %v18686_v41 = vld [vmem:[#allocation76_spill] sm:$0xff] }
 0x4c3   : > { %v6541_v17 = vshrl.u32 %v16281_v61, 16  ;;  %v6206_v46 = vadd.f32 1.0, %v6142_v12  ;;  %12446 = vrcp.f32 %v5537_v52  ;;  %v16378_v29 = vmul.f32 0.70710677, %v16372_v34  ;;  %v6667_v3 = vld [vmem:[#allocation2 + $0xa0] sm:$0xff]  ;;  %11388 = vmatprep.subr.bf16.mxu0 %v12057_v49 }
 0x4c4   : > { %v5791_v18 = vmul.f32 %v16315_v62, %v5759_v32  ;;  %v5725_v0 = vmul.f32 %v16334_v4, %v5693_v16  ;;  %v5972_v60 = vmul.f32 1.442695, %v5920_v27  ;;  %v16383_v5 = vadd.f32 %v11628_v2, %v18684_v56  ;;  %11358 = vmatprep.mubr.bf16.mxu0 %v6667_v3  ;;  %v12058_v27 = vld [vmem:[#allocation5 + $0x170] sm:$0xff]   ;;  %11389 = vmatpush3.bf16.msra.mxu0 %v12057_v49  ;;  %v12060_v56 = vld [vmem:[#allocation5 + $0x100] sm:$0xff]  }
 0x4c5   : > { %v16386_v20 = vor.u32 %v6541_v17, %v16317_v59  ;;  %v6108_v61 = vsub.f32 0.0, %v6044_v23  ;;  %v16389_v26 = vand.u32 2147483647, %v16378_v29  ;;  %v6670_v15 = vld [vmem:[#allocation2 + $0xb8] sm:$0xff]  ;;  %v6668_v43 = vld [vmem:[#allocation2 + $0xa8] sm:$0xff]  ;;  %v10674_v8 = vadd.f32 %v18686_v41, %v18685_v37  ;;  %11390 = vmatprep.subr.bf16.mxu0 %v12058_v27  ;;  %v6671_v37 = vld [vmem:[#allocation2 + $0xc0] sm:$0xff]  ;;  %10856 = vmatprep.subr.bf16.mxu1 %v12060_v56 }
 0x4c6   : > { %v5823_v25 = vadd.f32 0.2548296, %v5791_v18  ;;  %v5757_v45 = vadd.f32 -0.28449672, %v5725_v0  ;;  %v16392_v51 = vmul.f32 0.70710677, %v16383_v5  ;;  %11359 = vmatmul.mubr.bf16.gmra.mrb[116].mxu0 %v6670_v15  ;;  %6976 = vmatmul.mubr.bf16.gmra.mrb[180].mxu1 %v6668_v43  ;;  %v10677_v50 = vadd.f32 %v15906_v48, %v15894_v1 }
 0x4c7   : > { %vm6079_vm9 = vcmp.ge.f32.partialorder %v16253_v58, 0.0  ;;  %v16398_v59 = vmul.f32 0.5, %v16301_v11  ;;  %v5889_v12 = vsub.f32 0.0, %v16350_v54  ;;  %v5506_v44 = vmul.f32 0.3275911, %v16389_v26  ;;  %6983 = vmatprep.mubr.bf16.mxu1 %v6672_v7  ;;  %v18687_v48 = vld [vmem:[#allocation46_spill] sm:$0xff] }
 0x4c8   : > { %v16404_v31 = vpop.eup %12440  ;;  %v16407_v52 = vmul.f32 %v6206_v46, %v16287_v30  ;;  %v5855_v22 = vmul.f32 %v16315_v62, %v5823_v25  ;;  %v5789_v11 = vmul.f32 %v16334_v4, %v5757_v45  ;;  %v5475_v32 = vand.u32 2147483647, %v16392_v51  ;;  %11391 = vmatpush3.bf16.msra.mxu0 %v12058_v27  ;;  %v12062_v41 = vld [vmem:[#allocation5 + $0x1c0] sm:$0xff]   ;;  %v12064_v56 = vld [vmem:[#allocation5 + $0x108] sm:$0xff]  }
 0x4c9   : > { %v12443_v16 = vpop.eup %12442  ;;  %v5600_v33 = vmul.f32 1.0614054, %v16404_v31  ;;  %12448 = vpow2.f32 %v5972_v60  ;;  %v5538_v1 = vadd.f32 1.0, %v5506_v44  ;;  %v11640_v2 = vadd.f32 %v18687_v48, %v10674_v8  ;;  %v12059_v60 = vld [vmem:[#allocation5 + $0x178] sm:$0xff]  }
 0x4ca   : > { %v6140_v17 = vsel %vm6076_vm3, %v6044_v23, %v6108_v61  ;;  %v6015_v30 = vmul.f32 %v12443_v16, %v5855_v22  ;;  %v5821_v46 = vadd.f32 0.2548296, %v5789_v11  ;;  %v5507_v3 = vmul.f32 0.3275911, %v5475_v32  ;;  %v12061_v61 = vld [vmem:[#allocation5 + $0xc0] sm:$0xff]   ;;  %11392 = vmatprep.subr.bf16.mxu0 %v12059_v60  ;;  %v18688_v11 = vld [vmem:[#allocation47_spill] sm:$0xff] }
 0x4cb   : > { %vm6077_vm4 = vcmp.ge.f32.partialorder %v16257_v63, 0.0  ;;  %v5632_v62 = vadd.f32 -1.4531521, %v5600_v33  ;;  %v5921_v18 = vmul.f32 %v5889_v12, %v16350_v54  ;;  %12450 = vrcp.f32 %v5538_v1  ;;  %10857 = vmatpush3.bf16.msra.mxu1 %v12061_v61 }
 0x4cc   : > { %v16419_v0 = vadd.f32 %v11640_v2, %v15904_v57  ;;  %v12445_v49 = vpop.eup %12444  ;;  %v6047_v15 = vsub.f32 1.0, %v6015_v30  ;;  %v5853_v43 = vmul.f32 %v16334_v4, %v5821_v46  ;;  %v5890_v55 = vsub.f32 0.0, %v16389_v26  ;;  %11393 = vmatpush3.bf16.msra.mxu0 %v12059_v60  ;;  %10858 = vmatprep.subr.bf16.mxu1 %v12064_v56 }
 0x4cd   : > { %v5539_v23 = vadd.f32 1.0, %v5507_v3  ;;  %v16423_v7 = vpop.eup %12446  ;;  %v6204_v25 = vadd.f32 1.0, %v6140_v17  ;;  %v5664_v54 = vmul.f32 %v16404_v31, %v5632_v62  ;;  %v5891_v45 = vsub.f32 0.0, %v5475_v32  ;;  %10992 = vmatprep.subr.bf16.mxu0 %v12062_v41  ;;  %v18689_v41 = vld [vmem:[#allocation25_spill] sm:$0xff] }
 0x4ce   : > { %v16427_v57 = vmul.f32 0.70710677, %v16419_v0  ;;  %v6111_v8 = vsub.f32 0.0, %v6047_v15  ;;  %v6013_v4 = vmul.f32 %v12445_v49, %v5853_v43  ;;  %v5601_v12 = vmul.f32 1.0614054, %v16423_v7  ;;  %6984 = vmatmul.mubr.bf16.gmra.mrb[184].mxu1 %v6671_v37  ;;  %v12065_v49 = vld [vmem:[#allocation5 + $0xc8] sm:$0xff]  }
 0x4cf   : > { %12452 = vrcp.f32 %v5539_v23  ;;  %v5696_v44 = vadd.f32 1.4214138, %v5664_v54  ;;  %v5974_v27 = vmul.f32 1.442695, %v5921_v18  ;;  %v11648_v16 = vadd.f32 %v18688_v11, %v10677_v50  ;;  %10859 = vmatpush3.bf16.msra.mxu1 %v12065_v49  ;;  %v18695_v49 = vld [vmem:[#allocation27_spill] sm:$0xff] }
 0x4d0   : > { %v16431_v22 = vand.u32 2147483647, %v16427_v57  ;;  %v6143_v33 = vsel %vm6079_vm9, %v6047_v15, %v6111_v8  ;;  %v6045_v1 = vsub.f32 1.0, %v6013_v4  ;;  %v5633_v48 = vadd.f32 -1.4531521, %v5601_v12  ;;  %v12066_v15 = vld [vmem:[#allocation5 + $0x110] sm:$0xff]  }
 0x4d1   : > { %v5922_v2 = vmul.f32 %v5890_v55, %v16389_v26  ;;  %v6236_v17 = vmul.f32 %v6204_v25, %v16353_v6  ;;  %v6207_v30 = vadd.f32 1.0, %v6143_v33  ;;  %v5728_v46 = vmul.f32 %v16404_v31, %v5696_v44  ;;  %10860 = vmatprep.subr.bf16.mxu1 %v12066_v15  ;;  %v18691_v4 = vld [vmem:[#allocation26_spill] sm:$0xff] }
 0x4d2   : > { %v5508_v3 = vmul.f32 0.3275911, %v16431_v22  ;;  %v6109_v62 = vsub.f32 0.0, %v6045_v1  ;;  %v5665_v50 = vmul.f32 %v16423_v7, %v5633_v48  ;;  %v5923_v18 = vmul.f32 %v5891_v45, %v5475_v32 }
 0x4d3   : > { %v16442_v58 = vadd.f32 %v11648_v16, %v15916_v24  ;;  %v12449_v26 = vpop.eup %12448  ;;  %v6239_v60 = vmul.f32 %v6207_v30, %v16357_v53  ;;  %v5760_v6 = vadd.f32 -0.28449672, %v5728_v46  ;;  %v16447_v55 = vadd.f32 %v15997_v47, %v15994_v28  ;;  %v12067_v28 = vld [vmem:[#allocation5 + $0xd0] sm:$0xff]  }
 0x4d4   : > { %v5540_v43 = vadd.f32 1.0, %v5508_v3  ;;  %v6141_v23 = vsel %vm6077_vm4, %v6045_v1, %v6109_v62  ;;  %v5697_v61 = vadd.f32 1.4214138, %v5665_v50  ;;  %v5976_v32 = vmul.f32 1.442695, %v5922_v2  ;;  %10861 = vmatpush3.bf16.msra.mxu1 %v12067_v28  ;;  %v12070_v62 = vld [vmem:[#allocation5 + $0x118] sm:$0xff]  }
 0x4d5   : > { %v16452_v24 = vmul.f32 0.70710677, %v16442_v58  ;;  %v16454_v25 = vpop.eup %12450  ;;  %v6261_v54 = vpack.c.bf16 %v6239_v60, %v16407_v52  ;;  %v6205_v53 = vadd.f32 1.0, %v6141_v23  ;;  %v5792_v45 = vmul.f32 %v16404_v31, %v5760_v6  ;;  %v12071_v50 = vld [vmem:[#allocation5 + $0xd8] sm:$0xff]   ;;  %v12072_v60 = vld [vmem:[#allocation5 + $0x120] sm:$0xff]   ;;  %10862 = vmatprep.subr.bf16.mxu1 %v12070_v62 }
 0x4d6   : > { %12454 = vpow2.f32 %v5974_v27  ;;  %v5729_v47 = vmul.f32 %v16423_v7, %v5697_v61  ;;  %v5602_v63 = vmul.f32 1.0614054, %v16454_v25  ;;  %v5978_v37 = vmul.f32 1.442695, %v5923_v18  ;;  %v18693_v18 = vld [vmem:[#allocation28_spill] sm:$0xff]  ;;  %v12073_v28 = vld [vmem:[#allocation5 + $0xe0] sm:$0xff]  }
 0x4d7   : > { %12456 = vrcp.f32 %v5540_v43  ;;  %vm18690_vm10 = vnez %v18689_v41  ;;  %6458 = vst [vmem:[#allocation2 + $0xf8] sm:$0xff] %v6261_v54  ;;  %vm18692_vm6 = vnez %v18691_v4  ;;  %v6237_v12 = vmul.f32 %v6205_v53, %v16369_v13 }
 0x4d8   : > { %v6277_v8 = vsel %vm18690_vm10, %v6261_v54, 0  ;;  %v16464_v52 = vsel %vm18692_vm6, %v6261_v54, 0  ;;  %v5824_v44 = vadd.f32 0.2548296, %v5792_v45  ;;  %vm6080_vm7 = vcmp.ge.f32.partialorder %v16309_v38, 0.0  ;;  %10863 = vmatpush3.bf16.msra.mxu1 %v12071_v50  ;;  %vm18707_vm6 = vmmov %vm18655_vm8 }
 0x4d9   : > { %v16467_v27 = vpop.eup %12452  ;;  %v6356_v11 = vshrl.u32 %v6277_v8, 16  ;;  %v6553_v16 = vshll.u32 %v16464_v52, 16  ;;  %12458 = vpow2.f32 %v5976_v32  ;;  %v16472_v33 = vand.u32 2147483647, %v16452_v24  ;;  %10864 = vmatprep.subr.bf16.mxu1 %v12072_v60 }
 0x4da   : > { %v6260_v1 = vpack.c.bf16 %v6237_v12, %v6236_v17  ;;  %v5856_v48 = vmul.f32 %v16404_v31, %v5824_v44  ;;  %v5761_v2 = vadd.f32 -0.28449672, %v5729_v47  ;;  %v5634_v30 = vadd.f32 -1.4531521, %v5602_v63 }
 0x4db   : > { %v16475_v46 = vrot.slane %v6356_v11, 7  ;;  %v6359_v13 = vshll.u32 %v6277_v8, 16  ;;  %v5603_v3 = vmul.f32 1.0614054, %v16467_v27  ;;  %12460 = vpow2.f32 %v5978_v37 }
 0x4dc   : > { %vm18694_vm1 = vnez %v18693_v18  ;;  %6457 = vst [vmem:[#allocation2 + $0xe0] sm:$0xff] %v6260_v1  ;;  %vm18696_vm2 = vnez %v18695_v49  ;;  %v6016_v15 = vmul.f32 %v12449_v26, %v5856_v48  ;;  %v5793_v31 = vmul.f32 %v16423_v7, %v5761_v2  ;;  %10865 = vmatpush3.bf16.msra.mxu1 %v12073_v28  ;;  %v12079_v28 = vld [vmem:[#allocation5 + $0xf0] sm:$0xff]  }
 0x4dd   : > { %v6276_v56 = vsel %vm18694_vm1, %v6260_v1, 0  ;;  %v6473_v17 = vsel %vm18696_vm2, %v6260_v1, 0  ;;  %v6361_v6 = vor.u32 %v6359_v13, %v16475_v46  ;;  %v16484_v43 = vrot.slane %v6553_v16, 1  ;;  %vm18708_vm1 = vmmov %vm18652_vm11 }
 0x4de   : > { %v6348_v23 = vshrl.u32 %v6276_v56, 16  ;;  %v5892_v61 = vsub.f32 0.0, %v16431_v22  ;;  %v6351_v32 = vshll.u32 %v6276_v56, 16  ;;  %v6545_v54 = vshll.u32 %v6473_v17, 16 }
 0x4df   : > { %v6048_v53 = vsub.f32 1.0, %v6016_v15  ;;  %v5825_v45 = vadd.f32 0.2548296, %v5793_v31  ;;  %v6549_v63 = vshrl.u32 %v6473_v17, 16  ;;  %v5666_v26 = vmul.f32 %v16454_v25, %v5634_v30  ;;  %v12077_v15 = vld [vmem:[#allocation5 + $0xe8] sm:$0xff]  }
 0x4e0   : > { %v6350_v47 = vrot.slane %v6348_v23, 7  ;;  %v5635_v37 = vadd.f32 -1.4531521, %v5603_v3  ;;  %v12455_v41 = vpop.eup %12454  ;;  %v6547_v8 = vrot.slane %v6545_v54, 1  ;;  %v5509_v44 = vmul.f32 0.3275911, %v16472_v33 }
 0x4e1   : > { %v6112_v4 = vsub.f32 0.0, %v6048_v53  ;;  %v5857_v12 = vmul.f32 %v16423_v7, %v5825_v45  ;;  %v16490_v11 = vpop.eup %12456  ;;  %v5698_v48 = vadd.f32 1.4214138, %v5666_v26  ;;  %v5924_v49 = vmul.f32 %v5892_v61, %v16431_v22 }
 0x4e2   : > { %v6353_v16 = vor.u32 %v6351_v32, %v6350_v47  ;;  %v6362_v1 = vsel %vm18652_vm11, %v6350_v47, %v6361_v6  ;;  %v5667_v2 = vmul.f32 %v16467_v27, %v5635_v37  ;;  %v6548_v30 = vsel %vm18697_vm14, %v16386_v20, %v6547_v8  ;;  %v12076_v20 = vld [vmem:[#allocation5 + $0x128] sm:$0xff]   ;;  %vm18715_vm14 = vmmov %vm18707_vm6 }
 0x4e3   : > { %6439 = vst [vmem:[#allocation2 + $0xf0] sm:$0xff] %v6362_v1  ;;  %v6551_v13 = vor.u32 %v6549_v63, %v6547_v8  ;;  %v6144_v3 = vsel %vm6080_vm7, %v6048_v53, %v6112_v4  ;;  %v6017_v62 = vmul.f32 %v12455_v41, %v5857_v12  ;;  %v16498_v7 = vpop.eup %12458  ;;  %6635 = vst [vmem:[#allocation2 + $0xd0] sm:$0xff] %v6548_v30  ;;  %v16504_v17 = vld [vmem:[#allocation2 + $0xe0] sm:$0xff]  ;;  %v5604_v60 = vmul.f32 1.0614054, %v16490_v11  ;;  %v18699_v8 = vld [vmem:[#allocation48_spill] sm:$0xff] }
 0x4e4   : > { %v6354_v50 = vsel %vm18698_vm15, %v16298_v36, %v6353_v16  ;;  %v5730_v18 = vmul.f32 %v16454_v25, %v5698_v48  ;;  %v5699_v56 = vadd.f32 1.4214138, %v5667_v2  ;;  %v5541_v6 = vadd.f32 1.0, %v5509_v44  ;;  %6991 = vmatprep.mubr.bf16.mxu1 %v16504_v17  ;;  %v12078_v36 = vld [vmem:[#allocation5 + $0x130] sm:$0xff]   ;;  %10866 = vmatprep.subr.bf16.mxu1 %v12076_v20  ;;  %v18700_v2 = vld [vmem:[#allocation49_spill] sm:$0xff]  ;;  %vm18716_vm15 = vmmov %vm18708_vm1 }
 0x4e5   : > { %6438 = vst [vmem:[#allocation2 + $0xd8] sm:$0xff] %v6354_v50  ;;  %v6556_v38 = vsel %vm18655_vm8, %v6551_v13, %v16484_v43  ;;  %v6049_v31 = vsub.f32 1.0, %v6017_v62  ;;  %v16510_v23 = vpop.eup %12460  ;;  %v6208_v32 = vadd.f32 1.0, %v6144_v3  ;;  %vm6081_vm3 = vcmp.ge.f32.partialorder %v16332_v35, 0.0  ;;  %10867 = vmatpush3.bf16.msra.mxu1 %v12077_v15  ;;  %v12082_v62 = vld [vmem:[#allocation5 + $0x138] sm:$0xff]   ;;  %v18702_v15 = vld [vmem:[#allocation50_spill] sm:$0xff] }
 0x4e6   : > { %6636 = vst [vmem:[#allocation2 + $0xe8] sm:$0xff] %v6556_v38  ;;  %v5762_v22 = vadd.f32 -0.28449672, %v5730_v18  ;;  %v5731_v61 = vmul.f32 %v16467_v27, %v5699_v56  ;;  %v6177_v53 = vmul.f32 0.5, %v16324_v39  ;;  %v5636_v45 = vadd.f32 -1.4531521, %v5604_v60  ;;  %10868 = vmatprep.subr.bf16.mxu1 %v12078_v36 }
 0x4e7   : > { %v6113_v54 = vsub.f32 0.0, %v6049_v31  ;;  %12462 = vrcp.f32 %v5541_v6  ;;  %v16517_v63 = vmul.f32 0.5, %v16372_v34  ;;  %v5980_v37 = vmul.f32 1.442695, %v5924_v49  ;;  %v12083_v50 = vld [vmem:[#allocation5 + $0xf8] sm:$0xff]   ;;  %v18701_v56 = vld [vmem:[#allocation77_spill] sm:$0xff] }
 0x4e8   : > { %v5794_v47 = vmul.f32 %v16454_v25, %v5762_v22  ;;  %v5763_v26 = vadd.f32 -0.28449672, %v5731_v61  ;;  %v5668_v41 = vmul.f32 %v16490_v11, %v5636_v45  ;;  %v11636_v4 = vadd.f32 %v18699_v8, %v16447_v55 }
 0x4e9   : > { %v6145_v35 = vsel %vm6081_vm3, %v6049_v31, %v6113_v54  ;;  %v10683_v39 = vadd.f32 %v16014_v14, %v16012_v10  ;;  %v6240_v12 = vmul.f32 %v6208_v32, %v16398_v59  ;;  %vm6082_vm9 = vcmp.ge.f32.partialorder %v16378_v29, 0.0  ;;  %10869 = vmatpush3.bf16.msra.mxu1 %v12079_v28  ;;  %v16558_v31 = vld [vmem:[#allocation2 + $0xf8] sm:$0xff]  ;;  %v18703_v32 = vld [vmem:[#allocation32_spill] sm:$0xff] }
 0x4ea   : > { %v6209_v44 = vadd.f32 1.0, %v6145_v35  ;;  %v5826_v16 = vadd.f32 0.2548296, %v5794_v47  ;;  %v5795_v1 = vmul.f32 %v16467_v27, %v5763_v26  ;;  %v5700_v34 = vadd.f32 1.4214138, %v5668_v41  ;;  %v16533_v13 = vld [vmem:[#allocation2 + $0xd0] sm:$0xff]  ;;  %10870 = vmatprep.subr.bf16.mxu1 %v12082_v62 }
 0x4eb   : > { %v16528_v48 = vadd.f32 %v11636_v4, %v15896_v19  ;;  %v11644_v30 = vadd.f32 %v18700_v2, %v10683_v39  ;;  %v10686_v55 = vadd.f32 %v16068_v9, %v16060_v40  ;;  %v16538_v3 = vadd.f32 %v16092_v42, %v16080_v21  ;;  %11362 = vmatprep.mubr.bf16.mxu0 %v16533_v13 }
 0x4ec   : > { %v6241_v10 = vmul.f32 %v6209_v44, %v6177_v53  ;;  %v5858_v14 = vmul.f32 %v16454_v25, %v5826_v16  ;;  %v5827_v59 = vadd.f32 0.2548296, %v5795_v1  ;;  %v16541_v19 = vld [vmem:[#allocation2 + $0xd8] sm:$0xff]  ;;  %v5732_v18 = vmul.f32 %v16490_v11, %v5700_v34  ;;  %v16584_v1 = vld [vmem:[#allocation2 + $0xf0] sm:$0xff] }
 0x4ed   : > { %v5893_v40 = vsub.f32 0.0, %v16472_v33  ;;  %v16546_v9 = vmul.f32 0.70710677, %v16528_v48  ;;  %v16549_v25 = vadd.f32 %v11644_v30, %v18701_v56  ;;  %v16551_v49 = vld [vmem:[#allocation2 + $0xe8] sm:$0xff]  ;;  %6992 = vmatmul.mubr.bf16.gmra.mrb[188].mxu1 %v16541_v19  ;;  %v11656_v38 = vadd.f32 %v18702_v15, %v10686_v55 }
 0x4ee   : > { %v6262_v21 = vpack.c.bf16 %v6241_v10, %v6240_v12  ;;  %v6018_v42 = vmul.f32 %v16498_v7, %v5858_v14  ;;  %v5859_v20 = vmul.f32 %v16467_v27, %v5827_v59  ;;  %11363 = vmatmul.mubr.bf16.gmra.mrb[120].mxu0 %v16551_v49  ;;  %v6557_v60 = vshrl.u32 %v16464_v52, 16  ;;  %6999 = vmatprep.mubr.bf16.mxu1 %v16558_v31  ;;  %v18705_v27 = vld [vmem:[#allocation31_spill] sm:$0xff] }
 0x4ef   : > { %v5764_v6 = vadd.f32 -0.28449672, %v5732_v18  ;;  %12464 = vpow2.f32 %v5980_v37  ;;  %v16562_v36 = vand.u32 2147483647, %v16546_v9  ;;  %vm18704_vm4 = vnez %v18703_v32  ;;  %10871 = vmatpush3.bf16.msra.mxu1 %v12083_v50 }
 0x4f0   : > { %v6278_v7 = vsel %vm18704_vm4, %v6262_v21, 0  ;;  %6459 = vst [vmem:[#allocation2 + $0x110] sm:$0xff] %v6262_v21  ;;  %vm18706_vm10 = vnez %v18705_v27  ;;  %v6050_v61 = vsub.f32 1.0, %v6018_v42  ;;  %v6019_v54 = vmul.f32 %v16510_v23, %v5859_v20 }
 0x4f1   : > { %v16569_v22 = vsel %vm18706_vm10, %v6262_v21, 0  ;;  %v16572_v52 = vpop.eup %12462  ;;  %v6559_v53 = vor.u32 %v6557_v60, %v16484_v43  ;;  %v6364_v45 = vshrl.u32 %v6278_v7, 16  ;;  %v5925_v47 = vmul.f32 %v5893_v40, %v16472_v33  ;;  %vm18730_vm10 = vmmov %vm18707_vm6 }
 0x4f2   : > { %v6561_v28 = vshll.u32 %v16569_v22, 16  ;;  %v6114_v26 = vsub.f32 0.0, %v6050_v61  ;;  %v6051_v37 = vsub.f32 1.0, %v6019_v54  ;;  %v5796_v35 = vmul.f32 %v16490_v11, %v5764_v6 }
 0x4f3   : > { %v5605_v41 = vmul.f32 1.0614054, %v16572_v52  ;;  %v16579_v8 = vrot.slane %v6364_v45, 7  ;;  %v6367_v4 = vshll.u32 %v6278_v7, 16  ;;  %v5510_v39 = vmul.f32 0.3275911, %v16562_v36 }
 0x4f4   : > { %v6563_v23 = vrot.slane %v6561_v28, 1  ;;  %v6146_v43 = vsel %vm6082_vm9, %v6050_v61, %v6114_v26  ;;  %v6115_v12 = vsub.f32 0.0, %v6051_v37  ;;  %v5828_v44 = vadd.f32 0.2548296, %v5796_v35  ;;  %v18711_v61 = vld [vmem:[#allocation29_spill] sm:$0xff] }
 0x4f5   : > { %v5637_v16 = vadd.f32 -1.4531521, %v5605_v41  ;;  %v6369_v33 = vor.u32 %v6367_v4, %v16579_v8  ;;  %v6210_v2 = vadd.f32 1.0, %v6146_v43  ;;  %vm6083_vm7 = vcmp.ge.f32.partialorder %v16392_v51, 0.0  ;;  %7000 = vmatmul.mubr.bf16.gmra.mrb[192].mxu1 %v16584_v1 }
 0x4f6   : > { %v6564_v34 = vsel %vm18707_vm6, %v6559_v53, %v6563_v23  ;;  %v6147_v30 = vsel %vm6083_vm7, %v6051_v37, %v6115_v12  ;;  %v5982_v29 = vmul.f32 1.442695, %v5925_v47  ;;  %v5542_v10 = vadd.f32 1.0, %v5510_v39  ;;  %vm18731_vm6 = vmmov %vm18708_vm1 }
 0x4f7   : > { %6637 = vst [vmem:[#allocation2 + $0x100] sm:$0xff] %v6564_v34  ;;  %v5669_v55 = vmul.f32 %v16572_v52, %v5637_v16  ;;  %v6370_v14 = vsel %vm18708_vm1, %v16475_v46, %v6369_v33  ;;  %v6179_v59 = vmul.f32 0.5, %v16383_v5  ;;  %v6211_v62 = vadd.f32 1.0, %v6147_v30  ;;  %v16595_v18 = vld [vmem:[#allocation2 + $0x110] sm:$0xff]  ;;  %v18709_v46 = vld [vmem:[#allocation79_spill] sm:$0xff] }
 0x4f8   : > { %v5860_v50 = vmul.f32 %v16490_v11, %v5828_v44  ;;  %6440 = vst [vmem:[#allocation2 + $0x108] sm:$0xff] %v6370_v14  ;;  %12466 = vrcp.f32 %v5542_v10  ;;  %v16598_v40 = vmul.f32 0.70710677, %v16549_v25  ;;  %7007 = vmatprep.mubr.bf16.mxu1 %v16595_v18  ;;  %v6242_v21 = vmul.f32 %v6210_v2, %v16517_v63  ;;  %v18710_v5 = vld [vmem:[#allocation51_spill] sm:$0xff] }
 0x4f9   : > { %v5701_v51 = vadd.f32 1.4214138, %v5669_v55  ;;  %v12465_v56 = vpop.eup %12464  ;;  %v6243_v42 = vmul.f32 %v6211_v62, %v6179_v59  ;;  %v16603_v20 = vadd.f32 %v11656_v38, %v18709_v46  ;;  %v11664_v11 = vadd.f32 %v18710_v5, %v16538_v3  ;;  %v18713_v3 = vld [vmem:[#allocation30_spill] sm:$0xff] }
 0x4fa   : > { %12468 = vpow2.f32 %v5982_v29  ;;  %v16609_v60 = vand.u32 2147483647, %v16598_v40  ;;  %v6020_v32 = vmul.f32 %v12465_v56, %v5860_v50  ;;  %v6565_v38 = vshrl.u32 %v16569_v22, 16  ;;  %v18717_v56 = vld [vmem:[#allocation10_spill] sm:$0xff] }
 0x4fb   : > { %v5733_v15 = vmul.f32 %v16572_v52, %v5701_v51  ;;  %v6263_v6 = vpack.c.bf16 %v6243_v42, %v6242_v21  ;;  %v16612_v7 = vmul.f32 0.70710677, %v16603_v20  ;;  %vm18712_vm2 = vnez %v18711_v61  ;;  %v18719_v42 = vld [vmem:[#allocation12_spill] sm:$0xff] }
 0x4fc   : > { %v5511_v63 = vmul.f32 0.3275911, %v16609_v60  ;;  %vm18714_vm11 = vnez %v18713_v3  ;;  %v5894_v37 = vsub.f32 0.0, %v16562_v36  ;;  %v6567_v22 = vor.u32 %v6565_v38, %v6563_v23 }
 0x4fd   : > { %v5765_v27 = vadd.f32 -0.28449672, %v5733_v15  ;;  %v6279_v54 = vsel %vm18712_vm2, %v6263_v6, 0  ;;  %6460 = vst [vmem:[#allocation2 + $0x128] sm:$0xff] %v6263_v6  ;;  %v16620_v53 = vsel %vm18714_vm11, %v6263_v6, 0  ;;  %v6052_v35 = vsub.f32 1.0, %v6020_v32 }
 0x4fe   : > { %v16623_v45 = vand.u32 2147483647, %v16612_v7  ;;  %v16625_v28 = vld [vmem:[#allocation2 + $0x100] sm:$0xff]  ;;  %v6372_v47 = vshrl.u32 %v6279_v54, 16  ;;  %v6569_v26 = vshll.u32 %v16620_v53, 16  ;;  %v5543_v4 = vadd.f32 1.0, %v5511_v63 }
 0x4ff   : > { %11366 = vmatprep.mubr.bf16.mxu0 %v16625_v28  ;;  %v5797_v41 = vmul.f32 %v16572_v52, %v5765_v27  ;;  %v16631_v39 = vld [vmem:[#allocation2 + $0x108] sm:$0xff]  ;;  %v6375_v12 = vshll.u32 %v6279_v54, 16  ;;  %v6180_v30 = vmul.f32 0.5, %v16419_v0  ;;  %v5926_v55 = vmul.f32 %v5894_v37, %v16562_v36  ;;  %v18718_v0 = vld [vmem:[#allocation11_spill] sm:$0xff]  ;;  %v18721_v15 = vld [vmem:[#allocation14_spill] sm:$0xff] }
 0x500   : > { %v16633_v43 = vrot.slane %v6372_v47, 7  ;;  %v16635_v44 = vrot.slane %v6569_v26, 1  ;;  %v5512_v16 = vmul.f32 0.3275911, %v16623_v45  ;;  %7008 = vmatmul.mubr.bf16.gmra.mrb[196].mxu1 %v16631_v39  ;;  %12470 = vrcp.f32 %v5543_v4  ;;  %v18722_v27 = vld [vmem:[#allocation52_spill] sm:$0xff]  ;;  %v18723_v54 = vld [vmem:[#allocation53_spill] sm:$0xff] }
 0x501   : > { %v5829_v33 = vadd.f32 0.2548296, %v5797_v41  ;;  %7015 = vmatprep.mubr.bf16.mxu1 %v6263_v6  ;;  %v6116_v29 = vsub.f32 0.0, %v6052_v35  ;;  %v5895_v51 = vsub.f32 0.0, %v16609_v60  ;;  %v16652_v21 = vadd.f32 %v11664_v11, %v18717_v56 }
 0x502   : > { %v16639_v34 = vpop.eup %12466  ;;  %v6377_v23 = vor.u32 %v6375_v12, %v16633_v43  ;;  %v6572_v2 = vsel %vm18715_vm14, %v6567_v22, %v16635_v44  ;;  %v5544_v59 = vadd.f32 1.0, %v5512_v16  ;;  %v10692_v36 = vadd.f32 %v18719_v42, %v18718_v0 }
 0x503   : > { %6638 = vst [vmem:[#allocation2 + $0x118] sm:$0xff] %v6572_v2  ;;  %v5861_v10 = vmul.f32 %v16572_v52, %v5829_v33  ;;  %v5606_v14 = vmul.f32 1.0614054, %v16639_v34  ;;  %11367 = vmatmul.mubr.bf16.gmra.mrb[124].mxu0 %v6572_v2  ;;  %v18720_v52 = vld [vmem:[#allocation13_spill] sm:$0xff]  ;;  %vm6084_vm8 = vcmp.ge.f32.partialorder %v16427_v57, 0.0  ;;  %vm6085_vm3 = vcmp.ge.f32.partialorder %v16452_v24, 0.0 }
 0x504   : > { %v12469_v62 = vpop.eup %12468  ;;  %v6378_v50 = vsel %vm18716_vm15, %v16579_v8, %v6377_v23  ;;  %12472 = vrcp.f32 %v5544_v59  ;;  %v10695_v6 = vadd.f32 %v18721_v15, %v18720_v52  ;;  %v5984_v32 = vmul.f32 1.442695, %v5926_v55  ;;  %v18724_v57 = vld [vmem:[#allocation78_spill] sm:$0xff]  ;;  %vm18736_vm15 = vmmov %vm18730_vm10 }
 0x505   : > { %6441 = vst [vmem:[#allocation2 + $0x120] sm:$0xff] %v6378_v50  ;;  %v6021_v46 = vmul.f32 %v12469_v62, %v5861_v10  ;;  %v5638_v5 = vadd.f32 -1.4531521, %v5606_v14  ;;  %v16660_v8 = vmul.f32 0.70710677, %v16652_v21  ;;  %v11652_v63 = vadd.f32 %v18722_v27, %v10692_v36 }
 0x506   : > { %v6148_v11 = vsel %vm6084_vm8, %v6052_v35, %v6116_v29  ;;  %v11660_v3 = vadd.f32 %v18723_v54, %v10695_v6  ;;  %v6181_v47 = vmul.f32 0.5, %v16442_v58  ;;  %v5927_v4 = vmul.f32 %v5895_v51, %v16609_v60  ;;  %v18725_v35 = vld [vmem:[#allocation80_spill] sm:$0xff] }
 0x507   : > { %v6053_v38 = vsub.f32 1.0, %v6021_v46  ;;  %v5670_v61 = vmul.f32 %v16639_v34, %v5638_v5  ;;  %v16668_v26 = vand.u32 2147483647, %v16660_v8  ;;  %v16671_v37 = vadd.f32 %v11652_v63, %v18724_v57  ;;  %v18728_v54 = vld [vmem:[#allocation36_spill] sm:$0xff] }
 0x508   : > { %v16675_v12 = vadd.f32 %v11660_v3, %v18725_v35  ;;  %v6212_v16 = vadd.f32 1.0, %v6148_v11  ;;  %12474 = vpow2.f32 %v5984_v32  ;;  %v5896_v55 = vsub.f32 0.0, %v16623_v45 }
 0x509   : > { %v6117_v22 = vsub.f32 0.0, %v6053_v38  ;;  %v5702_v41 = vadd.f32 1.4214138, %v5670_v61  ;;  %v5513_v33 = vmul.f32 0.3275911, %v16668_v26  ;;  %v6573_v60 = vshrl.u32 %v16620_v53, 16 }
 0x50a   : > { %v16679_v24 = vmul.f32 0.70710677, %v16671_v37  ;;  %v16681_v58 = vpop.eup %12470  ;;  %v16686_v29 = vmul.f32 0.70710677, %v16675_v12  ;;  %v5986_v51 = vmul.f32 1.442695, %v5927_v4  ;;  %v6244_v0 = vmul.f32 %v6212_v16, %v6180_v30 }
 0x50b   : > { %v6149_v23 = vsel %vm6085_vm3, %v6053_v38, %v6117_v22  ;;  %v5734_v2 = vmul.f32 %v16639_v34, %v5702_v41  ;;  %v5607_v14 = vmul.f32 1.0614054, %v16681_v58  ;;  %v5545_v59 = vadd.f32 1.0, %v5513_v33  ;;  %v18726_v61 = vld [vmem:[#allocation35_spill] sm:$0xff]  ;;  %vm18737_vm3 = vmmov %vm18731_vm6 }
 0x50c   : > { %v6213_v10 = vadd.f32 1.0, %v6149_v23  ;;  %v16690_v62 = vld [vmem:[#allocation2 + $0x120] sm:$0xff]  ;;  %v16693_v56 = vand.u32 2147483647, %v16679_v24  ;;  %v5928_v5 = vmul.f32 %v5896_v55, %v16623_v45  ;;  %v16702_v15 = vand.u32 2147483647, %v16686_v29 }
 0x50d   : > { %v5766_v50 = vadd.f32 -0.28449672, %v5734_v2  ;;  %7016 = vmatmul.mubr.bf16.gmra.mrb[200].mxu1 %v16690_v62  ;;  %v5639_v36 = vadd.f32 -1.4531521, %v5607_v14  ;;  %12476 = vrcp.f32 %v5545_v59  ;;  %v6575_v6 = vor.u32 %v6573_v60, %v16635_v44 }
 0x50e   : > { %v6245_v42 = vmul.f32 %v6213_v10, %v6181_v47  ;;  %v16696_v46 = vpop.eup %12472  ;;  %v5514_v52 = vmul.f32 0.3275911, %v16693_v56  ;;  %12478 = vpow2.f32 %v5986_v51  ;;  %v5515_v38 = vmul.f32 0.3275911, %v16702_v15 }
 0x50f   : > { %v5798_v53 = vmul.f32 %v16639_v34, %v5766_v50  ;;  %v5671_v27 = vmul.f32 %v16681_v58, %v5639_v36  ;;  %v5608_v30 = vmul.f32 1.0614054, %v16696_v46  ;;  %vm18727_vm9 = vnez %v18726_v61 }
 0x510   : > { %v6264_v32 = vpack.c.bf16 %v6245_v42, %v6244_v0  ;;  %v5546_v11 = vadd.f32 1.0, %v5514_v52  ;;  %vm18729_vm4 = vnez %v18728_v54  ;;  %v5988_v41 = vmul.f32 1.442695, %v5928_v5 }
 0x511   : > { %v5830_v63 = vadd.f32 0.2548296, %v5798_v53  ;;  %v5703_v47 = vadd.f32 1.4214138, %v5671_v27  ;;  %v5640_v44 = vadd.f32 -1.4531521, %v5608_v30 }
 0x512   : > { %v6280_v45 = vsel %vm18727_vm9, %v6264_v32, 0  ;;  %6461 = vst [vmem:[#allocation2 + $0x140] sm:$0xff] %v6264_v32  ;;  %v16712_v3 = vsel %vm18729_vm4, %v6264_v32, 0  ;;  %7023 = vmatprep.mubr.bf16.mxu1 %v6264_v32  ;;  %v5897_v4 = vsub.f32 0.0, %v16668_v26  ;;  %v12475_v35 = vpop.eup %12474  ;;  %12480 = vrcp.f32 %v5546_v11  ;;  %vm18740_vm4 = vmmov %vm18730_vm10 }
 0x513   : > { %v6380_v57 = vshrl.u32 %v6280_v45, 16  ;;  %v6577_v22 = vshll.u32 %v16712_v3, 16  ;;  %v5862_v16 = vmul.f32 %v16639_v34, %v5830_v63  ;;  %v5735_v33 = vmul.f32 %v16681_v58, %v5703_v47 }
 0x514   : > { %v5672_v23 = vmul.f32 %v16696_v46, %v5640_v44  ;;  %v6383_v55 = vshll.u32 %v6280_v45, 16  ;;  %v5547_v10 = vadd.f32 1.0, %v5515_v38  ;;  %12482 = vpow2.f32 %v5988_v41 }
 0x515   : > { %v16719_v2 = vrot.slane %v6380_v57, 7  ;;  %v16721_v60 = vrot.slane %v6577_v22, 1  ;;  %v6022_v14 = vmul.f32 %v12475_v35, %v5862_v16  ;;  %v5767_v59 = vadd.f32 -0.28449672, %v5735_v33 }
 0x516   : > { %v5704_v50 = vadd.f32 1.4214138, %v5672_v23  ;;  %v5929_v34 = vmul.f32 %v5897_v4, %v16668_v26  ;;  %12484 = vrcp.f32 %v5547_v10  ;;  %v5898_v45 = vsub.f32 0.0, %v16693_v56 }
 0x517   : > { %v6385_v51 = vor.u32 %v6383_v55, %v16719_v2  ;;  %v6580_v0 = vsel %vm18730_vm10, %v6575_v6, %v16721_v60  ;;  %v16727_v42 = vpop.eup %12476  ;;  %v6054_v36 = vsub.f32 1.0, %v6022_v14  ;;  %v5799_v53 = vmul.f32 %v16681_v58, %v5767_v59 }
 0x518   : > { %6639 = vst [vmem:[#allocation2 + $0x130] sm:$0xff] %v6580_v0  ;;  %v5736_v5 = vmul.f32 %v16696_v46, %v5704_v50  ;;  %11370 = vmatprep.mubr.bf16.mxu0 %v6580_v0  ;;  %v5609_v32 = vmul.f32 1.0614054, %v16727_v42  ;;  %v12479_v26 = vpop.eup %12478  ;;  %v5990_v11 = vmul.f32 1.442695, %v5929_v34  ;;  %vm6086_vm7 = vcmp.ge.f32.partialorder %v16546_v9, 0.0 }
 0x519   : > { %v6386_v52 = vsel %vm18731_vm6, %v16633_v43, %v6385_v51  ;;  %v5831_v6 = vadd.f32 0.2548296, %v5799_v53  ;;  %v6118_v30 = vsub.f32 0.0, %v6054_v36  ;;  %v5930_v35 = vmul.f32 %v5898_v45, %v16693_v56 }
 0x51a   : > { %6442 = vst [vmem:[#allocation2 + $0x138] sm:$0xff] %v6386_v52  ;;  %v5768_v27 = vadd.f32 -0.28449672, %v5736_v5  ;;  %7024 = vmatmul.mubr.bf16.gmra.mrb[204].mxu1 %v6386_v52  ;;  %v5641_v63 = vadd.f32 -1.4531521, %v5609_v32  ;;  %12486 = vpow2.f32 %v5990_v11  ;;  %v5899_v16 = vsub.f32 0.0, %v16702_v15 }
 0x51b   : > { %v5863_v38 = vmul.f32 %v16681_v58, %v5831_v6  ;;  %v6150_v57 = vsel %vm6086_vm7, %v6054_v36, %v6118_v30  ;;  %v6182_v23 = vmul.f32 0.5, %v16528_v48  ;;  %v6183_v50 = vmul.f32 0.5, %v16549_v25  ;;  %vm18747_vm7 = vmmov %vm18740_vm4 }
 0x51c   : > { %v5800_v61 = vmul.f32 %v16696_v46, %v5768_v27  ;;  %v5673_v54 = vmul.f32 %v16727_v42, %v5641_v63  ;;  %v16738_v47 = vpop.eup %12480  ;;  %v6214_v14 = vadd.f32 1.0, %v6150_v57  ;;  %vm6087_vm1 = vcmp.ge.f32.partialorder %v16598_v40, 0.0  ;;  %v18734_v57 = vld [vmem:[#allocation34_spill] sm:$0xff] }
 0x51d   : > { %v6023_v43 = vmul.f32 %v12479_v26, %v5863_v38  ;;  %v5610_v41 = vmul.f32 1.0614054, %v16738_v47  ;;  %v5992_v48 = vmul.f32 1.442695, %v5930_v35  ;;  %v5931_v53 = vmul.f32 %v5899_v16, %v16702_v15 }
 0x51e   : > { %v5832_v44 = vadd.f32 0.2548296, %v5800_v61  ;;  %v5705_v22 = vadd.f32 1.4214138, %v5673_v54  ;;  %v12483_v33 = vpop.eup %12482  ;;  %v6246_v27 = vmul.f32 %v6214_v14, %v6182_v23  ;;  %vm18735_vm11 = vnez %v18734_v57 }
 0x51f   : > { %v6055_v4 = vsub.f32 1.0, %v6023_v43  ;;  %v5642_v9 = vadd.f32 -1.4531521, %v5610_v41  ;;  %12488 = vpow2.f32 %v5992_v48  ;;  %v5994_v63 = vmul.f32 1.442695, %v5931_v53  ;;  %v18732_v43 = vld [vmem:[#allocation33_spill] sm:$0xff] }
 0x520   : > { %v5864_v58 = vmul.f32 %v16696_v46, %v5832_v44  ;;  %v5737_v55 = vmul.f32 %v16727_v42, %v5705_v22  ;;  %v16747_v10 = vpop.eup %12484  ;;  %vm18733_vm2 = vnez %v18732_v43  ;;  %vm6088_vm14 = vcmp.ge.f32.partialorder %v16612_v7, 0.0 }
 0x521   : > { %v6119_v59 = vsub.f32 0.0, %v6055_v4  ;;  %v5674_v56 = vmul.f32 %v16738_v47, %v5642_v9  ;;  %v5611_v0 = vmul.f32 1.0614054, %v16747_v10  ;;  %12490 = vpow2.f32 %v5994_v63 }
 0x522   : > { %v6024_v51 = vmul.f32 %v12483_v33, %v5864_v58  ;;  %v5769_v46 = vadd.f32 -0.28449672, %v5737_v55  ;;  %vm6089_vm8 = vcmp.ge.f32.partialorder %v16660_v8, 0.0  ;;  %v6184_v53 = vmul.f32 0.5, %v16603_v20 }
 0x523   : > { %v6151_v34 = vsel %vm6087_vm1, %v6055_v4, %v6119_v59  ;;  %v5706_v32 = vadd.f32 1.4214138, %v5674_v56  ;;  %v5643_v6 = vadd.f32 -1.4531521, %v5611_v0  ;;  %v6581_v4 = vshrl.u32 %v16712_v3, 16  ;;  %vm18748_vm1 = vmmov %vm18737_vm3 }
 0x524   : > { %v6056_v36 = vsub.f32 1.0, %v6024_v51  ;;  %v6215_v5 = vadd.f32 1.0, %v6151_v34  ;;  %v5801_v52 = vmul.f32 %v16727_v42, %v5769_v46  ;;  %v12487_v11 = vpop.eup %12486  ;;  %vm6090_vm9 = vcmp.ge.f32.partialorder %v16679_v24, 0.0 }
 0x525   : > { %v5738_v40 = vmul.f32 %v16738_v47, %v5706_v32  ;;  %v5675_v30 = vmul.f32 %v16747_v10, %v5643_v6  ;;  %v6583_v55 = vor.u32 %v6581_v4, %v16721_v60 }
 0x526   : > { %v6247_v25 = vmul.f32 %v6215_v5, %v6183_v50  ;;  %v5833_v26 = vadd.f32 0.2548296, %v5801_v52  ;;  %v6120_v61 = vsub.f32 0.0, %v6056_v36  ;;  %v6185_v5 = vmul.f32 0.5, %v16652_v21 }
 0x527   : > { %v5770_v15 = vadd.f32 -0.28449672, %v5738_v40  ;;  %v5707_v54 = vadd.f32 1.4214138, %v5675_v30 }
 0x528   : > { %v6265_v38 = vpack.c.bf16 %v6247_v25, %v6246_v27  ;;  %v5865_v45 = vmul.f32 %v16727_v42, %v5833_v26  ;;  %v6152_v16 = vsel %vm6088_vm14, %v6056_v36, %v6120_v61 }
 0x529   : > { %v5802_v33 = vmul.f32 %v16738_v47, %v5770_v15  ;;  %v5739_v23 = vmul.f32 %v16747_v10, %v5707_v54  ;;  %v6216_v56 = vadd.f32 1.0, %v6152_v16  ;;  %v12489_v36 = vpop.eup %12488  ;;  %v6186_v16 = vmul.f32 0.5, %v16671_v37  ;;  %v18744_v37 = vld [vmem:[#allocation38_spill] sm:$0xff] }
 0x52a   : > { %v6281_v44 = vsel %vm18733_vm2, %v6265_v38, 0  ;;  %6462 = vst [vmem:[#allocation2 + $0x158] sm:$0xff] %v6265_v38  ;;  %v6478_v22 = vsel %vm18735_vm11, %v6265_v38, 0  ;;  %v6025_v41 = vmul.f32 %v12487_v11, %v5865_v45  ;;  %7031 = vmatprep.mubr.bf16.mxu1 %v6265_v38  ;;  %vm18745_vm6 = vnez %v18744_v37  ;;  %v12666_v37 = vld [vmem:[#allocation2 + $0x70] sm:$0xff] }
 0x52b   : > { %v6388_v58 = vshrl.u32 %v6281_v44, 16  ;;  %v6585_v35 = vshll.u32 %v6478_v22, 16  ;;  %v6391_v14 = vshll.u32 %v6281_v44, 16  ;;  %v5834_v7 = vadd.f32 0.2548296, %v5802_v33  ;;  %v12491_v26 = vpop.eup %12490 }
 0x52c   : > { %v6057_v42 = vsub.f32 1.0, %v6025_v41  ;;  %v5771_v51 = vadd.f32 -0.28449672, %v5739_v23  ;;  %v6248_v6 = vmul.f32 %v6216_v56, %v6184_v53  ;;  %v6589_v38 = vshrl.u32 %v6478_v22, 16 }
 0x52d   : > { %v6390_v9 = vrot.slane %v6388_v58, 7  ;;  %v6587_v59 = vrot.slane %v6585_v35, 1  ;;  %v5866_v34 = vmul.f32 %v16738_v47, %v5834_v7  ;;  %v18742_v7 = vld [vmem:[#allocation37_spill] sm:$0xff] }
 0x52e   : > { %v6121_v50 = vsub.f32 0.0, %v6057_v42  ;;  %v5803_v60 = vmul.f32 %v16747_v10, %v5771_v51  ;;  %vm18743_vm10 = vnez %v18742_v7  ;;  %v12080_v7 = vld [vmem:[#allocation5 + $0x1d8] sm:$0xff]  }
 0x52f   : > { %v6393_v46 = vor.u32 %v6391_v14, %v6390_v9  ;;  %v16768_v3 = vsel %vm18736_vm15, %v6583_v55, %v6587_v59  ;;  %v6026_v8 = vmul.f32 %v12489_v36, %v5866_v34  ;;  %v12656_v14 = vld [vmem:[#allocation2 + $0x20] sm:$0xff] }
 0x530   : > { %6640 = vst [vmem:[#allocation2 + $0x148] sm:$0xff] %v16768_v3  ;;  %v6153_v0 = vsel %vm6089_vm8, %v6057_v42, %v6121_v50  ;;  %11371 = vmatmul.mubr.bf16.gmra.mrb[128].mxu0 %v16768_v3  ;;  %v5835_v32 = vadd.f32 0.2548296, %v5803_v60  ;;  %v6187_v42 = vmul.f32 0.5, %v16675_v12 }
 0x531   : > { %v6394_v48 = vsel %vm18737_vm3, %v16719_v2, %v6393_v46  ;;  %v6217_v52 = vadd.f32 1.0, %v6153_v0  ;;  %v6058_v47 = vsub.f32 1.0, %v6026_v8  ;;  %v12657_v8 = vld [vmem:[#allocation2 + $0x18] sm:$0xff] }
 0x532   : > { %6443 = vst [vmem:[#allocation2 + $0x150] sm:$0xff] %v6394_v48  ;;  %7032 = vmatmul.mubr.bf16.gmra.mrb[208].mxu1 %v6394_v48  ;;  %v5867_v25 = vmul.f32 %v16747_v10, %v5835_v32  ;;  %v6591_v10 = vor.u32 %v6589_v38, %v6587_v59  ;;  %v12659_v38 = vld [vmem:[#allocation2 + $0x28] sm:$0xff] }
 0x533   : > { %v6249_v27 = vmul.f32 %v6217_v52, %v6185_v5  ;;  %v6122_v30 = vsub.f32 0.0, %v6058_v47 }
 0x534   : > { %v6027_v63 = vmul.f32 %v12491_v26, %v5867_v25  ;;  %v12671_v25 = vld [vmem:[#allocation2 + $0xb8] sm:$0xff] }
 0x535   : > { %v6266_v40 = vpack.c.bf16 %v6249_v27, %v6248_v6  ;;  %v6154_v15 = vsel %vm6090_vm9, %v6058_v47, %v6122_v30  ;;  %v6446_v6 = vld [vmem:[#allocation2 + $0x198] sm:$0x1] }
 0x536   : > { %v6059_v54 = vsub.f32 1.0, %v6027_v63  ;;  %v6218_v35 = vadd.f32 1.0, %v6154_v15  ;;  %v16807_v27 = vld [vmem:[#allocation2 + $0x38] sm:$0xff]  ;;  %v6643_v63 = vld [vmem:[#allocation2 + $0x190] sm:$0xff] }
 0x537   : > { %v6282_v2 = vsel %vm15293_vm5, %v6266_v40, 0  ;;  %6463 = vst [vmem:[#allocation2 + $0x170] sm:$0xff] %v6266_v40  ;;  %v6479_v21 = vsel %vm15297_vm13, %v6266_v40, 0  ;;  %7039 = vmatprep.mubr.bf16.mxu1 %v6266_v40  ;;  %vm6091_vm5 = vcmp.ge.f32.partialorder %v16686_v29, 0.0  ;;  %vm18741_vm13 = vmmov %vm18737_vm3  ;;  %v10736_v29 = vpop.f32.mrb[152].mxu1 }
 0x538   : > { %v6396_v61 = vshrl.u32 %v6282_v2, 16  ;;  %v6593_v45 = vshll.u32 %v6479_v21, 16  ;;  %v6399_v44 = vshll.u32 %v6282_v2, 16  ;;  %v6123_v41 = vsub.f32 0.0, %v6059_v54 }
 0x539   : > { %v6250_v23 = vmul.f32 %v6218_v35, %v6186_v16  ;;  %v6597_v50 = vshrl.u32 %v6479_v21, 16 }
 0x53a   : > { %v6398_v43 = vrot.slane %v6396_v61, 7  ;;  %v6595_v57 = vrot.slane %v6593_v45, 1  ;;  %v6155_v22 = vsel %vm6091_vm5, %v6059_v54, %v6123_v41  ;;  %v16833_v41 = vld [vmem:[#allocation2 + $0x50] sm:$0xff] }
 0x53b   : > { %v6219_v33 = vadd.f32 1.0, %v6155_v22  ;;  %v12663_v22 = vld [vmem:[#allocation2 + $0x58] sm:$0xff] }
 0x53c   : > { %v6401_v4 = vor.u32 %v6399_v44, %v6398_v43  ;;  %v16786_v58 = vsel %vm18740_vm4, %v6591_v10, %v6595_v57  ;;  %v6599_v34 = vor.u32 %v6597_v50, %v6595_v57  ;;  %v12063_v44 = vld [vmem:[#allocation5 + $0x180] sm:$0xff]   ;;  %v12068_v57 = vld [vmem:[#allocation5 + $0x1c8] sm:$0xff]   ;;  %v16840_v50 = vld [vmem:[#allocation2 + $0x48] sm:$0xff] }
 0x53d   : > { %6641 = vst [vmem:[#allocation2 + $0x160] sm:$0xff] %v16786_v58  ;;  %11374 = vmatprep.mubr.bf16.mxu0 %v16786_v58  ;;  %v6251_v55 = vmul.f32 %v6219_v33, %v6187_v42  ;;  %v12074_v42 = vld [vmem:[#allocation5 + $0x1d0] sm:$0xff]  }
 0x53e   : > { %v6402_v24 = vsel %vm18741_vm13, %v6390_v9, %v6401_v4  ;;  %v10737_v9 = vpop.f32.mrb[153].mxu1  ;;  %v12662_v4 = vld [vmem:[#allocation2 + $0x40] sm:$0xff] }
 0x53f   : > { %6444 = vst [vmem:[#allocation2 + $0x168] sm:$0xff] %v6402_v24  ;;  %7040 = vmatmul.mubr.bf16.gmra.mrb[212].mxu1 %v6402_v24  ;;  %v16794_v59 = vpack.c.bf16 %v6251_v55, %v6250_v23  ;;  %v10739_v0 = vpop.f32.mrb[154].mxu1  ;;  %v16803_v36 = vadd.f32 %v10737_v9, %v10736_v29  ;;  %v12069_v24 = vld [vmem:[#allocation5 + $0x188] sm:$0xff]   ;;  %v12075_v29 = vld [vmem:[#allocation5 + $0x190] sm:$0xff]   ;;  %v12081_v9 = vld [vmem:[#allocation5 + $0x198] sm:$0xff]  }
 0x540   : > { %7520 = vmatprep.mubr.bf16.mxu1 %v12656_v14  ;;  %v10740_v48 = vpop.f32.mrb[155].mxu1 }
 0x541   : > { %v6283_v51 = vsel %vm18743_vm10, %v16794_v59, 0  ;;  %6464 = vst [vmem:[#allocation2 + $0x188] sm:$0xff] %v16794_v59  ;;  %v6480_v12 = vsel %vm18745_vm6, %v16794_v59, 0  ;;  %v16805_v32 = vadd.f32 %v10740_v48, %v10739_v0  ;;  %v10742_v11 = vpop.f32.mrb[156].mxu1 }
 0x542   : > { %v6404_v46 = vshrl.u32 %v6283_v51, 16  ;;  %v6601_v56 = vshll.u32 %v6480_v12, 16  ;;  %v6407_v60 = vshll.u32 %v6283_v51, 16  ;;  %v6605_v52 = vshrl.u32 %v6480_v12, 16  ;;  %v10743_v61 = vpop.f32.mrb[157].mxu1  ;;  %v16843_v51 = vld [vmem:[#allocation2 + $0x68] sm:$0xff] }
 0x543   : > { %v16826_v45 = vadd.f32 %v10743_v61, %v10742_v11  ;;  %v10745_v15 = vpop.f32.mrb[158].mxu1  ;;  %v12667_v12 = vld [vmem:[#allocation2 + $0x88] sm:$0xff] }
 0x544   : > { %v6406_v53 = vrot.slane %v6404_v46, 7  ;;  %v6603_v5 = vrot.slane %v6601_v56, 1  ;;  %v10746_v54 = vpop.f32.mrb[159].mxu1  ;;  %v12084_v56 = vld [vmem:[#allocation5 + $0x1e0] sm:$0xff]  }
 0x545   : > { %v16828_v10 = vadd.f32 %v10746_v54, %v10745_v15  ;;  %v12089_v15 = vld [vmem:[#allocation5 + $0x1b0] sm:$0xff]   ;;  %v16858_v54 = vld [vmem:[#allocation2 + $0x78] sm:$0xff] }
 0x546   : > { %v6409_v47 = vor.u32 %v6407_v60, %v6406_v53  ;;  %v6447_v26 = vsel %vm13571_vm0, %v6406_v53, %v6446_v6  ;;  %v16813_v40 = vsel %vm18747_vm7, %v6599_v34, %v6603_v5  ;;  %v6607_v30 = vor.u32 %v6605_v52, %v6603_v5  ;;  %v12085_v53 = vld [vmem:[#allocation5 + $0x1a0] sm:$0xff]   ;;  %v16848_v5 = vld [vmem:[#allocation2 + $0x60] sm:$0xff] }
 0x547   : > { %7521 = vmatmul.mubr.bf16.vlgmr.msra.gmra.mrb[216].mxu1 %v12657_v8  ;;  %6448 = vst [vmem:[#allocation2 + $0x198] sm:$0x1] %v6447_v26  ;;  %6642 = vst [vmem:[#allocation2 + $0x178] sm:$0xff] %v16813_v40  ;;  %11375 = vmatmul.mubr.bf16.gmra.mrb[132].mxu0 %v16813_v40  ;;  %v12086_v8 = vld [vmem:[#allocation5 + $0x1e8] sm:$0xff]   ;;  %v16853_v6 = vld [vmem:[#allocation2 + $0x80] sm:$0xff] }
 0x548   : > { %7528 = vmatprep.mubr.bf16.mxu1 %v16807_v27  ;;  %v16818_v2 = vsel %vm18748_vm1, %v6398_v43, %v6409_v47  ;;  %v16822_v21 = vsel %vm15275_vm12, %v6607_v30, %v6643_v63  ;;  %11394 = vmatprep.mubr.bf16.mxu0 %v12659_v38  ;;  %v16830_v43 = vld [vmem:[#allocation2 + $0x30] sm:$0xff]  ;;  %v12670_v47 = vld [vmem:[#allocation2 + $0xa0] sm:$0xff]  ;;  %v12087_v26 = vld [vmem:[#allocation5 + $0x1a8] sm:$0xff]  }
 0x549   : > { %6445 = vst [vmem:[#allocation2 + $0x180] sm:$0xff] %v16818_v2  ;;  %6645 = vst [vmem:[#allocation2 + $0x190] sm:$0xff] %v16822_v21  ;;  %v10748_v35 = vpop.f32.mrb[160].mxu1  ;;  %v12088_v63 = vld [vmem:[#allocation5 + $0x1f0] sm:$0xff]  }
 0x54a   : > { %v10749_v16 = vpop.f32.mrb[161].mxu1 }
 0x54b   : > { %v16836_v33 = vadd.f32 %v10749_v16, %v10748_v35  ;;  %v10751_v23 = vpop.f32.mrb[162].mxu1  ;;  %v12091_v35 = vld [vmem:[#allocation5 + $0x1b8] sm:$0xff]   ;;  %v16871_v16 = vld [vmem:[#allocation2 + $0xb0] sm:$0xff] }
 0x54c   : > { %v10752_v55 = vpop.f32.mrb[163].mxu1 }
 0x54d   : > { %v16838_v14 = vadd.f32 %v10752_v55, %v10751_v23  ;;  %v16884_v23 = vld [vmem:[#allocation2 + $0x130] sm:$0xff]  ;;  %v16888_v55 = vld [vmem:[#allocation2 + $0xc0] sm:$0xff] }
 0x54f   : > { %7529 = vmatmul.mubr.bf16.gmra.mrb[220].mxu1 %v16830_v43  ;;  %11395 = vmatmul.mubr.bf16.vlgmr.msra.gmra.mrb[104].mxu0 %v12662_v4  ;;  %v16863_v4 = vld [vmem:[#allocation2 + $0x98] sm:$0xff] }
 0x550   : > { %7536 = vmatprep.mubr.bf16.mxu1 %v16833_v41  ;;  %10993 = vmatpush3.bf16.msra.mxu0 %v12063_v44 }
 0x551   : > { %11398 = vmatprep.mubr.bf16.mxu0 %v12663_v22  ;;  %10994 = vmatprep.subr.bf16.mxu0 %v12068_v57  ;;  %v12090_v57 = vld [vmem:[#allocation5 + $0x1f8] sm:$0xff]   ;;  %v12092_v22 = vld [vmem:[#allocation5 + $0x200] sm:$0xff]  }
 0x554   : > { %10995 = vmatpush3.bf16.msra.mxu0 %v12069_v24  ;;  %v10754_v46 = vpop.f32.mrb[164].mxu1  ;;  %v16868_v24 = vld [vmem:[#allocation2 + $0x90] sm:$0xff] }
 0x555   : > { %10996 = vmatprep.subr.bf16.mxu0 %v12074_v42  ;;  %v10755_v0 = vpop.f32.mrb[165].mxu1  ;;  %v16875_v42 = vld [vmem:[#allocation2 + $0x118] sm:$0xff] }
 0x556   : > { %v16846_v34 = vadd.f32 %v10755_v0, %v10754_v46  ;;  %v10757_v60 = vpop.f32.mrb[166].mxu1 }
 0x557   : > { %7537 = vmatmul.mubr.bf16.gmra.mrb[224].mxu1 %v16840_v50  ;;  %11399 = vmatmul.mubr.bf16.gmra.mrb[108].mxu0 %v12666_v37  ;;  %v10758_v48 = vpop.f32.mrb[167].mxu1 }
 0x558   : > { %7544 = vmatprep.mubr.bf16.mxu1 %v16843_v51  ;;  %11402 = vmatprep.mubr.bf16.mxu0 %v12667_v12  ;;  %v16851_v52 = vadd.f32 %v10758_v48, %v10757_v60 }
 0x559   : > { %10997 = vmatpush3.bf16.msra.mxu0 %v12075_v29 }
 0x55a   : > { %10998 = vmatprep.subr.bf16.mxu0 %v12080_v7 }
 0x55c   : > { %v10760_v30 = vpop.f32.mrb[168].mxu1 }
 0x55d   : > { %10999 = vmatpush3.bf16.msra.mxu0 %v12081_v9  ;;  %v10761_v11 = vpop.f32.mrb[169].mxu1 }
 0x55e   : > { %11000 = vmatprep.subr.bf16.mxu0 %v12084_v56  ;;  %v16856_v20 = vadd.f32 %v10761_v11, %v10760_v30  ;;  %v10763_v38 = vpop.f32.mrb[170].mxu1  ;;  %v16928_v11 = vld [vmem:[#allocation2 + $0x138] sm:$0xff] }
 0x55f   : > { %7545 = vmatmul.mubr.bf16.gmra.mrb[228].mxu1 %v16848_v5  ;;  %11403 = vmatmul.mubr.bf16.gmra.mrb[112].mxu0 %v12670_v47  ;;  %v10764_v61 = vpop.f32.mrb[171].mxu1 }
 0x560   : > { %7552 = vmatprep.mubr.bf16.mxu1 %v16853_v6  ;;  %11406 = vmatprep.mubr.bf16.mxu0 %v12671_v25  ;;  %v16861_v44 = vadd.f32 %v10764_v61, %v10763_v38  ;;  %v12098_v25 = vld [vmem:[#allocation5 + $0x230] sm:$0xff]   ;;  %v7287_v61 = vld [vmem:[#allocation2 + $0x158] sm:$0xff] }
 0x561   : > { %11001 = vmatpush3.bf16.msra.mxu0 %v12085_v53 }
 0x562   : > { %11002 = vmatprep.subr.bf16.mxu0 %v12086_v8  ;;  %v16921_v8 = vld [vmem:[#allocation2 + $0x140] sm:$0xff] }
 0x565   : > { %11003 = vmatpush3.bf16.msra.mxu0 %v12087_v26 }
 0x566   : > { %11004 = vmatprep.subr.bf16.mxu0 %v12088_v63 }
 0x567   : > { %7553 = vmatmul.mubr.bf16.gmra.mrb[232].mxu1 %v16858_v54  ;;  %11407 = vmatmul.mubr.bf16.gmra.mrb[116].mxu0 %v16533_v13  ;;  %v16878_v13 = vld [vmem:[#allocation2 + $0xa8] sm:$0xff] }
 0x568   : > { %7560 = vmatprep.mubr.bf16.mxu1 %v16863_v4  ;;  %11410 = vmatprep.mubr.bf16.mxu0 %v16551_v49  ;;  %v16881_v49 = vld [vmem:[#allocation2 + $0xc8] sm:$0xff] }
 0x569   : > { %11005 = vmatpush3.bf16.msra.mxu0 %v12089_v15  ;;  %v7290_v15 = vld [vmem:[#allocation2 + $0x170] sm:$0xff] }
 0x56a   : > { %11006 = vmatprep.subr.bf16.mxu0 %v12090_v57  ;;  %v7289_v57 = vld [vmem:[#allocation2 + $0x168] sm:$0xff] }
 0x56d   : > { %11007 = vmatpush3.bf16.msra.mxu0 %v12091_v35 }
 0x56e   : > { %11426 = vmatprep.subr.bf16.mxu0 %v12092_v22 }
 0x56f   : > { %7561 = vmatmul.mubr.bf16.gmra.mrb[236].mxu1 %v16868_v24  ;;  %11411 = vmatmul.mubr.bf16.gmra.mrb[120].mxu0 %v16625_v28 }
 0x570   : > { %7568 = vmatprep.mubr.bf16.mxu1 %v16871_v16  ;;  %11414 = vmatprep.mubr.bf16.mxu0 %v16875_v42 }
 0x577   : > { %7569 = vmatmul.mubr.bf16.gmra.mrb[240].mxu1 %v16878_v13  ;;  %11415 = vmatmul.mubr.bf16.gmra.mrb[124].mxu0 %v16884_v23 }
 0x578   : > { %7576 = vmatprep.mubr.bf16.mxu1 %v16881_v49  ;;  %11418 = vmatprep.mubr.bf16.mxu0 %v16768_v3 }
 0x57b   : > { %v10766_v28 = vpop.f32.mrb[172].mxu1 }
 0x57c   : > { %v10767_v29 = vpop.f32.mrb[173].mxu1 }
 0x57d   : > { %v16892_v7 = vadd.f32 %v10767_v29, %v10766_v28  ;;  %v10769_v37 = vpop.f32.mrb[174].mxu1  ;;  %v12679_v28 = vld [vmem:[#allocation2 + $0xe0] sm:$0xff] }
 0x57e   : > { %v10770_v12 = vpop.f32.mrb[175].mxu1 }
 0x57f   : > { %7577 = vmatmul.mubr.bf16.gmra.mrb[244].mxu1 %v16888_v55  ;;  %11419 = vmatmul.mubr.bf16.gmra.mrb[128].mxu0 %v16786_v58  ;;  %v16896_v9 = vadd.f32 %v10770_v12, %v10769_v37 }
 0x580   : > { %7584 = vmatprep.mubr.bf16.mxu1 %v16504_v17  ;;  %11422 = vmatprep.mubr.bf16.mxu0 %v16813_v40  ;;  %v12093_v40 = vld [vmem:[#allocation5 + $0x208] sm:$0xff]  }
 0x583   : > { %v10772_v3 = vpop.f32.mrb[176].mxu1 }
 0x584   : > { %v10773_v46 = vpop.f32.mrb[177].mxu1 }
 0x585   : > { %v16900_v56 = vadd.f32 %v10773_v46, %v10772_v3  ;;  %v10775_v17 = vpop.f32.mrb[178].mxu1  ;;  %v12681_v3 = vld [vmem:[#allocation2 + $0xf8] sm:$0xff] }
 0x586   : > { %v10776_v0 = vpop.f32.mrb[179].mxu1 }
 0x587   : > { %7585 = vmatmul.mubr.bf16.gmra.mrb[248].mxu1 %v16541_v19  ;;  %11423 = vmatmul.mubr.bf16.gmra.mrb[132].mxu0 %v16822_v21  ;;  %v16904_v58 = vadd.f32 %v10776_v0, %v10775_v17  ;;  %v12094_v19 = vld [vmem:[#allocation5 + $0x210] sm:$0xff]   ;;  %v12682_v17 = vld [vmem:[#allocation2 + $0xf0] sm:$0xff] }
 0x588   : > { %7592 = vmatprep.mubr.bf16.mxu1 %v16558_v31  ;;  %8115 = vmatprep.mubr.bf16.mxu0 %v16807_v27  ;;  %v16911_v31 = vld [vmem:[#allocation2 + $0x128] sm:$0xff] }
 0x589   : > { %v12095_v27 = vld [vmem:[#allocation5 + $0x218] sm:$0xff]  }
 0x58f   : > { %7593 = vmatmul.mubr.bf16.gmra.mrb[252].mxu1 %v16584_v1  ;;  %8116 = vmatmul.mubr.bf16.vlgmr.msra.gmra.mrb[136].mxu0 %v16830_v43  ;;  %v12096_v43 = vld [vmem:[#allocation5 + $0x220] sm:$0xff]  }
 0x590   : > { %7600 = vmatprep.mubr.bf16.mxu1 %v16595_v18  ;;  %11427 = vmatpush3.bf16.msra.mxu0 %v12092_v22 }
 0x591   : > { %8123 = vmatprep.mubr.bf16.mxu0 %v16833_v41  ;;  %11428 = vmatprep.subr.bf16.mxu0 %v12093_v40 }
 0x594   : > { %11429 = vmatpush3.bf16.msra.mxu0 %v12093_v40 }
 0x595   : > { %11430 = vmatprep.subr.bf16.mxu0 %v12094_v19 }
 0x597   : > { %7601 = vmatmul.mubr.bf16.gmra.mrb[0].mxu1 %v16631_v39  ;;  %8124 = vmatmul.mubr.bf16.gmra.mrb[140].mxu0 %v16840_v50  ;;  %v12097_v50 = vld [vmem:[#allocation5 + $0x228] sm:$0xff]  }
 0x598   : > { %7608 = vmatprep.mubr.bf16.mxu1 %v16911_v31  ;;  %8131 = vmatprep.mubr.bf16.mxu0 %v16843_v51 }
 0x599   : > { %v10778_v1 = vpop.f32.mrb[180].mxu1  ;;  %11431 = vmatpush3.bf16.msra.mxu0 %v12094_v19 }
 0x59a   : > { %v10779_v21 = vpop.f32.mrb[181].mxu1  ;;  %11432 = vmatprep.subr.bf16.mxu0 %v12095_v27 }
 0x59b   : > { %v16916_v41 = vadd.f32 %v10779_v21, %v10778_v1  ;;  %v10781_v60 = vpop.f32.mrb[182].mxu1 }
 0x59c   : > { %v10782_v48 = vpop.f32.mrb[183].mxu1 }
 0x59d   : > { %v16918_v53 = vadd.f32 %v10782_v48, %v10781_v60  ;;  %11433 = vmatpush3.bf16.msra.mxu0 %v12095_v27 }
 0x59e   : > { %11434 = vmatprep.subr.bf16.mxu0 %v12096_v43 }
 0x59f   : > { %7609 = vmatmul.mubr.bf16.gmra.mrb[4].mxu1 %v16690_v62  ;;  %8132 = vmatmul.mubr.bf16.gmra.mrb[144].mxu0 %v16848_v5  ;;  %v12099_v5 = vld [vmem:[#allocation5 + $0x238] sm:$0xff]  }
 0x5a0   : > { %7616 = vmatprep.mubr.bf16.mxu1 %v16921_v8  ;;  %8139 = vmatprep.mubr.bf16.mxu0 %v16853_v6  ;;  %v7286_v6 = vld [vmem:[#allocation2 + $0x150] sm:$0xff] }
 0x5a1   : > { %v10784_v51 = vpop.f32.mrb[184].mxu1  ;;  %11435 = vmatpush3.bf16.msra.mxu0 %v12096_v43 }
 0x5a2   : > { %v10785_v47 = vpop.f32.mrb[185].mxu1  ;;  %11436 = vmatprep.subr.bf16.mxu0 %v12097_v50 }
 0x5a3   : > { %v16926_v26 = vadd.f32 %v10785_v47, %v10784_v51  ;;  %v10787_v30 = vpop.f32.mrb[186].mxu1 }
 0x5a4   : > { %v10788_v63 = vpop.f32.mrb[187].mxu1 }
 0x5a5   : > { %v16930_v38 = vadd.f32 %v10788_v63, %v10787_v30  ;;  %11437 = vmatpush3.bf16.msra.mxu0 %v12097_v50 }
 0x5a6   : > { %11438 = vmatprep.subr.bf16.mxu0 %v12098_v25 }
 0x5a7   : > { %7617 = vmatmul.mubr.bf16.gmra.mrb[8].mxu1 %v16928_v11  ;;  %8140 = vmatmul.mubr.bf16.gmra.mrb[148].mxu0 %v16858_v54 }
 0x5a8   : > { %7624 = vmatprep.mubr.bf16.mxu1 %v7287_v61  ;;  %8147 = vmatprep.mubr.bf16.mxu0 %v16863_v4 }
 0x5a9   : > { %11439 = vmatpush3.bf16.msra.mxu0 %v12098_v25 }
 0x5aa   : > { %11440 = vmatprep.subr.bf16.mxu0 %v12099_v5 }
 0x5ad   : > { %11441 = vmatpush3.bf16.msra.mxu0 %v12099_v5 }
 0x5af   : > { %7625 = vmatmul.mubr.bf16.gmra.mrb[12].mxu1 %v7286_v6  ;;  %8148 = vmatmul.mubr.bf16.gmra.mrb[152].mxu0 %v16868_v24 }
 0x5b0   : > { %7632 = vmatprep.mubr.bf16.mxu1 %v7290_v15  ;;  %8155 = vmatprep.mubr.bf16.mxu0 %v16871_v16 }
 0x5b7   : > { %7633 = vmatmul.mubr.bf16.gmra.mrb[16].mxu1 %v7289_v57  ;;  %8156 = vmatmul.mubr.bf16.gmra.mrb[156].mxu0 %v16878_v13 }
 0x5b8   : > { %7640 = vmatprep.mubr.bf16.mxu1 %v16794_v59  ;;  %8163 = vmatprep.mubr.bf16.mxu0 %v16881_v49  ;;  %v12680_v49 = vld [vmem:[#allocation2 + $0xd8] sm:$0xff] }
 0x5bf   : > { %7641 = vmatmul.mubr.bf16.gmra.mrb[20].mxu1 %v16818_v2  ;;  %8164 = vmatmul.mubr.bf16.gmra.mrb[160].mxu0 %v16888_v55 }
 0x5c0   : > { %v10790_v54 = vpop.f32.mrb[188].mxu1  ;;  %8171 = vmatprep.mubr.bf16.mxu0 %v12679_v28 }
 0x5c1   : > { %v10791_v4 = vpop.f32.mrb[189].mxu1 }
 0x5c2   : > { %v16941_v35 = vadd.f32 %v10791_v4, %v10790_v54  ;;  %v10793_v22 = vpop.f32.mrb[190].mxu1  ;;  %v7887_v4 = vld [vmem:[#allocation2 + $0x198] sm:$0xff] }
 0x5c3   : > { %v10794_v24 = vpop.f32.mrb[191].mxu1 }
 0x5c4   : > { %v16944_v16 = vadd.f32 %v10794_v24, %v10793_v22 }
 0x5c7   : > { %8172 = vmatmul.mubr.bf16.gmra.mrb[164].mxu0 %v12680_v49  ;;  %v7853_v49 = vld [vmem:[#allocation2 + $0x88] sm:$0xff] }
 0x5c8   : > { %v10796_v29 = vpop.f32.mrb[192].mxu1  ;;  %8179 = vmatprep.mubr.bf16.mxu0 %v12681_v3 }
 0x5c9   : > { %v10797_v37 = vpop.f32.mrb[193].mxu1 }
 0x5ca   : > { %v16946_v12 = vadd.f32 %v10797_v37, %v10796_v29  ;;  %v10799_v13 = vpop.f32.mrb[194].mxu1 }
 0x5cb   : > { %v10800_v2 = vpop.f32.mrb[195].mxu1 }
 0x5cc   : > { %v16948_v46 = vadd.f32 %v10800_v2, %v10799_v13  ;;  %v7856_v2 = vld [vmem:[#allocation2 + $0xa0] sm:$0xff] }
 0x5cf   : > { %8180 = vmatmul.mubr.bf16.gmra.mrb[168].mxu0 %v12682_v17  ;;  %v16983_v17 = vld [vmem:[%s18277_s6] ss:$0 sm:$0xff] }
 0x5d0   : > { %8187 = vmatprep.mubr.bf16.mxu0 %v16595_v18 }
 0x5d3   : > { %v10802_v55 = vpop.f32.mrb[196].mxu1 }
 0x5d4   : > { %v10803_v0 = vpop.f32.mrb[197].mxu1 }
 0x5d5   : > { %v16951_v40 = vadd.f32 %v10803_v0, %v10802_v55  ;;  %v10805_v19 = vpop.f32.mrb[198].mxu1  ;;  %v11670_v0 = vadd.f32 %v16803_v36, %v16983_v17  ;;  %v7862_v36 = vld [vmem:[#allocation2 + $0xd0] sm:$0xff] }
 0x5d6   : > { %v10806_v27 = vpop.f32.mrb[199].mxu1 }
 0x5d7   : > { %v16953_v1 = vadd.f32 %v10806_v27, %v10805_v19  ;;  %8188 = vmatmul.mubr.bf16.gmra.mrb[172].mxu0 %v16631_v39 }
 0x5d8   : > { %8195 = vmatprep.mubr.bf16.mxu0 %v16911_v31 }
 0x5df   : > { %8196 = vmatmul.mubr.bf16.gmra.mrb[176].mxu0 %v16690_v62  ;;  %v7884_v62 = vld [vmem:[#allocation2 + $0x180] sm:$0xff] }
 0x5e0   : > { %v10808_v21 = vpop.f32.mrb[200].mxu1  ;;  %8203 = vmatprep.mubr.bf16.mxu0 %v16921_v8  ;;  %v16969_v8 = vld [vmem:[#allocation2] sm:$0xff] }
 0x5e1   : > { %v10809_v43 = vpop.f32.mrb[201].mxu1 }
 0x5e2   : > { %v16957_v60 = vadd.f32 %v10809_v43, %v10808_v21  ;;  %v10811_v48 = vpop.f32.mrb[202].mxu1  ;;  %v12100_v43 = vld [vmem:[%s18278_s7] sm:$0xff]  }
 0x5e3   : > { %v10812_v50 = vpop.f32.mrb[203].mxu1  ;;  %11474 = vmatprep.subr.bf16.mxu1 %v12100_v43 }
 0x5e4   : > { %v16961_v18 = vadd.f32 %v10812_v50, %v10811_v48  ;;  %v11678_v48 = vadd.f32 %v16805_v32, %v16983_v17  ;;  %11475 = vmatpush3.bf16.msra.mxu1 %v12100_v43  ;;  %v11674_v32 = vadd.f32 %v16828_v10, %v16983_v17  ;;  %v12101_v10 = vld [vmem:[%s18278_s7 + $0x8] sm:$0xff]  }
 0x5e5   : > { %11476 = vmatprep.subr.bf16.mxu1 %v12101_v10 }
 0x5e7   : > { %8204 = vmatmul.mubr.bf16.gmra.mrb[180].mxu0 %v16928_v11 }
 0x5e8   : > { %8211 = vmatprep.mubr.bf16.mxu0 %v7287_v61  ;;  %11477 = vmatpush3.bf16.msra.mxu1 %v12101_v10 }
 0x5ed   : > { %v10814_v51 = vpop.f32.mrb[204].mxu1 }
 0x5ee   : > { %v10815_v47 = vpop.f32.mrb[205].mxu1 }
 0x5ef   : > { %v16964_v39 = vadd.f32 %v10815_v47, %v10814_v51  ;;  %v10817_v31 = vpop.f32.mrb[206].mxu1  ;;  %8212 = vmatmul.mubr.bf16.gmra.mrb[184].mxu0 %v7286_v6  ;;  %v7844_v6 = vld [vmem:[#allocation2 + $0x40] sm:$0xff] }
 0x5f0   : > { %v10818_v25 = vpop.f32.mrb[207].mxu1  ;;  %8219 = vmatprep.mubr.bf16.mxu0 %v7290_v15  ;;  %v7847_v15 = vld [vmem:[#allocation2 + $0x58] sm:$0xff] }
 0x5f1   : > { %v16966_v30 = vadd.f32 %v10818_v25, %v10817_v31  ;;  %v7859_v31 = vld [vmem:[#allocation2 + $0xb8] sm:$0xff] }
 0x5f7   : > { %8220 = vmatmul.mubr.bf16.gmra.mrb[188].mxu0 %v7289_v57 }
 0x5f8   : > { %8227 = vmatprep.mubr.bf16.mxu0 %v16794_v59  ;;  %v7850_v59 = vld [vmem:[#allocation2 + $0x70] sm:$0xff] }
 0x5ff   : > { %8228 = vmatmul.mubr.bf16.gmra.mrb[192].mxu0 %v7884_v62 }
 0x600   : > { %8235 = vmatprep.mubr.bf16.mxu0 %v16969_v8 }
 0x605   : > { %v10820_v63 = vpop.f32.mrb[208].mxu1 }
 0x606   : > { %v10821_v11 = vpop.f32.mrb[209].mxu1 }
 0x607   : > { %v16972_v61 = vadd.f32 %v10821_v11, %v10820_v63  ;;  %v10823_v5 = vpop.f32.mrb[210].mxu1  ;;  %8236 = vmatmul.mubr.bf16.gmra.mrb[196].mxu0 %v7887_v4  ;;  %v11666_v63 = vadd.f32 %v16826_v45, %v16983_v17  ;;  %v11686_v45 = vadd.f32 %v16836_v33, %v16983_v17 }
 0x608   : > { %v10824_v54 = vpop.f32.mrb[211].mxu1  ;;  %11442 = vmatprep.mubr.bf16.mxu0 %v7844_v6 }
 0x609   : > { %v16974_v22 = vadd.f32 %v10824_v54, %v10823_v5 }
 0x60f   : > { %11443 = vmatmul.mubr.bf16.vlgmr.msra.gmra.mrb[104].mxu0 %v7847_v15 }
 0x610   : > { %11446 = vmatprep.mubr.bf16.mxu0 %v7850_v59  ;;  %v7865_v59 = vld [vmem:[#allocation2 + $0xe8] sm:$0xff] }
 0x612   : > { %v10826_v57 = vpop.f32.mrb[212].mxu1 }
 0x613   : > { %v10827_v24 = vpop.f32.mrb[213].mxu1 }
 0x614   : > { %v16976_v28 = vadd.f32 %v10827_v24, %v10826_v57  ;;  %v10829_v29 = vpop.f32.mrb[214].mxu1  ;;  %v7868_v57 = vld [vmem:[#allocation2 + $0x100] sm:$0xff] }
 0x615   : > { %v10830_v37 = vpop.f32.mrb[215].mxu1 }
 0x616   : > { %v16978_v13 = vadd.f32 %v10830_v37, %v10829_v29 }
 0x617   : > { %11447 = vmatmul.mubr.bf16.gmra.mrb[108].mxu0 %v7853_v49 }
 0x618   : > { %11450 = vmatprep.mubr.bf16.mxu0 %v7856_v2 }
 0x61a   : > { %v10872_v3 = vpop.f32.mrb[216].mxu1 }
 0x61b   : > { %v10873_v55 = vpop.f32.mrb[217].mxu1 }
 0x61c   : > { %v10874_v19 = vadd.f32 %v10873_v55, %v10872_v3  ;;  %v10875_v27 = vpop.f32.mrb[218].mxu1  ;;  %v11694_v3 = vadd.f32 %v16838_v14, %v16983_v17  ;;  %v11690_v14 = vadd.f32 %v16851_v52, %v16983_v17  ;;  %v12102_v52 = vld [vmem:[%s18278_s7 + $0x10] sm:$0xff]  }
 0x61d   : > { %v10876_v21 = vpop.f32.mrb[219].mxu1  ;;  %11478 = vmatprep.subr.bf16.mxu1 %v12102_v52 }
 0x61e   : > { %v16992_v50 = vadd.f32 %v11670_v0, %v10874_v19  ;;  %v10877_v51 = vadd.f32 %v10876_v21, %v10875_v27  ;;  %v11682_v21 = vadd.f32 %v16846_v34, %v16983_v17  ;;  %v11702_v34 = vadd.f32 %v16856_v20, %v16983_v17  ;;  %11479 = vmatpush3.bf16.msra.mxu1 %v12102_v52  ;;  %v7886_v20 = vld [vmem:[#allocation2 + $0x190] sm:$0xff] }
 0x61f   : > { %11451 = vmatmul.mubr.bf16.gmra.mrb[112].mxu0 %v7859_v31 }
 0x620   : > { %v16994_v47 = vadd.f32 %v11678_v48, %v10877_v51  ;;  %11454 = vmatprep.mubr.bf16.mxu0 %v7862_v36 }
 0x622   : > { %v10878_v25 = vpop.f32.mrb[220].mxu1 }
 0x623   : > { %v10879_v62 = vpop.f32.mrb[221].mxu1 }
 0x624   : > { %v10880_v11 = vadd.f32 %v10879_v62, %v10878_v25  ;;  %v10881_v5 = vpop.f32.mrb[222].mxu1  ;;  %v7877_v62 = vld [vmem:[#allocation2 + $0x148] sm:$0xff] }
 0x625   : > { %v10882_v54 = vpop.f32.mrb[223].mxu1 }
 0x626   : > { %v17000_v4 = vadd.f32 %v11666_v63, %v10880_v11  ;;  %v10883_v6 = vadd.f32 %v10882_v54, %v10881_v5 }
 0x627   : > { %11455 = vmatmul.mubr.bf16.gmra.mrb[116].mxu0 %v7865_v59 }
 0x628   : > { %v17002_v15 = vadd.f32 %v11674_v32, %v10883_v6  ;;  %11458 = vmatprep.mubr.bf16.mxu0 %v7868_v57  ;;  %v11710_v32 = vadd.f32 %v16861_v44, %v16983_v17  ;;  %v11706_v44 = vadd.f32 %v16896_v9, %v16983_v17  ;;  %v11726_v9 = vadd.f32 %v16904_v58, %v16983_v17 }
 0x62a   : > { %v10884_v24 = vpop.f32.mrb[224].mxu1 }
 0x62b   : > { %v10885_v29 = vpop.f32.mrb[225].mxu1 }
 0x62c   : > { %v10886_v37 = vadd.f32 %v10885_v29, %v10884_v24  ;;  %v10887_v49 = vpop.f32.mrb[226].mxu1  ;;  %v7883_v24 = vld [vmem:[#allocation2 + $0x178] sm:$0xff] }
 0x62d   : > { %v10888_v2 = vpop.f32.mrb[227].mxu1 }
 0x62e   : > { %v17011_v55 = vadd.f32 %v11686_v45, %v10886_v37  ;;  %v10889_v0 = vadd.f32 %v10888_v2, %v10887_v49  ;;  %v11698_v37 = vadd.f32 %v16892_v7, %v16983_v17 }
 0x62f   : > { %11459 = vmatmul.mubr.bf16.gmra.mrb[120].mxu0 %v16875_v42  ;;  %v7880_v42 = vld [vmem:[#allocation2 + $0x160] sm:$0xff] }
 0x630   : > { %v17013_v19 = vadd.f32 %v11694_v3, %v10889_v0  ;;  %11462 = vmatprep.mubr.bf16.mxu0 %v16884_v23 }
 0x632   : > { %v10890_v33 = vpop.f32.mrb[228].mxu1 }
 0x633   : > { %v10891_v27 = vpop.f32.mrb[229].mxu1 }
 0x634   : > { %v10892_v43 = vadd.f32 %v10891_v27, %v10890_v33  ;;  %v10893_v48 = vpop.f32.mrb[230].mxu1 }
 0x635   : > { %v10894_v51 = vpop.f32.mrb[231].mxu1 }
 0x636   : > { %v17021_v31 = vadd.f32 %v11682_v21, %v10892_v43  ;;  %v10895_v36 = vadd.f32 %v10894_v51, %v10893_v48  ;;  %v11718_v43 = vadd.f32 %v16900_v56, %v16983_v17  ;;  %v11714_v56 = vadd.f32 %v16916_v41, %v16983_v17  ;;  %v12104_v41 = vld [vmem:[%s18278_s7 + $0x20] sm:$0xff]  }
 0x637   : > { %11463 = vmatmul.mubr.bf16.gmra.mrb[124].mxu0 %v7877_v62 }
 0x638   : > { %v17023_v25 = vadd.f32 %v11690_v14, %v10895_v36  ;;  %11466 = vmatprep.mubr.bf16.mxu0 %v7880_v42  ;;  %v12103_v14 = vld [vmem:[%s18278_s7 + $0x18] sm:$0xff]  }
 0x639   : > { %11480 = vmatprep.subr.bf16.mxu1 %v12103_v14 }
 0x63a   : > { %v10896_v63 = vpop.f32.mrb[232].mxu1  ;;  %11481 = vmatpush3.bf16.msra.mxu1 %v12103_v14 }
 0x63b   : > { %v10897_v23 = vpop.f32.mrb[233].mxu1  ;;  %11482 = vmatprep.subr.bf16.mxu1 %v12104_v41 }
 0x63c   : > { %v10898_v11 = vadd.f32 %v10897_v23, %v10896_v63  ;;  %v10899_v5 = vpop.f32.mrb[234].mxu1 }
 0x63d   : > { %v10900_v54 = vpop.f32.mrb[235].mxu1 }
 0x63e   : > { %v17032_v6 = vadd.f32 %v11702_v34, %v10898_v11  ;;  %v10901_v59 = vadd.f32 %v10900_v54, %v10899_v5  ;;  %v11722_v5 = vadd.f32 %v16918_v53, %v16983_v17  ;;  %v11742_v53 = vadd.f32 %v16930_v38, %v16983_v17  ;;  %11483 = vmatpush3.bf16.msra.mxu1 %v12104_v41 }
 0x63f   : > { %11467 = vmatmul.mubr.bf16.gmra.mrb[128].mxu0 %v7883_v24  ;;  %v11734_v24 = vadd.f32 %v16926_v26, %v16983_v17  ;;  %v11730_v26 = vadd.f32 %v16941_v35, %v16983_v17 }
 0x640   : > { %v17034_v57 = vadd.f32 %v11710_v32, %v10901_v59  ;;  %11470 = vmatprep.mubr.bf16.mxu0 %v7886_v20 }
 0x642   : > { %v10902_v29 = vpop.f32.mrb[236].mxu1 }
 0x643   : > { %v10903_v45 = vpop.f32.mrb[237].mxu1 }
 0x644   : > { %v10904_v49 = vadd.f32 %v10903_v45, %v10902_v29  ;;  %v10905_v2 = vpop.f32.mrb[238].mxu1 }
 0x645   : > { %v10906_v10 = vpop.f32.mrb[239].mxu1 }
 0x646   : > { %v17040_v3 = vadd.f32 %v11698_v37, %v10904_v49  ;;  %v10907_v0 = vadd.f32 %v10906_v10, %v10905_v2 }
 0x647   : > { %11471 = vmatmul.mubr.bf16.gmra.mrb[132].mxu0 %v16969_v8 }
 0x648   : > { %v17042_v33 = vadd.f32 %v11706_v44, %v10907_v0 }
 0x64a   : > { %v10908_v27 = vpop.f32.mrb[240].mxu1 }
 0x64b   : > { %v10909_v21 = vpop.f32.mrb[241].mxu1 }
 0x64c   : > { %v10910_v48 = vadd.f32 %v10909_v21, %v10908_v27  ;;  %v10911_v7 = vpop.f32.mrb[242].mxu1 }
 0x64d   : > { %v10912_v51 = vpop.f32.mrb[243].mxu1 }
 0x64e   : > { %v17052_v36 = vadd.f32 %v11718_v43, %v10910_v48  ;;  %v10913_v62 = vadd.f32 %v10912_v51, %v10911_v7  ;;  %v11738_v48 = vadd.f32 %v16944_v16, %v16983_v17  ;;  %v11750_v16 = vadd.f32 %v16946_v12, %v16983_v17 }
 0x650   : > { %v17054_v8 = vadd.f32 %v11726_v9, %v10913_v62 }
 0x652   : > { %v10914_v42 = vpop.f32.mrb[244].mxu1 }
 0x653   : > { %v10915_v63 = vpop.f32.mrb[245].mxu1 }
 0x654   : > { %v10916_v23 = vadd.f32 %v10915_v63, %v10914_v42  ;;  %v10917_v34 = vpop.f32.mrb[246].mxu1 }
 0x655   : > { %v10918_v11 = vpop.f32.mrb[247].mxu1 }
 0x656   : > { %v17060_v54 = vadd.f32 %v11714_v56, %v10916_v23  ;;  %v10919_v58 = vadd.f32 %v10918_v11, %v10917_v34 }
 0x658   : > { %v17062_v52 = vadd.f32 %v11722_v5, %v10919_v58 }
 0x65a   : > { %v10920_v32 = vpop.f32.mrb[248].mxu1 }
 0x65b   : > { %v10921_v59 = vpop.f32.mrb[249].mxu1 }
 0x65c   : > { %v10922_v20 = vadd.f32 %v10921_v59, %v10920_v32  ;;  %v10923_v29 = vpop.f32.mrb[250].mxu1  ;;  %v11758_v59 = vadd.f32 %v16948_v46, %v16983_v17  ;;  %v11746_v46 = vadd.f32 %v16951_v40, %v16983_v17 }
 0x65d   : > { %v10924_v45 = vpop.f32.mrb[251].mxu1 }
 0x65e   : > { %v17071_v37 = vadd.f32 %v11734_v24, %v10922_v20  ;;  %v10925_v49 = vadd.f32 %v10924_v45, %v10923_v29 }
 0x660   : > { %v17073_v2 = vadd.f32 %v11742_v53, %v10925_v49 }
 0x662   : > { %v10926_v10 = vpop.f32.mrb[252].mxu1  ;;  %v11008_v21 = vpop.f32.mrb[136].mxu0 }
 0x663   : > { %v10927_v44 = vpop.f32.mrb[253].mxu1  ;;  %v11009_v38 = vpop.f32.mrb[137].mxu0 }
 0x664   : > { %v10928_v0 = vadd.f32 %v10927_v44, %v10926_v10  ;;  %v10929_v27 = vpop.f32.mrb[254].mxu1  ;;  %v11010_v14 = vadd.f32 %v11009_v38, %v11008_v21  ;;  %v11011_v9 = vpop.f32.mrb[138].mxu0 }
 0x665   : > { %v10930_v43 = vpop.f32.mrb[255].mxu1  ;;  %v11012_v62 = vpop.f32.mrb[139].mxu0 }
 0x666   : > { %v17079_v7 = vadd.f32 %v11730_v26, %v10928_v0  ;;  %v10931_v51 = vadd.f32 %v10930_v43, %v10929_v27  ;;  %v11013_v63 = vadd.f32 %v11012_v62, %v11011_v9  ;;  %v17084_v56 = vadd.f32 %v16992_v50, %v11010_v14 }
 0x667   : > { %v11754_v43 = vadd.f32 %v16953_v1, %v16983_v17  ;;  %v11766_v1 = vadd.f32 %v16957_v60, %v16983_v17 }
 0x668   : > { %v17081_v42 = vadd.f32 %v11738_v48, %v10931_v51  ;;  %v17087_v34 = vadd.f32 %v16994_v47, %v11013_v63 }
 0x66a   : > { %v10932_v35 = vpop.f32.mrb[0].mxu1  ;;  %v11014_v58 = vpop.f32.mrb[140].mxu0 }
 0x66b   : > { %v10933_v23 = vpop.f32.mrb[1].mxu1  ;;  %v11015_v24 = vpop.f32.mrb[141].mxu0 }
 0x66c   : > { %v10934_v11 = vadd.f32 %v10933_v23, %v10932_v35  ;;  %v10935_v5 = vpop.f32.mrb[2].mxu1  ;;  %v11016_v29 = vadd.f32 %v11015_v24, %v11014_v58  ;;  %v11017_v45 = vpop.f32.mrb[142].mxu0 }
 0x66d   : > { %v10936_v32 = vpop.f32.mrb[3].mxu1  ;;  %v11018_v41 = vpop.f32.mrb[143].mxu0 }
 0x66e   : > { %v17093_v20 = vadd.f32 %v11750_v16, %v10934_v11  ;;  %v10937_v50 = vadd.f32 %v10936_v32, %v10935_v5  ;;  %v11019_v47 = vadd.f32 %v11018_v41, %v11017_v45  ;;  %v17098_v49 = vadd.f32 %v17000_v4, %v11016_v29 }
 0x66f   : > { %v11774_v32 = vadd.f32 %v16961_v18, %v16983_v17  ;;  %v11762_v18 = vadd.f32 %v16964_v39, %v16983_v17 }
 0x670   : > { %v17095_v53 = vadd.f32 %v11758_v59, %v10937_v50  ;;  %v17101_v44 = vadd.f32 %v17002_v15, %v11019_v47 }
 0x672   : > { %v10938_v12 = vpop.f32.mrb[4].mxu1  ;;  %v11020_v27 = vpop.f32.mrb[144].mxu0 }
 0x673   : > { %v10939_v10 = vpop.f32.mrb[5].mxu1  ;;  %v11021_v48 = vpop.f32.mrb[145].mxu0 }
 0x674   : > { %v10940_v26 = vadd.f32 %v10939_v10, %v10938_v12  ;;  %v10941_v0 = vpop.f32.mrb[6].mxu1  ;;  %v11022_v51 = vadd.f32 %v11021_v48, %v11020_v27  ;;  %v11023_v14 = vpop.f32.mrb[146].mxu0 }
 0x675   : > { %v10942_v21 = vpop.f32.mrb[7].mxu1  ;;  %v11024_v9 = vpop.f32.mrb[147].mxu0 }
 0x676   : > { %v17107_v38 = vadd.f32 %v11746_v46, %v10940_v26  ;;  %v10943_v4 = vadd.f32 %v10942_v21, %v10941_v0  ;;  %v11025_v15 = vadd.f32 %v11024_v9, %v11023_v14  ;;  %v17112_v63 = vadd.f32 %v17011_v55, %v11022_v51 }
 0x677   : > { %v11770_v21 = vadd.f32 %v16966_v30, %v16983_v17  ;;  %v11782_v30 = vadd.f32 %v16972_v61, %v16983_v17 }
 0x678   : > { %v17109_v62 = vadd.f32 %v11754_v43, %v10943_v4  ;;  %v17115_v23 = vadd.f32 %v17013_v19, %v11025_v15 }
 0x67a   : > { %v10944_v40 = vpop.f32.mrb[8].mxu1  ;;  %v11026_v5 = vpop.f32.mrb[148].mxu0 }
 0x67b   : > { %v10945_v35 = vpop.f32.mrb[9].mxu1  ;;  %v11027_v59 = vpop.f32.mrb[149].mxu0 }
 0x67c   : > { %v10946_v16 = vadd.f32 %v10945_v35, %v10944_v40  ;;  %v10947_v11 = vpop.f32.mrb[10].mxu1  ;;  %v11028_v50 = vadd.f32 %v11027_v59, %v11026_v5  ;;  %v11029_v29 = vpop.f32.mrb[150].mxu0 }
 0x67d   : > { %v10948_v58 = vpop.f32.mrb[11].mxu1  ;;  %v11030_v45 = vpop.f32.mrb[151].mxu0 }
 0x67e   : > { %v17121_v24 = vadd.f32 %v11766_v1, %v10946_v16  ;;  %v10949_v55 = vadd.f32 %v10948_v58, %v10947_v11  ;;  %v11031_v19 = vadd.f32 %v11030_v45, %v11029_v29  ;;  %v17126_v47 = vadd.f32 %v17021_v31, %v11028_v50 }
 0x67f   : > { %v11790_v58 = vadd.f32 %v16974_v22, %v16983_v17  ;;  %v11778_v22 = vadd.f32 %v16976_v28, %v16983_v17 }
 0x680   : > { %v17123_v41 = vadd.f32 %v11774_v32, %v10949_v55  ;;  %v17129_v10 = vadd.f32 %v17023_v25, %v11031_v19 }
 0x682   : > { %v10950_v60 = vpop.f32.mrb[12].mxu1  ;;  %v11032_v0 = vpop.f32.mrb[152].mxu0 }
 0x683   : > { %v10951_v12 = vpop.f32.mrb[13].mxu1  ;;  %v11033_v43 = vpop.f32.mrb[153].mxu0 }
 0x684   : > { %v10952_v46 = vadd.f32 %v10951_v12, %v10950_v60  ;;  %v10953_v26 = vpop.f32.mrb[14].mxu1  ;;  %v11034_v4 = vadd.f32 %v11033_v43, %v11032_v0  ;;  %v11035_v51 = vpop.f32.mrb[154].mxu0 }
 0x685   : > { %v10954_v27 = vpop.f32.mrb[15].mxu1  ;;  %v11036_v14 = vpop.f32.mrb[155].mxu0 }
 0x686   : > { %v17135_v48 = vadd.f32 %v11762_v18, %v10952_v46  ;;  %v10955_v31 = vadd.f32 %v10954_v27, %v10953_v26  ;;  %v11037_v25 = vadd.f32 %v11036_v14, %v11035_v51  ;;  %v17140_v15 = vadd.f32 %v17032_v6, %v11034_v4  ;;  %v12105_v26 = vld [vmem:[%s18278_s7 + $0x28] sm:$0xff]  }
 0x687   : > { %11484 = vmatprep.subr.bf16.mxu1 %v12105_v26 }
 0x688   : > { %v17137_v9 = vadd.f32 %v11770_v21, %v10955_v31  ;;  %v17143_v35 = vadd.f32 %v17034_v57, %v11037_v25  ;;  %11485 = vmatpush3.bf16.msra.mxu1 %v12105_v26 }
 0x68a   : > { %v10956_v39 = vpop.f32.mrb[16].mxu1  ;;  %v11038_v11 = vpop.f32.mrb[156].mxu0 }
 0x68b   : > { %v10957_v40 = vpop.f32.mrb[17].mxu1  ;;  %v11039_v32 = vpop.f32.mrb[157].mxu0 }
 0x68c   : > { %v10958_v1 = vadd.f32 %v10957_v40, %v10956_v39  ;;  %v10959_v16 = vpop.f32.mrb[18].mxu1  ;;  %v11040_v55 = vadd.f32 %v11039_v32, %v11038_v11  ;;  %v11041_v50 = vpop.f32.mrb[158].mxu0 }
 0x68d   : > { %v10960_v5 = vpop.f32.mrb[19].mxu1  ;;  %v11042_v29 = vpop.f32.mrb[159].mxu0 }
 0x68e   : > { %v17149_v59 = vadd.f32 %v11782_v30, %v10958_v1  ;;  %v10961_v6 = vadd.f32 %v10960_v5, %v10959_v16  ;;  %v11043_v57 = vadd.f32 %v11042_v29, %v11041_v50  ;;  %v17154_v19 = vadd.f32 %v17040_v3, %v11040_v55 }
 0x68f   : > { %v11786_v3 = vadd.f32 %v16978_v13, %v16983_v17 }
 0x690   : > { %v17151_v45 = vadd.f32 %v11790_v58, %v10961_v6  ;;  %v17157_v12 = vadd.f32 %v17042_v33, %v11043_v57 }
 0x692   : > { %v10962_v61 = vpop.f32.mrb[20].mxu1  ;;  %v11044_v0 = vpop.f32.mrb[160].mxu0 }
 0x693   : > { %v10963_v60 = vpop.f32.mrb[21].mxu1  ;;  %v11045_v21 = vpop.f32.mrb[161].mxu0 }
 0x694   : > { %v10964_v18 = vadd.f32 %v10963_v60, %v10962_v61  ;;  %v10965_v46 = vpop.f32.mrb[22].mxu1  ;;  %v11046_v33 = vadd.f32 %v11045_v21, %v11044_v0  ;;  %v11047_v4 = vpop.f32.mrb[162].mxu0 }
 0x695   : > { %v10966_v27 = vpop.f32.mrb[23].mxu1  ;;  %v11048_v28 = vpop.f32.mrb[163].mxu0 }
 0x696   : > { %v17166_v43 = vadd.f32 %v11778_v22, %v10964_v18  ;;  %v10967_v31 = vadd.f32 %v10966_v27, %v10965_v46  ;;  %v11049_v14 = vadd.f32 %v11048_v28, %v11047_v4  ;;  %v17171_v25 = vadd.f32 %v17052_v36, %v11046_v33 }
 0x698   : > { %v17168_v51 = vadd.f32 %v11786_v3, %v10967_v31  ;;  %v17174_v39 = vadd.f32 %v17054_v8, %v11049_v14 }
 0x69a   : > { %18750 = vst [vmem:[#allocation15_spill] sm:$0xff] %v17174_v39  ;;  %v11050_v40 = vpop.f32.mrb[164].mxu0 }
 0x69b   : > { %v11051_v13 = vpop.f32.mrb[165].mxu0 }
 0x69c   : > { %v11052_v17 = vadd.f32 %v11051_v13, %v11050_v40  ;;  %v11053_v30 = vpop.f32.mrb[166].mxu0  ;;  %v12106_v13 = vld [vmem:[%s18278_s7 + $0x30] sm:$0xff]  }
 0x69d   : > { %v11054_v1 = vpop.f32.mrb[167].mxu0  ;;  %11486 = vmatprep.subr.bf16.mxu1 %v12106_v13 }
 0x69e   : > { %v11055_v16 = vadd.f32 %v11054_v1, %v11053_v30  ;;  %v17177_v11 = vadd.f32 %v17060_v54, %v11052_v17  ;;  %11487 = vmatpush3.bf16.msra.mxu1 %v12106_v13 }
 0x6a0   : > { %v17180_v5 = vadd.f32 %v17062_v52, %v11055_v16 }
 0x6a2   : > { %v11056_v58 = vpop.f32.mrb[168].mxu0 }
 0x6a3   : > { %v11057_v32 = vpop.f32.mrb[169].mxu0 }
 0x6a4   : > { %v11058_v6 = vadd.f32 %v11057_v32, %v11056_v58  ;;  %v11059_v36 = vpop.f32.mrb[170].mxu0 }
 0x6a5   : > { %v11060_v55 = vpop.f32.mrb[171].mxu0 }
 0x6a6   : > { %v11061_v50 = vadd.f32 %v11060_v55, %v11059_v36  ;;  %v17183_v8 = vadd.f32 %v17071_v37, %v11058_v6 }
 0x6a8   : > { %18751 = vst [vmem:[#allocation16_spill] sm:$0xff] %v17183_v8  ;;  %v17186_v29 = vadd.f32 %v17073_v2, %v11061_v50 }
 0x6aa   : > { %18752 = vst [vmem:[#allocation54_spill] sm:$0xff] %v17186_v29  ;;  %v11062_v57 = vpop.f32.mrb[172].mxu0 }
 0x6ab   : > { %v11063_v61 = vpop.f32.mrb[173].mxu0 }
 0x6ac   : > { %v11064_v60 = vadd.f32 %v11063_v61, %v11062_v57  ;;  %v11065_v54 = vpop.f32.mrb[174].mxu0 }
 0x6ad   : > { %v11066_v22 = vpop.f32.mrb[175].mxu0 }
 0x6ae   : > { %v11067_v18 = vadd.f32 %v11066_v22, %v11065_v54  ;;  %v17189_v52 = vadd.f32 %v17079_v7, %v11064_v60 }
 0x6b0   : > { %18753 = vst [vmem:[#allocation63_spill] sm:$0xff] %v17189_v52  ;;  %v17192_v46 = vadd.f32 %v17081_v42, %v11067_v18 }
 0x6b2   : > { %18754 = vst [vmem:[#allocation64_spill] sm:$0xff] %v17192_v46  ;;  %v11068_v26 = vpop.f32.mrb[176].mxu0 }
 0x6b3   : > { %v11069_v0 = vpop.f32.mrb[177].mxu0 }
 0x6b4   : > { %v11070_v27 = vadd.f32 %v11069_v0, %v11068_v26  ;;  %v11071_v37 = vpop.f32.mrb[178].mxu0 }
 0x6b5   : > { %v11072_v3 = vpop.f32.mrb[179].mxu0 }
 0x6b6   : > { %v11073_v21 = vadd.f32 %v11072_v3, %v11071_v37  ;;  %v17195_v2 = vadd.f32 %v17093_v20, %v11070_v27 }
 0x6b8   : > { %18755 = vst [vmem:[#allocation56_spill] sm:$0xff] %v17195_v2  ;;  %v17198_v31 = vadd.f32 %v17095_v53, %v11073_v21 }
 0x6ba   : > { %18756 = vst [vmem:[#allocation65_spill] sm:$0xff] %v17198_v31  ;;  %v11074_v33 = vpop.f32.mrb[180].mxu0 }
 0x6bb   : > { %v11075_v4 = vpop.f32.mrb[181].mxu0 }
 0x6bc   : > { %v11076_v28 = vadd.f32 %v11075_v4, %v11074_v33  ;;  %v11077_v7 = vpop.f32.mrb[182].mxu0 }
 0x6bd   : > { %v11078_v14 = vpop.f32.mrb[183].mxu0 }
 0x6be   : > { %v11079_v40 = vadd.f32 %v11078_v14, %v11077_v7  ;;  %v17201_v42 = vadd.f32 %v17107_v38, %v11076_v28 }
 0x6c0   : > { %18757 = vst [vmem:[#allocation55_spill] sm:$0xff] %v17201_v42  ;;  %v17207_v17 = vadd.f32 %v17109_v62, %v11079_v40 }
 0x6c2   : > { %18758 = vst [vmem:[#allocation17_spill] sm:$0xff] %v17207_v17  ;;  %v11080_v20 = vpop.f32.mrb[184].mxu0 }
 0x6c3   : > { %v11081_v53 = vpop.f32.mrb[185].mxu0 }
 0x6c4   : > { %v11082_v30 = vadd.f32 %v11081_v53, %v11080_v20  ;;  %v11083_v1 = vpop.f32.mrb[186].mxu0 }
 0x6c5   : > { %v11084_v16 = vpop.f32.mrb[187].mxu0 }
 0x6c6   : > { %v11085_v58 = vadd.f32 %v11084_v16, %v11083_v1  ;;  %v17210_v32 = vadd.f32 %v17121_v24, %v11082_v30 }
 0x6c8   : > { %18759 = vst [vmem:[#allocation18_spill] sm:$0xff] %v17210_v32  ;;  %v17213_v38 = vadd.f32 %v17123_v41, %v11085_v58 }
 0x6ca   : > { %18760 = vst [vmem:[#allocation19_spill] sm:$0xff] %v17213_v38  ;;  %v11086_v6 = vpop.f32.mrb[188].mxu0 }
 0x6cb   : > { %v11087_v36 = vpop.f32.mrb[189].mxu0 }
 0x6cc   : > { %v11088_v55 = vadd.f32 %v11087_v36, %v11086_v6  ;;  %v11089_v50 = vpop.f32.mrb[190].mxu0 }
 0x6cd   : > { %v11090_v62 = vpop.f32.mrb[191].mxu0 }
 0x6ce   : > { %v11091_v57 = vadd.f32 %v11090_v62, %v11089_v50  ;;  %v17216_v61 = vadd.f32 %v17135_v48, %v11088_v55  ;;  %v12107_v50 = vld [vmem:[%s18278_s7 + $0x38] sm:$0xff]  }
 0x6cf   : > { %11488 = vmatprep.subr.bf16.mxu1 %v12107_v50 }
 0x6d0   : > { %18761 = vst [vmem:[#allocation20_spill] sm:$0xff] %v17216_v61  ;;  %v17219_v60 = vadd.f32 %v17137_v9, %v11091_v57  ;;  %11489 = vmatpush3.bf16.msra.mxu1 %v12107_v50 }
 0x6d2   : > { %18762 = vst [vmem:[#allocation66_spill] sm:$0xff] %v17219_v60  ;;  %v11092_v54 = vpop.f32.mrb[192].mxu0 }
 0x6d3   : > { %v11093_v22 = vpop.f32.mrb[193].mxu0 }
 0x6d4   : > { %v11094_v18 = vadd.f32 %v11093_v22, %v11092_v54  ;;  %v11095_v24 = vpop.f32.mrb[194].mxu0 }
 0x6d5   : > { %v11096_v26 = vpop.f32.mrb[195].mxu0 }
 0x6d6   : > { %v11097_v0 = vadd.f32 %v11096_v26, %v11095_v24  ;;  %v17222_v41 = vadd.f32 %v17149_v59, %v11094_v18 }
 0x6d8   : > { %18763 = vst [vmem:[#allocation58_spill] sm:$0xff] %v17222_v41  ;;  %v17225_v33 = vadd.f32 %v17151_v45, %v11097_v0 }
 0x6da   : > { %v11098_v27 = vpop.f32.mrb[196].mxu0  ;;  %18764 = vst [vmem:[#allocation68_spill] sm:$0xff] %v17225_v33 }
 0x6db   : > { %v11099_v37 = vpop.f32.mrb[197].mxu0 }
 0x6dc   : > { %v11100_v3 = vadd.f32 %v11099_v37, %v11098_v27  ;;  %v11101_v21 = vpop.f32.mrb[198].mxu0 }
 0x6dd   : > { %v11102_v48 = vpop.f32.mrb[199].mxu0 }
 0x6de   : > { %v11103_v4 = vadd.f32 %v11102_v48, %v11101_v21  ;;  %v17228_v9 = vadd.f32 %v17166_v43, %v11100_v3 }
 0x6e0   : > { %18765 = vst [vmem:[#allocation57_spill] sm:$0xff] %v17228_v9  ;;  %v17231_v28 = vadd.f32 %v17168_v51, %v11103_v4 }
 0x6e2   : > { %18766 = vst [vmem:[#allocation59_spill] sm:$0xff] %v17231_v28  ;;  %v11444_v7 = vpop.f32.mrb[104].mxu0 }
 0x6e3   : > { %v17234_v14 = vadd.f32 %v17098_v49, %v11444_v7  ;;  %v8278_v59 = vpop.f32.mrb[105].mxu0 }
 0x6e4   : > { %v17237_v40 = vadd.f32 %v17084_v56, %v8278_v59  ;;  %v11445_v13 = vpop.f32.mrb[106].mxu0 }
 0x6e5   : > { %v17240_v45 = vmul.f32 0.70710677, %v17234_v14  ;;  %v17243_v20 = vadd.f32 %v17101_v44, %v11445_v13  ;;  %v8281_v43 = vpop.f32.mrb[107].mxu0 }
 0x6e6   : > { %v17246_v53 = vmul.f32 0.70710677, %v17237_v40  ;;  %v17249_v51 = vadd.f32 %v17087_v34, %v8281_v43 }
 0x6e7   : > { %v8471_v49 = vand.u32 2147483647, %v17240_v45  ;;  %v17253_v30 = vmul.f32 0.70710677, %v17243_v20  ;;  %vm9079_vm0 = vcmp.ge.f32.partialorder %v17240_v45, 0.0 }
 0x6e8   : > { %v17256_v56 = vand.u32 2147483647, %v17246_v53  ;;  %v17259_v1 = vmul.f32 0.70710677, %v17249_v51  ;;  %vm9077_vm11 = vcmp.ge.f32.partialorder %v17246_v53, 0.0 }
 0x6e9   : > { %v8503_v44 = vmul.f32 0.3275911, %v8471_v49  ;;  %v8472_v16 = vand.u32 2147483647, %v17253_v30  ;;  %v8887_v4 = vsub.f32 0.0, %v8471_v49  ;;  %vm9080_vm12 = vcmp.ge.f32.partialorder %v17253_v30, 0.0 }
 0x6ea   : > { %v8501_v58 = vmul.f32 0.3275911, %v17256_v56  ;;  %v17264_v6 = vand.u32 2147483647, %v17259_v1  ;;  %v11448_v55 = vpop.f32.mrb[108].mxu0  ;;  %vm9078_vm15 = vcmp.ge.f32.partialorder %v17259_v1, 0.0 }
 0x6eb   : > { %v8535_v34 = vadd.f32 1.0, %v8503_v44  ;;  %v8504_v36 = vmul.f32 0.3275911, %v8472_v16  ;;  %v8294_v54 = vpop.f32.mrb[109].mxu0  ;;  %v17271_v0 = vadd.f32 %v17126_v47, %v11448_v55  ;;  %v8888_v43 = vsub.f32 0.0, %v8472_v16 }
 0x6ec   : > { %v8533_v62 = vadd.f32 1.0, %v8501_v58  ;;  %v8502_v57 = vmul.f32 0.3275911, %v17264_v6  ;;  %v11449_v18 = vpop.f32.mrb[110].mxu0  ;;  %v17274_v27 = vadd.f32 %v17112_v63, %v8294_v54 }
 0x6ed   : > { %12492 = vrcp.f32 %v8535_v34  ;;  %v8536_v22 = vadd.f32 1.0, %v8504_v36  ;;  %v8297_v24 = vpop.f32.mrb[111].mxu0  ;;  %v17277_v37 = vadd.f32 %v17129_v10, %v11449_v18  ;;  %v17283_v21 = vmul.f32 0.70710677, %v17271_v0 }
 0x6ee   : > { %12494 = vrcp.f32 %v8533_v62  ;;  %v8534_v26 = vadd.f32 1.0, %v8502_v57  ;;  %v17280_v3 = vadd.f32 %v17115_v23, %v8297_v24  ;;  %v17286_v48 = vmul.f32 0.70710677, %v17274_v27 }
 0x6ef   : > { %12496 = vrcp.f32 %v8536_v22  ;;  %v17289_v47 = vmul.f32 0.70710677, %v17277_v37  ;;  %v8475_v63 = vand.u32 2147483647, %v17283_v21  ;;  %v8919_v34 = vmul.f32 %v8887_v4, %v8471_v49 }
 0x6f0   : > { %12498 = vrcp.f32 %v8534_v26  ;;  %v17293_v10 = vand.u32 2147483647, %v17286_v48  ;;  %v17301_v55 = vmul.f32 0.70710677, %v17280_v3  ;;  %v8920_v26 = vmul.f32 %v8888_v43, %v8472_v16 }
 0x6f1   : > { %v17296_v59 = vand.u32 2147483647, %v17289_v47  ;;  %v8507_v44 = vmul.f32 0.3275911, %v8475_v63  ;;  %v8953_v28 = vmul.f32 1.442695, %v8919_v34 }
 0x6f2   : > { %v11452_v7 = vpop.f32.mrb[112].mxu0  ;;  %v8505_v58 = vmul.f32 0.3275911, %v17293_v10  ;;  %18767 = vst [vmem:[#allocation60_spill] sm:$0xff] %v17301_v55  ;;  %v17311_v24 = vand.u32 2147483647, %v17301_v55 }
 0x6f3   : > { %v8310_v23 = vpop.f32.mrb[113].mxu0  ;;  %v8508_v36 = vmul.f32 0.3275911, %v17296_v59  ;;  %v8539_v62 = vadd.f32 1.0, %v8507_v44  ;;  %v8955_v16 = vmul.f32 1.442695, %v8920_v26  ;;  %v17326_v34 = vadd.f32 %v17154_v19, %v11452_v7 }
 0x6f4   : > { %v11453_v13 = vpop.f32.mrb[114].mxu0  ;;  %v8537_v57 = vadd.f32 1.0, %v8505_v58  ;;  %v8506_v58 = vmul.f32 0.3275911, %v17311_v24  ;;  %v8891_v43 = vsub.f32 0.0, %v8475_v63  ;;  %vm9083_vm2 = vcmp.ge.f32.partialorder %v17283_v21, 0.0 }
 0x6f5   : > { %v17305_v54 = vpop.f32.mrb[115].mxu0  ;;  %12500 = vrcp.f32 %v8539_v62  ;;  %v8540_v4 = vadd.f32 1.0, %v8508_v36  ;;  %v17333_v31 = vmul.f32 0.70710677, %v17326_v34  ;;  %vm9084_vm14 = vcmp.ge.f32.partialorder %v17289_v47, 0.0 }
 0x6f6   : > { %12502 = vrcp.f32 %v8537_v57  ;;  %vm9081_vm8 = vcmp.ge.f32.partialorder %v17286_v48, 0.0  ;;  %v18787_v48 = vld [vmem:[#allocation63_spill] sm:$0xff] }
 0x6f7   : > { %v17303_v50 = vpop.eup %12492  ;;  %12504 = vrcp.f32 %v8540_v4  ;;  %18768 = vst [vmem:[#allocation21_spill] sm:$0xff] %v17333_v31  ;;  %v17337_v4 = vmul.f32 0.5, %v17234_v14 }
 0x6f8   : > { %v17307_v22 = vpop.eup %12494  ;;  %v8599_v18 = vmul.f32 1.0614054, %v17303_v50  ;;  %12506 = vpow2.f32 %v8953_v28  ;;  %v17344_v28 = vand.u32 2147483647, %v17333_v31 }
 0x6f9   : > { %v8597_v49 = vmul.f32 1.0614054, %v17307_v22  ;;  %v17314_v41 = vpop.eup %12496  ;;  %12508 = vpow2.f32 %v8955_v16  ;;  %v17356_v16 = vadd.f32 %v17157_v12, %v11453_v13 }
 0x6fa   : > { %v8631_v33 = vadd.f32 -1.4531521, %v8599_v18  ;;  %v17317_v9 = vpop.f32.mrb[116].mxu0  ;;  %v8600_v60 = vmul.f32 1.0614054, %v17314_v41  ;;  %v17323_v61 = vpop.eup %12498 }
 0x6fb   : > { %v8629_v44 = vadd.f32 -1.4531521, %v8597_v49  ;;  %v17321_v32 = vpop.f32.mrb[117].mxu0  ;;  %v8598_v18 = vmul.f32 1.0614054, %v17323_v61  ;;  %v8538_v49 = vadd.f32 1.0, %v8506_v58 }
 0x6fc   : > { %v8663_v38 = vmul.f32 %v17303_v50, %v8631_v33  ;;  %v17328_v36 = vpop.f32.mrb[118].mxu0  ;;  %v8632_v57 = vadd.f32 -1.4531521, %v8600_v60  ;;  %v8892_v60 = vsub.f32 0.0, %v17296_v59 }
 0x6fd   : > { %v8661_v33 = vmul.f32 %v17307_v22, %v8629_v44  ;;  %v8630_v7 = vadd.f32 -1.4531521, %v8598_v18  ;;  %v17340_v17 = vpop.f32.mrb[119].mxu0  ;;  %12510 = vrcp.f32 %v8538_v49  ;;  %v8886_v49 = vsub.f32 0.0, %v17264_v6 }
 0x6fe   : > { %v8695_v62 = vadd.f32 1.4214138, %v8663_v38  ;;  %v8664_v19 = vmul.f32 %v17314_v41, %v8632_v57  ;;  %v8923_v38 = vmul.f32 %v8891_v43, %v8475_v63  ;;  %v8511_v63 = vmul.f32 0.3275911, %v17344_v28 }
 0x6ff   : > { %v8662_v2 = vmul.f32 %v17323_v61, %v8630_v7  ;;  %v17352_v57 = vpop.eup %12500  ;;  %v8693_v18 = vadd.f32 1.4214138, %v8661_v33  ;;  %v8885_v33 = vsub.f32 0.0, %v17256_v56 }
 0x700   : > { %v8727_v26 = vmul.f32 %v17303_v50, %v8695_v62  ;;  %v8696_v58 = vadd.f32 1.4214138, %v8664_v19  ;;  %v17348_v62 = vadd.f32 %v17140_v15, %v8310_v23  ;;  %v8603_v7 = vmul.f32 1.0614054, %v17352_v57 }
 0x701   : > { %v8694_v23 = vadd.f32 1.4214138, %v8662_v2  ;;  %v8543_v13 = vadd.f32 1.0, %v8511_v63  ;;  %v8725_v2 = vmul.f32 %v17307_v22, %v8693_v18 }
 0x702   : > { %v8759_v44 = vadd.f32 -0.28449672, %v8727_v26  ;;  %v17350_v14 = vpop.f32.mrb[120].mxu0  ;;  %v17360_v26 = vpop.eup %12502  ;;  %v8728_v15 = vmul.f32 %v17314_v41, %v8696_v58  ;;  %v8635_v31 = vadd.f32 -1.4531521, %v8603_v7 }
 0x703   : > { %18769 = vst [vmem:[#allocation22_spill] sm:$0xff] %v17350_v14  ;;  %v17358_v43 = vpop.f32.mrb[121].mxu0  ;;  %v8601_v12 = vmul.f32 1.0614054, %v17360_v26  ;;  %v8961_v58 = vmul.f32 1.442695, %v8923_v38  ;;  %v8726_v14 = vmul.f32 %v17323_v61, %v8694_v23  ;;  %12512 = vrcp.f32 %v8543_v13 }
 0x704   : > { %18770 = vst [vmem:[#allocation42_spill] sm:$0xff] %v17358_v43  ;;  %v8791_v19 = vmul.f32 %v17303_v50, %v8759_v44  ;;  %v17365_v42 = vpop.f32.mrb[122].mxu0  ;;  %v8760_v55 = vadd.f32 -0.28449672, %v8728_v15  ;;  %v17372_v44 = vpop.eup %12504  ;;  %v8667_v63 = vmul.f32 %v17352_v57, %v8635_v31 }
 0x705   : > { %18771 = vst [vmem:[#allocation61_spill] sm:$0xff] %v17365_v42  ;;  %v17370_v29 = vpop.f32.mrb[123].mxu0  ;;  %v8633_v8 = vadd.f32 -1.4531521, %v8601_v12  ;;  %v8924_v42 = vmul.f32 %v8892_v60, %v17296_v59  ;;  %v8604_v7 = vmul.f32 1.0614054, %v17372_v44  ;;  %v8918_v59 = vmul.f32 %v8886_v49, %v17264_v6 }
 0x706   : > { %18772 = vst [vmem:[#allocation62_spill] sm:$0xff] %v17370_v29  ;;  %v8823_v46 = vadd.f32 0.2548296, %v8791_v19  ;;  %v8792_v52 = vmul.f32 %v17314_v41, %v8760_v55  ;;  %v12507_v29 = vpop.eup %12506  ;;  %v8917_v19 = vmul.f32 %v8885_v33, %v17256_v56  ;;  %v8699_v60 = vadd.f32 1.4214138, %v8667_v63 }
 0x707   : > { %v8665_v15 = vmul.f32 %v17360_v26, %v8633_v8  ;;  %v12509_v55 = vpop.eup %12508  ;;  %12514 = vpow2.f32 %v8961_v58  ;;  %v8636_v23 = vadd.f32 -1.4531521, %v8604_v7  ;;  %v8963_v31 = vmul.f32 1.442695, %v8924_v42 }
 0x708   : > { %v8855_v43 = vmul.f32 %v17303_v50, %v8823_v46  ;;  %v8824_v18 = vadd.f32 0.2548296, %v8792_v52  ;;  %v8757_v50 = vadd.f32 -0.28449672, %v8725_v2  ;;  %v8758_v33 = vadd.f32 -0.28449672, %v8726_v14 }
 0x709   : > { %v8731_v8 = vmul.f32 %v17352_v57, %v8699_v60  ;;  %v8949_v52 = vmul.f32 1.442695, %v8917_v19  ;;  %v8697_v6 = vadd.f32 1.4214138, %v8665_v15  ;;  %v8951_v2 = vmul.f32 1.442695, %v8918_v59 }
 0x70a   : > { %v9015_v38 = vmul.f32 %v12507_v29, %v8855_v43  ;;  %v17384_v46 = vpop.f32.mrb[124].mxu0  ;;  %v8856_v56 = vmul.f32 %v17314_v41, %v8824_v18  ;;  %v17390_v29 = vpop.eup %12510  ;;  %v8668_v43 = vmul.f32 %v17372_v44, %v8636_v23  ;;  %v8789_v14 = vmul.f32 %v17307_v22, %v8757_v50 }
 0x70b   : > { %v17388_v39 = vpop.f32.mrb[125].mxu0  ;;  %v8763_v58 = vadd.f32 -0.28449672, %v8731_v8  ;;  %v8889_v63 = vsub.f32 0.0, %v17293_v10  ;;  %12516 = vpow2.f32 %v8963_v31  ;;  %v8790_v19 = vmul.f32 %v17323_v61, %v8758_v33 }
 0x70c   : > { %v9047_v12 = vsub.f32 1.0, %v9015_v38  ;;  %v17394_v49 = vpop.f32.mrb[126].mxu0  ;;  %v9016_v42 = vmul.f32 %v12509_v55, %v8856_v56  ;;  %v8700_v7 = vadd.f32 1.4214138, %v8668_v43  ;;  %12518 = vpow2.f32 %v8949_v52 }
 0x70d   : > { %v17396_v41 = vpop.f32.mrb[127].mxu0  ;;  %v8795_v15 = vmul.f32 %v17352_v57, %v8763_v58  ;;  %v8729_v18 = vmul.f32 %v17360_v26, %v8697_v6  ;;  %v8602_v60 = vmul.f32 1.0614054, %v17390_v29  ;;  %v9176_v50 = vmul.f32 0.5, %v17243_v20  ;;  %v17408_v31 = vpop.eup %12512 }
 0x70e   : > { %v9111_v13 = vsub.f32 0.0, %v9047_v12  ;;  %v9048_v45 = vsub.f32 1.0, %v9016_v42  ;;  %v8732_v59 = vmul.f32 %v17372_v44, %v8700_v7  ;;  %12520 = vpow2.f32 %v8951_v2 }
 0x70f   : > { %v8827_v23 = vadd.f32 0.2548296, %v8795_v15  ;;  %v8921_v33 = vmul.f32 %v8889_v63, %v17293_v10  ;;  %v8821_v52 = vadd.f32 0.2548296, %v8789_v14  ;;  %v8822_v43 = vadd.f32 0.2548296, %v8790_v19 }
 0x710   : > { %v9143_v38 = vsel %vm9079_vm0, %v9047_v12, %v9111_v13  ;;  %v9112_v55 = vsub.f32 0.0, %v9048_v45  ;;  %v8764_v8 = vadd.f32 -0.28449672, %v8732_v59  ;;  %v8761_v58 = vadd.f32 -0.28449672, %v8729_v18 }
 0x711   : > { %v9207_v12 = vadd.f32 1.0, %v9143_v38  ;;  %v8859_v13 = vmul.f32 %v17352_v57, %v8827_v23  ;;  %v12515_v20 = vpop.eup %12514  ;;  %v8634_v15 = vadd.f32 -1.4531521, %v8602_v60  ;;  %v8607_v30 = vmul.f32 1.0614054, %v17408_v31 }
 0x712   : > { %v17406_v56 = vpop.f32.mrb[128].mxu0  ;;  %v9144_v6 = vsel %vm9080_vm12, %v9048_v45, %v9112_v55  ;;  %v8796_v7 = vmul.f32 %v17372_v44, %v8764_v8  ;;  %v17420_v10 = vmul.f32 0.70710677, %v17348_v62  ;;  %v8957_v45 = vmul.f32 1.442695, %v8921_v33 }
 0x713   : > { %18773 = vst [vmem:[#allocation73_spill] sm:$0xff] %v17406_v56  ;;  %v17413_v42 = vpop.f32.mrb[129].mxu0  ;;  %v9208_v2 = vadd.f32 1.0, %v9144_v6  ;;  %v9019_v38 = vmul.f32 %v12515_v20, %v8859_v13  ;;  %v17425_v57 = vmul.f32 %v9207_v12, %v17337_v4  ;;  %v8853_v18 = vmul.f32 %v17307_v22, %v8821_v52 }
 0x714   : > { %v17416_v56 = vpop.f32.mrb[130].mxu0  ;;  %v8828_v19 = vadd.f32 0.2548296, %v8796_v7  ;;  %v8639_v60 = vadd.f32 -1.4531521, %v8607_v30  ;;  %v8854_v8 = vmul.f32 %v17323_v61, %v8822_v43  ;;  %v8666_v13 = vmul.f32 %v17390_v29, %v8634_v15 }
 0x715   : > { %v17422_v14 = vpop.f32.mrb[131].mxu0  ;;  %18775 = vst [vmem:[#allocation67_spill] sm:$0xff] %v17425_v57  ;;  %v17427_v63 = vmul.f32 %v9208_v2, %v9176_v50  ;;  %v9051_v59 = vsub.f32 1.0, %v9019_v38  ;;  %v12517_v55 = vpop.eup %12516  ;;  %v8793_v50 = vmul.f32 %v17360_v26, %v8761_v58  ;;  %v17438_v33 = vand.u32 2147483647, %v17420_v10 }
 0x716   : > { %18774 = vst [vmem:[#allocation43_spill] sm:$0xff] %v17422_v14  ;;  %v8860_v6 = vmul.f32 %v17372_v44, %v8828_v19  ;;  %v8671_v12 = vmul.f32 %v17408_v31, %v8639_v60  ;;  %v12519_v52 = vpop.eup %12518  ;;  %12522 = vpow2.f32 %v8957_v45  ;;  %v8895_v2 = vsub.f32 0.0, %v17344_v28 }
 0x717   : > { %18776 = vst [vmem:[#allocation69_spill] sm:$0xff] %v17427_v63  ;;  %v9115_v4 = vsub.f32 0.0, %v9051_v59  ;;  %v17444_v61 = vmul.f32 0.70710677, %v17356_v16  ;;  %v9013_v7 = vmul.f32 %v12519_v52, %v8853_v18  ;;  %v8509_v15 = vmul.f32 0.3275911, %v17438_v33 }
 0x718   : > { %v9020_v20 = vmul.f32 %v12517_v55, %v8860_v6  ;;  %v12521_v43 = vpop.eup %12520  ;;  %v8703_v58 = vadd.f32 1.4214138, %v8671_v12  ;;  %v17451_v38 = vmul.f32 0.5, %v17237_v40  ;;  %v8825_v55 = vadd.f32 0.2548296, %v8793_v50 }
 0x719   : > { %v9014_v30 = vmul.f32 %v12521_v43, %v8854_v8  ;;  %v9147_v45 = vsel %vm9083_vm2, %v9051_v59, %v9115_v4  ;;  %v8698_v6 = vadd.f32 1.4214138, %v8666_v13  ;;  %v8890_v23 = vsub.f32 0.0, %v17311_v24 }
 0x71a   : > { %v17440_v22 = vpop.f32.mrb[132].mxu0  ;;  %v9052_v19 = vsub.f32 1.0, %v9020_v20  ;;  %v8541_v57 = vadd.f32 1.0, %v8509_v15  ;;  %v8735_v18 = vmul.f32 %v17408_v31, %v8703_v58  ;;  %v8927_v21 = vmul.f32 %v8895_v2, %v17344_v28 }
 0x71b   : > { %18777 = vst [vmem:[#allocation70_spill] sm:$0xff] %v17440_v22  ;;  %v17446_v44 = vpop.f32.mrb[133].mxu0  ;;  %v17459_v12 = vand.u32 2147483647, %v17444_v61  ;;  %v9045_v40 = vsub.f32 1.0, %v9013_v7  ;;  %v9211_v59 = vadd.f32 1.0, %v9147_v45  ;;  %v8857_v28 = vmul.f32 %v17360_v26, %v8825_v55 }
 0x71c   : > { %18778 = vst [vmem:[#allocation71_spill] sm:$0xff] %v17446_v44  ;;  %v17453_v60 = vpop.f32.mrb[134].mxu0  ;;  %v9116_v63 = vsub.f32 0.0, %v9052_v19  ;;  %12524 = vrcp.f32 %v8541_v57  ;;  %v9046_v8 = vsub.f32 1.0, %v9014_v30  ;;  %v9179_v13 = vmul.f32 0.5, %v17271_v0 }
 0x71d   : > { %18779 = vst [vmem:[#allocation23_spill] sm:$0xff] %v17453_v60  ;;  %v8512_v50 = vmul.f32 0.3275911, %v17459_v12  ;;  %v17465_v52 = vpop.f32.mrb[135].mxu0  ;;  %v9180_v20 = vmul.f32 0.5, %v17277_v37  ;;  %v8730_v43 = vmul.f32 %v17390_v29, %v8698_v6  ;;  %v8922_v7 = vmul.f32 %v8890_v23, %v17311_v24 }
 0x71e   : > { %v9148_v4 = vsel %vm9084_vm14, %v9052_v19, %v9116_v63  ;;  %18780 = vst [vmem:[#allocation24_spill] sm:$0xff] %v17465_v52  ;;  %v8767_v58 = vadd.f32 -0.28449672, %v8735_v18  ;;  %v8969_v47 = vmul.f32 1.442695, %v8927_v21  ;;  %v9109_v15 = vsub.f32 0.0, %v9045_v40 }
 0x71f   : > { %v9212_v2 = vadd.f32 1.0, %v9148_v4  ;;  %v8544_v57 = vadd.f32 1.0, %v8512_v50  ;;  %v17471_v30 = vmul.f32 %v9211_v59, %v9179_v13  ;;  %v17477_v63 = vadd.f32 %v17143_v35, %v17305_v54  ;;  %v18793_v19 = vld [vmem:[#allocation64_spill] sm:$0xff] }
 0x720   : > { %v12523_v26 = vpop.eup %12522  ;;  %v9110_v45 = vsub.f32 0.0, %v9046_v8  ;;  %v17481_v37 = vadd.f32 %v17177_v11, %v17317_v9  ;;  %v17485_v24 = vadd.f32 %v17171_v25, %v17321_v32  ;;  %v8762_v55 = vadd.f32 -0.28449672, %v8730_v43 }
 0x721   : > { %18781 = vst [vmem:[#allocation44_spill] sm:$0xff] %v17471_v30  ;;  %v17473_v0 = vmul.f32 %v9212_v2, %v9180_v20  ;;  %12526 = vrcp.f32 %v8544_v57  ;;  %v9017_v23 = vmul.f32 %v12523_v26, %v8857_v28  ;;  %v17490_v6 = vmul.f32 0.70710677, %v17477_v63 }
 0x722   : > { %v9174_v35 = vmul.f32 0.5, %v17249_v51  ;;  %v8959_v54 = vmul.f32 1.442695, %v8922_v7  ;;  %v8799_v18 = vmul.f32 %v17408_v31, %v8767_v58  ;;  %v17495_v11 = vmul.f32 0.70710677, %v17481_v37 }
 0x723   : > { %18782 = vst [vmem:[#allocation72_spill] sm:$0xff] %v17473_v0  ;;  %v17499_v25 = vmul.f32 0.5, %v17274_v27  ;;  %12528 = vpow2.f32 %v8969_v47  ;;  %v17502_v32 = vand.u32 2147483647, %v17490_v6  ;;  %v9141_v9 = vsel %vm9077_vm11, %v9045_v40, %v9109_v15 }
 0x724   : > { %v9142_v21 = vsel %vm9078_vm15, %v9046_v8, %v9110_v45  ;;  %v17507_v51 = vand.u32 2147483647, %v17495_v11  ;;  %v17510_v59 = vmul.f32 0.70710677, %v17485_v24  ;;  %v9049_v1 = vsub.f32 1.0, %v9017_v23 }
 0x725   : > { %v8794_v27 = vmul.f32 %v17390_v29, %v8762_v55  ;;  %v8896_v4 = vsub.f32 0.0, %v17459_v12  ;;  %v8510_v50 = vmul.f32 0.3275911, %v17502_v32  ;;  %12530 = vpow2.f32 %v8959_v54 }
 0x726   : > { %v17512_v13 = vpop.eup %12524  ;;  %v8831_v28 = vadd.f32 0.2548296, %v8799_v18  ;;  %v8515_v40 = vmul.f32 0.3275911, %v17507_v51  ;;  %v9205_v8 = vadd.f32 1.0, %v9141_v9  ;;  %v9206_v43 = vadd.f32 1.0, %v9142_v21 }
 0x727   : > { %v8605_v53 = vmul.f32 1.0614054, %v17512_v13  ;;  %v8542_v20 = vadd.f32 1.0, %v8510_v50  ;;  %v17521_v2 = vand.u32 2147483647, %v17510_v59  ;;  %v17525_v47 = vadd.f32 %v17180_v5, %v17328_v36 }
 0x728   : > { %v8547_v58 = vadd.f32 1.0, %v8515_v40  ;;  %v9113_v57 = vsub.f32 0.0, %v9049_v1  ;;  %v8826_v15 = vadd.f32 0.2548296, %v8794_v27  ;;  %v17531_v23 = vmul.f32 0.5, %v17280_v3 }
 0x729   : > { %v8637_v7 = vadd.f32 -1.4531521, %v8605_v53  ;;  %12532 = vrcp.f32 %v8542_v20  ;;  %v8513_v26 = vmul.f32 0.3275911, %v17521_v2  ;;  %v8863_v55 = vmul.f32 %v17408_v31, %v8831_v28 }
 0x72a   : > { %v8928_v54 = vmul.f32 %v8896_v4, %v17459_v12  ;;  %12534 = vrcp.f32 %v8547_v58  ;;  %v17536_v18 = vmul.f32 0.5, %v17326_v34  ;;  %v8893_v5 = vsub.f32 0.0, %v17438_v33 }
 0x72b   : > { %v17528_v45 = vpop.eup %12526  ;;  %v8545_v9 = vadd.f32 1.0, %v8513_v26  ;;  %v17541_v21 = vmul.f32 %v9205_v8, %v17451_v38  ;;  %v17543_v27 = vmul.f32 %v9206_v43, %v9174_v35  ;;  %v8669_v3 = vmul.f32 %v17512_v13, %v8637_v7  ;;  %v18785_v35 = vld [vmem:[#allocation15_spill] sm:$0xff]  ;;  %v18786_v43 = vld [vmem:[#allocation22_spill] sm:$0xff]  ;;  %v18789_v7 = vld [vmem:[#allocation16_spill] sm:$0xff] }
 0x72c   : > { %v8608_v36 = vmul.f32 1.0614054, %v17528_v45  ;;  %v17547_v31 = vmul.f32 0.70710677, %v17525_v47  ;;  %v9145_v34 = vsel %vm9081_vm8, %v9049_v1, %v9113_v57  ;;  %v8858_v4 = vmul.f32 %v17390_v29, %v8826_v15  ;;  %v18788_v29 = vld [vmem:[#allocation42_spill] sm:$0xff] }
 0x72d   : > { %18783 = vst [vmem:[#allocation45_spill] sm:$0xff] %v17541_v21  ;;  %18784 = vst [vmem:[#allocation75_spill] sm:$0xff] %v17543_v27  ;;  %v12529_v12 = vpop.eup %12528  ;;  %12536 = vrcp.f32 %v8545_v9  ;;  %v8971_v53 = vmul.f32 1.442695, %v8928_v54  ;;  %v17557_v40 = vadd.f32 %v18785_v35, %v17340_v17  ;;  %v8925_v8 = vmul.f32 %v8893_v5, %v17438_v33 }
 0x72e   : > { %v8640_v50 = vadd.f32 -1.4531521, %v8608_v36  ;;  %v9023_v28 = vmul.f32 %v12529_v12, %v8863_v55  ;;  %v17553_v38 = vand.u32 2147483647, %v17547_v31  ;;  %v17563_v1 = vadd.f32 %v18787_v48, %v18786_v43  ;;  %v18790_v12 = vld [vmem:[#allocation21_spill] sm:$0xff] }
 0x72f   : > { %v17567_v58 = vadd.f32 %v18789_v7, %v18788_v29  ;;  %v12531_v57 = vpop.eup %12530  ;;  %v17569_v15 = vadd.f32 1.0, %v9145_v34  ;;  %v8701_v26 = vadd.f32 1.4214138, %v8669_v3  ;;  %v8899_v55 = vsub.f32 0.0, %v17507_v51  ;;  %v18791_v7 = vld [vmem:[#allocation60_spill] sm:$0xff] }
 0x730   : > { %v8672_v20 = vmul.f32 %v17528_v45, %v8640_v50  ;;  %v8516_v17 = vmul.f32 0.3275911, %v17553_v38  ;;  %v9018_v54 = vmul.f32 %v12531_v57, %v8858_v4  ;;  %v17574_v5 = vmul.f32 0.70710677, %v17557_v40 }
 0x731   : > { %v17577_v36 = vmul.f32 0.70710677, %v17563_v1  ;;  %v9055_v9 = vsub.f32 1.0, %v9023_v28  ;;  %vm9087_vm3 = vcmp.ge.f32.partialorder %v18790_v12, 0.0  ;;  %12538 = vpow2.f32 %v8971_v53 }
 0x732   : > { %v8704_v33 = vadd.f32 1.4214138, %v8672_v20  ;;  %v8894_v34 = vsub.f32 0.0, %v17502_v32  ;;  %v8548_v50 = vadd.f32 1.0, %v8516_v17  ;;  %v8965_v35 = vmul.f32 1.442695, %v8925_v8 }
 0x733   : > { %v17581_v3 = vpop.eup %12532  ;;  %v17585_v4 = vand.u32 2147483647, %v17574_v5  ;;  %v17588_v20 = vand.u32 2147483647, %v17577_v36  ;;  %v8733_v28 = vmul.f32 %v17512_v13, %v8701_v26  ;;  %v8931_v29 = vmul.f32 %v8899_v55, %v17507_v51 }
 0x734   : > { %v8736_v43 = vmul.f32 %v17528_v45, %v8704_v33  ;;  %v17590_v48 = vpop.eup %12534  ;;  %v8606_v53 = vmul.f32 1.0614054, %v17581_v3  ;;  %12540 = vrcp.f32 %v8548_v50  ;;  %vm9082_vm9 = vcmp.ge.f32.partialorder %v18791_v7, 0.0  ;;  %v18792_v33 = vld [vmem:[#allocation61_spill] sm:$0xff] }
 0x735   : > { %v8611_v57 = vmul.f32 1.0614054, %v17590_v48  ;;  %v8514_v17 = vmul.f32 0.3275911, %v17585_v4  ;;  %v17600_v30 = vadd.f32 %v18793_v19, %v18792_v33  ;;  %v9050_v0 = vsub.f32 1.0, %v9018_v54 }
 0x736   : > { %v8768_v8 = vadd.f32 -0.28449672, %v8736_v43  ;;  %v9119_v52 = vsub.f32 0.0, %v9055_v9  ;;  %v8638_v60 = vadd.f32 -1.4531521, %v8606_v53  ;;  %v8926_v26 = vmul.f32 %v8894_v34, %v17502_v32 }
 0x737   : > { %v17603_v44 = vpop.eup %12536  ;;  %v8643_v55 = vadd.f32 -1.4531521, %v8611_v57  ;;  %v8546_v50 = vadd.f32 1.0, %v8514_v17  ;;  %v8519_v43 = vmul.f32 0.3275911, %v17588_v20  ;;  %v9114_v32 = vsub.f32 0.0, %v9050_v0 }
 0x738   : > { %v8800_v51 = vmul.f32 %v17528_v45, %v8768_v8  ;;  %v8765_v27 = vadd.f32 -0.28449672, %v8733_v28  ;;  %v8670_v21 = vmul.f32 %v17581_v3, %v8638_v60  ;;  %v8977_v22 = vmul.f32 1.442695, %v8931_v29 }
 0x739   : > { %v8609_v19 = vmul.f32 1.0614054, %v17603_v44  ;;  %v8675_v54 = vmul.f32 %v17590_v48, %v8643_v55  ;;  %12542 = vrcp.f32 %v8546_v50  ;;  %v8551_v53 = vadd.f32 1.0, %v8519_v43 }
 0x73a   : > { %v8832_v33 = vadd.f32 0.2548296, %v8800_v51  ;;  %vm9088_vm4 = vcmp.ge.f32.partialorder %v17444_v61, 0.0  ;;  %v8702_v34 = vadd.f32 1.4214138, %v8670_v21  ;;  %v8900_v57 = vsub.f32 0.0, %v17553_v38 }
 0x73b   : > { %v8641_v8 = vadd.f32 -1.4531521, %v8609_v19  ;;  %v9151_v28 = vsel %vm9087_vm3, %v9055_v9, %v9119_v52  ;;  %v8707_v29 = vadd.f32 1.4214138, %v8675_v54  ;;  %12544 = vrcp.f32 %v8551_v53  ;;  %v12539_v17 = vpop.eup %12538 }
 0x73c   : > { %v8864_v60 = vmul.f32 %v17528_v45, %v8832_v33  ;;  %v8797_v51 = vmul.f32 %v17512_v13, %v8765_v27  ;;  %v8967_v55 = vmul.f32 1.442695, %v8926_v26  ;;  %12546 = vpow2.f32 %v8977_v22 }
 0x73d   : > { %v8673_v50 = vmul.f32 %v17603_v44, %v8641_v8  ;;  %12548 = vpow2.f32 %v8965_v35  ;;  %v8734_v21 = vmul.f32 %v17581_v3, %v8702_v34  ;;  %v8739_v19 = vmul.f32 %v17590_v48, %v8707_v29 }
 0x73e   : > { %v9024_v43 = vmul.f32 %v12539_v17, %v8864_v60  ;;  %v17619_v14 = vpop.eup %12540  ;;  %v9146_v52 = vsel %vm9082_vm9, %v9050_v0, %v9114_v32  ;;  %v9215_v45 = vadd.f32 1.0, %v9151_v28  ;;  %v9184_v9 = vmul.f32 0.5, %v17356_v16  ;;  %v18795_v28 = vld [vmem:[#allocation54_spill] sm:$0xff] }
 0x73f   : > { %v8932_v27 = vmul.f32 %v8900_v57, %v17553_v38  ;;  %v8771_v22 = vadd.f32 -0.28449672, %v8739_v19  ;;  %v8897_v26 = vsub.f32 0.0, %v17521_v2  ;;  %v8612_v35 = vmul.f32 1.0614054, %v17619_v14  ;;  %v18794_v57 = vld [vmem:[#allocation62_spill] sm:$0xff] }
 0x740   : > { %v9056_v12 = vsub.f32 1.0, %v9024_v43  ;;  %v8829_v33 = vadd.f32 0.2548296, %v8797_v51  ;;  %12550 = vpow2.f32 %v8967_v55  ;;  %v8705_v54 = vadd.f32 1.4214138, %v8673_v50 }
 0x741   : > { %v17628_v53 = vmul.f32 0.70710677, %v17567_v58  ;;  %v8766_v7 = vadd.f32 -0.28449672, %v8734_v21  ;;  %v8803_v0 = vmul.f32 %v17590_v48, %v8771_v22  ;;  %v8644_v32 = vadd.f32 -1.4531521, %v8612_v35 }
 0x742   : > { %v9120_v34 = vsub.f32 0.0, %v9056_v12  ;;  %v17632_v16 = vmul.f32 %v9215_v45, %v17536_v18  ;;  %v8979_v38 = vmul.f32 1.442695, %v8932_v27  ;;  %v17639_v60 = vadd.f32 %v18795_v28, %v18794_v57 }
 0x743   : > { %v17635_v8 = vand.u32 2147483647, %v17628_v53  ;;  %v17641_v29 = vpop.eup %12542  ;;  %v8835_v51 = vadd.f32 0.2548296, %v8803_v0  ;;  %v8929_v55 = vmul.f32 %v8897_v26, %v17521_v2  ;;  %v8676_v50 = vmul.f32 %v17619_v14, %v8644_v32 }
 0x744   : > { %v9152_v17 = vsel %vm9088_vm4, %v9056_v12, %v9120_v34  ;;  %v8861_v18 = vmul.f32 %v17512_v13, %v8829_v33  ;;  %v8737_v21 = vmul.f32 %v17603_v44, %v8705_v54  ;;  %v8610_v19 = vmul.f32 1.0614054, %v17641_v29 }
 0x745   : > { %v9216_v43 = vadd.f32 1.0, %v9152_v17  ;;  %v17650_v45 = vpop.eup %12544  ;;  %v8798_v27 = vmul.f32 %v17581_v3, %v8766_v7  ;;  %v8867_v22 = vmul.f32 %v17590_v48, %v8835_v51  ;;  %v8708_v61 = vadd.f32 1.4214138, %v8676_v50 }
 0x746   : > { %v8517_v12 = vmul.f32 0.3275911, %v17635_v8  ;;  %v12547_v35 = vpop.eup %12546  ;;  %12552 = vpow2.f32 %v8979_v38  ;;  %v8642_v26 = vadd.f32 -1.4531521, %v8610_v19  ;;  %v8898_v13 = vsub.f32 0.0, %v17585_v4 }
 0x747   : > { %v17655_v2 = vmul.f32 %v9216_v43, %v9184_v9  ;;  %v12549_v33 = vpop.eup %12548  ;;  %v9027_v54 = vmul.f32 %v12547_v35, %v8867_v22  ;;  %v8740_v34 = vmul.f32 %v17619_v14, %v8708_v61  ;;  %v8615_v0 = vmul.f32 1.0614054, %v17650_v45 }
 0x748   : > { %v8549_v32 = vadd.f32 1.0, %v8517_v12  ;;  %v8769_v7 = vadd.f32 -0.28449672, %v8737_v21  ;;  %v8973_v57 = vmul.f32 1.442695, %v8929_v55  ;;  %v8674_v28 = vmul.f32 %v17641_v29, %v8642_v26 }
 0x749   : > { %v8830_v9 = vadd.f32 0.2548296, %v8798_v27  ;;  %v8772_v17 = vadd.f32 -0.28449672, %v8740_v34  ;;  %v8647_v38 = vadd.f32 -1.4531521, %v8615_v0  ;;  %v9021_v43 = vmul.f32 %v12549_v33, %v8861_v18 }
 0x74a   : > { %12554 = vrcp.f32 %v8549_v32  ;;  %v12551_v51 = vpop.eup %12550  ;;  %v9210_v50 = vadd.f32 1.0, %v9146_v52  ;;  %v17664_v19 = vmul.f32 0.5, %v17348_v62  ;;  %v8706_v22 = vadd.f32 1.4214138, %v8674_v28 }
 0x74b   : > { %v9059_v61 = vsub.f32 1.0, %v9027_v54  ;;  %v8804_v12 = vmul.f32 %v17619_v14, %v8772_v17  ;;  %v8930_v35 = vmul.f32 %v8898_v13, %v17585_v4  ;;  %v8679_v55 = vmul.f32 %v17650_v45, %v8647_v38 }
 0x74c   : > { %v17671_v21 = vmul.f32 %v17569_v15, %v17499_v25  ;;  %v8801_v27 = vmul.f32 %v17603_v44, %v8769_v7  ;;  %v8738_v52 = vmul.f32 %v17641_v29, %v8706_v22  ;;  %v8903_v18 = vsub.f32 0.0, %v17588_v20 }
 0x74d   : > { %v8862_v62 = vmul.f32 %v17581_v3, %v8830_v9  ;;  %12556 = vpow2.f32 %v8973_v57  ;;  %v8836_v26 = vadd.f32 0.2548296, %v8804_v12  ;;  %v8711_v33 = vadd.f32 1.4214138, %v8679_v55 }
 0x74e   : > { %v17678_v54 = vmul.f32 %v9210_v50, %v17531_v23  ;;  %v9053_v4 = vsub.f32 1.0, %v9021_v43  ;;  %vm9085_vm5 = vcmp.ge.f32.partialorder %v17420_v10, 0.0  ;;  %v17682_v25 = vmul.f32 0.5, %v17477_v63 }
 0x74f   : > { %v9187_v15 = vmul.f32 0.5, %v17481_v37  ;;  %v9123_v13 = vsub.f32 0.0, %v9059_v61  ;;  %v8868_v34 = vmul.f32 %v17619_v14, %v8836_v26  ;;  %v8975_v0 = vmul.f32 1.442695, %v8930_v35 }
 0x750   : > { %v17687_v3 = vmul.f32 0.70710677, %v17600_v30  ;;  %v12553_v32 = vpop.eup %12552  ;;  %vm9091_vm13 = vcmp.ge.f32.partialorder %v17495_v11, 0.0  ;;  %v8833_v23 = vadd.f32 0.2548296, %v8801_v27  ;;  %v8935_v57 = vmul.f32 %v8903_v18, %v17588_v20 }
 0x751   : > { %v8770_v7 = vadd.f32 -0.28449672, %v8738_v52  ;;  %v9022_v28 = vmul.f32 %v12551_v51, %v8862_v62  ;;  %v9028_v9 = vmul.f32 %v12553_v32, %v8868_v34  ;;  %v8743_v63 = vmul.f32 %v17650_v45, %v8711_v33 }
 0x752   : > { %v8488_v37 = vand.u32 2147483647, %v17687_v3  ;;  %v9117_v17 = vsub.f32 0.0, %v9053_v4  ;;  %v17694_v14 = vmul.f32 0.5, %v17485_v24  ;;  %vm9092_vm10 = vcmp.ge.f32.partialorder %v17547_v31, 0.0 }
 0x753   : > { %v17698_v38 = vmul.f32 0.70710677, %v17639_v60  ;;  %v9155_v50 = vsel %vm9091_vm13, %v9059_v61, %v9123_v13  ;;  %v9060_v43 = vsub.f32 1.0, %v9028_v9  ;;  %12558 = vpow2.f32 %v8975_v0  ;;  %v18796_v9 = vld [vmem:[#allocation55_spill] sm:$0xff] }
 0x754   : > { %v17700_v11 = vpop.eup %12554  ;;  %v8520_v20 = vmul.f32 0.3275911, %v8488_v37  ;;  %vm9086_vm6 = vcmp.ge.f32.partialorder %v17490_v6, 0.0  ;;  %v8865_v51 = vmul.f32 %v17603_v44, %v8833_v23  ;;  %v8802_v22 = vmul.f32 %v17641_v29, %v8770_v7 }
 0x755   : > { %v8985_v12 = vmul.f32 1.442695, %v8935_v57  ;;  %v17706_v24 = vand.u32 2147483647, %v17698_v38  ;;  %v9054_v35 = vsub.f32 1.0, %v9022_v28  ;;  %v9124_v55 = vsub.f32 0.0, %v9060_v43 }
 0x756   : > { %v8775_v27 = vadd.f32 -0.28449672, %v8743_v63  ;;  %v8552_v52 = vadd.f32 1.0, %v8520_v20  ;;  %v9219_v18 = vadd.f32 1.0, %v9155_v50  ;;  %v8613_v61 = vmul.f32 1.0614054, %v17700_v11 }
 0x757   : > { %v8901_v62 = vsub.f32 0.0, %v17635_v8  ;;  %v8518_v26 = vmul.f32 0.3275911, %v17706_v24  ;;  %v12557_v33 = vpop.eup %12556  ;;  %v9149_v44 = vsel %vm9085_vm5, %v9053_v4, %v9117_v17  ;;  %v9156_v13 = vsel %vm9092_vm10, %v9060_v43, %v9124_v55 }
 0x758   : > { %v9188_v34 = vmul.f32 0.5, %v17525_v47  ;;  %12560 = vrcp.f32 %v8552_v52  ;;  %v9025_v0 = vmul.f32 %v12557_v33, %v8865_v51  ;;  %v9220_v32 = vadd.f32 1.0, %v9156_v13 }
 0x759   : > { %v8834_v23 = vadd.f32 0.2548296, %v8802_v22  ;;  %12562 = vpow2.f32 %v8985_v12  ;;  %v9118_v7 = vsub.f32 0.0, %v9054_v35  ;;  %v8807_v57 = vmul.f32 %v17650_v45, %v8775_v27 }
 0x75a   : > { %v8550_v28 = vadd.f32 1.0, %v8518_v26  ;;  %v17719_v63 = vadd.f32 %v18796_v9, %v17384_v46  ;;  %v17721_v10 = vmul.f32 %v9219_v18, %v9187_v15  ;;  %v17723_v4 = vmul.f32 %v9220_v32, %v9188_v34  ;;  %v18797_v18 = vld [vmem:[#allocation56_spill] sm:$0xff] }
 0x75b   : > { %v8645_v31 = vadd.f32 -1.4531521, %v8613_v61  ;;  %v8933_v47 = vmul.f32 %v8901_v62, %v17635_v8  ;;  %v9213_v17 = vadd.f32 1.0, %v9149_v44  ;;  %v8904_v50 = vsub.f32 0.0, %v8488_v37  ;;  %v18798_v62 = vld [vmem:[#allocation17_spill] sm:$0xff] }
 0x75c   : > { %12564 = vrcp.f32 %v8550_v28  ;;  %v17727_v43 = vmul.f32 0.70710677, %v17719_v63  ;;  %v9057_v20 = vsub.f32 1.0, %v9025_v0  ;;  %vm9089_vm7 = vcmp.ge.f32.partialorder %v17510_v59, 0.0 }
 0x75d   : > { %v8866_v15 = vmul.f32 %v17641_v29, %v8834_v23  ;;  %v12559_v51 = vpop.eup %12558  ;;  %v9150_v22 = vsel %vm9086_vm6, %v9054_v35, %v9118_v7  ;;  %v17736_v8 = vmul.f32 0.5, %v17557_v40  ;;  %v8839_v12 = vadd.f32 0.2548296, %v8807_v57 }
 0x75e   : > { %v8491_v55 = vand.u32 2147483647, %v17727_v43  ;;  %v8677_v27 = vmul.f32 %v17700_v11, %v8645_v31  ;;  %v8981_v52 = vmul.f32 1.442695, %v8933_v47  ;;  %v17742_v61 = vadd.f32 %v18797_v18, %v17388_v39 }
 0x75f   : > { %v17746_v29 = vadd.f32 %v18798_v62, %v17394_v49  ;;  %v17749_v6 = vmul.f32 %v9213_v17, %v17664_v19  ;;  %v17752_v40 = vmul.f32 0.5, %v17563_v1  ;;  %v8936_v35 = vmul.f32 %v8904_v50, %v8488_v37 }
 0x760   : > { %v8523_v26 = vmul.f32 0.3275911, %v8491_v55  ;;  %v9214_v33 = vadd.f32 1.0, %v9150_v22  ;;  %v9121_v44 = vsub.f32 0.0, %v9057_v20  ;;  %v9026_v13 = vmul.f32 %v12559_v51, %v8866_v15 }
 0x761   : > { %v17755_v34 = vmul.f32 0.70710677, %v17742_v61  ;;  %v8871_v0 = vmul.f32 %v17650_v45, %v8839_v12  ;;  %v8902_v49 = vsub.f32 0.0, %v17706_v24  ;;  %v17762_v19 = vmul.f32 0.70710677, %v17746_v29 }
 0x762   : > { %v17757_v39 = vpop.eup %12560  ;;  %v8555_v32 = vadd.f32 1.0, %v8523_v26  ;;  %v8709_v23 = vadd.f32 1.4214138, %v8677_v27  ;;  %12566 = vpow2.f32 %v8981_v52  ;;  %vm9090_vm1 = vcmp.ge.f32.partialorder %v17574_v5, 0.0 }
 0x763   : > { %v12563_v1 = vpop.eup %12562  ;;  %v8616_v37 = vmul.f32 1.0614054, %v17757_v39  ;;  %v17766_v7 = vand.u32 2147483647, %v17755_v34  ;;  %v17770_v57 = vmul.f32 0.5, %v17567_v58  ;;  %v17774_v9 = vmul.f32 %v9214_v33, %v17682_v25 }
 0x764   : > { %v8987_v45 = vmul.f32 1.442695, %v8936_v35  ;;  %12568 = vrcp.f32 %v8555_v32  ;;  %v8492_v28 = vand.u32 2147483647, %v17762_v19  ;;  %v9058_v31 = vsub.f32 1.0, %v9026_v13  ;;  %v18799_v35 = vld [vmem:[#allocation65_spill] sm:$0xff] }
 0x765   : > { %v8648_v47 = vadd.f32 -1.4531521, %v8616_v37  ;;  %v8521_v17 = vmul.f32 0.3275911, %v17766_v7  ;;  %v9153_v15 = vsel %vm9089_vm7, %v9057_v20, %v9121_v44  ;;  %v9031_v51 = vmul.f32 %v12563_v1, %v8871_v0  ;;  %v18800_v37 = vld [vmem:[#allocation73_spill] sm:$0xff] }
 0x766   : > { %v17777_v50 = vpop.eup %12564  ;;  %v8934_v58 = vmul.f32 %v8902_v49, %v17706_v24  ;;  %v8524_v22 = vmul.f32 0.3275911, %v8492_v28  ;;  %v8741_v12 = vmul.f32 %v17700_v11, %v8709_v23  ;;  %12570 = vpow2.f32 %v8987_v45  ;;  %v18801_v45 = vld [vmem:[#allocation20_spill] sm:$0xff] }
 0x767   : > { %v8680_v27 = vmul.f32 %v17757_v39, %v8648_v47  ;;  %v8614_v25 = vmul.f32 1.0614054, %v17777_v50  ;;  %v8553_v52 = vadd.f32 1.0, %v8521_v17  ;;  %v8907_v18 = vsub.f32 0.0, %v8491_v55 }
 0x768   : > { %v8556_v62 = vadd.f32 1.0, %v8524_v22  ;;  %v17787_v26 = vadd.f32 %v18799_v35, %v17396_v41  ;;  %v9122_v59 = vsub.f32 0.0, %v9058_v31  ;;  %v17790_v33 = vmul.f32 0.5, %v17600_v30 }
 0x769   : > { %v8712_v20 = vadd.f32 1.4214138, %v8680_v27  ;;  %12572 = vrcp.f32 %v8553_v52  ;;  %v9063_v24 = vsub.f32 1.0, %v9031_v51  ;;  %vm9095_vm0 = vcmp.ge.f32.partialorder %v17577_v36, 0.0 }
 0x76a   : > { %v8646_v44 = vadd.f32 -1.4531521, %v8614_v25  ;;  %12574 = vrcp.f32 %v8556_v62  ;;  %v17794_v13 = vmul.f32 0.70710677, %v17787_v26  ;;  %v17796_v0 = vadd.f32 1.0, %v9153_v15 }
 0x76b   : > { %v8773_v49 = vadd.f32 -0.28449672, %v8741_v12  ;;  %v8744_v41 = vmul.f32 %v17757_v39, %v8712_v20  ;;  %v8983_v32 = vmul.f32 1.442695, %v8934_v58  ;;  %v17800_v1 = vmul.f32 0.5, %v17639_v60 }
 0x76c   : > { %v8939_v30 = vmul.f32 %v8907_v18, %v8491_v55  ;;  %v17803_v23 = vand.u32 2147483647, %v17794_v13  ;;  %v17807_v47 = vadd.f32 %v18801_v45, %v18800_v37  ;;  %v17809_v17 = vpop.eup %12566  ;;  %v9154_v15 = vsel %vm9090_vm1, %v9058_v31, %v9122_v59 }
 0x76d   : > { %v8776_v51 = vadd.f32 -0.28449672, %v8744_v41  ;;  %v17814_v22 = vmul.f32 0.5, %v17719_v63  ;;  %v8908_v58 = vsub.f32 0.0, %v8492_v28  ;;  %v9127_v55 = vsub.f32 0.0, %v9063_v24  ;;  %v18802_v41 = vld [vmem:[#allocation18_spill] sm:$0xff] }
 0x76e   : > { %v17816_v60 = vpop.eup %12568  ;;  %v8678_v12 = vmul.f32 %v17777_v50, %v8646_v44  ;;  %v8522_v27 = vmul.f32 0.3275911, %v17803_v23  ;;  %v17821_v25 = vmul.f32 0.70710677, %v17807_v47  ;;  %v8805_v52 = vmul.f32 %v17700_v11, %v8773_v49 }
 0x76f   : > { %v8808_v5 = vmul.f32 %v17757_v39, %v8776_v51  ;;  %12576 = vpow2.f32 %v8983_v32  ;;  %v8619_v31 = vmul.f32 1.0614054, %v17816_v60  ;;  %v8993_v63 = vmul.f32 1.442695, %v8939_v30 }
 0x770   : > { %v8905_v18 = vsub.f32 0.0, %v17766_v7  ;;  %v8554_v62 = vadd.f32 1.0, %v8522_v27  ;;  %v17828_v35 = vand.u32 2147483647, %v17821_v25  ;;  %v8940_v44 = vmul.f32 %v8908_v58, %v8492_v28  ;;  %v12571_v49 = vpop.eup %12570 }
 0x771   : > { %v8840_v59 = vadd.f32 0.2548296, %v8808_v5  ;;  %v8651_v20 = vadd.f32 -1.4531521, %v8619_v31  ;;  %v17832_v37 = vadd.f32 %v18802_v41, %v17413_v42  ;;  %v17834_v45 = vadd.f32 1.0, %v9154_v15 }
 0x772   : > { %vm9096_vm12 = vcmp.ge.f32.partialorder %v17687_v3, 0.0  ;;  %v8710_v32 = vadd.f32 1.4214138, %v8678_v12  ;;  %12578 = vrcp.f32 %v8554_v62  ;;  %v8527_v30 = vmul.f32 0.3275911, %v17828_v35 }
 0x773   : > { %v17838_v51 = vpop.eup %12572  ;;  %v9159_v27 = vsel %vm9095_vm0, %v9063_v24, %v9127_v55  ;;  %v8837_v5 = vadd.f32 0.2548296, %v8805_v52  ;;  %v8872_v28 = vmul.f32 %v17757_v39, %v8840_v59  ;;  %v8683_v42 = vmul.f32 %v17816_v60, %v8651_v20 }
 0x774   : > { %v17844_v58 = vpop.eup %12574  ;;  %12580 = vpow2.f32 %v8993_v63  ;;  %v8617_v15 = vmul.f32 1.0614054, %v17838_v51  ;;  %v8937_v12 = vmul.f32 %v8905_v18, %v17766_v7  ;;  %v8559_v31 = vadd.f32 1.0, %v8527_v30 }
 0x775   : > { %v9032_v62 = vmul.f32 %v12571_v49, %v8872_v28  ;;  %v8715_v41 = vadd.f32 1.4214138, %v8683_v42  ;;  %v8620_v46 = vmul.f32 1.0614054, %v17844_v58  ;;  %v8995_v48 = vmul.f32 1.442695, %v8940_v44 }
 0x776   : > { %v8742_v36 = vmul.f32 %v17777_v50, %v8710_v32  ;;  %v8649_v24 = vadd.f32 -1.4531521, %v8617_v15  ;;  %12582 = vrcp.f32 %v8559_v31  ;;  %v17851_v39 = vmul.f32 0.70710677, %v17832_v37 }
 0x777   : > { %v9064_v55 = vsub.f32 1.0, %v9032_v62  ;;  %v8747_v52 = vmul.f32 %v17816_v60, %v8715_v41  ;;  %v8652_v63 = vadd.f32 -1.4531521, %v8620_v46  ;;  %v8906_v59 = vsub.f32 0.0, %v17803_v23 }
 0x778   : > { %v9223_v7 = vadd.f32 1.0, %v9159_v27  ;;  %v8869_v18 = vmul.f32 %v17700_v11, %v8837_v5  ;;  %v8681_v20 = vmul.f32 %v17838_v51, %v8649_v24  ;;  %v17858_v44 = vand.u32 2147483647, %v17851_v39 }
 0x779   : > { %v17860_v49 = vpop.eup %12576  ;;  %v9128_v32 = vsub.f32 0.0, %v9064_v55  ;;  %v8779_v30 = vadd.f32 -0.28449672, %v8747_v52  ;;  %v8989_v28 = vmul.f32 1.442695, %v8937_v12  ;;  %v8684_v42 = vmul.f32 %v17844_v58, %v8652_v63 }
 0x77a   : > { %v8774_v15 = vadd.f32 -0.28449672, %v8742_v36  ;;  %v8713_v31 = vadd.f32 1.4214138, %v8681_v20  ;;  %12584 = vpow2.f32 %v8995_v48  ;;  %v8525_v46 = vmul.f32 0.3275911, %v17858_v44 }
 0x77b   : > { %v9160_v11 = vsel %vm9096_vm12, %v9064_v55, %v9128_v32  ;;  %v8811_v27 = vmul.f32 %v17816_v60, %v8779_v30  ;;  %v8716_v5 = vadd.f32 1.4214138, %v8684_v42  ;;  %v8938_v62 = vmul.f32 %v8906_v59, %v17803_v23 }
 0x77c   : > { %v17868_v41 = vpop.eup %12578  ;;  %v9224_v24 = vadd.f32 1.0, %v9160_v11  ;;  %v8745_v12 = vmul.f32 %v17838_v51, %v8713_v31  ;;  %v8911_v52 = vsub.f32 0.0, %v17828_v35  ;;  %v8557_v36 = vadd.f32 1.0, %v8525_v46 }
 0x77d   : > { %v17873_v48 = vmul.f32 %v9223_v7, %v17752_v40  ;;  %v8843_v63 = vadd.f32 0.2548296, %v8811_v27  ;;  %v8748_v3 = vmul.f32 %v17844_v58, %v8716_v5  ;;  %v8618_v55 = vmul.f32 1.0614054, %v17868_v41 }
 0x77e   : > { %v12581_v20 = vpop.eup %12580  ;;  %v17878_v32 = vmul.f32 %v9224_v24, %v17790_v33  ;;  %v8806_v23 = vmul.f32 %v17777_v50, %v8774_v15  ;;  %v8777_v59 = vadd.f32 -0.28449672, %v8745_v12  ;;  %12586 = vrcp.f32 %v8557_v36  ;;  %v18804_v24 = vld [vmem:[#allocation66_spill] sm:$0xff]  ;;  %v18805_v36 = vld [vmem:[#allocation43_spill] sm:$0xff] }
 0x77f   : > { %18803 = vst [vmem:[#allocation74_spill] sm:$0xff] %v17873_v48  ;;  %v17882_v30 = vmul.f32 %v17809_v17, %v8869_v18  ;;  %v8875_v42 = vmul.f32 %v17816_v60, %v8843_v63  ;;  %v8780_v40 = vadd.f32 -0.28449672, %v8748_v3  ;;  %v8650_v7 = vadd.f32 -1.4531521, %v8618_v55  ;;  %v18806_v63 = vld [vmem:[#allocation19_spill] sm:$0xff] }
 0x780   : > { %v17885_v31 = vpop.eup %12582  ;;  %vm9099_vm2 = vcmp.ge.f32.partialorder %v17727_v43, 0.0  ;;  %12588 = vpow2.f32 %v8989_v28  ;;  %v8991_v33 = vmul.f32 1.442695, %v8938_v62  ;;  %v8943_v15 = vmul.f32 %v8911_v52, %v17828_v35  ;;  %v18807_v3 = vld [vmem:[#allocation70_spill] sm:$0xff]  ;;  %v18808_v55 = vld [vmem:[#allocation57_spill] sm:$0xff] }
 0x781   : > { %v9035_v11 = vmul.f32 %v12581_v20, %v8875_v42  ;;  %v8812_v27 = vmul.f32 %v17844_v58, %v8780_v40  ;;  %v8682_v17 = vmul.f32 %v17868_v41, %v8650_v7  ;;  %v8623_v60 = vmul.f32 1.0614054, %v17885_v31 }
 0x782   : > { %v8838_v18 = vadd.f32 0.2548296, %v8806_v23  ;;  %v8809_v5 = vmul.f32 %v17838_v51, %v8777_v59  ;;  %v17897_v12 = vadd.f32 %v18804_v24, %v17416_v56  ;;  %v17901_v28 = vadd.f32 %v18806_v63, %v18805_v36 }
 0x783   : > { %v9067_v62 = vsub.f32 1.0, %v9035_v11  ;;  %v8844_v35 = vadd.f32 0.2548296, %v8812_v27  ;;  %v8714_v52 = vadd.f32 1.4214138, %v8682_v17  ;;  %v17905_v20 = vadd.f32 %v18808_v55, %v18807_v3 }
 0x784   : > { %v12585_v42 = vpop.eup %12584  ;;  %vm9100_vm11 = vcmp.ge.f32.partialorder %v17762_v19, 0.0  ;;  %12590 = vpow2.f32 %v8991_v33  ;;  %v8655_v23 = vadd.f32 -1.4531521, %v8623_v60  ;;  %v17909_v59 = vmul.f32 0.70710677, %v17897_v12 }
 0x785   : > { %v9131_v56 = vsub.f32 0.0, %v9067_v62  ;;  %v8876_v40 = vmul.f32 %v17844_v58, %v8844_v35  ;;  %v8746_v7 = vmul.f32 %v17868_v41, %v8714_v52  ;;  %v17914_v11 = vmul.f32 0.70710677, %v17901_v28 }
 0x786   : > { %v9061_v27 = vsub.f32 1.0, %v17882_v30  ;;  %v8870_v17 = vmul.f32 %v17777_v50, %v8838_v18  ;;  %v8687_v24 = vmul.f32 %v17885_v31, %v8655_v23  ;;  %v17920_v33 = vand.u32 2147483647, %v17909_v59 }
 0x787   : > { %v8841_v60 = vadd.f32 0.2548296, %v8809_v5  ;;  %v9036_v36 = vmul.f32 %v12585_v42, %v8876_v40  ;;  %v8778_v63 = vadd.f32 -0.28449672, %v8746_v7  ;;  %v9001_v3 = vmul.f32 1.442695, %v8943_v15 }
 0x788   : > { %v17922_v55 = vpop.eup %12586  ;;  %v17926_v58 = vmul.f32 %v17796_v0, %v17694_v14  ;;  %v8719_v35 = vadd.f32 1.4214138, %v8687_v24  ;;  %v8528_v30 = vmul.f32 0.3275911, %v17920_v33  ;;  %v17930_v50 = vand.u32 2147483647, %v17914_v11 }
 0x789   : > { %vm9093_vm14 = vcmp.ge.f32.partialorder %v17628_v53, 0.0  ;;  %v9163_v18 = vsel %vm9099_vm2, %v9067_v62, %v9131_v56  ;;  %v9068_v5 = vsub.f32 1.0, %v9036_v36  ;;  %v8810_v15 = vmul.f32 %v17868_v41, %v8778_v63 }
 0x78a   : > { %v8621_v52 = vmul.f32 1.0614054, %v17922_v55  ;;  %v12589_v42 = vpop.eup %12588  ;;  %v9030_v14 = vmul.f32 %v17860_v49, %v8870_v17  ;;  %v8751_v0 = vmul.f32 %v17885_v31, %v8719_v35  ;;  %v8909_v23 = vsub.f32 0.0, %v17858_v44 }
 0x78b   : > { %v8560_v40 = vadd.f32 1.0, %v8528_v30  ;;  %v8873_v7 = vmul.f32 %v17838_v51, %v8841_v60  ;;  %v9132_v24 = vsub.f32 0.0, %v9068_v5  ;;  %v8842_v46 = vadd.f32 0.2548296, %v8810_v15 }
 0x78c   : > { %v8653_v48 = vadd.f32 -1.4531521, %v8621_v52  ;;  %v9227_v43 = vadd.f32 1.0, %v9163_v18  ;;  %v8783_v62 = vadd.f32 -0.28449672, %v8751_v0  ;;  %vm9094_vm15 = vcmp.ge.f32.partialorder %v17698_v38, 0.0 }
 0x78d   : > { %12592 = vrcp.f32 %v8560_v40  ;;  %v8526_v56 = vmul.f32 0.3275911, %v17930_v50  ;;  %v9164_v49 = vsel %vm9100_vm11, %v9068_v5, %v9132_v24  ;;  %v9196_v17 = vmul.f32 0.5, %v17746_v29  ;;  %v18817_v38 = vld [vmem:[#allocation59_spill] sm:$0xff] }
 0x78e   : > { %v8874_v36 = vmul.f32 %v17868_v41, %v8842_v46  ;;  %v8685_v63 = vmul.f32 %v17922_v55, %v8653_v48  ;;  %v12591_v51 = vpop.eup %12590  ;;  %v9125_v60 = vsub.f32 0.0, %v9061_v27  ;;  %v9062_v35 = vsub.f32 1.0, %v9030_v14 }
 0x78f   : > { %v9228_v30 = vadd.f32 1.0, %v9164_v49  ;;  %v8558_v18 = vadd.f32 1.0, %v8526_v56  ;;  %v17948_v15 = vmul.f32 %v12589_v42, %v8873_v7  ;;  %12594 = vpow2.f32 %v9001_v3 }
 0x790   : > { %v8717_v52 = vadd.f32 1.4214138, %v8685_v63  ;;  %v8941_v0 = vmul.f32 %v8909_v23, %v17858_v44  ;;  %v17952_v19 = vmul.f32 %v9227_v43, %v17814_v22  ;;  %v9034_v29 = vmul.f32 %v12591_v51, %v8874_v36  ;;  %v18811_v36 = vld [vmem:[#allocation71_spill] sm:$0xff] }
 0x791   : > { %v17954_v5 = vmul.f32 %v9228_v30, %v9196_v17  ;;  %v8815_v41 = vmul.f32 %v17885_v31, %v8783_v62  ;;  %v17958_v48 = vmul.f32 0.5, %v17742_v61  ;;  %v8912_v42 = vsub.f32 0.0, %v17920_v33  ;;  %v18810_v62 = vld [vmem:[#allocation75_spill] sm:$0xff] }
 0x792   : > { %v8749_v46 = vmul.f32 %v17922_v55, %v8717_v52  ;;  %12596 = vrcp.f32 %v8558_v18  ;;  %v9157_v3 = vsel %vm9093_vm14, %v9061_v27, %v9125_v60  ;;  %v9126_v44 = vsub.f32 0.0, %v9062_v35  ;;  %v18809_v27 = vld [vmem:[#allocation45_spill] sm:$0xff] }
 0x793   : > { %v9280_v22 = vpack.c.bf16 %v17954_v5, %v17952_v19  ;;  %v17967_v14 = vmul.f32 0.70710677, %v17905_v20  ;;  %v9065_v23 = vsub.f32 1.0, %v17948_v15  ;;  %v17971_v61 = vmul.f32 0.5, %v17787_v26  ;;  %v18812_v26 = vld [vmem:[#allocation58_spill] sm:$0xff] }
 0x794   : > { %v8781_v40 = vadd.f32 -0.28449672, %v8749_v46  ;;  %v8997_v7 = vmul.f32 1.442695, %v8941_v0  ;;  %vm9097_vm8 = vcmp.ge.f32.partialorder %v17755_v34, 0.0  ;;  %v9066_v24 = vsub.f32 1.0, %v9034_v29 }
 0x795   : > { %v8847_v43 = vadd.f32 0.2548296, %v8815_v41  ;;  %v17975_v53 = vand.u32 2147483647, %v17967_v14  ;;  %v9269_v56 = vpack.c.bf16 %v18810_v62, %v18809_v27  ;;  %v9221_v49 = vadd.f32 1.0, %v9157_v3  ;;  %v18813_v0 = vld [vmem:[#allocation69_spill] sm:$0xff] }
 0x796   : > { %vm9098_vm3 = vcmp.ge.f32.partialorder %v17794_v13, 0.0  ;;  %v8944_v17 = vmul.f32 %v8912_v42, %v17920_v33  ;;  %v17983_v63 = vadd.f32 %v18812_v26, %v18811_v36  ;;  %v9158_v60 = vsel %vm9094_vm15, %v9062_v35, %v9126_v44  ;;  %v18814_v29 = vld [vmem:[#allocation67_spill] sm:$0xff] }
 0x797   : > { %v17985_v51 = vpop.eup %12592  ;;  %v8813_v30 = vmul.f32 %v17922_v55, %v8781_v40  ;;  %v8910_v18 = vsub.f32 0.0, %v17930_v50  ;;  %v8531_v15 = vmul.f32 0.3275911, %v17975_v53  ;;  %11490 = vmatprep.mubr.bf16.mxu1 %v9269_v56  ;;  %12598 = vpow2.f32 %v8997_v7  ;;  %v18816_v46 = vld [vmem:[#allocation23_spill] sm:$0xff] }
 0x798   : > { %v8624_v52 = vmul.f32 1.0614054, %v17985_v51  ;;  %v17994_v33 = vmul.f32 0.70710677, %v17983_v63  ;;  %v18815_v41 = vpack.c.bf16 %v18813_v0, %v18814_v29  ;;  %v18001_v35 = vadd.f32 %v18817_v38, %v18816_v46 }
 0x799   : > { %v9129_v42 = vsub.f32 0.0, %v9065_v23  ;;  %v9130_v3 = vsub.f32 0.0, %v9066_v24  ;;  %v8879_v44 = vmul.f32 %v17885_v31, %v8847_v43  ;;  %v8563_v40 = vadd.f32 1.0, %v8531_v15  ;;  %v12595_v27 = vpop.eup %12594 }
 0x79a   : > { %11491 = vmatmul.mubr.bf16.vlgmr.msra.gmra.mrb[24].mxu1 %v18815_v41  ;;  %v18006_v7 = vmul.f32 %v17834_v45, %v17736_v8  ;;  %v8656_v62 = vadd.f32 -1.4531521, %v8624_v52  ;;  %v9003_v56 = vmul.f32 1.442695, %v8944_v17  ;;  %v18009_v36 = vand.u32 2147483647, %v17994_v33 }
 0x79b   : > { %v18012_v26 = vmul.f32 0.5, %v17807_v47  ;;  %v8845_v0 = vadd.f32 0.2548296, %v8813_v30  ;;  %v8942_v29 = vmul.f32 %v8910_v18, %v17930_v50  ;;  %12600 = vrcp.f32 %v8563_v40 }
 0x79c   : > { %v18015_v41 = vpop.eup %12596  ;;  %v18018_v31 = vmul.f32 %v9221_v49, %v17770_v57  ;;  %v9222_v43 = vadd.f32 1.0, %v9158_v60  ;;  %v8688_v8 = vmul.f32 %v17985_v51, %v8656_v62  ;;  %v8529_v45 = vmul.f32 0.3275911, %v18009_v36  ;;  %v18819_v62 = vld [vmem:[#allocation68_spill] sm:$0xff] }
 0x79d   : > { %v9162_v17 = vsel %vm9098_vm3, %v9066_v24, %v9130_v3  ;;  %v9039_v15 = vmul.f32 %v12595_v27, %v8879_v44  ;;  %v8622_v47 = vmul.f32 1.0614054, %v18015_v41  ;;  %v18026_v30 = vmul.f32 0.70710677, %v18001_v35  ;;  %v18818_v27 = vld [vmem:[#allocation24_spill] sm:$0xff] }
 0x79e   : > { %v9161_v50 = vsel %vm9097_vm8, %v9065_v23, %v9129_v42  ;;  %v8720_v18 = vadd.f32 1.4214138, %v8688_v8  ;;  %12602 = vpow2.f32 %v9003_v56  ;;  %v8561_v57 = vadd.f32 1.0, %v8529_v45 }
 0x79f   : > { %v8877_v49 = vmul.f32 %v17922_v55, %v8845_v0  ;;  %v8654_v60 = vadd.f32 -1.4531521, %v8622_v47  ;;  %v8999_v52 = vmul.f32 1.442695, %v8942_v29  ;;  %v18032_v46 = vand.u32 2147483647, %v18026_v30 }
 0x7a0   : > { %v9226_v13 = vadd.f32 1.0, %v9162_v17  ;;  %vm9103_vm9 = vcmp.ge.f32.partialorder %v17821_v25, 0.0  ;;  %v8752_v24 = vmul.f32 %v17985_v51, %v8720_v18  ;;  %v8915_v38 = vsub.f32 0.0, %v17975_v53  ;;  %v18821_v18 = vld [vmem:[#allocation44_spill] sm:$0xff] }
 0x7a1   : > { %12604 = vrcp.f32 %v8561_v57  ;;  %v18038_v34 = vmul.f32 %v9222_v43, %v17800_v1  ;;  %v9071_v23 = vsub.f32 1.0, %v9039_v15  ;;  %v8686_v42 = vmul.f32 %v18015_v41, %v8654_v60  ;;  %v12599_v3 = vpop.eup %12598 }
 0x7a2   : > { %v8532_v55 = vmul.f32 0.3275911, %v18032_v46  ;;  %v9225_v44 = vadd.f32 1.0, %v9161_v50  ;;  %v8784_v40 = vadd.f32 -0.28449672, %v8752_v24  ;;  %v18044_v56 = vadd.f32 %v18819_v62, %v18818_v27 }
 0x7a3   : > { %v9271_v0 = vpack.c.bf16 %v17678_v54, %v17671_v21  ;;  %v9037_v29 = vmul.f32 %v12599_v3, %v8877_v49  ;;  %v8718_v8 = vadd.f32 1.4214138, %v8686_v42  ;;  %12606 = vpow2.f32 %v8999_v52  ;;  %v18820_v54 = vld [vmem:[#allocation72_spill] sm:$0xff] }
 0x7a4   : > { %v8564_v1 = vadd.f32 1.0, %v8532_v55  ;;  %v18049_v43 = vmul.f32 %v9226_v13, %v17971_v61  ;;  %v8816_v45 = vmul.f32 %v17985_v51, %v8784_v40  ;;  %v8947_v17 = vmul.f32 %v8915_v38, %v17975_v53 }
 0x7a5   : > { %v18054_v15 = vmul.f32 0.70710677, %v18044_v56  ;;  %11494 = vmatprep.mubr.bf16.mxu1 %v9271_v0  ;;  %v18056_v47 = vpop.eup %12600  ;;  %v9135_v50 = vsub.f32 0.0, %v9071_v23  ;;  %v8750_v21 = vmul.f32 %v18015_v41, %v8718_v8  ;;  %v18822_v57 = vpack.c.bf16 %v18820_v54, %v18821_v18 }
 0x7a6   : > { %12608 = vrcp.f32 %v8564_v1  ;;  %v9273_v61 = vpack.c.bf16 %v17774_v9, %v17749_v6  ;;  %v18065_v49 = vmul.f32 %v9225_v44, %v17958_v48  ;;  %v8848_v53 = vadd.f32 0.2548296, %v8816_v45 }
 0x7a7   : > { %11495 = vmatmul.mubr.bf16.gmra.mrb[28].mxu1 %v18822_v57  ;;  %v8627_v60 = vmul.f32 1.0614054, %v18056_v47  ;;  %v9275_v52 = vpack.c.bf16 %v18006_v7, %v17926_v58  ;;  %v9069_v13 = vsub.f32 1.0, %v9037_v29  ;;  %v8782_v24 = vadd.f32 -0.28449672, %v8750_v21 }
 0x7a8   : > { %v18071_v38 = vand.u32 2147483647, %v18054_v15  ;;  %11498 = vmatprep.mubr.bf16.mxu1 %v9273_v61  ;;  %v9277_v42 = vpack.c.bf16 %v18038_v34, %v18018_v31  ;;  %v12603_v55 = vpop.eup %12602  ;;  %v8880_v6 = vmul.f32 %v17985_v51, %v8848_v53  ;;  %v9009_v48 = vmul.f32 1.442695, %v8947_v17 }
 0x7a9   : > { %v8659_v9 = vadd.f32 -1.4531521, %v8627_v60  ;;  %v9279_v3 = vpack.c.bf16 %v18049_v43, %v18065_v49  ;;  %v9167_v58 = vsel %vm9103_vm9, %v9071_v23, %v9135_v50  ;;  %v8814_v7 = vmul.f32 %v18015_v41, %v8782_v24 }
 0x7aa   : > { %v8913_v44 = vsub.f32 0.0, %v18009_v36  ;;  %v8530_v40 = vmul.f32 0.3275911, %v18071_v38  ;;  %vm9101_vm4 = vcmp.ge.f32.partialorder %v17851_v39, 0.0  ;;  %v9040_v62 = vmul.f32 %v12603_v55, %v8880_v6 }
 0x7ab   : > { %v18083_v27 = vpop.eup %12604  ;;  %v8691_v51 = vmul.f32 %v18056_v47, %v8659_v9  ;;  %v8916_v0 = vsub.f32 0.0, %v18032_v46  ;;  %v9133_v29 = vsub.f32 0.0, %v9069_v13  ;;  %v8846_v8 = vadd.f32 0.2548296, %v8814_v7 }
 0x7ac   : > { %v8625_v25 = vmul.f32 1.0614054, %v18083_v27  ;;  %v8562_v23 = vadd.f32 1.0, %v8530_v40  ;;  %v9231_v1 = vadd.f32 1.0, %v9167_v58  ;;  %v9072_v45 = vsub.f32 1.0, %v9040_v62 }
 0x7ad   : > { %v8723_v17 = vadd.f32 1.4214138, %v8691_v51  ;;  %12610 = vpow2.f32 %v9009_v48  ;;  %v12607_v50 = vpop.eup %12606  ;;  %v8878_v21 = vmul.f32 %v18015_v41, %v8846_v8  ;;  %v8945_v18 = vmul.f32 %v8913_v44, %v18009_v36 }
 0x7ae   : > { %v8657_v54 = vadd.f32 -1.4531521, %v8625_v25  ;;  %12612 = vrcp.f32 %v8562_v23  ;;  %v18823_v57 = vpack.c.bf16 %v17655_v2, %v17632_v16  ;;  %v9136_v61 = vsub.f32 0.0, %v9072_v45 }
 0x7af   : > { %v9200_v53 = vmul.f32 0.5, %v17897_v12  ;;  %v8755_v60 = vmul.f32 %v18056_v47, %v8723_v17  ;;  %v8948_v24 = vmul.f32 %v8916_v0, %v18032_v46  ;;  %v9165_v41 = vsel %vm9101_vm4, %v9069_v13, %v9133_v29 }
 0x7b0   : > { %11499 = vmatmul.mubr.bf16.gmra.mrb[32].mxu1 %v18823_v57  ;;  %v12609_v55 = vpop.eup %12608  ;;  %vm9104_vm5 = vcmp.ge.f32.partialorder %v17909_v59, 0.0  ;;  %v9038_v36 = vmul.f32 %v12607_v50, %v8878_v21  ;;  %v8689_v6 = vmul.f32 %v18083_v27, %v8657_v54  ;;  %v18102_v16 = vmul.f32 %v9231_v1, %v18012_v26 }
 0x7b1   : > { %11502 = vmatprep.mubr.bf16.mxu1 %v9275_v52  ;;  %v9168_v2 = vsel %vm9104_vm5, %v9072_v45, %v9136_v61  ;;  %v8787_v9 = vadd.f32 -0.28449672, %v8755_v60  ;;  %v8628_v12 = vmul.f32 1.0614054, %v12609_v55  ;;  %v9005_v46 = vmul.f32 1.442695, %v8945_v18 }
 0x7b2   : > { %v9232_v48 = vadd.f32 1.0, %v9168_v2  ;;  %v9070_v58 = vsub.f32 1.0, %v9038_v36  ;;  %v8721_v7 = vadd.f32 1.4214138, %v8689_v6  ;;  %v9229_v52 = vadd.f32 1.0, %v9165_v41  ;;  %v18825_v6 = vld [vmem:[#allocation74_spill] sm:$0xff] }
 0x7b3   : > { %v8819_v44 = vmul.f32 %v18056_v47, %v8787_v9  ;;  %v8660_v39 = vadd.f32 -1.4531521, %v8628_v12  ;;  %v9011_v13 = vmul.f32 1.442695, %v8948_v24  ;;  %v8914_v26 = vsub.f32 0.0, %v18071_v38 }
 0x7b4   : > { %v18105_v40 = vmul.f32 %v9232_v48, %v9200_v53  ;;  %v9134_v59 = vsub.f32 0.0, %v9070_v58  ;;  %v8753_v62 = vmul.f32 %v18083_v27, %v8721_v7  ;;  %v9197_v51 = vmul.f32 0.5, %v17832_v37 }
 0x7b5   : > { %vm9102_vm13 = vcmp.ge.f32.partialorder %v17914_v11, 0.0  ;;  %v8851_v0 = vadd.f32 0.2548296, %v8819_v44  ;;  %v8692_v29 = vmul.f32 %v12609_v55, %v8660_v39  ;;  %12614 = vpow2.f32 %v9005_v46 }
 0x7b6   : > { %v9282_v8 = vpack.c.bf16 %v18105_v40, %v18102_v16  ;;  %v9166_v25 = vsel %vm9102_vm13, %v9070_v58, %v9134_v59  ;;  %v8785_v23 = vadd.f32 -0.28449672, %v8753_v62  ;;  %v18824_v1 = vpack.c.bf16 %v17723_v4, %v17721_v10  ;;  %v18149_v16 = vld [vmem:[%s18279_s8] ss:$0 sm:$0xff] }
 0x7b7   : > { %v12611_v45 = vpop.eup %12610  ;;  %v9198_v17 = vmul.f32 0.5, %v17901_v28  ;;  %v9230_v50 = vadd.f32 1.0, %v9166_v25  ;;  %v8883_v37 = vmul.f32 %v18056_v47, %v8851_v0  ;;  %v8724_v21 = vadd.f32 1.4214138, %v8692_v29 }
 0x7b8   : > { %11503 = vmatmul.mubr.bf16.gmra.mrb[36].mxu1 %v18824_v1  ;;  %v12613_v11 = vpop.eup %12612  ;;  %v9261_v54 = vmul.f32 %v9229_v52, %v9197_v51  ;;  %v8817_v18 = vmul.f32 %v18083_v27, %v8785_v23  ;;  %12616 = vpow2.f32 %v9011_v13  ;;  %v8946_v57 = vmul.f32 %v8914_v26, %v18071_v38 }
 0x7b9   : > { %11506 = vmatprep.mubr.bf16.mxu1 %v9277_v42  ;;  %v9262_v10 = vmul.f32 %v9230_v50, %v9198_v17  ;;  %v9043_v4 = vmul.f32 %v12611_v45, %v8883_v37  ;;  %v8756_v61 = vmul.f32 %v12609_v55, %v8724_v21  ;;  %v8626_v53 = vmul.f32 1.0614054, %v12613_v11 }
 0x7ba   : > { %v8849_v28 = vadd.f32 0.2548296, %v8817_v18  ;;  %v9007_v41 = vmul.f32 1.442695, %v8946_v57  ;;  %v18826_v2 = vpack.c.bf16 %v17878_v32, %v18825_v6  ;;  %vm9107_vm10 = vcmp.ge.f32.partialorder %v17967_v14, 0.0  ;;  %v10282_v6 = vld [vmem:[%s12904_s23 + $0x18] sm:$0xff]  }
 0x7bb   : > { %v8788_v60 = vadd.f32 -0.28449672, %v8756_v61  ;;  %v8658_v24 = vadd.f32 -1.4531521, %v8626_v53  ;;  %v9281_v47 = vpack.c.bf16 %v9262_v10, %v9261_v54  ;;  %v9075_v36 = vsub.f32 1.0, %v9043_v4  ;;  %v10202_v54 = vld [vmem:[%s12904_s23] sm:$0xff]  }
 0x7bc   : > { %v8881_v31 = vmul.f32 %v18083_v27, %v8849_v28  ;;  %12618 = vpow2.f32 %v9007_v41  ;;  %vm9108_vm6 = vcmp.ge.f32.partialorder %v18026_v30, 0.0  ;;  %v9203_v14 = vmul.f32 0.5, %v17905_v20 }
 0x7bd   : > { %v8820_v34 = vmul.f32 %v12609_v55, %v8788_v60  ;;  %v8690_v42 = vmul.f32 %v12613_v11, %v8658_v24  ;;  %v9139_v48 = vsub.f32 0.0, %v9075_v36  ;;  %v9204_v0 = vmul.f32 0.5, %v18001_v35 }
 0x7be   : > { %vm9105_vm7 = vcmp.ge.f32.partialorder %v17994_v33, 0.0  ;;  %vm9106_vm1 = vcmp.ge.f32.partialorder %v18054_v15, 0.0  ;;  %v9201_v35 = vmul.f32 0.5, %v17983_v63  ;;  %v9202_v17 = vmul.f32 0.5, %v18044_v56 }
 0x7bf   : > { %v8852_v9 = vadd.f32 0.2548296, %v8820_v34  ;;  %v8722_v38 = vadd.f32 1.4214138, %v8690_v42  ;;  %v12615_v12 = vpop.eup %12614  ;;  %v9171_v39 = vsel %vm9107_vm10, %v9075_v36, %v9139_v48  ;;  %v10204_v4 = vunpack.c.h.bf16 %v10202_v54 }
 0x7c0   : > { %11507 = vmatmul.mubr.bf16.gmra.mrb[40].mxu1 %v18826_v2  ;;  %v9041_v58 = vmul.f32 %v12615_v12, %v8881_v31  ;;  %vm9741_vm0 = vcmask 125952   ;;  %v10281_v2 = vld [vmem:[%s12904_s23 + $0x10] sm:$0xff]  }
 0x7c1   : > { %11510 = vmatprep.mubr.bf16.mxu1 %v9279_v3  ;;  %v8884_v7 = vmul.f32 %v12609_v55, %v8852_v9  ;;  %v8754_v46 = vmul.f32 %v12613_v11, %v8722_v38  ;;  %v9235_v3 = vadd.f32 1.0, %v9171_v39  ;;  %v10215_v9 = vunpack.c.l.bf16 %v10282_v6 }
 0x7c2   : > { %v12617_v52 = vpop.eup %12616  ;;  %v9073_v32 = vsub.f32 1.0, %v9041_v58  ;;  %v10211_v12 = vunpack.c.l.bf16 %v10281_v2 }
 0x7c3   : > { %v9044_v27 = vmul.f32 %v12617_v52, %v8884_v7  ;;  %v8786_v44 = vadd.f32 -0.28449672, %v8754_v46  ;;  %v9267_v23 = vmul.f32 %v9235_v3, %v9203_v14  ;;  %v10216_v7 = vunpack.c.h.bf16 %v10282_v6  ;;  %v10287_v6 = vld [vmem:[%s12904_s23 + $0x40] sm:$0xff]  }
 0x7c4   : > { %v9137_v55 = vsub.f32 0.0, %v9073_v32 }
 0x7c5   : > { %v9076_v13 = vsub.f32 1.0, %v9044_v27  ;;  %v8818_v59 = vmul.f32 %v12613_v11, %v8786_v44  ;;  %v10212_v27 = vunpack.c.h.bf16 %v10281_v2 }
 0x7c6   : > { %v12619_v51 = vpop.eup %12618  ;;  %v9169_v5 = vsel %vm9105_vm7, %v9073_v32, %v9137_v55  ;;  %v10283_v55 = vld [vmem:[%s12904_s23 + $0x20] sm:$0xff]  }
 0x7c7   : > { %v9140_v43 = vsub.f32 0.0, %v9076_v13  ;;  %v8850_v49 = vadd.f32 0.2548296, %v8818_v59  ;;  %v9233_v45 = vadd.f32 1.0, %v9169_v5 }
 0x7c8   : > { %11511 = vmatmul.mubr.bf16.gmra.mrb[44].mxu1 %v9280_v22 }
 0x7c9   : > { %11514 = vmatprep.mubr.bf16.mxu1 %v9281_v47  ;;  %v9172_v62 = vsel %vm9108_vm6, %v9076_v13, %v9140_v43  ;;  %v8882_v26 = vmul.f32 %v12613_v11, %v8850_v49  ;;  %v9265_v50 = vmul.f32 %v9233_v45, %v9201_v35  ;;  %v10280_v11 = vld [vmem:[%s12904_s23 + $0x8] sm:$0xff]  }
 0x7ca   : > { %v9236_v29 = vadd.f32 1.0, %v9172_v62  ;;  %v10207_v15 = vunpack.c.l.bf16 %v10280_v11  ;;  %v10208_v18 = vunpack.c.h.bf16 %v10280_v11  ;;  %v10284_v43 = vld [vmem:[%s12904_s23 + $0x28] sm:$0xff]   ;;  %v10285_v11 = vld [vmem:[%s12904_s23 + $0x30] sm:$0xff]  }
 0x7cb   : > { %v9042_v25 = vmul.f32 %v12619_v51, %v8882_v26  ;;  %v10223_v14 = vunpack.c.l.bf16 %v10284_v43  ;;  %v10224_v5 = vunpack.c.h.bf16 %v10284_v43 }
 0x7cc   : > { %v9268_v19 = vmul.f32 %v9236_v29, %v9204_v0 }
 0x7cd   : > { %v9074_v22 = vsub.f32 1.0, %v9042_v25  ;;  %v10219_v25 = vunpack.c.l.bf16 %v10283_v55 }
 0x7ce   : > { %v9284_v1 = vpack.c.bf16 %v9268_v19, %v9267_v23 }
 0x7cf   : > { %v9138_v30 = vsub.f32 0.0, %v9074_v22 }
 0x7d0   : > { %11515 = vmatmul.mubr.bf16.gmra.mrb[48].mxu1 %v9282_v8  ;;  %v10203_v8 = vunpack.c.l.bf16 %v10202_v54 }
 0x7d1   : > { %v9170_v20 = vsel %vm9106_vm1, %v9074_v22, %v9138_v30  ;;  %v10220_v30 = vunpack.c.h.bf16 %v10283_v55  ;;  %v10290_v55 = vld [vmem:[%s12904_s23 + $0x58] sm:$0xff]  }
 0x7d2   : > { %v9234_v33 = vadd.f32 1.0, %v9170_v20 }
 0x7d4   : > { %v9266_v37 = vmul.f32 %v9234_v33, %v9202_v17 }
 0x7d6   : > { %v9283_v21 = vpack.c.bf16 %v9266_v37, %v9265_v50  ;;  %v10286_v50 = vld [vmem:[%s12904_s23 + $0x38] sm:$0xff]  }
 0x7d8   : > { %11518 = vmatprep.mubr.bf16.mxu1 %v9283_v21 }
 0x7d9   : > { %11519 = vmatmul.mubr.bf16.gmra.mrb[52].mxu1 %v9284_v1 }
 0x86d   : > { %v11492_v40 = vpop.f32.mrb[24].mxu1 }
 0x86e   : > { %v9399_v63 = vadd.f32 %v11492_v40, %v18149_v16  ;;  %v9390_v56 = vpop.f32.mrb[25].mxu1 }
 0x86f   : > { %v9391_v57 = vadd.f32 %v18149_v16, %v9390_v56  ;;  %v11493_v10 = vpop.f32.mrb[26].mxu1 }
 0x870   : > { %v9583_v61 = vadd.f32 %v10207_v15, %v9399_v63  ;;  %v9402_v53 = vadd.f32 %v11493_v10, %v18149_v16  ;;  %v9393_v28 = vpop.f32.mrb[27].mxu1 }
 0x871   : > { %v9581_v60 = vadd.f32 %v10203_v8, %v9391_v57  ;;  %v9394_v24 = vadd.f32 %v18149_v16, %v9393_v28  ;;  %v10231_v8 = vunpack.c.l.bf16 %v10286_v50  ;;  %v10228_v28 = vunpack.c.h.bf16 %v10285_v11 }
 0x872   : > { %v10107_v47 = vpack.c.bf16 %v9583_v61, %v9583_v61  ;;  %v9584_v41 = vadd.f32 %v10208_v18, %v9402_v53  ;;  %v10227_v18 = vunpack.c.l.bf16 %v10285_v11  ;;  %v10292_v11 = vld [vmem:[%s12904_s23 + $0x68] sm:$0xff]  }
 0x873   : > { %v10105_v36 = vpack.c.bf16 %v9581_v60, %v9581_v60  ;;  %v9582_v31 = vadd.f32 %v10204_v4, %v9394_v24  ;;  %v10232_v4 = vunpack.c.h.bf16 %v10286_v50 }
 0x874   : > { %9744 = vst.msk [vmem:[%s18159_s15 + $0x8] sm:$0xf] %vm9741_vm0, %v10107_v47  ;;  %v10108_v34 = vpack.c.bf16 %v9584_v41, %v9584_v41 }
 0x875   : > { %9742 = vst.msk [vmem:[%s18159_s15] sm:$0xf] %vm9741_vm0, %v10105_v36  ;;  %v10106_v42 = vpack.c.bf16 %v9582_v31, %v9582_v31  ;;  %v10288_v31 = vld [vmem:[%s12904_s23 + $0x48] sm:$0xff]  }
 0x876   : > { %9745 = vst.msk [vmem:[%s18159_s15 + $0xc] sm:$0xf] %vm9741_vm0, %v10108_v34 }
 0x877   : > { %9743 = vst.msk [vmem:[%s18159_s15 + $0x4] sm:$0xf] %vm9741_vm0, %v10106_v42 }
 0x87a   : > { %v11496_v38 = vpop.f32.mrb[28].mxu1 }
 0x87b   : > { %v9415_v48 = vadd.f32 %v11496_v38, %v18149_v16  ;;  %v9406_v58 = vpop.f32.mrb[29].mxu1 }
 0x87c   : > { %v9407_v46 = vadd.f32 %v18149_v16, %v9406_v58  ;;  %v11497_v52 = vpop.f32.mrb[30].mxu1 }
 0x87d   : > { %v9587_v44 = vadd.f32 %v10215_v9, %v9415_v48  ;;  %v9418_v39 = vadd.f32 %v11497_v52, %v18149_v16  ;;  %v9409_v32 = vpop.f32.mrb[31].mxu1 }
 0x87e   : > { %v9585_v13 = vadd.f32 %v10211_v12, %v9407_v46  ;;  %v9410_v59 = vadd.f32 %v18149_v16, %v9409_v32  ;;  %v10239_v12 = vunpack.c.l.bf16 %v10288_v31  ;;  %v10236_v32 = vunpack.c.h.bf16 %v10287_v6 }
 0x87f   : > { %v10111_v49 = vpack.c.bf16 %v9587_v44, %v9587_v44  ;;  %v9588_v3 = vadd.f32 %v10216_v7, %v9418_v39  ;;  %v10235_v7 = vunpack.c.l.bf16 %v10287_v6 }
 0x880   : > { %v10109_v62 = vpack.c.bf16 %v9585_v13, %v9585_v13  ;;  %v9586_v26 = vadd.f32 %v10212_v27, %v9410_v59  ;;  %v10240_v27 = vunpack.c.h.bf16 %v10288_v31 }
 0x881   : > { %9748 = vst.msk [vmem:[%s18159_s15 + $0x18] sm:$0xf] %vm9741_vm0, %v10111_v49  ;;  %v10112_v51 = vpack.c.bf16 %v9588_v3, %v9588_v3 }
 0x882   : > { %9746 = vst.msk [vmem:[%s18159_s15 + $0x10] sm:$0xf] %vm9741_vm0, %v10109_v62  ;;  %v10110_v0 = vpack.c.bf16 %v9586_v26, %v9586_v26 }
 0x883   : > { %v11500_v29 = vpop.f32.mrb[32].mxu1  ;;  %9749 = vst.msk [vmem:[%s18159_s15 + $0x1c] sm:$0xf] %vm9741_vm0, %v10112_v51  ;;  %v10289_v51 = vld [vmem:[%s12904_s23 + $0x50] sm:$0xff]  }
 0x884   : > { %v9431_v23 = vadd.f32 %v11500_v29, %v18149_v16  ;;  %v9422_v19 = vpop.f32.mrb[33].mxu1  ;;  %9747 = vst.msk [vmem:[%s18159_s15 + $0x14] sm:$0xf] %vm9741_vm0, %v10110_v0 }
 0x885   : > { %v9423_v22 = vadd.f32 %v18149_v16, %v9422_v19  ;;  %v11501_v1 = vpop.f32.mrb[34].mxu1 }
 0x886   : > { %v9591_v45 = vadd.f32 %v10223_v14, %v9431_v23  ;;  %v9434_v20 = vadd.f32 %v11501_v1, %v18149_v16  ;;  %v9425_v35 = vpop.f32.mrb[35].mxu1 }
 0x887   : > { %v9589_v17 = vadd.f32 %v10219_v25, %v9423_v22  ;;  %v9426_v33 = vadd.f32 %v18149_v16, %v9425_v35  ;;  %v10247_v25 = vunpack.c.l.bf16 %v10290_v55  ;;  %v10244_v35 = vunpack.c.h.bf16 %v10289_v51 }
 0x888   : > { %v10115_v37 = vpack.c.bf16 %v9591_v45, %v9591_v45  ;;  %v9592_v21 = vadd.f32 %v10224_v5, %v9434_v20  ;;  %v10243_v5 = vunpack.c.l.bf16 %v10289_v51 }
 0x889   : > { %v10113_v54 = vpack.c.bf16 %v9589_v17, %v9589_v17  ;;  %v9590_v15 = vadd.f32 %v10220_v30, %v9426_v33  ;;  %v10248_v30 = vunpack.c.h.bf16 %v10290_v55 }
 0x88a   : > { %9752 = vst.msk [vmem:[%s18159_s15 + $0x28] sm:$0xf] %vm9741_vm0, %v10115_v37  ;;  %v10116_v40 = vpack.c.bf16 %v9592_v21, %v9592_v21 }
 0x88b   : > { %9750 = vst.msk [vmem:[%s18159_s15 + $0x20] sm:$0xf] %vm9741_vm0, %v10113_v54  ;;  %v10114_v63 = vpack.c.bf16 %v9590_v15, %v9590_v15  ;;  %v11504_v56 = vpop.f32.mrb[36].mxu1 }
 0x88c   : > { %9753 = vst.msk [vmem:[%s18159_s15 + $0x2c] sm:$0xf] %vm9741_vm0, %v10116_v40  ;;  %v9447_v57 = vadd.f32 %v11504_v56, %v18149_v16  ;;  %v9438_v10 = vpop.f32.mrb[37].mxu1  ;;  %v10291_v40 = vld [vmem:[%s12904_s23 + $0x60] sm:$0xff]  }
 0x88d   : > { %9751 = vst.msk [vmem:[%s18159_s15 + $0x24] sm:$0xf] %vm9741_vm0, %v10114_v63  ;;  %v9439_v61 = vadd.f32 %v18149_v16, %v9438_v10  ;;  %v11505_v53 = vpop.f32.mrb[38].mxu1 }
 0x88e   : > { %v9595_v60 = vadd.f32 %v10231_v8, %v9447_v57  ;;  %v9450_v24 = vadd.f32 %v11505_v53, %v18149_v16  ;;  %v9441_v47 = vpop.f32.mrb[39].mxu1 }
 0x88f   : > { %v9593_v41 = vadd.f32 %v10227_v18, %v9439_v61  ;;  %v9442_v36 = vadd.f32 %v18149_v16, %v9441_v47  ;;  %v10255_v18 = vunpack.c.l.bf16 %v10292_v11  ;;  %v10252_v47 = vunpack.c.h.bf16 %v10291_v40 }
 0x890   : > { %v10119_v34 = vpack.c.bf16 %v9595_v60, %v9595_v60  ;;  %v9596_v42 = vadd.f32 %v10232_v4, %v9450_v24  ;;  %v10251_v4 = vunpack.c.l.bf16 %v10291_v40 }
 0x891   : > { %v10117_v2 = vpack.c.bf16 %v9593_v41, %v9593_v41  ;;  %v9594_v9 = vadd.f32 %v10228_v28, %v9442_v36  ;;  %v10256_v28 = vunpack.c.h.bf16 %v10292_v11 }
 0x892   : > { %9756 = vst.msk [vmem:[%s18159_s15 + $0x38] sm:$0xf] %vm9741_vm0, %v10119_v34  ;;  %v10120_v38 = vpack.c.bf16 %v9596_v42, %v9596_v42 }
 0x893   : > { %9754 = vst.msk [vmem:[%s18159_s15 + $0x30] sm:$0xf] %vm9741_vm0, %v10117_v2  ;;  %v10118_v48 = vpack.c.bf16 %v9594_v9, %v9594_v9  ;;  %v11508_v58 = vpop.f32.mrb[40].mxu1 }
 0x894   : > { %9757 = vst.msk [vmem:[%s18159_s15 + $0x3c] sm:$0xf] %vm9741_vm0, %v10120_v38  ;;  %v9463_v46 = vadd.f32 %v11508_v58, %v18149_v16  ;;  %v9454_v52 = vpop.f32.mrb[41].mxu1 }
 0x895   : > { %9755 = vst.msk [vmem:[%s18159_s15 + $0x34] sm:$0xf] %vm9741_vm0, %v10118_v48  ;;  %v9455_v44 = vadd.f32 %v18149_v16, %v9454_v52  ;;  %v11509_v39 = vpop.f32.mrb[42].mxu1  ;;  %v10294_v48 = vld [vmem:[%s12904_s23 + $0x78] sm:$0xff]  }
 0x896   : > { %v9599_v13 = vadd.f32 %v10239_v12, %v9463_v46  ;;  %v9466_v59 = vadd.f32 %v11509_v39, %v18149_v16  ;;  %v9457_v43 = vpop.f32.mrb[43].mxu1  ;;  %v10263_v46 = vunpack.c.l.bf16 %v10294_v48 }
 0x897   : > { %v9597_v49 = vadd.f32 %v10235_v7, %v9455_v44  ;;  %v9458_v3 = vadd.f32 %v18149_v16, %v9457_v43  ;;  %v10293_v7 = vld [vmem:[%s12904_s23 + $0x70] sm:$0xff]  }
 0x898   : > { %v10123_v62 = vpack.c.bf16 %v9599_v13, %v9599_v13  ;;  %v9600_v26 = vadd.f32 %v10240_v27, %v9466_v59  ;;  %v10259_v27 = vunpack.c.l.bf16 %v10293_v7  ;;  %v10260_v43 = vunpack.c.h.bf16 %v10293_v7 }
 0x899   : > { %v10121_v14 = vpack.c.bf16 %v9597_v49, %v9597_v49  ;;  %v9598_v0 = vadd.f32 %v10236_v32, %v9458_v3  ;;  %v10264_v32 = vunpack.c.h.bf16 %v10294_v48 }
 0x89a   : > { %9760 = vst.msk [vmem:[%s18159_s15 + $0x48] sm:$0xf] %vm9741_vm0, %v10123_v62  ;;  %v10124_v29 = vpack.c.bf16 %v9600_v26, %v9600_v26 }
 0x89b   : > { %9758 = vst.msk [vmem:[%s18159_s15 + $0x40] sm:$0xf] %vm9741_vm0, %v10121_v14  ;;  %v10122_v23 = vpack.c.bf16 %v9598_v0, %v9598_v0  ;;  %v11512_v19 = vpop.f32.mrb[44].mxu1 }
 0x89c   : > { %9761 = vst.msk [vmem:[%s18159_s15 + $0x4c] sm:$0xf] %vm9741_vm0, %v10124_v29  ;;  %v9479_v22 = vadd.f32 %v11512_v19, %v18149_v16  ;;  %v9470_v1 = vpop.f32.mrb[45].mxu1 }
 0x89d   : > { %9759 = vst.msk [vmem:[%s18159_s15 + $0x44] sm:$0xf] %vm9741_vm0, %v10122_v23  ;;  %v9471_v45 = vadd.f32 %v18149_v16, %v9470_v1  ;;  %v11513_v20 = vpop.f32.mrb[46].mxu1 }
 0x89e   : > { %v9603_v17 = vadd.f32 %v10247_v25, %v9479_v22  ;;  %v9482_v33 = vadd.f32 %v11513_v20, %v18149_v16  ;;  %v9473_v50 = vpop.f32.mrb[47].mxu1 }
 0x89f   : > { %v9601_v37 = vadd.f32 %v10243_v5, %v9471_v45  ;;  %v9474_v21 = vadd.f32 %v18149_v16, %v9473_v50 }
 0x8a0   : > { %v10127_v54 = vpack.c.bf16 %v9603_v17, %v9603_v17  ;;  %v9604_v15 = vadd.f32 %v10248_v30, %v9482_v33 }
 0x8a1   : > { %v10125_v8 = vpack.c.bf16 %v9601_v37, %v9601_v37  ;;  %v9602_v63 = vadd.f32 %v10244_v35, %v9474_v21 }
 0x8a2   : > { %9764 = vst.msk [vmem:[%s18159_s15 + $0x58] sm:$0xf] %vm9741_vm0, %v10127_v54  ;;  %v10128_v56 = vpack.c.bf16 %v9604_v15, %v9604_v15 }
 0x8a3   : > { %9762 = vst.msk [vmem:[%s18159_s15 + $0x50] sm:$0xf] %vm9741_vm0, %v10125_v8  ;;  %v10126_v57 = vpack.c.bf16 %v9602_v63, %v9602_v63  ;;  %v11516_v10 = vpop.f32.mrb[48].mxu1 }
 0x8a4   : > { %9765 = vst.msk [vmem:[%s18159_s15 + $0x5c] sm:$0xf] %vm9741_vm0, %v10128_v56  ;;  %v9495_v61 = vadd.f32 %v11516_v10, %v18149_v16  ;;  %v9486_v53 = vpop.f32.mrb[49].mxu1 }
 0x8a5   : > { %9763 = vst.msk [vmem:[%s18159_s15 + $0x54] sm:$0xf] %vm9741_vm0, %v10126_v57  ;;  %v9487_v60 = vadd.f32 %v18149_v16, %v9486_v53  ;;  %v11517_v24 = vpop.f32.mrb[50].mxu1 }
 0x8a6   : > { %v9607_v41 = vadd.f32 %v10255_v18, %v9495_v61  ;;  %v9498_v36 = vadd.f32 %v11517_v24, %v18149_v16  ;;  %v9489_v31 = vpop.f32.mrb[51].mxu1 }
 0x8a7   : > { %v9605_v34 = vadd.f32 %v10251_v4, %v9487_v60  ;;  %v9490_v42 = vadd.f32 %v18149_v16, %v9489_v31 }
 0x8a8   : > { %v10131_v6 = vpack.c.bf16 %v9607_v41, %v9607_v41  ;;  %v9608_v2 = vadd.f32 %v10256_v28, %v9498_v36 }
 0x8a9   : > { %v10129_v9 = vpack.c.bf16 %v9605_v34, %v9605_v34  ;;  %v9606_v38 = vadd.f32 %v10252_v47, %v9490_v42 }
 0x8aa   : > { %9768 = vst.msk [vmem:[%s18159_s15 + $0x68] sm:$0xf] %vm9741_vm0, %v10131_v6  ;;  %v10132_v12 = vpack.c.bf16 %v9608_v2, %v9608_v2 }
 0x8ab   : > { %9766 = vst.msk [vmem:[%s18159_s15 + $0x60] sm:$0xf] %vm9741_vm0, %v10129_v9  ;;  %v10130_v58 = vpack.c.bf16 %v9606_v38, %v9606_v38 }
 0x8ac   : > { %9769 = vst.msk [vmem:[%s18159_s15 + $0x6c] sm:$0xf] %vm9741_vm0, %v10132_v12  ;;  %v11520_v52 = vpop.f32.mrb[52].mxu1 }
 0x8ad   : > { %9767 = vst.msk [vmem:[%s18159_s15 + $0x64] sm:$0xf] %vm9741_vm0, %v10130_v58  ;;  %v9511_v44 = vadd.f32 %v11520_v52, %v18149_v16  ;;  %v9502_v39 = vpop.f32.mrb[53].mxu1 }
 0x8ae   : > { %v9503_v13 = vadd.f32 %v18149_v16, %v9502_v39  ;;  %v11521_v59 = vpop.f32.mrb[54].mxu1 }
 0x8af   : > { %v9611_v49 = vadd.f32 %v10263_v46, %v9511_v44  ;;  %v9514_v3 = vadd.f32 %v11521_v59, %v18149_v16  ;;  %v9505_v55 = vpop.f32.mrb[55].mxu1 }
 0x8b0   : > { %v9609_v62 = vadd.f32 %v10259_v27, %v9503_v13  ;;  %v9506_v26 = vadd.f32 %v18149_v16, %v9505_v55 }
 0x8b1   : > { %v10135_v51 = vpack.c.bf16 %v9611_v49, %v9611_v49  ;;  %v9612_v14 = vadd.f32 %v10264_v32, %v9514_v3 }
 0x8b2   : > { %v10133_v0 = vpack.c.bf16 %v9609_v62, %v9609_v62  ;;  %v9610_v29 = vadd.f32 %v10260_v43, %v9506_v26 }
 0x8b3   : > { %9772 = vst.msk [vmem:[%s18159_s15 + $0x78] sm:$0xf] %vm9741_vm0, %v10135_v51  ;;  %v10136_v25 = vpack.c.bf16 %v9612_v14, %v9612_v14 }
 0x8b4   : > { %9770 = vst.msk [vmem:[%s18159_s15 + $0x70] sm:$0xf] %vm9741_vm0, %v10133_v0  ;;  %v10134_v23 = vpack.c.bf16 %v9610_v29, %v9610_v29 }
 0x8b5   : > { %9773 = vst.msk [vmem:[%s18159_s15 + $0x7c] sm:$0xf] %vm9741_vm0, %v10136_v25 }
 0x8b6   : > { %9771 = vst.msk [vmem:[%s18159_s15 + $0x74] sm:$0xf] %vm9741_vm0, %v10134_v23 }
 0x8b7 PF: > { %s21_s30 = sadd.s32 1, %s12754_s30  }
 0x8b8   : > { %p18_p5 = scmp.ge.s32.totalorder %s21_s30, 4  }
 0x8ba   :  { %20 = sbr.rel (!%p18_p5) target bundleno = 2 (0x2), region = 99 }
 0x8c1   :  { %9795 = vsyncpa [#allocation4], 1 }
 0x8c2   :  { %9797 = vsyncpa [#allocation4 + $0x1], 1 }
 0x8c3   :  { %9798 = vsyncpa [#allocation6], 1 }

</bundles_post_ra>
